<compile_context>
chip_gen: v7x
topology: tpu7x:2x2x1
jax: 0.10.0
libtpu: 0.0.40
codegen_flags: <defaults>
</compile_context>

<pallas_src>
import jax
import jax.numpy as jnp
from jax import lax
from jax.experimental import pallas as pl
from jax.experimental.pallas import tpu as pltpu

_LANE = 128
_MAX_SINGLE_BLOCK_LANES = 2048       # tile the lane dim above this to bound VMEM per step
_VMEM_LIMIT = 32 * 1024 * 1024       # explicit cap: safe under v5e/v6e defaults and v7x's 64 MiB
_USE_BF16_MXU = False                # flip for v6e/v7x at larger sizes; f32 kept (v5e parity)


def _round_up(x, m):
    return ((x + m - 1) // m) * m


# ---------------------------------------------------------------------------
# Kernel 1: weight-stationary conv-as-matmul with fused bias + activation.
#   W (Cout, Cin) @ X (Cin, M) + b   with M (= B*N*T) on lanes (lane-dense stores).
#   act: "none" | "leaky" | "glu"  (GLU halves the rows: sigmoid(gate)*leaky(filter))
# ---------------------------------------------------------------------------
def _make_mm_kernel(act, c_half, use_bf16):
    def kernel(x_ref, w_ref, b_ref, o_ref):
        w = w_ref[...]
        x = x_ref[...]
        if use_bf16:
            w = w.astype(jnp.bfloat16)
            x = x.astype(jnp.bfloat16)
        acc = jnp.dot(w, x, preferred_element_type=jnp.float32)
        acc = acc + b_ref[...]                       # (Cout,1) broadcast over lanes
        if act == "leaky":
            acc = jnp.where(acc > 0, acc, 0.01 * acc)
        elif act == "glu":
            filt = acc[:c_half]
            gate = acc[c_half:]
            acc = jax.nn.sigmoid(gate) * jnp.where(filt > 0, filt, 0.01 * filt)
        o_ref[...] = acc.astype(o_ref.dtype)
    return kernel


def conv_matmul(W, X, b=None, act="none", c_half=None, use_bf16=False):
    """(Cout, Cin) @ (Cin, M) + b with fused epilogue; output last dim is lane-dense."""
    W = W.astype(jnp.float32)
    X = X.astype(jnp.float32)
    Cout, Cin = W.shape
    Cin2, M = X.shape
    assert Cin == Cin2
    if act == "glu":
        assert c_half is not None and 2 * c_half == Cout
    if b is None:
        b = jnp.zeros((Cout,), jnp.float32)
    b2 = jnp.asarray(b, jnp.float32).reshape(Cout, 1)
    rows = c_half if act == "glu" else Cout

    # Lane tiling: a single block when small (one grid step, no padding when M is
    # already a multiple of 128); 2048-lane tiles otherwise.
    # TODO(synk): add a K-tiled accumulator (grid over Cin + f32 VMEM scratch) if Cin
    #             grows past a few hundred; at Cin<=144 a single K block is optimal.
    tn = min(_round_up(M, _LANE), _MAX_SINGLE_BLOCK_LANES)
    Mp = _round_up(M, tn)
    if Mp != M:
        X = jnp.pad(X, ((0, 0), (0, Mp - M)))

    out = pl.pallas_call(
        _make_mm_kernel(act, c_half, use_bf16),
        out_shape=jax.ShapeDtypeStruct((rows, Mp), jnp.float32),
        grid=(Mp // tn,),
        in_specs=[
            pl.BlockSpec((Cin, tn), lambda i: (0, i)),
            pl.BlockSpec((Cout, Cin), lambda i: (0, 0)),   # weight resident across grid
            pl.BlockSpec((Cout, 1), lambda i: (0, 0)),
        ],
        out_specs=pl.BlockSpec((rows, tn), lambda i: (0, i)),
        compiler_params=pltpu.CompilerParams(
            dimension_semantics=("parallel",),
            vmem_limit_bytes=_VMEM_LIMIT,
        ),
    )(X, W, b2)
    return out[:, :M] if Mp != M else out


# ---------------------------------------------------------------------------
# Kernel 2: per-batch fused TATT_1 + attention apply + residual + LayerNorm.
# grid=(B,); all per-sample matmuls of the old Python loops live inside one kernel.
# ---------------------------------------------------------------------------
def _make_attn_ln_kernel(C, N, T):
    CN = C * N

    def kernel(x1_ref, xin_ref, w1_ref, w2_ref, w_ref, bmat_ref, v_ref,
               bnp_ref, lnw_ref, lnb_ref, o_ref):
        s = x1_ref[:, 0]        # (C, N, T) gated GCN output for this batch element
        xin = xin_ref[:, 0]     # (C, N, T) residual branch
        # --- TATT_1: f1/f2 as VPU multiply+reduce (no (.,1)-wide MXU matmuls) ---
        f1t = jnp.sum(s * w1_ref[...][:, :, None], axis=0)       # (N, T) == f1^T
        f2 = jnp.sum(s * w2_ref[...][:, :, None], axis=1)        # (C, T)
        wf2 = jnp.dot(w_ref[...], f2, preferred_element_type=jnp.float32)     # (N, T)
        # logits = f1 @ (w @ f2): contract the node dim of f1^T and wf2
        logits = lax.dot_general(f1t, wf2, (((0,), (0,)), ((), ())),
                                 preferred_element_type=jnp.float32)          # (T, T)
        logits = jax.nn.sigmoid(logits + bmat_ref[...])
        logits = jnp.dot(v_ref[...], logits, preferred_element_type=jnp.float32)
        # BatchNorm1d(T) (eval) on logits.permute(0,2,1) == affine along the last axis
        bn = bnp_ref[...]
        rm, rv, gm, bt = bn[0:1], bn[1:2], bn[2:3], bn[3:4]
        logits = (logits - rm) * lax.rsqrt(rv + 1e-5) * gm + bt
        # softmax along the last axis
        mx = jnp.max(logits, axis=-1, keepdims=True)
        e = jnp.exp(logits - mx)
        coefs = e / jnp.sum(e, axis=-1, keepdims=True)            # (T, T)
        # --- apply attention: einsum('cnl,ql->cnq')  (== X @ coefs^T) ---
        xa = lax.dot_general(s.reshape(CN, T), coefs, (((1,), (1,)), ((), ())),
                             preferred_element_type=jnp.float32).reshape(C, N, T)
        # --- residual + leaky_relu + LayerNorm([C, N, T]) ---
        y = jnp.where(xa > 0, xa, 0.01 * xa) + xin
        mu = jnp.mean(y, axis=(0, 1, 2), keepdims=True)
        var = jnp.mean((y - mu) ** 2, axis=(0, 1, 2), keepdims=True)
        y = (y - mu) * lax.rsqrt(var + 1e-5) * lnw_ref[...] + lnb_ref[...]
        o_ref[...] = y.reshape(C, 1, N, T)

    return kernel


def attention_ln(tatt, ln_w, ln_b, x1, x_input):
    C, B, N, T = x1.shape
    w1 = tatt['conv1_w'].reshape(C, 1).astype(jnp.float32)
    w2 = tatt['conv2_w'].reshape(1, N).astype(jnp.float32)
    bnp = jnp.stack([tatt['bn_rm'], tatt['bn_rv'], tatt['bn_w'], tatt['bn_b']],
                    0).astype(jnp.float32)
    return pl.pallas_call(
        _make_attn_ln_kernel(C, N, T),
        out_shape=jax.ShapeDtypeStruct((C, B, N, T), jnp.float32),
        grid=(B,),
        in_specs=[
            pl.BlockSpec((C, 1, N, T), lambda b: (0, b, 0, 0)),
            pl.BlockSpec((C, 1, N, T), lambda b: (0, b, 0, 0)),
            pl.BlockSpec((C, 1), lambda b: (0, 0)),
            pl.BlockSpec((1, N), lambda b: (0, 0)),
            pl.BlockSpec((N, C), lambda b: (0, 0)),
            pl.BlockSpec((T, T), lambda b: (0, 0)),
            pl.BlockSpec((T, T), lambda b: (0, 0)),
            pl.BlockSpec((4, T), lambda b: (0, 0)),
            pl.BlockSpec((C, N, T), lambda b: (0, 0, 0)),
            pl.BlockSpec((C, N, T), lambda b: (0, 0, 0)),
        ],
        out_specs=pl.BlockSpec((C, 1, N, T), lambda b: (0, b, 0, 0)),
        compiler_params=pltpu.CompilerParams(
            dimension_semantics=("parallel",),
            vmem_limit_bytes=_VMEM_LIMIT,
        ),
    )(x1, x_input, w1, w2, tatt['w'].astype(jnp.float32),
      tatt['b'].astype(jnp.float32), tatt['v'].astype(jnp.float32),
      bnp, ln_w.astype(jnp.float32), ln_b.astype(jnp.float32))


# ---------------------------------------------------------------------------
# Glue (layout plumbing; all heavy math goes through the Pallas kernels above)
# ---------------------------------------------------------------------------
def im2col_time(x, Kt, pad):
    """(C, B, N, T) -> (C*Kt, B, N, Tout) with channel index c*Kt + kt."""
    C, B, N, T = x.shape
    xp = jnp.pad(x, ((0, 0), (0, 0), (0, 0), (pad, pad)))
    Tout = T + 2 * pad - Kt + 1
    cols = jnp.stack([xp[..., k:k + Tout] for k in range(Kt)], axis=1)
    return cols.reshape(C * Kt, B, N, Tout)


def cheby_stack(adj, K):
    """Raw Chebyshev stack (K, N, N); 16x16 recursion in plain jnp (no Pallas overhead)."""
    N = adj.shape[0]
    Ls = [jnp.eye(N, dtype=jnp.float32), adj]
    for _ in range(2, K):
        Ls.append(2.0 * (adj @ Ls[-1]) - Ls[-2])
    return jnp.stack(Ls[:K], 0)      # index order [k, q, n]


def st_block_2(p, x, A, K, Kt):
    """DGCN-style ST_BLOCK_2 reconstruction.  x: (Cin, B, N, T) channel-major."""
    Cin, B, N, T = x.shape
    c_out = p['conv1_w'].shape[0]
    M = B * N * T
    x2d = x.reshape(Cin, M)

    # residual branch: 1x1 conv (lane-dense matmul)
    x_input = conv_matmul(p['conv1_w'], x2d, p['conv1_b'])                     # (c_out, M)

    # temporal conv (1, Kt) with fused leaky_relu
    xcol = im2col_time(x, Kt, pad=1).reshape(Cin * Kt, M)
    x1 = conv_matmul(p['time_w'].reshape(c_out, Cin * Kt), xcol, p['time_b'],
                     act="leaky")                                              # (c_out, M)

    # K-order Chebyshev graph propagation: one lane-dense matmul over the whole batch
    Lap = cheby_stack(A, K)                                                    # (K, N, N)
    xn = x1.reshape(c_out, B, N, T).transpose(2, 0, 1, 3).reshape(N, c_out * B * T)
    prop = conv_matmul(Lap.reshape(K * N, N), xn)                              # (K*N, c_out*B*T)
    prop = prop.reshape(K, N, c_out, B, T).transpose(2, 0, 3, 1, 4)            # (c_out, K, B, N, T)
    prop = prop.reshape(c_out * K, B, N, T)

    # GCN temporal conv with the GLU gating fused into the matmul epilogue
    pcol = im2col_time(prop, Kt, pad=1).reshape(c_out * K * Kt, M)
    x1 = conv_matmul(p['gcn_w'].reshape(2 * c_out, c_out * K * Kt), pcol, p['gcn_b'],
                     act="glu", c_half=c_out, use_bf16=_USE_BF16_MXU)          # (c_out, M)

    # fused temporal attention + apply + residual + LayerNorm, batched over B
    out = attention_ln(p['tatt'], p['ln_w'], p['ln_b'],
                       x1.reshape(c_out, B, N, T), x_input.reshape(c_out, B, N, T))
    return out, A


def output_head(params, x):
    """conv1..conv3 (1x1) on 12-step slices + conv4 ((1,2)/stride-2) on last 24; summed."""
    C, B, N, T = x.shape
    assert T == 60, "DVGCN output head hard-codes tem_size == 60"
    x1 = x[..., 0:12]
    x2 = x[..., 12:24]
    x3 = x[..., 24:36]
    x4 = x[..., 36:60]
    xs = jnp.stack([x1, x2, x3, x4[..., 0::2], x4[..., 1::2]], axis=0)   # (5, C, B, N, 12)
    Xh = xs.reshape(5 * C, B * N * 12)
    Wh = jnp.concatenate([params['conv1_w'], params['conv2_w'], params['conv3_w'],
                          params['conv4_w'][:, 0], params['conv4_w'][:, 1]], 0)[None, :]
    bias = (params['conv1_b'] + params['conv2_b'] + params['conv3_b']
            + params['conv4_b']).reshape(1)
    # transposed head: the long B*N*12 dim (multiple of 128) lands on lanes, Cout=1 on sublanes
    y = conv_matmul(Wh, Xh, bias)                                        # (1, B*N*12)
    return y.reshape(B, N, 12)


# ---------------------------------------------------------------------------
# DVGCN forward
# ---------------------------------------------------------------------------
def dvgcn_forward(params, x_w, x_d, x_r, supports, adj_r, K, Kt):
    # TODO(synk): adj_r feeds the (unavailable) SATT/LSTM dynamic adjacency; unused here.
    del adj_r
    rm, rv = params['bn_rm'], params['bn_rv']

    def bn2d(v):   # BatchNorm2d(c_in, affine=False), eval mode (running stats)
        return (v - rm[None, :, None, None]) / jnp.sqrt(rv[None, :, None, None] + 1e-5)

    x = jnp.concatenate([bn2d(x_w), bn2d(x_d), bn2d(x_r)], axis=-1)      # (B, Cin, N, T)

    # adjacency: (h + supports) row-normalized; 16x16 -> plain jnp (launch overhead otherwise)
    A = params['h'] + supports
    d = 1.0 / (jnp.sum(A, -1, keepdims=True) + 1e-4)
    A = A * d
    A1 = A                                    # F.dropout(A, 0.8, training=False) == identity

    # channel-major layout (C, B, N, T): matmul lane dim becomes B*N*T (multiple of 128)
    x = jnp.transpose(x, (1, 0, 2, 3)).astype(jnp.float32)
    x, _ = st_block_2(params['block1'], x, A1, K, Kt)
    x, d_adj = st_block_2(params['block2'], x, A1, K, Kt)
    y = output_head(params, x)
    return y, d_adj, A


# ---------------------------------------------------------------------------
# Deterministic parameter initialization
# ---------------------------------------------------------------------------
def init_params(key, c_in, c_out, N, T, K, Kt):
    keys = list(jax.random.split(key, 64))
    it = iter(keys)

    def nrm(shape, scale=0.1):
        return scale * jax.random.normal(next(it), shape, dtype=jnp.float32)

    def block_params(cin):
        return dict(
            conv1_w=nrm((c_out, cin)), conv1_b=nrm((c_out,)),
            time_w=nrm((c_out, cin, 1, Kt)), time_b=nrm((c_out,)),
            gcn_w=nrm((2 * c_out, K * c_out, 1, Kt)), gcn_b=nrm((2 * c_out,)),
            tatt=dict(conv1_w=nrm((c_out,)), conv2_w=nrm((N,)),
                      w=nrm((N, c_out)), b=jnp.zeros((T, T), jnp.float32),
                      v=nrm((T, T)),
                      bn_w=jnp.ones((T,), jnp.float32), bn_b=jnp.zeros((T,), jnp.float32),
                      bn_rm=jnp.zeros((T,), jnp.float32), bn_rv=jnp.ones((T,), jnp.float32)),
            ln_w=jnp.ones((c_out, N, T), jnp.float32),
            ln_b=jnp.zeros((c_out, N, T), jnp.float32),
        )

    return dict(
        h=jax.random.uniform(next(it), (N, N), jnp.float32, 0.0, 1e-4),
        bn_rm=jnp.zeros((c_in,), jnp.float32),
        bn_rv=jnp.ones((c_in,), jnp.float32),
        block1=block_params(c_in),
        block2=block_params(c_out),
        conv1_w=nrm((c_out,)), conv1_b=nrm(()),
        conv2_w=nrm((c_out,)), conv2_b=nrm(()),
        conv3_w=nrm((c_out,)), conv3_b=nrm(()),
        conv4_w=nrm((c_out, 2)), conv4_b=nrm(()),
    )


# ---------------------------------------------------------------------------
if __name__ == "__main__":
    B, c_in, c_out, N = 2, 2, 16, 16
    week, day, recent = 24, 12, 24      # tem_size = 60 (required by hard-coded slices)
    K, Kt = 3, 3
    T = week + day + recent

    key = jax.random.PRNGKey(0)
    kp, kw, kd, kr, ks, ka = jax.random.split(key, 6)
    params = init_params(kp, c_in, c_out, N, T, K, Kt)

    x_w = jax.random.normal(kw, (B, c_in, N, week), jnp.float32)
    x_d = jax.random.normal(kd, (B, c_in, N, day), jnp.float32)
    x_r = jax.random.normal(kr, (B, c_in, N, recent), jnp.float32)
    supports = jax.nn.softmax(jax.random.normal(ks, (N, N), jnp.float32), axis=-1)
    adj_r = jax.nn.softmax(jax.random.normal(ka, (N, N), jnp.float32), axis=-1)

    fwd = jax.jit(lambda a, b, c, d, e: dvgcn_forward(params, a, b, c, d, e, K, Kt))
    y, d_adj, A = fwd(x_w, x_d, x_r, supports, adj_r)
    jax.block_until_ready((y, d_adj, A))

    assert y.shape == (B, N, 12), y.shape
    assert A.shape == (N, N)
    assert d_adj.shape == (N, N)
    assert jnp.all(jnp.isfinite(y))
    print("KERNEL_OK")
</pallas_src>

<mosaic_0001>
module attributes {stable_mosaic.version = 11 : i64} {
  func.func @kernel(%arg0: i32, %arg1: memref<6x1920xf32, #tpu.memory_space<vmem>>, %arg2: memref<16x6xf32, #tpu.memory_space<vmem>>, %arg3: memref<16x1xf32, #tpu.memory_space<vmem>>, %arg4: memref<16x1920xf32, #tpu.memory_space<vmem>>) attributes {dimension_semantics = [#tpu.dimension_semantics<parallel>], iteration_bounds = array<i64: 1>, scalar_prefetch = 0 : i64, scratch_operands = 0 : i64, tpu.core_type = #tpu.core_type<tc>, window_params = [{transform_indices = @transform_0, window_bounds = array<i64: 6, 1920>}, {pipeline_mode = #tpu.pipeline_mode<synchronous>, transform_indices = @transform_1, window_bounds = array<i64: 16, 6>}, {pipeline_mode = #tpu.pipeline_mode<synchronous>, transform_indices = @transform_2, window_bounds = array<i64: 16, 1>}, {transform_indices = @transform_3, window_bounds = array<i64: 16, 1920>}]} {
    %c0 = arith.constant 0 : index
    %c0_0 = arith.constant 0 : index
    %0 = vector.load %arg2[%c0, %c0_0] : memref<16x6xf32, #tpu.memory_space<vmem>>, vector<16x6xf32>
    %c0_1 = arith.constant 0 : index
    %c0_2 = arith.constant 0 : index
    %1 = vector.load %arg1[%c0_1, %c0_2] : memref<6x1920xf32, #tpu.memory_space<vmem>>, vector<6x1920xf32>
    %cst = arith.constant dense<0.000000e+00> : vector<16x1920xf32>
    %2 = tpu.matmul %0, %1, %cst {dimension_numbers = #tpu.dot_dimension_numbers<[1], [0], [0], [1], [0, 0, 1, 1], [], []>} : vector<16x6xf32>, vector<6x1920xf32>, vector<16x1920xf32> -> vector<16x1920xf32>
    %c0_3 = arith.constant 0 : index
    %c0_4 = arith.constant 0 : index
    %3 = vector.load %arg3[%c0_3, %c0_4] : memref<16x1xf32, #tpu.memory_space<vmem>>, vector<16x1xf32>
    %4 = vector.broadcast %3 : vector<16x1xf32> to vector<16x1920xf32>
    %5 = arith.addf %2, %4 : vector<16x1920xf32>
    %cst_5 = arith.constant 0.000000e+00 : f32
    %6 = vector.broadcast %cst_5 : f32 to vector<16x1920xf32>
    %7 = arith.cmpf ogt, %5, %6 : vector<16x1920xf32>
    %cst_6 = arith.constant 0.00999999977 : f32
    %8 = vector.broadcast %cst_6 : f32 to vector<16x1920xf32>
    %9 = arith.mulf %8, %5 : vector<16x1920xf32>
    %10 = arith.select %7, %5, %9 : vector<16x1920xi1>, vector<16x1920xf32>
    %c0_7 = arith.constant 0 : index
    %c0_8 = arith.constant 0 : index
    %11 = vector.load %arg4[%c0_7, %c0_8] : memref<16x1920xf32, #tpu.memory_space<vmem>>, vector<16x1920xf32>
    tpu.vector_store %arg4[%c0_7, %c0_8], %10 {strides = array<i32>} : memref<16x1920xf32, #tpu.memory_space<vmem>>, vector<16x1920xf32>,
    return
  }
  func.func @transform_0(%arg0: i32) -> (i32, i32) {
    %c0_i32 = arith.constant 0 : i32
    %c0_i32_0 = arith.constant 0 : i32
    return %c0_i32, %arg0 : i32, i32
  }
  func.func @transform_1(%arg0: i32) -> (i32, i32) {
    %c0_i32 = arith.constant 0 : i32
    %c0_i32_0 = arith.constant 0 : i32
    %c0_i32_1 = arith.constant 0 : i32
    return %c0_i32, %c0_i32_0 : i32, i32
  }
  func.func @transform_2(%arg0: i32) -> (i32, i32) {
    %c0_i32 = arith.constant 0 : i32
    %c0_i32_0 = arith.constant 0 : i32
    %c0_i32_1 = arith.constant 0 : i32
    return %c0_i32, %c0_i32_0 : i32, i32
  }
  func.func @transform_3(%arg0: i32) -> (i32, i32) {
    %c0_i32 = arith.constant 0 : i32
    %c0_i32_0 = arith.constant 0 : i32
    return %c0_i32, %arg0 : i32, i32
  }
}

module attributes {stable_mosaic.version = 11 : i64} {
  func.func @kernel(%arg0: i32, %arg1: memref<16x1920xf32, #tpu.memory_space<vmem>>, %arg2: memref<48x16xf32, #tpu.memory_space<vmem>>, %arg3: memref<48x1xf32, #tpu.memory_space<vmem>>, %arg4: memref<48x1920xf32, #tpu.memory_space<vmem>>) attributes {dimension_semantics = [#tpu.dimension_semantics<parallel>], iteration_bounds = array<i64: 1>, scalar_prefetch = 0 : i64, scratch_operands = 0 : i64, tpu.core_type = #tpu.core_type<tc>, window_params = [{transform_indices = @transform_0, window_bounds = array<i64: 16, 1920>}, {pipeline_mode = #tpu.pipeline_mode<synchronous>, transform_indices = @transform_1, window_bounds = array<i64: 48, 16>}, {pipeline_mode = #tpu.pipeline_mode<synchronous>, transform_indices = @transform_2, window_bounds = array<i64: 48, 1>}, {transform_indices = @transform_3, window_bounds = array<i64: 48, 1920>}]} {
    %c0 = arith.constant 0 : index
    %c0_0 = arith.constant 0 : index
    %0 = vector.load %arg2[%c0, %c0_0] : memref<48x16xf32, #tpu.memory_space<vmem>>, vector<48x16xf32>
    %c0_1 = arith.constant 0 : index
    %c0_2 = arith.constant 0 : index
    %1 = vector.load %arg1[%c0_1, %c0_2] : memref<16x1920xf32, #tpu.memory_space<vmem>>, vector<16x1920xf32>
    %cst = arith.constant dense<0.000000e+00> : vector<48x1920xf32>
    %2 = tpu.matmul %0, %1, %cst {dimension_numbers = #tpu.dot_dimension_numbers<[1], [0], [0], [1], [0, 0, 1, 1], [], []>} : vector<48x16xf32>, vector<16x1920xf32>, vector<48x1920xf32> -> vector<48x1920xf32>
    %c0_3 = arith.constant 0 : index
    %c0_4 = arith.constant 0 : index
    %3 = vector.load %arg3[%c0_3, %c0_4] : memref<48x1xf32, #tpu.memory_space<vmem>>, vector<48x1xf32>
    %4 = vector.broadcast %3 : vector<48x1xf32> to vector<48x1920xf32>
    %5 = arith.addf %2, %4 : vector<48x1920xf32>
    %c0_5 = arith.constant 0 : index
    %c0_6 = arith.constant 0 : index
    %6 = vector.load %arg4[%c0_5, %c0_6] : memref<48x1920xf32, #tpu.memory_space<vmem>>, vector<48x1920xf32>
    tpu.vector_store %arg4[%c0_5, %c0_6], %5 {strides = array<i32>} : memref<48x1920xf32, #tpu.memory_space<vmem>>, vector<48x1920xf32>,
    return
  }
  func.func @transform_0(%arg0: i32) -> (i32, i32) {
    %c0_i32 = arith.constant 0 : i32
    %c0_i32_0 = arith.constant 0 : i32
    return %c0_i32, %arg0 : i32, i32
  }
  func.func @transform_1(%arg0: i32) -> (i32, i32) {
    %c0_i32 = arith.constant 0 : i32
    %c0_i32_0 = arith.constant 0 : i32
    %c0_i32_1 = arith.constant 0 : i32
    return %c0_i32, %c0_i32_0 : i32, i32
  }
  func.func @transform_2(%arg0: i32) -> (i32, i32) {
    %c0_i32 = arith.constant 0 : i32
    %c0_i32_0 = arith.constant 0 : i32
    %c0_i32_1 = arith.constant 0 : i32
    return %c0_i32, %c0_i32_0 : i32, i32
  }
  func.func @transform_3(%arg0: i32) -> (i32, i32) {
    %c0_i32 = arith.constant 0 : i32
    %c0_i32_0 = arith.constant 0 : i32
    return %c0_i32, %arg0 : i32, i32
  }
}

module attributes {stable_mosaic.version = 11 : i64} {
  func.func @kernel(%arg0: i32, %arg1: memref<144x1920xf32, #tpu.memory_space<vmem>>, %arg2: memref<32x144xf32, #tpu.memory_space<vmem>>, %arg3: memref<32x1xf32, #tpu.memory_space<vmem>>, %arg4: memref<16x1920xf32, #tpu.memory_space<vmem>>) attributes {dimension_semantics = [#tpu.dimension_semantics<parallel>], iteration_bounds = array<i64: 1>, scalar_prefetch = 0 : i64, scratch_operands = 0 : i64, tpu.core_type = #tpu.core_type<tc>, window_params = [{transform_indices = @transform_0, window_bounds = array<i64: 144, 1920>}, {pipeline_mode = #tpu.pipeline_mode<synchronous>, transform_indices = @transform_1, window_bounds = array<i64: 32, 144>}, {pipeline_mode = #tpu.pipeline_mode<synchronous>, transform_indices = @transform_2, window_bounds = array<i64: 32, 1>}, {transform_indices = @transform_3, window_bounds = array<i64: 16, 1920>}]} {
    %c0 = arith.constant 0 : index
    %c0_0 = arith.constant 0 : index
    %0 = vector.load %arg2[%c0, %c0_0] : memref<32x144xf32, #tpu.memory_space<vmem>>, vector<32x144xf32>
    %c0_1 = arith.constant 0 : index
    %c0_2 = arith.constant 0 : index
    %1 = vector.load %arg1[%c0_1, %c0_2] : memref<144x1920xf32, #tpu.memory_space<vmem>>, vector<144x1920xf32>
    %cst = arith.constant dense<0.000000e+00> : vector<32x1920xf32>
    %2 = tpu.matmul %0, %1, %cst {dimension_numbers = #tpu.dot_dimension_numbers<[1], [0], [0], [1], [0, 0, 1, 1], [], []>} : vector<32x144xf32>, vector<144x1920xf32>, vector<32x1920xf32> -> vector<32x1920xf32>
    %c0_3 = arith.constant 0 : index
    %c0_4 = arith.constant 0 : index
    %3 = vector.load %arg3[%c0_3, %c0_4] : memref<32x1xf32, #tpu.memory_space<vmem>>, vector<32x1xf32>
    %4 = vector.broadcast %3 : vector<32x1xf32> to vector<32x1920xf32>
    %5 = arith.addf %2, %4 : vector<32x1920xf32>
    %6 = vector.extract_strided_slice %5 {offsets = [0, 0], sizes = [16, 1920], strides = [1, 1]} : vector<32x1920xf32> to vector<16x1920xf32>
    %7 = vector.extract_strided_slice %5 {offsets = [16, 0], sizes = [16, 1920], strides = [1, 1]} : vector<32x1920xf32> to vector<16x1920xf32>
    %8 = arith.negf %7 : vector<16x1920xf32>
    %9 = math.exp %8 : vector<16x1920xf32>
    %cst_5 = arith.constant 1.000000e+00 : f32
    %10 = vector.broadcast %cst_5 : f32 to vector<16x1920xf32>
    %11 = arith.addf %10, %9 : vector<16x1920xf32>
    %12 = arith.divf %10, %11 : vector<16x1920xf32>
    %cst_6 = arith.constant 0.000000e+00 : f32
    %13 = vector.broadcast %cst_6 : f32 to vector<16x1920xf32>
    %14 = arith.cmpf ogt, %6, %13 : vector<16x1920xf32>
    %cst_7 = arith.constant 0.00999999977 : f32
    %15 = vector.broadcast %cst_7 : f32 to vector<16x1920xf32>
    %16 = arith.mulf %15, %6 : vector<16x1920xf32>
    %17 = arith.select %14, %6, %16 : vector<16x1920xi1>, vector<16x1920xf32>
    %18 = arith.mulf %12, %17 : vector<16x1920xf32>
    %c0_8 = arith.constant 0 : index
    %c0_9 = arith.constant 0 : index
    %19 = vector.load %arg4[%c0_8, %c0_9] : memref<16x1920xf32, #tpu.memory_space<vmem>>, vector<16x1920xf32>
    tpu.vector_store %arg4[%c0_8, %c0_9], %18 {strides = array<i32>} : memref<16x1920xf32, #tpu.memory_space<vmem>>, vector<16x1920xf32>,
    return
  }
  func.func @transform_0(%arg0: i32) -> (i32, i32) {
    %c0_i32 = arith.constant 0 : i32
    %c0_i32_0 = arith.constant 0 : i32
    return %c0_i32, %arg0 : i32, i32
  }
  func.func @transform_1(%arg0: i32) -> (i32, i32) {
    %c0_i32 = arith.constant 0 : i32
    %c0_i32_0 = arith.constant 0 : i32
    %c0_i32_1 = arith.constant 0 : i32
    return %c0_i32, %c0_i32_0 : i32, i32
  }
  func.func @transform_2(%arg0: i32) -> (i32, i32) {
    %c0_i32 = arith.constant 0 : i32
    %c0_i32_0 = arith.constant 0 : i32
    %c0_i32_1 = arith.constant 0 : i32
    return %c0_i32, %c0_i32_0 : i32, i32
  }
  func.func @transform_3(%arg0: i32) -> (i32, i32) {
    %c0_i32 = arith.constant 0 : i32
    %c0_i32_0 = arith.constant 0 : i32
    return %c0_i32, %arg0 : i32, i32
  }
}

module attributes {stable_mosaic.version = 11 : i64} {
  func.func @kernel(%arg0: i32, %arg1: memref<2x1920xf32, #tpu.memory_space<vmem>>, %arg2: memref<16x2xf32, #tpu.memory_space<vmem>>, %arg3: memref<16x1xf32, #tpu.memory_space<vmem>>, %arg4: memref<16x1920xf32, #tpu.memory_space<vmem>>) attributes {dimension_semantics = [#tpu.dimension_semantics<parallel>], iteration_bounds = array<i64: 1>, scalar_prefetch = 0 : i64, scratch_operands = 0 : i64, tpu.core_type = #tpu.core_type<tc>, window_params = [{transform_indices = @transform_0, window_bounds = array<i64: 2, 1920>}, {pipeline_mode = #tpu.pipeline_mode<synchronous>, transform_indices = @transform_1, window_bounds = array<i64: 16, 2>}, {pipeline_mode = #tpu.pipeline_mode<synchronous>, transform_indices = @transform_2, window_bounds = array<i64: 16, 1>}, {transform_indices = @transform_3, window_bounds = array<i64: 16, 1920>}]} {
    %c0 = arith.constant 0 : index
    %c0_0 = arith.constant 0 : index
    %0 = vector.load %arg2[%c0, %c0_0] : memref<16x2xf32, #tpu.memory_space<vmem>>, vector<16x2xf32>
    %c0_1 = arith.constant 0 : index
    %c0_2 = arith.constant 0 : index
    %1 = vector.load %arg1[%c0_1, %c0_2] : memref<2x1920xf32, #tpu.memory_space<vmem>>, vector<2x1920xf32>
    %cst = arith.constant dense<0.000000e+00> : vector<16x1920xf32>
    %2 = tpu.matmul %0, %1, %cst {dimension_numbers = #tpu.dot_dimension_numbers<[1], [0], [0], [1], [0, 0, 1, 1], [], []>} : vector<16x2xf32>, vector<2x1920xf32>, vector<16x1920xf32> -> vector<16x1920xf32>
    %c0_3 = arith.constant 0 : index
    %c0_4 = arith.constant 0 : index
    %3 = vector.load %arg3[%c0_3, %c0_4] : memref<16x1xf32, #tpu.memory_space<vmem>>, vector<16x1xf32>
    %4 = vector.broadcast %3 : vector<16x1xf32> to vector<16x1920xf32>
    %5 = arith.addf %2, %4 : vector<16x1920xf32>
    %c0_5 = arith.constant 0 : index
    %c0_6 = arith.constant 0 : index
    %6 = vector.load %arg4[%c0_5, %c0_6] : memref<16x1920xf32, #tpu.memory_space<vmem>>, vector<16x1920xf32>
    tpu.vector_store %arg4[%c0_5, %c0_6], %5 {strides = array<i32>} : memref<16x1920xf32, #tpu.memory_space<vmem>>, vector<16x1920xf32>,
    return
  }
  func.func @transform_0(%arg0: i32) -> (i32, i32) {
    %c0_i32 = arith.constant 0 : i32
    %c0_i32_0 = arith.constant 0 : i32
    return %c0_i32, %arg0 : i32, i32
  }
  func.func @transform_1(%arg0: i32) -> (i32, i32) {
    %c0_i32 = arith.constant 0 : i32
    %c0_i32_0 = arith.constant 0 : i32
    %c0_i32_1 = arith.constant 0 : i32
    return %c0_i32, %c0_i32_0 : i32, i32
  }
  func.func @transform_2(%arg0: i32) -> (i32, i32) {
    %c0_i32 = arith.constant 0 : i32
    %c0_i32_0 = arith.constant 0 : i32
    %c0_i32_1 = arith.constant 0 : i32
    return %c0_i32, %c0_i32_0 : i32, i32
  }
  func.func @transform_3(%arg0: i32) -> (i32, i32) {
    %c0_i32 = arith.constant 0 : i32
    %c0_i32_0 = arith.constant 0 : i32
    return %c0_i32, %arg0 : i32, i32
  }
}

module attributes {stable_mosaic.version = 11 : i64} {
  func.func @kernel(%arg0: i32, %arg1: memref<16x1x16x60xf32, #tpu.memory_space<vmem>>, %arg2: memref<16x1x16x60xf32, #tpu.memory_space<vmem>>, %arg3: memref<16x1xf32, #tpu.memory_space<vmem>>, %arg4: memref<1x16xf32, #tpu.memory_space<vmem>>, %arg5: memref<16x16xf32, #tpu.memory_space<vmem>>, %arg6: memref<60x60xf32, #tpu.memory_space<vmem>>, %arg7: memref<60x60xf32, #tpu.memory_space<vmem>>, %arg8: memref<4x60xf32, #tpu.memory_space<vmem>>, %arg9: memref<16x16x60xf32, #tpu.memory_space<vmem>>, %arg10: memref<16x16x60xf32, #tpu.memory_space<vmem>>, %arg11: memref<16x1x16x60xf32, #tpu.memory_space<vmem>>) attributes {dimension_semantics = [#tpu.dimension_semantics<parallel>], iteration_bounds = array<i64: 2>, scalar_prefetch = 0 : i64, scratch_operands = 0 : i64, tpu.core_type = #tpu.core_type<tc>, window_params = [{transform_indices = @transform_0, window_bounds = array<i64: 16, 1, 16, 60>}, {transform_indices = @transform_1, window_bounds = array<i64: 16, 1, 16, 60>}, {pipeline_mode = #tpu.pipeline_mode<synchronous>, transform_indices = @transform_2, window_bounds = array<i64: 16, 1>}, {pipeline_mode = #tpu.pipeline_mode<synchronous>, transform_indices = @transform_3, window_bounds = array<i64: 1, 16>}, {pipeline_mode = #tpu.pipeline_mode<synchronous>, transform_indices = @transform_4, window_bounds = array<i64: 16, 16>}, {pipeline_mode = #tpu.pipeline_mode<synchronous>, transform_indices = @transform_5, window_bounds = array<i64: 60, 60>}, {pipeline_mode = #tpu.pipeline_mode<synchronous>, transform_indices = @transform_6, window_bounds = array<i64: 60, 60>}, {pipeline_mode = #tpu.pipeline_mode<synchronous>, transform_indices = @transform_7, window_bounds = array<i64: 4, 60>}, {pipeline_mode = #tpu.pipeline_mode<synchronous>, transform_indices = @transform_8, window_bounds = array<i64: 16, 16, 60>}, {pipeline_mode = #tpu.pipeline_mode<synchronous>, transform_indices = @transform_9, window_bounds = array<i64: 16, 16, 60>}, {transform_indices = @transform_10, window_bounds = array<i64: 16, 1, 16, 60>}]} {
    %c0 = arith.constant 0 : index
    %c0_0 = arith.constant 0 : index
    %c0_1 = arith.constant 0 : index
    %c0_2 = arith.constant 0 : index
    %0 = vector.load %arg1[%c0, %c0_0, %c0_1, %c0_2] : memref<16x1x16x60xf32, #tpu.memory_space<vmem>>, vector<16x1x16x60xf32>
    %1 = vector.shape_cast %0 : vector<16x1x16x60xf32> to vector<16x16x60xf32>
    %c0_3 = arith.constant 0 : index
    %c0_4 = arith.constant 0 : index
    %c0_5 = arith.constant 0 : index
    %c0_6 = arith.constant 0 : index
    %2 = vector.load %arg2[%c0_3, %c0_4, %c0_5, %c0_6] : memref<16x1x16x60xf32, #tpu.memory_space<vmem>>, vector<16x1x16x60xf32>
    %3 = vector.shape_cast %2 : vector<16x1x16x60xf32> to vector<16x16x60xf32>
    %c0_7 = arith.constant 0 : index
    %c0_8 = arith.constant 0 : index
    %4 = vector.load %arg3[%c0_7, %c0_8] : memref<16x1xf32, #tpu.memory_space<vmem>>, vector<16x1xf32>
    %5 = vector.shape_cast %4 : vector<16x1xf32> to vector<16x1x1xf32>
    %6 = vector.broadcast %5 : vector<16x1x1xf32> to vector<16x16x60xf32>
    %7 = arith.mulf %1, %6 : vector<16x16x60xf32>
    %cst = arith.constant dense<0.000000e+00> : vector<16x60xf32>
    %8 = vector.multi_reduction <add>, %7, %cst [0] : vector<16x16x60xf32> to vector<16x60xf32>
    %c0_9 = arith.constant 0 : index
    %c0_10 = arith.constant 0 : index
    %9 = vector.load %arg4[%c0_9, %c0_10] : memref<1x16xf32, #tpu.memory_space<vmem>>, vector<1x16xf32>
    %10 = vector.shape_cast %9 : vector<1x16xf32> to vector<1x16x1xf32>
    %11 = vector.broadcast %10 : vector<1x16x1xf32> to vector<16x16x60xf32>
    %12 = arith.mulf %1, %11 : vector<16x16x60xf32>
    %cst_11 = arith.constant dense<0.000000e+00> : vector<16x60xf32>
    %13 = vector.multi_reduction <add>, %12, %cst_11 [1] : vector<16x16x60xf32> to vector<16x60xf32>
    %c0_12 = arith.constant 0 : index
    %c0_13 = arith.constant 0 : index
    %14 = vector.load %arg5[%c0_12, %c0_13] : memref<16x16xf32, #tpu.memory_space<vmem>>, vector<16x16xf32>
    %cst_14 = arith.constant dense<0.000000e+00> : vector<16x60xf32>
    %15 = tpu.matmul %14, %13, %cst_14 {dimension_numbers = #tpu.dot_dimension_numbers<[1], [0], [0], [1], [0, 0, 1, 1], [], []>} : vector<16x16xf32>, vector<16x60xf32>, vector<16x60xf32> -> vector<16x60xf32>
    %cst_15 = arith.constant dense<0.000000e+00> : vector<60x60xf32>
    %16 = tpu.matmul %8, %15, %cst_15 {dimension_numbers = #tpu.dot_dimension_numbers<[0], [0], [1], [1], [0, 1, 1, 1], [], []>} : vector<16x60xf32>, vector<16x60xf32>, vector<60x60xf32> -> vector<60x60xf32>
    %c0_16 = arith.constant 0 : index
    %c0_17 = arith.constant 0 : index
    %17 = vector.load %arg6[%c0_16, %c0_17] : memref<60x60xf32, #tpu.memory_space<vmem>>, vector<60x60xf32>
    %18 = arith.addf %16, %17 : vector<60x60xf32>
    %19 = arith.negf %18 : vector<60x60xf32>
    %20 = math.exp %19 : vector<60x60xf32>
    %cst_18 = arith.constant 1.000000e+00 : f32
    %21 = vector.broadcast %cst_18 : f32 to vector<60x60xf32>
    %22 = arith.addf %21, %20 : vector<60x60xf32>
    %23 = arith.divf %21, %22 : vector<60x60xf32>
    %c0_19 = arith.constant 0 : index
    %c0_20 = arith.constant 0 : index
    %24 = vector.load %arg7[%c0_19, %c0_20] : memref<60x60xf32, #tpu.memory_space<vmem>>, vector<60x60xf32>
    %cst_21 = arith.constant dense<0.000000e+00> : vector<60x60xf32>
    %25 = tpu.matmul %24, %23, %cst_21 {dimension_numbers = #tpu.dot_dimension_numbers<[1], [0], [0], [1], [0, 0, 1, 1], [], []>} : vector<60x60xf32>, vector<60x60xf32>, vector<60x60xf32> -> vector<60x60xf32>
    %c0_22 = arith.constant 0 : index
    %c0_23 = arith.constant 0 : index
    %26 = vector.load %arg8[%c0_22, %c0_23] : memref<4x60xf32, #tpu.memory_space<vmem>>, vector<4x60xf32>
    %27 = vector.extract_strided_slice %26 {offsets = [0, 0], sizes = [1, 60], strides = [1, 1]} : vector<4x60xf32> to vector<1x60xf32>
    %28 = vector.extract_strided_slice %26 {offsets = [1, 0], sizes = [1, 60], strides = [1, 1]} : vector<4x60xf32> to vector<1x60xf32>
    %29 = vector.extract_strided_slice %26 {offsets = [2, 0], sizes = [1, 60], strides = [1, 1]} : vector<4x60xf32> to vector<1x60xf32>
    %30 = vector.extract_strided_slice %26 {offsets = [3, 0], sizes = [1, 60], strides = [1, 1]} : vector<4x60xf32> to vector<1x60xf32>
    %31 = vector.broadcast %27 : vector<1x60xf32> to vector<60x60xf32>
    %32 = arith.subf %25, %31 : vector<60x60xf32>
    %cst_24 = arith.constant 9.99999974E-6 : f32
    %33 = vector.broadcast %cst_24 : f32 to vector<1x60xf32>
    %34 = arith.addf %28, %33 : vector<1x60xf32>
    %35 = math.rsqrt %34 : vector<1x60xf32>
    %36 = vector.broadcast %35 : vector<1x60xf32> to vector<60x60xf32>
    %37 = arith.mulf %32, %36 : vector<60x60xf32>
    %38 = vector.broadcast %29 : vector<1x60xf32> to vector<60x60xf32>
    %39 = arith.mulf %37, %38 : vector<60x60xf32>
    %40 = vector.broadcast %30 : vector<1x60xf32> to vector<60x60xf32>
    %41 = arith.addf %39, %40 : vector<60x60xf32>
    %cst_25 = arith.constant dense<0xFF800000> : vector<60xf32>
    %42 = vector.multi_reduction <maximumf>, %41, %cst_25 [1] : vector<60x60xf32> to vector<60xf32>
    %43 = vector.shape_cast %42 : vector<60xf32> to vector<60x1xf32>
    %44 = vector.broadcast %43 : vector<60x1xf32> to vector<60x60xf32>
    %45 = arith.subf %41, %44 : vector<60x60xf32>
    %46 = math.exp %45 : vector<60x60xf32>
    %cst_26 = arith.constant dense<0.000000e+00> : vector<60xf32>
    %47 = vector.multi_reduction <add>, %46, %cst_26 [1] : vector<60x60xf32> to vector<60xf32>
    %48 = vector.shape_cast %47 : vector<60xf32> to vector<60x1xf32>
    %49 = vector.broadcast %48 : vector<60x1xf32> to vector<60x60xf32>
    %50 = arith.divf %46, %49 : vector<60x60xf32>
    %51 = vector.shape_cast %1 : vector<16x16x60xf32> to vector<256x60xf32>
    %cst_27 = arith.constant dense<0.000000e+00> : vector<256x60xf32>
    %52 = tpu.matmul %51, %50, %cst_27 {dimension_numbers = #tpu.dot_dimension_numbers<[1], [1], [0], [0], [0, 0, 1, 0], [], []>} : vector<256x60xf32>, vector<60x60xf32>, vector<256x60xf32> -> vector<256x60xf32>
    %53 = vector.shape_cast %52 : vector<256x60xf32> to vector<16x16x60xf32>
    %cst_28 = arith.constant 0.000000e+00 : f32
    %54 = vector.broadcast %cst_28 : f32 to vector<16x16x60xf32>
    %55 = arith.cmpf ogt, %53, %54 : vector<16x16x60xf32>
    %cst_29 = arith.constant 0.00999999977 : f32
    %56 = vector.broadcast %cst_29 : f32 to vector<16x16x60xf32>
    %57 = arith.mulf %56, %53 : vector<16x16x60xf32>
    %58 = arith.select %55, %53, %57 : vector<16x16x60xi1>, vector<16x16x60xf32>
    %59 = arith.addf %58, %3 : vector<16x16x60xf32>
    %60 = vector.shape_cast %59 : vector<16x16x60xf32> to vector<1x16x16x60xf32>
    %cst_30 = arith.constant dense<0.000000e+00> : vector<1xf32>
    %61 = vector.multi_reduction <add>, %60, %cst_30 [1, 2, 3] : vector<1x16x16x60xf32> to vector<1xf32>
    %62 = vector.shape_cast %61 : vector<1xf32> to vector<1x1x1x1xf32>
    %63 = vector.extract %62[0, 0, 0, 0] : f32 from vector<1x1x1x1xf32>
    %64 = vector.broadcast %63 : f32 to vector<1x1x1xf32>
    %cst_31 = arith.constant 1.536000e+04 : f32
    %65 = vector.broadcast %cst_31 : f32 to vector<1x1x1xf32>
    %66 = arith.divf %64, %65 : vector<1x1x1xf32>
    %67 = vector.broadcast %66 : vector<1x1x1xf32> to vector<16x16x60xf32>
    %68 = arith.subf %59, %67 : vector<16x16x60xf32>
    %69 = arith.mulf %68, %68 : vector<16x16x60xf32>
    %70 = vector.shape_cast %69 : vector<16x16x60xf32> to vector<1x16x16x60xf32>
    %cst_32 = arith.constant dense<0.000000e+00> : vector<1xf32>
    %71 = vector.multi_reduction <add>, %70, %cst_32 [1, 2, 3] : vector<1x16x16x60xf32> to vector<1xf32>
    %72 = vector.shape_cast %71 : vector<1xf32> to vector<1x1x1x1xf32>
    %73 = vector.extract %72[0, 0, 0, 0] : f32 from vector<1x1x1x1xf32>
    %74 = vector.broadcast %73 : f32 to vector<1x1x1xf32>
    %cst_33 = arith.constant 1.536000e+04 : f32
    %75 = vector.broadcast %cst_33 : f32 to vector<1x1x1xf32>
    %76 = arith.divf %74, %75 : vector<1x1x1xf32>
    %77 = vector.broadcast %66 : vector<1x1x1xf32> to vector<16x16x60xf32>
    %78 = arith.subf %59, %77 : vector<16x16x60xf32>
    %cst_34 = arith.constant 9.99999974E-6 : f32
    %79 = vector.broadcast %cst_34 : f32 to vector<1x1x1xf32>
    %80 = arith.addf %76, %79 : vector<1x1x1xf32>
    %81 = math.rsqrt %80 : vector<1x1x1xf32>
    %82 = vector.broadcast %81 : vector<1x1x1xf32> to vector<16x16x60xf32>
    %83 = arith.mulf %78, %82 : vector<16x16x60xf32>
    %c0_35 = arith.constant 0 : index
    %c0_36 = arith.constant 0 : index
    %c0_37 = arith.constant 0 : index
    %84 = vector.load %arg9[%c0_35, %c0_36, %c0_37] : memref<16x16x60xf32, #tpu.memory_space<vmem>>, vector<16x16x60xf32>
    %85 = arith.mulf %83, %84 : vector<16x16x60xf32>
    %c0_38 = arith.constant 0 : index
    %c0_39 = arith.constant 0 : index
    %c0_40 = arith.constant 0 : index
    %86 = vector.load %arg10[%c0_38, %c0_39, %c0_40] : memref<16x16x60xf32, #tpu.memory_space<vmem>>, vector<16x16x60xf32>
    %87 = arith.addf %85, %86 : vector<16x16x60xf32>
    %88 = vector.shape_cast %87 : vector<16x16x60xf32> to vector<16x1x16x60xf32>
    %c0_41 = arith.constant 0 : index
    %c0_42 = arith.constant 0 : index
    %c0_43 = arith.constant 0 : index
    %c0_44 = arith.constant 0 : index
    %89 = vector.load %arg11[%c0_41, %c0_42, %c0_43, %c0_44] : memref<16x1x16x60xf32, #tpu.memory_space<vmem>>, vector<16x1x16x60xf32>
    tpu.vector_store %arg11[%c0_41, %c0_42, %c0_43, %c0_44], %88 {strides = array<i32>} : memref<16x1x16x60xf32, #tpu.memory_space<vmem>>, vector<16x1x16x60xf32>,
    return
  }
  func.func @transform_0(%arg0: i32) -> (i32, i32, i32, i32) {
    %c0_i32 = arith.constant 0 : i32
    %c0_i32_0 = arith.constant 0 : i32
    %c0_i32_1 = arith.constant 0 : i32
    %c0_i32_2 = arith.constant 0 : i32
    return %c0_i32, %arg0, %c0_i32_0, %c0_i32_1 : i32, i32, i32, i32
  }
  func.func @transform_1(%arg0: i32) -> (i32, i32, i32, i32) {
    %c0_i32 = arith.constant 0 : i32
    %c0_i32_0 = arith.constant 0 : i32
    %c0_i32_1 = arith.constant 0 : i32
    %c0_i32_2 = arith.constant 0 : i32
    return %c0_i32, %arg0, %c0_i32_0, %c0_i32_1 : i32, i32, i32, i32
  }
  func.func @transform_2(%arg0: i32) -> (i32, i32) {
    %c0_i32 = arith.constant 0 : i32
    %c0_i32_0 = arith.constant 0 : i32
    %c0_i32_1 = arith.constant 0 : i32
    return %c0_i32, %c0_i32_0 : i32, i32
  }
  func.func @transform_3(%arg0: i32) -> (i32, i32) {
    %c0_i32 = arith.constant 0 : i32
    %c0_i32_0 = arith.constant 0 : i32
    %c0_i32_1 = arith.constant 0 : i32
    return %c0_i32, %c0_i32_0 : i32, i32
  }
  func.func @transform_4(%arg0: i32) -> (i32, i32) {
    %c0_i32 = arith.constant 0 : i32
    %c0_i32_0 = arith.constant 0 : i32
    %c0_i32_1 = arith.constant 0 : i32
    return %c0_i32, %c0_i32_0 : i32, i32
  }
  func.func @transform_5(%arg0: i32) -> (i32, i32) {
    %c0_i32 = arith.constant 0 : i32
    %c0_i32_0 = arith.constant 0 : i32
    %c0_i32_1 = arith.constant 0 : i32
    return %c0_i32, %c0_i32_0 : i32, i32
  }
  func.func @transform_6(%arg0: i32) -> (i32, i32) {
    %c0_i32 = arith.constant 0 : i32
    %c0_i32_0 = arith.constant 0 : i32
    %c0_i32_1 = arith.constant 0 : i32
    return %c0_i32, %c0_i32_0 : i32, i32
  }
  func.func @transform_7(%arg0: i32) -> (i32, i32) {
    %c0_i32 = arith.constant 0 : i32
    %c0_i32_0 = arith.constant 0 : i32
    %c0_i32_1 = arith.constant 0 : i32
    return %c0_i32, %c0_i32_0 : i32, i32
  }
  func.func @transform_8(%arg0: i32) -> (i32, i32, i32) {
    %c0_i32 = arith.constant 0 : i32
    %c0_i32_0 = arith.constant 0 : i32
    %c0_i32_1 = arith.constant 0 : i32
    %c0_i32_2 = arith.constant 0 : i32
    return %c0_i32, %c0_i32_0, %c0_i32_1 : i32, i32, i32
  }
  func.func @transform_9(%arg0: i32) -> (i32, i32, i32) {
    %c0_i32 = arith.constant 0 : i32
    %c0_i32_0 = arith.constant 0 : i32
    %c0_i32_1 = arith.constant 0 : i32
    %c0_i32_2 = arith.constant 0 : i32
    return %c0_i32, %c0_i32_0, %c0_i32_1 : i32, i32, i32
  }
  func.func @transform_10(%arg0: i32) -> (i32, i32, i32, i32) {
    %c0_i32 = arith.constant 0 : i32
    %c0_i32_0 = arith.constant 0 : i32
    %c0_i32_1 = arith.constant 0 : i32
    %c0_i32_2 = arith.constant 0 : i32
    return %c0_i32, %arg0, %c0_i32_0, %c0_i32_1 : i32, i32, i32, i32
  }
}

module attributes {stable_mosaic.version = 11 : i64} {
  func.func @kernel(%arg0: i32, %arg1: memref<48x1920xf32, #tpu.memory_space<vmem>>, %arg2: memref<16x48xf32, #tpu.memory_space<vmem>>, %arg3: memref<16x1xf32, #tpu.memory_space<vmem>>, %arg4: memref<16x1920xf32, #tpu.memory_space<vmem>>) attributes {dimension_semantics = [#tpu.dimension_semantics<parallel>], iteration_bounds = array<i64: 1>, scalar_prefetch = 0 : i64, scratch_operands = 0 : i64, tpu.core_type = #tpu.core_type<tc>, window_params = [{transform_indices = @transform_0, window_bounds = array<i64: 48, 1920>}, {pipeline_mode = #tpu.pipeline_mode<synchronous>, transform_indices = @transform_1, window_bounds = array<i64: 16, 48>}, {pipeline_mode = #tpu.pipeline_mode<synchronous>, transform_indices = @transform_2, window_bounds = array<i64: 16, 1>}, {transform_indices = @transform_3, window_bounds = array<i64: 16, 1920>}]} {
    %c0 = arith.constant 0 : index
    %c0_0 = arith.constant 0 : index
    %0 = vector.load %arg2[%c0, %c0_0] : memref<16x48xf32, #tpu.memory_space<vmem>>, vector<16x48xf32>
    %c0_1 = arith.constant 0 : index
    %c0_2 = arith.constant 0 : index
    %1 = vector.load %arg1[%c0_1, %c0_2] : memref<48x1920xf32, #tpu.memory_space<vmem>>, vector<48x1920xf32>
    %cst = arith.constant dense<0.000000e+00> : vector<16x1920xf32>
    %2 = tpu.matmul %0, %1, %cst {dimension_numbers = #tpu.dot_dimension_numbers<[1], [0], [0], [1], [0, 0, 1, 1], [], []>} : vector<16x48xf32>, vector<48x1920xf32>, vector<16x1920xf32> -> vector<16x1920xf32>
    %c0_3 = arith.constant 0 : index
    %c0_4 = arith.constant 0 : index
    %3 = vector.load %arg3[%c0_3, %c0_4] : memref<16x1xf32, #tpu.memory_space<vmem>>, vector<16x1xf32>
    %4 = vector.broadcast %3 : vector<16x1xf32> to vector<16x1920xf32>
    %5 = arith.addf %2, %4 : vector<16x1920xf32>
    %cst_5 = arith.constant 0.000000e+00 : f32
    %6 = vector.broadcast %cst_5 : f32 to vector<16x1920xf32>
    %7 = arith.cmpf ogt, %5, %6 : vector<16x1920xf32>
    %cst_6 = arith.constant 0.00999999977 : f32
    %8 = vector.broadcast %cst_6 : f32 to vector<16x1920xf32>
    %9 = arith.mulf %8, %5 : vector<16x1920xf32>
    %10 = arith.select %7, %5, %9 : vector<16x1920xi1>, vector<16x1920xf32>
    %c0_7 = arith.constant 0 : index
    %c0_8 = arith.constant 0 : index
    %11 = vector.load %arg4[%c0_7, %c0_8] : memref<16x1920xf32, #tpu.memory_space<vmem>>, vector<16x1920xf32>
    tpu.vector_store %arg4[%c0_7, %c0_8], %10 {strides = array<i32>} : memref<16x1920xf32, #tpu.memory_space<vmem>>, vector<16x1920xf32>,
    return
  }
  func.func @transform_0(%arg0: i32) -> (i32, i32) {
    %c0_i32 = arith.constant 0 : i32
    %c0_i32_0 = arith.constant 0 : i32
    return %c0_i32, %arg0 : i32, i32
  }
  func.func @transform_1(%arg0: i32) -> (i32, i32) {
    %c0_i32 = arith.constant 0 : i32
    %c0_i32_0 = arith.constant 0 : i32
    %c0_i32_1 = arith.constant 0 : i32
    return %c0_i32, %c0_i32_0 : i32, i32
  }
  func.func @transform_2(%arg0: i32) -> (i32, i32) {
    %c0_i32 = arith.constant 0 : i32
    %c0_i32_0 = arith.constant 0 : i32
    %c0_i32_1 = arith.constant 0 : i32
    return %c0_i32, %c0_i32_0 : i32, i32
  }
  func.func @transform_3(%arg0: i32) -> (i32, i32) {
    %c0_i32 = arith.constant 0 : i32
    %c0_i32_0 = arith.constant 0 : i32
    return %c0_i32, %arg0 : i32, i32
  }
}

module attributes {stable_mosaic.version = 11 : i64} {
  func.func @kernel(%arg0: i32, %arg1: memref<16x1920xf32, #tpu.memory_space<vmem>>, %arg2: memref<16x16xf32, #tpu.memory_space<vmem>>, %arg3: memref<16x1xf32, #tpu.memory_space<vmem>>, %arg4: memref<16x1920xf32, #tpu.memory_space<vmem>>) attributes {dimension_semantics = [#tpu.dimension_semantics<parallel>], iteration_bounds = array<i64: 1>, scalar_prefetch = 0 : i64, scratch_operands = 0 : i64, tpu.core_type = #tpu.core_type<tc>, window_params = [{transform_indices = @transform_0, window_bounds = array<i64: 16, 1920>}, {pipeline_mode = #tpu.pipeline_mode<synchronous>, transform_indices = @transform_1, window_bounds = array<i64: 16, 16>}, {pipeline_mode = #tpu.pipeline_mode<synchronous>, transform_indices = @transform_2, window_bounds = array<i64: 16, 1>}, {transform_indices = @transform_3, window_bounds = array<i64: 16, 1920>}]} {
    %c0 = arith.constant 0 : index
    %c0_0 = arith.constant 0 : index
    %0 = vector.load %arg2[%c0, %c0_0] : memref<16x16xf32, #tpu.memory_space<vmem>>, vector<16x16xf32>
    %c0_1 = arith.constant 0 : index
    %c0_2 = arith.constant 0 : index
    %1 = vector.load %arg1[%c0_1, %c0_2] : memref<16x1920xf32, #tpu.memory_space<vmem>>, vector<16x1920xf32>
    %cst = arith.constant dense<0.000000e+00> : vector<16x1920xf32>
    %2 = tpu.matmul %0, %1, %cst {dimension_numbers = #tpu.dot_dimension_numbers<[1], [0], [0], [1], [0, 0, 1, 1], [], []>} : vector<16x16xf32>, vector<16x1920xf32>, vector<16x1920xf32> -> vector<16x1920xf32>
    %c0_3 = arith.constant 0 : index
    %c0_4 = arith.constant 0 : index
    %3 = vector.load %arg3[%c0_3, %c0_4] : memref<16x1xf32, #tpu.memory_space<vmem>>, vector<16x1xf32>
    %4 = vector.broadcast %3 : vector<16x1xf32> to vector<16x1920xf32>
    %5 = arith.addf %2, %4 : vector<16x1920xf32>
    %c0_5 = arith.constant 0 : index
    %c0_6 = arith.constant 0 : index
    %6 = vector.load %arg4[%c0_5, %c0_6] : memref<16x1920xf32, #tpu.memory_space<vmem>>, vector<16x1920xf32>
    tpu.vector_store %arg4[%c0_5, %c0_6], %5 {strides = array<i32>} : memref<16x1920xf32, #tpu.memory_space<vmem>>, vector<16x1920xf32>,
    return
  }
  func.func @transform_0(%arg0: i32) -> (i32, i32) {
    %c0_i32 = arith.constant 0 : i32
    %c0_i32_0 = arith.constant 0 : i32
    return %c0_i32, %arg0 : i32, i32
  }
  func.func @transform_1(%arg0: i32) -> (i32, i32) {
    %c0_i32 = arith.constant 0 : i32
    %c0_i32_0 = arith.constant 0 : i32
    %c0_i32_1 = arith.constant 0 : i32
    return %c0_i32, %c0_i32_0 : i32, i32
  }
  func.func @transform_2(%arg0: i32) -> (i32, i32) {
    %c0_i32 = arith.constant 0 : i32
    %c0_i32_0 = arith.constant 0 : i32
    %c0_i32_1 = arith.constant 0 : i32
    return %c0_i32, %c0_i32_0 : i32, i32
  }
  func.func @transform_3(%arg0: i32) -> (i32, i32) {
    %c0_i32 = arith.constant 0 : i32
    %c0_i32_0 = arith.constant 0 : i32
    return %c0_i32, %arg0 : i32, i32
  }
}

module attributes {stable_mosaic.version = 11 : i64} {
  func.func @kernel(%arg0: i32, %arg1: memref<80x384xf32, #tpu.memory_space<vmem>>, %arg2: memref<1x80xf32, #tpu.memory_space<vmem>>, %arg3: memref<1x1xf32, #tpu.memory_space<vmem>>, %arg4: memref<1x384xf32, #tpu.memory_space<vmem>>) attributes {dimension_semantics = [#tpu.dimension_semantics<parallel>], iteration_bounds = array<i64: 1>, scalar_prefetch = 0 : i64, scratch_operands = 0 : i64, tpu.core_type = #tpu.core_type<tc>, window_params = [{transform_indices = @transform_0, window_bounds = array<i64: 80, 384>}, {pipeline_mode = #tpu.pipeline_mode<synchronous>, transform_indices = @transform_1, window_bounds = array<i64: 1, 80>}, {pipeline_mode = #tpu.pipeline_mode<synchronous>, transform_indices = @transform_2, window_bounds = array<i64: 1, 1>}, {transform_indices = @transform_3, window_bounds = array<i64: 1, 384>}]} {
    %c0 = arith.constant 0 : index
    %c0_0 = arith.constant 0 : index
    %0 = vector.load %arg2[%c0, %c0_0] : memref<1x80xf32, #tpu.memory_space<vmem>>, vector<1x80xf32>
    %c0_1 = arith.constant 0 : index
    %c0_2 = arith.constant 0 : index
    %1 = vector.load %arg1[%c0_1, %c0_2] : memref<80x384xf32, #tpu.memory_space<vmem>>, vector<80x384xf32>
    %cst = arith.constant dense<0.000000e+00> : vector<1x384xf32>
    %2 = tpu.matmul %0, %1, %cst {dimension_numbers = #tpu.dot_dimension_numbers<[1], [0], [0], [1], [0, 0, 1, 1], [], []>} : vector<1x80xf32>, vector<80x384xf32>, vector<1x384xf32> -> vector<1x384xf32>
    %c0_3 = arith.constant 0 : index
    %c0_4 = arith.constant 0 : index
    %3 = vector.load %arg3[%c0_3, %c0_4] : memref<1x1xf32, #tpu.memory_space<vmem>>, vector<1x1xf32>
    %4 = vector.broadcast %3 : vector<1x1xf32> to vector<1x384xf32>
    %5 = arith.addf %2, %4 : vector<1x384xf32>
    %c0_5 = arith.constant 0 : index
    %c0_6 = arith.constant 0 : index
    %6 = vector.load %arg4[%c0_5, %c0_6] : memref<1x384xf32, #tpu.memory_space<vmem>>, vector<1x384xf32>
    tpu.vector_store %arg4[%c0_5, %c0_6], %5 {strides = array<i32>} : memref<1x384xf32, #tpu.memory_space<vmem>>, vector<1x384xf32>,
    return
  }
  func.func @transform_0(%arg0: i32) -> (i32, i32) {
    %c0_i32 = arith.constant 0 : i32
    %c0_i32_0 = arith.constant 0 : i32
    return %c0_i32, %arg0 : i32, i32
  }
  func.func @transform_1(%arg0: i32) -> (i32, i32) {
    %c0_i32 = arith.constant 0 : i32
    %c0_i32_0 = arith.constant 0 : i32
    %c0_i32_1 = arith.constant 0 : i32
    return %c0_i32, %c0_i32_0 : i32, i32
  }
  func.func @transform_2(%arg0: i32) -> (i32, i32) {
    %c0_i32 = arith.constant 0 : i32
    %c0_i32_0 = arith.constant 0 : i32
    %c0_i32_1 = arith.constant 0 : i32
    return %c0_i32, %c0_i32_0 : i32, i32
  }
  func.func @transform_3(%arg0: i32) -> (i32, i32) {
    %c0_i32 = arith.constant 0 : i32
    %c0_i32_0 = arith.constant 0 : i32
    return %c0_i32, %arg0 : i32, i32
  }
}

</mosaic_0001>

<bundles_post_ra>
// kernel: _lambda_.12
= control target key start
LH: loop header
LB: loop body
LE: loop exit
PB: predicated region body
PF: predicated region fallthrough
CT: control target
= control target key end

     0   :  { %8 = vsyncpa [#allocation3], 0  ;;  %s1223_s0 = inlined_call_operand.vmem [shape: f32[6,1920], index: 0, kind: input, shape index: {}]   ;;  %s1224_s1 = inlined_call_operand.hbm [shape: f32[16,6], index: 1, kind: input, shape index: {}]   ;;  %s1225_s2 = inlined_call_operand.hbm [shape: f32[16,1], index: 2, kind: input, shape index: {}]   ;;  %s1226_s3 = inlined_call_operand.vmem [shape: f32[16,1920], index: 3, kind: output, shape index: {}]  }
   0x1   :  { %9 = vsyncpa [#allocation5], 0  ;;  %s958_s12 = smov [#allocation2]   ;;  %s910_s16 = scalar_lea.hbm %s1224_s1, 256 }
   0x2   :  { %s17_s13 = sshll.u32 %s958_s12, 4  ;;  %p911_p0 = scmp.ne.s32.totalorder %s1224_s1, %s910_s16  ;;  %s18_s13 = int_to_ptr.vmem [resolvable:$true] %s17_s13 }
   0x3   :  { %p914_p1 = scmp.lt.u32.totalorder %s910_s16, %s1224_s1 }
   0x5   :  { %p916_p2 = pnand %p914_p1, %p911_p0 }
   0x7   :  { %919 = shalt.err (!%p916_p2)
}
   0x8   :  { %s920_s21 = scalar_lea.vmem %s18_s13, 256  ;;  %p925_p4 = scmp.lt.s32.totalorder %s18_s13, %s18_s13 }
   0x9   :  { %p921_p3 = scmp.ne.s32.totalorder %s18_s13, %s920_s21  ;;  %p926_p5 = scmp.lt.s32.totalorder %s920_s21, %s920_s21 }
   0xb   :  { %p927_p6 = por %p926_p5, %p925_p4 }
   0xd   :  { %p928_p7 = pnand %p927_p6, %p921_p3 }
   0xf   :  { %931 = shalt.err (!%p928_p7)
}
  0x10   :  { %s959_s22 = smov 128   ;;  %s960_s23 = smov 8  }
  0x11   :  { %23 = dma.hbm_to_vmem [thread:$0]  %s1224_s1, 256, %s18_s13, [#allocation3], %s959_s22, %s959_s22, %s960_s23  }
  0x12   :  { %s961_s26 = smov [#allocation4]   ;;  %s932_s30 = scalar_lea.hbm %s1225_s2, 256 }
  0x13   :  { %s29_s27 = sshll.u32 %s961_s26, 4  ;;  %p933_p8 = scmp.ne.s32.totalorder %s1225_s2, %s932_s30  ;;  %s30_s27 = int_to_ptr.vmem [resolvable:$true] %s29_s27 }
  0x14   :  { %p936_p9 = scmp.lt.u32.totalorder %s932_s30, %s1225_s2 }
  0x16   :  { %p938_p10 = pnand %p936_p9, %p933_p8 }
  0x18   :  { %941 = shalt.err (!%p938_p10)
}
  0x19   :  { %s942_s8 = scalar_lea.vmem %s30_s27, 256  ;;  %p947_p12 = scmp.lt.s32.totalorder %s30_s27, %s30_s27 }
  0x1a   :  { %p943_p11 = scmp.ne.s32.totalorder %s30_s27, %s942_s8  ;;  %p948_p13 = scmp.lt.s32.totalorder %s942_s8, %s942_s8 }
  0x1c   :  { %p949_p0 = por %p948_p13, %p947_p12 }
  0x1e   :  { %p950_p1 = pnand %p949_p0, %p943_p11 }
  0x20   :  { %953 = shalt.err (!%p950_p1)
}
  0x21   :  { %35 = dma.hbm_to_vmem [thread:$0]  %s1225_s2, 256, %s30_s27, [#allocation5], %s959_s22, %s959_s22, %s960_s23  }
  0x22   :  { %954 = dma.done.wait [#allocation3], 256  }
  0x23   :  { %955 = vsyncadd [#allocation3], 4294967040 }
  0x24   :  { %956 = dma.done.wait [#allocation5], 256  }
  0x25   :  { %957 = vsyncadd [#allocation5], 4294967040  ;;  %v962_v0 = vmov 0.0   ;;  %v963_v1 = vmov 0   ;;  %vm78_vm0 = vcmask 1045504   ;;  %vm71_vm1 = vcmask 48128  }
  0x26   :  { %188 = vmatprep.mubr.f32.mxu0 %v962_v0  ;;  %265 = vmatprep.mubr.f32.mxu1 %v962_v0  ;;  %v45_v2 = vld [vmem:[%s1223_s0 + $0x8] sm:$0x3f]  ;;  %v47_v3 = vld [vmem:[%s1223_s0 + $0x18] sm:$0x3f]  ;;  %v44_v4 = vld [vmem:[%s1223_s0] sm:$0x3f] }
  0x27   :  { %909 = vset.pattern.permute.xlu0 %v963_v1  ;;  %864 = vmatprep.subr.msk.mxu0 %vm78_vm0, %v45_v2  ;;  %v46_v5 = vld [vmem:[%s1223_s0 + $0x10] sm:$0x3f]  ;;  %v42_v6 = vld [vmem:[#allocation2] sm:$0xff]  ;;  %v49_v7 = vld [vmem:[%s1223_s0 + $0x28] sm:$0x3f] }
  0x28   :  { %868 = vmatprep.subr.msk.mxu1 %vm78_vm0, %v47_v3  ;;  %865 = vmatpush1.msk.msra.mxu0 %vm78_vm0, %v44_v4  ;;  %v48_v8 = vld [vmem:[%s1223_s0 + $0x20] sm:$0x3f]  ;;  %v51_v9 = vld [vmem:[%s1223_s0 + $0x38] sm:$0x3f]  ;;  %v53_v10 = vld [vmem:[%s1223_s0 + $0x48] sm:$0x3f] }
  0x29   :  { %869 = vmatpush1.msk.msra.mxu1 %vm78_vm0, %v46_v5  ;;  %866 = vmatmul.mubr.msk.f32.vlgmr.msra.gmra.mrb[0].mxu0 %vm71_vm1, %v42_v6  ;;  %v43_v11 = vld [vmem:[#allocation2 + $0x8] sm:$0xff]  ;;  %v50_v12 = vld [vmem:[%s1223_s0 + $0x30] sm:$0x3f]  ;;  %v55_v13 = vld [vmem:[%s1223_s0 + $0x58] sm:$0x3f] }
  0x2a   :  { %870 = vmatmul.mubr.msk.f32.vlgmr.msra.gmra.mrb[0].mxu1 %vm71_vm1, %v42_v6  ;;  %872 = vmatprep.subr.msk.mxu0 %vm78_vm0, %v49_v7  ;;  %v59_v14 = vld [vmem:[#allocation4] sm:$0xff]  ;;  %v52_v15 = vld [vmem:[%s1223_s0 + $0x40] sm:$0x3f]  ;;  %v57_v17 = vld [vmem:[%s1223_s0 + $0x68] sm:$0x3f] }
  0x2b   :  { %194 = vmatprep.mubr.f32.mxu0 %v962_v0  ;;  %873 = vmatpush1.msk.msra.mxu0 %vm78_vm0, %v48_v8  ;;  %v54_v16 = vld [vmem:[%s1223_s0 + $0x50] sm:$0x3f]  ;;  %v60_v19 = vld [vmem:[#allocation4 + $0x8] sm:$0xff]  ;;  %v56_v20 = vld [vmem:[%s1223_s0 + $0x60] sm:$0x3f] }
  0x2c   :  { %271 = vmatprep.mubr.f32.mxu1 %v962_v0  ;;  %876 = vmatprep.subr.msk.mxu1 %vm78_vm0, %v51_v9  ;;  %v58_v18 = vld [vmem:[%s1223_s0 + $0x70] sm:$0x3f] }
  0x2d   :  { %880 = vmatprep.subr.msk.mxu0 %vm78_vm0, %v53_v10  ;;  %867 = vmatmul.mubr.msk.f32.gmra.mrb[2].mxu0 %vm71_vm1, %v43_v11 }
  0x2e   :  { %871 = vmatmul.mubr.msk.f32.gmra.mrb[2].mxu1 %vm71_vm1, %v43_v11  ;;  %342 = vmatprep.mubr.f32.mxu0 %v962_v0 }
  0x2f   :  { %877 = vmatpush1.msk.msra.mxu1 %vm78_vm0, %v50_v12  ;;  %419 = vmatprep.mubr.f32.mxu1 %v962_v0 }
  0x30   :  { %884 = vmatprep.subr.msk.mxu1 %vm78_vm0, %v55_v13  ;;  %63 = vperm.xlu0 %909, %v59_v14  }
  0x31   :  { %874 = vmatmul.mubr.msk.f32.vlgmr.msra.gmra.mrb[4].mxu0 %vm71_vm1, %v42_v6 }
  0x32   :  { %878 = vmatmul.mubr.msk.f32.vlgmr.msra.gmra.mrb[4].mxu1 %vm71_vm1, %v42_v6  ;;  %881 = vmatpush1.msk.msra.mxu0 %vm78_vm0, %v52_v15 }
  0x33   :  { %348 = vmatprep.mubr.f32.mxu0 %v962_v0  ;;  %425 = vmatprep.mubr.f32.mxu1 %v962_v0 }
  0x34   :  { %885 = vmatpush1.msk.msra.mxu1 %vm78_vm0, %v54_v16  ;;  %888 = vmatprep.subr.msk.mxu0 %vm78_vm0, %v57_v17 }
  0x35   :  { %898 = vmatprep.subr.msk.mxu1 %vm78_vm0, %v58_v18  ;;  %875 = vmatmul.mubr.msk.f32.gmra.mrb[6].mxu0 %vm71_vm1, %v43_v11 }
  0x36   :  { %879 = vmatmul.mubr.msk.f32.gmra.mrb[6].mxu1 %vm71_vm1, %v43_v11  ;;  %496 = vmatprep.mubr.f32.mxu0 %v962_v0 }
  0x37   :  { %573 = vmatprep.mubr.f32.mxu1 %v962_v0  ;;  %68 = vperm.xlu0 %909, %v60_v19  }
  0x39   :  { %882 = vmatmul.mubr.msk.f32.vlgmr.msra.gmra.mrb[8].mxu0 %vm71_vm1, %v42_v6 }
  0x3a   :  { %886 = vmatmul.mubr.msk.f32.vlgmr.msra.gmra.mrb[8].mxu1 %vm71_vm1, %v42_v6  ;;  %889 = vmatpush1.msk.msra.mxu0 %vm78_vm0, %v56_v20 }
  0x3b   :  { %502 = vmatprep.mubr.f32.mxu0 %v962_v0  ;;  %579 = vmatprep.mubr.f32.mxu1 %v962_v0 }
  0x3c   :  { %899 = vmatpush3.msk.msra.mxu1 %vm78_vm0, %v58_v18 }
  0x3d   :  { %883 = vmatmul.mubr.msk.f32.gmra.mrb[10].mxu0 %vm71_vm1, %v43_v11 }
  0x3e   :  { %887 = vmatmul.mubr.msk.f32.gmra.mrb[10].mxu1 %vm71_vm1, %v43_v11  ;;  %650 = vmatprep.mubr.f32.mxu0 %v962_v0 }
  0x3f   :  { %900 = vmatprep.mubr.msk.f32.mxu1 %vm71_vm1, %v42_v6 }
  0x41   :  { %890 = vmatmul.mubr.msk.f32.vlgmr.msra.gmra.mrb[12].mxu0 %vm71_vm1, %v42_v6 }
  0x42   :  { %901 = vmatmul.mubr.msk.f32.vlgmr.msra.gmra.mrb[12].mxu1 %vm71_vm1, %v43_v11  ;;  %656 = vmatprep.mubr.f32.mxu0 %v962_v0 }
  0x45   :  { %891 = vmatmul.mubr.msk.f32.gmra.mrb[14].mxu0 %vm71_vm1, %v43_v11 }
  0xaf   :  { %v1099_v21 = vpop.permute.xlu0 %63 }
  0xb6   :  { %v1105_v32 = vpop.permute.xlu0 %68 }
  0xfc   :  { %v190_v22 = vpop.f32.mrb[0].mxu0 }
  0xfd   :  { %v267_v23 = vpop.f32.mrb[0].mxu1  ;;  %v191_v24 = vadd.f32 %v190_v22, %v1099_v21  ;;  %v192_v25 = vpop.f32.mrb[1].mxu0 }
  0xfe   :  { %v268_v26 = vadd.f32 %v267_v23, %v1099_v21  ;;  %v269_v27 = vpop.f32.mrb[1].mxu1  ;;  %v193_v28 = vadd.f32 %v192_v25, %v1099_v21 }
  0xff   :  { %v270_v29 = vadd.f32 %v269_v27, %v1099_v21  ;;  %vm738_vm2 = vcmp.gt.f32.partialorder %v191_v24, 0.0  ;;  %v768_v30 = vmul.f32 0.01, %v191_v24 }
 0x100   :  { %vm740_vm3 = vcmp.gt.f32.partialorder %v268_v26, 0.0  ;;  %v770_v31 = vmul.f32 0.01, %v268_v26  ;;  %vm739_vm4 = vcmp.gt.f32.partialorder %v193_v28, 0.0  ;;  %v769_v33 = vmul.f32 0.01, %v193_v28 }
 0x101   :  { %vm741_vm5 = vcmp.gt.f32.partialorder %v270_v29, 0.0  ;;  %v771_v34 = vmul.f32 0.01, %v270_v29  ;;  %v798_v35 = vsel %vm738_vm2, %v191_v24, %v768_v30  ;;  %v196_v37 = vpop.f32.mrb[2].mxu0  ;;  %v273_v38 = vpop.f32.mrb[2].mxu1 }
 0x102   :  { %v800_v36 = vsel %vm740_vm3, %v268_v26, %v770_v31  ;;  %828 = vst [vmem:[%s1226_s3] sm:$0xff] %v798_v35  ;;  %v799_v39 = vsel %vm739_vm4, %v193_v28, %v769_v33  ;;  %v197_v41 = vadd.f32 %v196_v37, %v1105_v32  ;;  %v198_v42 = vpop.f32.mrb[3].mxu0  ;;  %v274_v43 = vadd.f32 %v273_v38, %v1105_v32  ;;  %v275_v44 = vpop.f32.mrb[3].mxu1 }
 0x103   :  { %830 = vst [vmem:[%s1226_s3 + $0x10] sm:$0xff] %v800_v36  ;;  %v801_v40 = vsel %vm741_vm5, %v270_v29, %v771_v34  ;;  %829 = vst [vmem:[%s1226_s3 + $0x8] sm:$0xff] %v799_v39  ;;  %v199_v45 = vadd.f32 %v198_v42, %v1105_v32  ;;  %v276_v46 = vadd.f32 %v275_v44, %v1105_v32 }
 0x104   :  { %831 = vst [vmem:[%s1226_s3 + $0x18] sm:$0xff] %v801_v40  ;;  %vm753_vm6 = vcmp.gt.f32.partialorder %v197_v41, 0.0  ;;  %v783_v47 = vmul.f32 0.01, %v197_v41  ;;  %vm755_vm7 = vcmp.gt.f32.partialorder %v274_v43, 0.0  ;;  %v344_v53 = vpop.f32.mrb[4].mxu0 }
 0x105   :  { %v785_v48 = vmul.f32 0.01, %v274_v43  ;;  %vm754_vm8 = vcmp.gt.f32.partialorder %v199_v45, 0.0  ;;  %v784_v49 = vmul.f32 0.01, %v199_v45  ;;  %vm756_vm9 = vcmp.gt.f32.partialorder %v276_v46, 0.0 }
 0x106   :  { %v786_v50 = vmul.f32 0.01, %v276_v46  ;;  %v813_v51 = vsel %vm753_vm6, %v197_v41, %v783_v47  ;;  %v421_v54 = vpop.f32.mrb[4].mxu1  ;;  %v345_v57 = vadd.f32 %v344_v53, %v1099_v21  ;;  %v346_v58 = vpop.f32.mrb[5].mxu0 }
 0x107   :  { %v815_v52 = vsel %vm755_vm7, %v274_v43, %v785_v48  ;;  %843 = vst [vmem:[%s1226_s3 + $0x78] sm:$0xff] %v813_v51  ;;  %v814_v55 = vsel %vm754_vm8, %v199_v45, %v784_v49  ;;  %v422_v59 = vadd.f32 %v421_v54, %v1099_v21  ;;  %v423_v60 = vpop.f32.mrb[5].mxu1  ;;  %v347_v61 = vadd.f32 %v346_v58, %v1099_v21 }
 0x108   :  { %845 = vst [vmem:[%s1226_s3 + $0x88] sm:$0xff] %v815_v52  ;;  %v816_v56 = vsel %vm756_vm9, %v276_v46, %v786_v50  ;;  %844 = vst [vmem:[%s1226_s3 + $0x80] sm:$0xff] %v814_v55  ;;  %v424_v62 = vadd.f32 %v423_v60, %v1099_v21  ;;  %v350_v63 = vpop.f32.mrb[6].mxu0  ;;  %vm742_vm10 = vcmp.gt.f32.partialorder %v345_v57, 0.0  ;;  %v772_v1 = vmul.f32 0.01, %v345_v57 }
 0x109   :  { %846 = vst [vmem:[%s1226_s3 + $0x90] sm:$0xff] %v816_v56  ;;  %v427_v0 = vpop.f32.mrb[6].mxu1  ;;  %vm744_vm11 = vcmp.gt.f32.partialorder %v422_v59, 0.0  ;;  %v774_v2 = vmul.f32 0.01, %v422_v59  ;;  %vm743_vm12 = vcmp.gt.f32.partialorder %v347_v61, 0.0  ;;  %v351_v7 = vadd.f32 %v350_v63, %v1105_v32 }
 0x10a   :  { %v773_v3 = vmul.f32 0.01, %v347_v61  ;;  %vm745_vm13 = vcmp.gt.f32.partialorder %v424_v62, 0.0  ;;  %v775_v4 = vmul.f32 0.01, %v424_v62  ;;  %v802_v5 = vsel %vm742_vm10, %v345_v57, %v772_v1  ;;  %v352_v8 = vpop.f32.mrb[7].mxu0 }
 0x10b   :  { %v804_v6 = vsel %vm744_vm11, %v422_v59, %v774_v2  ;;  %v428_v9 = vadd.f32 %v427_v0, %v1105_v32  ;;  %v429_v10 = vpop.f32.mrb[7].mxu1  ;;  %832 = vst [vmem:[%s1226_s3 + $0x20] sm:$0xff] %v802_v5  ;;  %v353_v13 = vadd.f32 %v352_v8, %v1105_v32  ;;  %vm757_vm14 = vcmp.gt.f32.partialorder %v351_v7, 0.0 }
 0x10c   :  { %v803_v11 = vsel %vm743_vm12, %v347_v61, %v773_v3  ;;  %834 = vst [vmem:[%s1226_s3 + $0x30] sm:$0xff] %v804_v6  ;;  %v805_v12 = vsel %vm745_vm13, %v424_v62, %v775_v4  ;;  %v430_v14 = vadd.f32 %v429_v10, %v1105_v32  ;;  %v498_v15 = vpop.f32.mrb[8].mxu0  ;;  %v787_v17 = vmul.f32 0.01, %v351_v7 }
 0x10d   :  { %v575_v16 = vpop.f32.mrb[8].mxu1  ;;  %833 = vst [vmem:[%s1226_s3 + $0x28] sm:$0xff] %v803_v11  ;;  %835 = vst [vmem:[%s1226_s3 + $0x38] sm:$0xff] %v805_v12  ;;  %vm759_vm15 = vcmp.gt.f32.partialorder %v428_v9, 0.0  ;;  %v789_v18 = vmul.f32 0.01, %v428_v9  ;;  %v499_v24 = vadd.f32 %v498_v15, %v1099_v21 }
 0x10e   :  { %vm758_vm0 = vcmp.gt.f32.partialorder %v353_v13, 0.0  ;;  %v788_v19 = vmul.f32 0.01, %v353_v13  ;;  %vm760_vm1 = vcmp.gt.f32.partialorder %v430_v14, 0.0  ;;  %v790_v20 = vmul.f32 0.01, %v430_v14 }
 0x10f   :  { %v817_v22 = vsel %vm757_vm14, %v351_v7, %v787_v17  ;;  %v819_v23 = vsel %vm759_vm15, %v428_v9, %v789_v18  ;;  %v500_v25 = vpop.f32.mrb[9].mxu0  ;;  %v576_v26 = vadd.f32 %v575_v16, %v1099_v21  ;;  %v577_v27 = vpop.f32.mrb[9].mxu1  ;;  %vm746_vm2 = vcmp.gt.f32.partialorder %v499_v24, 0.0 }
 0x110   :  { %847 = vst [vmem:[%s1226_s3 + $0x98] sm:$0xff] %v817_v22  ;;  %v818_v28 = vsel %vm758_vm0, %v353_v13, %v788_v19  ;;  %849 = vst [vmem:[%s1226_s3 + $0xa8] sm:$0xff] %v819_v23  ;;  %v820_v29 = vsel %vm760_vm1, %v430_v14, %v790_v20  ;;  %v501_v30 = vadd.f32 %v500_v25, %v1099_v21  ;;  %v504_v33 = vpop.f32.mrb[10].mxu0  ;;  %v776_v35 = vmul.f32 0.01, %v499_v24 }
 0x111   :  { %v578_v31 = vadd.f32 %v577_v27, %v1099_v21  ;;  %v581_v34 = vpop.f32.mrb[10].mxu1  ;;  %848 = vst [vmem:[%s1226_s3 + $0xa0] sm:$0xff] %v818_v28  ;;  %850 = vst [vmem:[%s1226_s3 + $0xb0] sm:$0xff] %v820_v29  ;;  %vm748_vm3 = vcmp.gt.f32.partialorder %v576_v26, 0.0  ;;  %v778_v36 = vmul.f32 0.01, %v576_v26  ;;  %v505_v41 = vadd.f32 %v504_v33, %v1105_v32 }
 0x112   :  { %vm747_vm4 = vcmp.gt.f32.partialorder %v501_v30, 0.0  ;;  %v777_v37 = vmul.f32 0.01, %v501_v30  ;;  %v806_v39 = vsel %vm746_vm2, %v499_v24, %v776_v35  ;;  %v506_v42 = vpop.f32.mrb[11].mxu0  ;;  %v582_v43 = vadd.f32 %v581_v34, %v1105_v32  ;;  %v583_v44 = vpop.f32.mrb[11].mxu1 }
 0x113   :  { %vm749_vm5 = vcmp.gt.f32.partialorder %v578_v31, 0.0  ;;  %v779_v38 = vmul.f32 0.01, %v578_v31  ;;  %v808_v40 = vsel %vm748_vm3, %v576_v26, %v778_v36  ;;  %836 = vst [vmem:[%s1226_s3 + $0x40] sm:$0xff] %v806_v39  ;;  %v507_v47 = vadd.f32 %v506_v42, %v1105_v32 }
 0x114   :  { %v807_v45 = vsel %vm747_vm4, %v501_v30, %v777_v37  ;;  %838 = vst [vmem:[%s1226_s3 + $0x50] sm:$0xff] %v808_v40  ;;  %v584_v48 = vadd.f32 %v583_v44, %v1105_v32  ;;  %v652_v49 = vpop.f32.mrb[12].mxu0  ;;  %vm761_vm6 = vcmp.gt.f32.partialorder %v505_v41, 0.0  ;;  %v791_v51 = vmul.f32 0.01, %v505_v41 }
 0x115   :  { %v809_v46 = vsel %vm749_vm5, %v578_v31, %v779_v38  ;;  %v902_v50 = vpop.f32.mrb[12].mxu1  ;;  %837 = vst [vmem:[%s1226_s3 + $0x48] sm:$0xff] %v807_v45  ;;  %vm763_vm7 = vcmp.gt.f32.partialorder %v582_v43, 0.0  ;;  %v793_v52 = vmul.f32 0.01, %v582_v43  ;;  %vm762_vm8 = vcmp.gt.f32.partialorder %v507_v47, 0.0 }
 0x116   :  { %839 = vst [vmem:[%s1226_s3 + $0x58] sm:$0xff] %v809_v46  ;;  %v792_v53 = vmul.f32 0.01, %v507_v47  ;;  %vm764_vm9 = vcmp.gt.f32.partialorder %v584_v48, 0.0  ;;  %v794_v54 = vmul.f32 0.01, %v584_v48  ;;  %v821_v55 = vsel %vm761_vm6, %v505_v41, %v791_v51 }
 0x117   :  { %v823_v56 = vsel %vm763_vm7, %v582_v43, %v793_v52  ;;  %v653_v57 = vadd.f32 %v652_v49, %v1099_v21  ;;  %v735_v58 = vadd.f32 %v902_v50, %v1105_v32  ;;  %v654_v59 = vpop.f32.mrb[13].mxu0  ;;  %v729_v60 = vpop.f32.mrb[13].mxu1  ;;  %851 = vst [vmem:[%s1226_s3 + $0xb8] sm:$0xff] %v821_v55 }
 0x118   :  { %v822_v61 = vsel %vm762_vm8, %v507_v47, %v792_v53  ;;  %853 = vst [vmem:[%s1226_s3 + $0xc8] sm:$0xff] %v823_v56  ;;  %v824_v62 = vsel %vm764_vm9, %v584_v48, %v794_v54  ;;  %v655_v63 = vadd.f32 %v654_v59, %v1099_v21  ;;  %v730_v0 = vadd.f32 %v729_v60, %v1099_v21  ;;  %v658_v1 = vpop.f32.mrb[14].mxu0 }
 0x119   :  { %852 = vst [vmem:[%s1226_s3 + $0xc0] sm:$0xff] %v822_v61  ;;  %854 = vst [vmem:[%s1226_s3 + $0xd0] sm:$0xff] %v824_v62  ;;  %vm750_vm10 = vcmp.gt.f32.partialorder %v653_v57, 0.0  ;;  %v780_v2 = vmul.f32 0.01, %v653_v57  ;;  %vm767_vm11 = vcmp.gt.f32.partialorder %v735_v58, 0.0  ;;  %v659_v21 = vadd.f32 %v658_v1, %v1105_v32 }
 0x11a   :  { %v797_v3 = vmul.f32 0.01, %v735_v58  ;;  %vm751_vm12 = vcmp.gt.f32.partialorder %v655_v63, 0.0  ;;  %v781_v4 = vmul.f32 0.01, %v655_v63  ;;  %vm752_vm13 = vcmp.gt.f32.partialorder %v730_v0, 0.0 }
 0x11b   :  { %v782_v5 = vmul.f32 0.01, %v730_v0  ;;  %v810_v6 = vsel %vm750_vm10, %v653_v57, %v780_v2  ;;  %v660_v8 = vpop.f32.mrb[15].mxu0  ;;  %vm765_vm14 = vcmp.gt.f32.partialorder %v659_v21, 0.0  ;;  %v795_v12 = vmul.f32 0.01, %v659_v21 }
 0x11c   :  { %v827_v7 = vsel %vm767_vm11, %v735_v58, %v797_v3  ;;  %840 = vst [vmem:[%s1226_s3 + $0x60] sm:$0xff] %v810_v6  ;;  %v811_v9 = vsel %vm751_vm12, %v655_v63, %v781_v4  ;;  %v661_v11 = vadd.f32 %v660_v8, %v1105_v32 }
 0x11d   :  { %857 = vst [vmem:[%s1226_s3 + $0xe8] sm:$0xff] %v827_v7  ;;  %v812_v10 = vsel %vm752_vm13, %v730_v0, %v782_v5  ;;  %841 = vst [vmem:[%s1226_s3 + $0x68] sm:$0xff] %v811_v9  ;;  %v825_v14 = vsel %vm765_vm14, %v659_v21, %v795_v12 }
 0x11e   :  { %842 = vst [vmem:[%s1226_s3 + $0x70] sm:$0xff] %v812_v10  ;;  %vm766_vm15 = vcmp.gt.f32.partialorder %v661_v11, 0.0  ;;  %v796_v13 = vmul.f32 0.01, %v661_v11  ;;  %855 = vst [vmem:[%s1226_s3 + $0xd8] sm:$0xff] %v825_v14 }
 0x120   :  { %v826_v15 = vsel %vm766_vm15, %v661_v11, %v796_v13 }
 0x121   :  { %856 = vst [vmem:[%s1226_s3 + $0xe0] sm:$0xff] %v826_v15 }
 0x122   :  { %862 = vsyncpa [#allocation3], 1 }
 0x123   :  { %863 = vsyncpa [#allocation5], 1 }

// kernel: _lambda_.13
= control target key start
LH: loop header
LB: loop body
LE: loop exit
PB: predicated region body
PF: predicated region fallthrough
CT: control target
= control target key end

     0   :  { %v1108_v3 = vmov 0.0   ;;  %v1109_v6 = vmov 0   ;;  %vm86_vm0 = vcmask 130048   ;;  %s1778_s0 = inlined_call_operand.vmem [shape: f32[16,1920], index: 0, kind: input, shape index: {}]   ;;  %s1779_s1 = inlined_call_operand.vmem [shape: f32[48,16], index: 1, kind: input, shape index: {}]   ;;  %s1780_s2 = inlined_call_operand.vmem [shape: f32[48,1], index: 2, kind: input, shape index: {}]   ;;  %s1781_s3 = inlined_call_operand.vmem [shape: f32[48,1920], index: 3, kind: output, shape index: {}]  }
   0x1   :  { %v21_v0 = vld [vmem:[%s1778_s0 + $0x8] sm:$0xff]  ;;  %v36_v1 = vld [vmem:[%s1778_s0 + $0x80] sm:$0xff]  ;;  %169 = vmatprep.mubr.f32.mxu0 %v1108_v3  ;;  %199 = vmatprep.mubr.f32.mxu1 %v1108_v3  ;;  %v35_v5 = vld [vmem:[%s1778_s0 + $0x78] sm:$0xff] }
   0x2   :  { %v20_v2 = vld [vmem:[%s1778_s0] sm:$0xff]  ;;  %v1070_v4 = vpack.c.bf16 %v36_v1, %v21_v0  ;;  %1107 = vset.pattern.permute.xlu1 %v1109_v6  ;;  %1106 = vset.pattern.permute.xlu0 %v1109_v6  ;;  %v23_v9 = vld [vmem:[%s1778_s0 + $0x18] sm:$0xff]  ;;  %v38_v10 = vld [vmem:[%s1778_s0 + $0x90] sm:$0xff] }
   0x3   :  { %v1072_v7 = vpack.c.bf16 %v35_v5, %v20_v2  ;;  %v1147_v8 = vld [vmem:[%s1779_s1] sm:$0xff]  ;;  %v25_v11 = vld [vmem:[%s1778_s0 + $0x28] sm:$0xff]  ;;  %v1074_v12 = vpack.c.bf16 %v38_v10, %v23_v9  ;;  %v22_v14 = vld [vmem:[%s1778_s0 + $0x10] sm:$0xff] }
   0x4   :  { %1071 = vmatprep.subr.bf16.mxu0 %v1070_v4  ;;  %1102 = vmatprep.subr.bf16.mxu1 %v1070_v4  ;;  %v40_v13 = vld [vmem:[%s1778_s0 + $0xa0] sm:$0xff]  ;;  %v37_v15 = vld [vmem:[%s1778_s0 + $0x88] sm:$0xff]  ;;  %v39_v20 = vld [vmem:[%s1778_s0 + $0x98] sm:$0xff] }
   0x5   :  { %1073 = vmatpush1.bf16.msra.mxu0 %v1072_v7  ;;  %1103 = vmatpush1.bf16.msra.mxu1 %v1072_v7  ;;  %v1170_v16 = vld [vmem:[%s1779_s1 + $0x28] sm:$0xff]  ;;  %v1078_v17 = vpack.c.bf16 %v40_v13, %v25_v11  ;;  %v1076_v18 = vpack.c.bf16 %v37_v15, %v22_v14  ;;  %v24_v19 = vld [vmem:[%s1778_s0 + $0x20] sm:$0xff]  ;;  %v27_v22 = vld [vmem:[%s1778_s0 + $0x38] sm:$0xff] }
   0x6   :  { %1075 = vmatprep.subr.bf16.mxu1 %v1074_v12  ;;  %v1080_v21 = vpack.c.bf16 %v39_v20, %v24_v19  ;;  %v42_v23 = vld [vmem:[%s1778_s0 + $0xb0] sm:$0xff]  ;;  %v41_v26 = vld [vmem:[%s1778_s0 + $0xa8] sm:$0xff]  ;;  %v44_v28 = vld [vmem:[%s1778_s0 + $0xc0] sm:$0xff] }
   0x7   :  { %1079 = vmatprep.subr.bf16.mxu0 %v1078_v17  ;;  %v1082_v24 = vpack.c.bf16 %v42_v23, %v27_v22  ;;  %v26_v25 = vld [vmem:[%s1778_s0 + $0x30] sm:$0xff]  ;;  %v29_v27 = vld [vmem:[%s1778_s0 + $0x48] sm:$0xff]  ;;  %v31_v31 = vld [vmem:[%s1778_s0 + $0x58] sm:$0xff] }
   0x8   :  { %1001 = vmatmul.mubr.msk.f32.vlgmr.msra.gmra.mrb[0].mxu0 %vm86_vm0, %v1147_v8  ;;  %1006 = vmatmul.mubr.msk.f32.vlgmr.msra.gmra.mrb[0].mxu1 %vm86_vm0, %v1170_v16  ;;  %v1203_v29 = vld [vmem:[%s1779_s1 + $0x8] sm:$0xff]  ;;  %v1086_v30 = vpack.c.bf16 %v44_v28, %v29_v27  ;;  %v1084_v32 = vpack.c.bf16 %v41_v26, %v26_v25  ;;  %v46_v33 = vld [vmem:[%s1778_s0 + $0xd0] sm:$0xff]  ;;  %v50_v37 = vld [vmem:[%s1780_s2] sm:$0xff] }
   0x9   :  { %1077 = vmatpush1.bf16.msra.mxu1 %v1076_v18  ;;  %1081 = vmatpush1.bf16.msra.mxu0 %v1080_v21  ;;  %v1090_v34 = vpack.c.bf16 %v46_v33, %v31_v31  ;;  %v1222_v35 = vld [vmem:[%s1779_s1 + $0x10] sm:$0xff]  ;;  %v53_v38 = vld [vmem:[%s1780_s2 + $0x18] sm:$0xff]  ;;  %v51_v39 = vld [vmem:[%s1780_s2 + $0x8] sm:$0xff] }
   0xa   :  { %175 = vmatprep.mubr.f32.mxu0 %v1108_v3  ;;  %270 = vmatprep.mubr.f32.mxu1 %v1108_v3  ;;  %v52_v36 = vld [vmem:[%s1780_s2 + $0x10] sm:$0xff]  ;;  %v1245_v40 = vld [vmem:[%s1779_s1 + $0x18] sm:$0xff]  ;;  %v55_v41 = vld [vmem:[%s1780_s2 + $0x28] sm:$0xff] }
   0xb   :  { %1083 = vmatprep.subr.bf16.mxu1 %v1082_v24  ;;  %1087 = vmatprep.subr.bf16.mxu0 %v1086_v30  ;;  %v54_v42 = vld [vmem:[%s1780_s2 + $0x20] sm:$0xff]  ;;  %v43_v45 = vld [vmem:[%s1778_s0 + $0xb8] sm:$0xff]  ;;  %v33_v46 = vld [vmem:[%s1778_s0 + $0x68] sm:$0xff] }
   0xc   :  { %1002 = vmatmul.mubr.msk.f32.gmra.mrb[2].mxu0 %vm86_vm0, %v1203_v29  ;;  %1007 = vmatmul.mubr.msk.f32.vlgmr.msra.gmra.mrb[2].mxu1 %vm86_vm0, %v1147_v8  ;;  %v1262_v43 = vld [vmem:[%s1779_s1 + $0x20] sm:$0xff]  ;;  %v30_v50 = vld [vmem:[%s1778_s0 + $0x50] sm:$0xff]  ;;  %v45_v51 = vld [vmem:[%s1778_s0 + $0xc8] sm:$0xff] }
   0xd   :  { %181 = vmatprep.mubr.f32.mxu0 %v1108_v3  ;;  %276 = vmatprep.mubr.f32.mxu1 %v1108_v3  ;;  %v28_v44 = vld [vmem:[%s1778_s0 + $0x40] sm:$0xff]  ;;  %v34_v52 = vld [vmem:[%s1778_s0 + $0x70] sm:$0xff]  ;;  %v49_v53 = vld [vmem:[%s1778_s0 + $0xe8] sm:$0xff]  ;;  %v1092_v54 = vpack.c.bf16 %v45_v51, %v30_v50 }
   0xe   :  { %1085 = vmatpush1.bf16.msra.mxu1 %v1084_v32  ;;  %68 = vperm.xlu1 %1107, %v52_v36   ;;  %v48_v47 = vld [vmem:[%s1778_s0 + $0xe0] sm:$0xff]  ;;  %v1088_v48 = vpack.c.bf16 %v43_v45, %v28_v44  ;;  %v1098_v55 = vpack.c.bf16 %v49_v53, %v34_v52  ;;  %v47_v57 = vld [vmem:[%s1778_s0 + $0xd8] sm:$0xff] }
   0xf   :  { %1091 = vmatprep.subr.bf16.mxu1 %v1090_v34  ;;  %58 = vperm.xlu0 %1106, %v50_v37   ;;  %v1094_v49 = vpack.c.bf16 %v48_v47, %v33_v46  ;;  %v32_v56 = vld [vmem:[%s1778_s0 + $0x60] sm:$0xff] }
  0x10   :  { %1003 = vmatmul.mubr.msk.f32.gmra.mrb[4].mxu0 %vm86_vm0, %v1222_v35  ;;  %1008 = vmatmul.mubr.msk.f32.gmra.mrb[4].mxu1 %vm86_vm0, %v1203_v29  ;;  %v1096_v58 = vpack.c.bf16 %v47_v57, %v32_v56 }
  0x11   :  { %187 = vmatprep.mubr.f32.mxu0 %v1108_v3  ;;  %282 = vmatprep.mubr.f32.mxu1 %v1108_v3 }
  0x12   :  { %73 = vperm.xlu1 %1107, %v53_v38  }
  0x13   :  { %63 = vperm.xlu0 %1106, %v51_v39  }
  0x14   :  { %1004 = vmatmul.mubr.msk.f32.gmra.mrb[6].mxu0 %vm86_vm0, %v1245_v40  ;;  %1009 = vmatmul.mubr.msk.f32.gmra.mrb[6].mxu1 %vm86_vm0, %v1222_v35 }
  0x15   :  { %193 = vmatprep.mubr.f32.mxu0 %v1108_v3  ;;  %288 = vmatprep.mubr.f32.mxu1 %v1108_v3 }
  0x16   :  { %83 = vperm.xlu1 %1107, %v55_v41  }
  0x17   :  { %78 = vperm.xlu0 %1106, %v54_v42  }
  0x18   :  { %1005 = vmatmul.mubr.msk.f32.gmra.mrb[8].mxu0 %vm86_vm0, %v1262_v43  ;;  %1010 = vmatmul.mubr.msk.f32.gmra.mrb[8].mxu1 %vm86_vm0, %v1245_v40 }
  0x19   :  { %294 = vmatprep.mubr.f32.mxu1 %v1108_v3  ;;  %371 = vmatprep.mubr.f32.mxu0 %v1108_v3 }
  0x1c   :  { %1011 = vmatmul.mubr.msk.f32.gmra.mrb[10].mxu1 %vm86_vm0, %v1262_v43  ;;  %1013 = vmatmul.mubr.msk.f32.vlgmr.msra.gmra.mrb[10].mxu0 %vm86_vm0, %v1147_v8 }
  0x1d   :  { %1089 = vmatpush1.bf16.msra.mxu0 %v1088_v48  ;;  %300 = vmatprep.mubr.f32.mxu1 %v1108_v3 }
  0x1e   :  { %377 = vmatprep.mubr.f32.mxu0 %v1108_v3  ;;  %1095 = vmatprep.subr.bf16.mxu0 %v1094_v49 }
  0x20   :  { %1012 = vmatmul.mubr.msk.f32.gmra.mrb[12].mxu1 %vm86_vm0, %v1170_v16  ;;  %1014 = vmatmul.mubr.msk.f32.gmra.mrb[12].mxu0 %vm86_vm0, %v1203_v29 }
  0x21   :  { %383 = vmatprep.mubr.f32.mxu0 %v1108_v3  ;;  %472 = vmatprep.mubr.f32.mxu1 %v1108_v3 }
  0x24   :  { %1015 = vmatmul.mubr.msk.f32.gmra.mrb[14].mxu0 %vm86_vm0, %v1222_v35  ;;  %1019 = vmatmul.mubr.msk.f32.vlgmr.msra.gmra.mrb[14].mxu1 %vm86_vm0, %v1147_v8 }
  0x25   :  { %389 = vmatprep.mubr.f32.mxu0 %v1108_v3  ;;  %478 = vmatprep.mubr.f32.mxu1 %v1108_v3 }
  0x26   :  { %1093 = vmatpush1.bf16.msra.mxu1 %v1092_v54 }
  0x27   :  { %1099 = vmatprep.subr.bf16.mxu1 %v1098_v55 }
  0x28   :  { %1016 = vmatmul.mubr.msk.f32.gmra.mrb[16].mxu0 %vm86_vm0, %v1245_v40  ;;  %1020 = vmatmul.mubr.msk.f32.gmra.mrb[16].mxu1 %vm86_vm0, %v1203_v29 }
  0x29   :  { %395 = vmatprep.mubr.f32.mxu0 %v1108_v3  ;;  %484 = vmatprep.mubr.f32.mxu1 %v1108_v3 }
  0x2c   :  { %1017 = vmatmul.mubr.msk.f32.gmra.mrb[18].mxu0 %vm86_vm0, %v1262_v43  ;;  %1021 = vmatmul.mubr.msk.f32.gmra.mrb[18].mxu1 %vm86_vm0, %v1222_v35 }
  0x2d   :  { %401 = vmatprep.mubr.f32.mxu0 %v1108_v3  ;;  %490 = vmatprep.mubr.f32.mxu1 %v1108_v3 }
  0x30   :  { %1018 = vmatmul.mubr.msk.f32.gmra.mrb[20].mxu0 %vm86_vm0, %v1170_v16  ;;  %1022 = vmatmul.mubr.msk.f32.gmra.mrb[20].mxu1 %vm86_vm0, %v1245_v40 }
  0x31   :  { %496 = vmatprep.mubr.f32.mxu1 %v1108_v3  ;;  %573 = vmatprep.mubr.f32.mxu0 %v1108_v3 }
  0x34   :  { %1023 = vmatmul.mubr.msk.f32.gmra.mrb[22].mxu1 %vm86_vm0, %v1262_v43  ;;  %1025 = vmatmul.mubr.msk.f32.vlgmr.msra.gmra.mrb[22].mxu0 %vm86_vm0, %v1147_v8 }
  0x35   :  { %1097 = vmatpush1.bf16.msra.mxu0 %v1096_v58  ;;  %502 = vmatprep.mubr.f32.mxu1 %v1108_v3 }
  0x36   :  { %579 = vmatprep.mubr.f32.mxu0 %v1108_v3 }
  0x38   :  { %1024 = vmatmul.mubr.msk.f32.gmra.mrb[24].mxu1 %vm86_vm0, %v1170_v16  ;;  %1026 = vmatmul.mubr.msk.f32.gmra.mrb[24].mxu0 %vm86_vm0, %v1203_v29 }
  0x39   :  { %585 = vmatprep.mubr.f32.mxu0 %v1108_v3  ;;  %674 = vmatprep.mubr.f32.mxu1 %v1108_v3 }
  0x3c   :  { %1027 = vmatmul.mubr.msk.f32.gmra.mrb[26].mxu0 %vm86_vm0, %v1222_v35  ;;  %1031 = vmatmul.mubr.msk.f32.vlgmr.msra.gmra.mrb[26].mxu1 %vm86_vm0, %v1147_v8 }
  0x3d   :  { %591 = vmatprep.mubr.f32.mxu0 %v1108_v3  ;;  %680 = vmatprep.mubr.f32.mxu1 %v1108_v3 }
  0x3e   :  { %1101 = vmatpush3.bf16.msra.mxu1 %v1098_v55 }
  0x40   :  { %1028 = vmatmul.mubr.msk.f32.gmra.mrb[28].mxu0 %vm86_vm0, %v1245_v40  ;;  %1032 = vmatmul.mubr.msk.f32.gmra.mrb[28].mxu1 %vm86_vm0, %v1203_v29 }
  0x41   :  { %597 = vmatprep.mubr.f32.mxu0 %v1108_v3  ;;  %686 = vmatprep.mubr.f32.mxu1 %v1108_v3 }
  0x44   :  { %1029 = vmatmul.mubr.msk.f32.gmra.mrb[30].mxu0 %vm86_vm0, %v1262_v43  ;;  %1033 = vmatmul.mubr.msk.f32.gmra.mrb[30].mxu1 %vm86_vm0, %v1222_v35 }
  0x45   :  { %603 = vmatprep.mubr.f32.mxu0 %v1108_v3  ;;  %692 = vmatprep.mubr.f32.mxu1 %v1108_v3 }
  0x48   :  { %1030 = vmatmul.mubr.msk.f32.gmra.mrb[32].mxu0 %vm86_vm0, %v1170_v16  ;;  %1034 = vmatmul.mubr.msk.f32.gmra.mrb[32].mxu1 %vm86_vm0, %v1245_v40 }
  0x49   :  { %698 = vmatprep.mubr.f32.mxu1 %v1108_v3  ;;  %775 = vmatprep.mubr.f32.mxu0 %v1108_v3 }
  0x4c   :  { %1035 = vmatmul.mubr.msk.f32.gmra.mrb[34].mxu1 %vm86_vm0, %v1262_v43  ;;  %1037 = vmatmul.mubr.msk.f32.vlgmr.msra.gmra.mrb[34].mxu0 %vm86_vm0, %v1147_v8 }
  0x4d   :  { %704 = vmatprep.mubr.f32.mxu1 %v1108_v3  ;;  %781 = vmatprep.mubr.f32.mxu0 %v1108_v3 }
  0x50   :  { %1036 = vmatmul.mubr.msk.f32.gmra.mrb[36].mxu1 %vm86_vm0, %v1170_v16  ;;  %1038 = vmatmul.mubr.msk.f32.gmra.mrb[36].mxu0 %vm86_vm0, %v1203_v29 }
  0x51   :  { %787 = vmatprep.mubr.f32.mxu0 %v1108_v3  ;;  %1061 = vmatprep.mubr.msk.f32.mxu1 %vm86_vm0, %v1147_v8 }
  0x54   :  { %1039 = vmatmul.mubr.msk.f32.gmra.mrb[38].mxu0 %vm86_vm0, %v1222_v35  ;;  %1062 = vmatmul.mubr.msk.f32.vlgmr.msra.gmra.mrb[38].mxu1 %vm86_vm0, %v1203_v29 }
  0x55   :  { %793 = vmatprep.mubr.f32.mxu0 %v1108_v3  ;;  %1064 = vmatprep.mubr.msk.f32.mxu1 %vm86_vm0, %v1222_v35 }
  0x58   :  { %1040 = vmatmul.mubr.msk.f32.gmra.mrb[40].mxu0 %vm86_vm0, %v1245_v40  ;;  %1065 = vmatmul.mubr.msk.f32.gmra.mrb[40].mxu1 %vm86_vm0, %v1245_v40 }
  0x59   :  { %799 = vmatprep.mubr.f32.mxu0 %v1108_v3  ;;  %1067 = vmatprep.mubr.msk.f32.mxu1 %vm86_vm0, %v1262_v43 }
  0x5c   :  { %1041 = vmatmul.mubr.msk.f32.gmra.mrb[42].mxu0 %vm86_vm0, %v1262_v43  ;;  %1068 = vmatmul.mubr.msk.f32.gmra.mrb[42].mxu1 %vm86_vm0, %v1170_v16 }
  0x5d   :  { %805 = vmatprep.mubr.f32.mxu0 %v1108_v3 }
  0x60   :  { %1042 = vmatmul.mubr.msk.f32.gmra.mrb[44].mxu0 %vm86_vm0, %v1170_v16 }
  0x8d   :  { %v1406_v59 = vpop.permute.xlu1 %68 }
  0x8e   :  { %v1410_v61 = vpop.permute.xlu0 %58 }
  0x91   :  { %v1408_v60 = vpop.permute.xlu1 %73 }
  0x92   :  { %v1417_v6 = vpop.permute.xlu0 %63 }
  0x95   :  { %v1412_v62 = vpop.permute.xlu1 %83 }
  0x96   :  { %v1467_v31 = vpop.permute.xlu0 %78 }
  0xdb   :  { %v171_v63 = vpop.f32.mrb[0].mxu0  ;;  %v201_v0 = vpop.f32.mrb[0].mxu1 }
  0xdc   :  { %v172_v1 = vadd.f32 %v171_v63, %v1410_v61  ;;  %v173_v2 = vpop.f32.mrb[1].mxu0  ;;  %v202_v4 = vadd.f32 %v201_v0, %v1412_v62  ;;  %v203_v5 = vpop.f32.mrb[1].mxu1 }
  0xdd   :  { %v174_v3 = vadd.f32 %v173_v2, %v1410_v61  ;;  %v204_v7 = vadd.f32 %v203_v5, %v1412_v62 }
  0xde   :  { %907 = vst [vmem:[%s1781_s3] sm:$0xff] %v172_v1  ;;  %982 = vst [vmem:[%s1781_s3 + $0x258] sm:$0xff] %v202_v4 }
  0xdf   :  { %908 = vst [vmem:[%s1781_s3 + $0x8] sm:$0xff] %v174_v3  ;;  %v177_v8 = vpop.f32.mrb[2].mxu0  ;;  %983 = vst [vmem:[%s1781_s3 + $0x260] sm:$0xff] %v204_v7  ;;  %v272_v9 = vpop.f32.mrb[2].mxu1 }
  0xe0   :  { %v178_v10 = vadd.f32 %v177_v8, %v1417_v6  ;;  %v179_v11 = vpop.f32.mrb[3].mxu0  ;;  %v273_v12 = vadd.f32 %v272_v9, %v1410_v61  ;;  %v274_v13 = vpop.f32.mrb[3].mxu1 }
  0xe1   :  { %v180_v14 = vadd.f32 %v179_v11, %v1417_v6  ;;  %v275_v15 = vadd.f32 %v274_v13, %v1410_v61 }
  0xe2   :  { %922 = vst [vmem:[%s1781_s3 + $0x78] sm:$0xff] %v178_v10  ;;  %909 = vst [vmem:[%s1781_s3 + $0x10] sm:$0xff] %v273_v12 }
  0xe3   :  { %923 = vst [vmem:[%s1781_s3 + $0x80] sm:$0xff] %v180_v14  ;;  %v183_v16 = vpop.f32.mrb[4].mxu0  ;;  %910 = vst [vmem:[%s1781_s3 + $0x18] sm:$0xff] %v275_v15  ;;  %v278_v17 = vpop.f32.mrb[4].mxu1 }
  0xe4   :  { %v184_v18 = vadd.f32 %v183_v16, %v1406_v59  ;;  %v185_v19 = vpop.f32.mrb[5].mxu0  ;;  %v279_v20 = vadd.f32 %v278_v17, %v1417_v6  ;;  %v280_v21 = vpop.f32.mrb[5].mxu1 }
  0xe5   :  { %v186_v22 = vadd.f32 %v185_v19, %v1406_v59  ;;  %v281_v23 = vadd.f32 %v280_v21, %v1417_v6 }
  0xe6   :  { %937 = vst [vmem:[%s1781_s3 + $0xf0] sm:$0xff] %v184_v18  ;;  %924 = vst [vmem:[%s1781_s3 + $0x88] sm:$0xff] %v279_v20 }
  0xe7   :  { %938 = vst [vmem:[%s1781_s3 + $0xf8] sm:$0xff] %v186_v22  ;;  %v189_v24 = vpop.f32.mrb[6].mxu0  ;;  %925 = vst [vmem:[%s1781_s3 + $0x90] sm:$0xff] %v281_v23  ;;  %v284_v25 = vpop.f32.mrb[6].mxu1 }
  0xe8   :  { %v190_v26 = vadd.f32 %v189_v24, %v1408_v60  ;;  %v191_v27 = vpop.f32.mrb[7].mxu0  ;;  %v285_v28 = vadd.f32 %v284_v25, %v1406_v59  ;;  %v286_v29 = vpop.f32.mrb[7].mxu1 }
  0xe9   :  { %v192_v30 = vadd.f32 %v191_v27, %v1408_v60  ;;  %v287_v32 = vadd.f32 %v286_v29, %v1406_v59 }
  0xea   :  { %952 = vst [vmem:[%s1781_s3 + $0x168] sm:$0xff] %v190_v26  ;;  %939 = vst [vmem:[%s1781_s3 + $0x100] sm:$0xff] %v285_v28 }
  0xeb   :  { %953 = vst [vmem:[%s1781_s3 + $0x170] sm:$0xff] %v192_v30  ;;  %v195_v33 = vpop.f32.mrb[8].mxu0  ;;  %940 = vst [vmem:[%s1781_s3 + $0x108] sm:$0xff] %v287_v32  ;;  %v290_v34 = vpop.f32.mrb[8].mxu1 }
  0xec   :  { %v196_v35 = vadd.f32 %v195_v33, %v1467_v31  ;;  %v197_v36 = vpop.f32.mrb[9].mxu0  ;;  %v291_v37 = vadd.f32 %v290_v34, %v1408_v60  ;;  %v292_v38 = vpop.f32.mrb[9].mxu1 }
  0xed   :  { %v198_v39 = vadd.f32 %v197_v36, %v1467_v31  ;;  %v293_v40 = vadd.f32 %v292_v38, %v1408_v60 }
  0xee   :  { %967 = vst [vmem:[%s1781_s3 + $0x1e0] sm:$0xff] %v196_v35  ;;  %954 = vst [vmem:[%s1781_s3 + $0x178] sm:$0xff] %v291_v37 }
  0xef   :  { %968 = vst [vmem:[%s1781_s3 + $0x1e8] sm:$0xff] %v198_v39  ;;  %v373_v41 = vpop.f32.mrb[10].mxu0  ;;  %955 = vst [vmem:[%s1781_s3 + $0x180] sm:$0xff] %v293_v40  ;;  %v296_v42 = vpop.f32.mrb[10].mxu1 }
  0xf0   :  { %v374_v43 = vadd.f32 %v373_v41, %v1410_v61  ;;  %v375_v44 = vpop.f32.mrb[11].mxu0  ;;  %v297_v45 = vadd.f32 %v296_v42, %v1467_v31  ;;  %v298_v46 = vpop.f32.mrb[11].mxu1 }
  0xf1   :  { %v376_v47 = vadd.f32 %v375_v44, %v1410_v61  ;;  %v299_v48 = vadd.f32 %v298_v46, %v1467_v31 }
  0xf2   :  { %911 = vst [vmem:[%s1781_s3 + $0x20] sm:$0xff] %v374_v43  ;;  %969 = vst [vmem:[%s1781_s3 + $0x1f0] sm:$0xff] %v297_v45 }
  0xf3   :  { %912 = vst [vmem:[%s1781_s3 + $0x28] sm:$0xff] %v376_v47  ;;  %v379_v49 = vpop.f32.mrb[12].mxu0  ;;  %970 = vst [vmem:[%s1781_s3 + $0x1f8] sm:$0xff] %v299_v48  ;;  %v302_v50 = vpop.f32.mrb[12].mxu1 }
  0xf4   :  { %v380_v51 = vadd.f32 %v379_v49, %v1417_v6  ;;  %v381_v52 = vpop.f32.mrb[13].mxu0  ;;  %v303_v53 = vadd.f32 %v302_v50, %v1412_v62  ;;  %v304_v54 = vpop.f32.mrb[13].mxu1 }
  0xf5   :  { %v382_v55 = vadd.f32 %v381_v52, %v1417_v6  ;;  %v305_v56 = vadd.f32 %v304_v54, %v1412_v62 }
  0xf6   :  { %926 = vst [vmem:[%s1781_s3 + $0x98] sm:$0xff] %v380_v51  ;;  %984 = vst [vmem:[%s1781_s3 + $0x268] sm:$0xff] %v303_v53 }
  0xf7   :  { %927 = vst [vmem:[%s1781_s3 + $0xa0] sm:$0xff] %v382_v55  ;;  %v385_v57 = vpop.f32.mrb[14].mxu0  ;;  %985 = vst [vmem:[%s1781_s3 + $0x270] sm:$0xff] %v305_v56  ;;  %v474_v58 = vpop.f32.mrb[14].mxu1 }
  0xf8   :  { %v386_v63 = vadd.f32 %v385_v57, %v1406_v59  ;;  %v387_v0 = vpop.f32.mrb[15].mxu0  ;;  %v475_v1 = vadd.f32 %v474_v58, %v1410_v61  ;;  %v476_v2 = vpop.f32.mrb[15].mxu1 }
  0xf9   :  { %v388_v4 = vadd.f32 %v387_v0, %v1406_v59  ;;  %v477_v5 = vadd.f32 %v476_v2, %v1410_v61 }
  0xfa   :  { %941 = vst [vmem:[%s1781_s3 + $0x110] sm:$0xff] %v386_v63  ;;  %913 = vst [vmem:[%s1781_s3 + $0x30] sm:$0xff] %v475_v1 }
  0xfb   :  { %942 = vst [vmem:[%s1781_s3 + $0x118] sm:$0xff] %v388_v4  ;;  %v391_v3 = vpop.f32.mrb[16].mxu0  ;;  %914 = vst [vmem:[%s1781_s3 + $0x38] sm:$0xff] %v477_v5  ;;  %v480_v7 = vpop.f32.mrb[16].mxu1 }
  0xfc   :  { %v392_v8 = vadd.f32 %v391_v3, %v1408_v60  ;;  %v393_v9 = vpop.f32.mrb[17].mxu0  ;;  %v481_v10 = vadd.f32 %v480_v7, %v1417_v6  ;;  %v482_v11 = vpop.f32.mrb[17].mxu1 }
  0xfd   :  { %v394_v12 = vadd.f32 %v393_v9, %v1408_v60  ;;  %v483_v13 = vadd.f32 %v482_v11, %v1417_v6 }
  0xfe   :  { %956 = vst [vmem:[%s1781_s3 + $0x188] sm:$0xff] %v392_v8  ;;  %928 = vst [vmem:[%s1781_s3 + $0xa8] sm:$0xff] %v481_v10 }
  0xff   :  { %957 = vst [vmem:[%s1781_s3 + $0x190] sm:$0xff] %v394_v12  ;;  %v397_v14 = vpop.f32.mrb[18].mxu0  ;;  %929 = vst [vmem:[%s1781_s3 + $0xb0] sm:$0xff] %v483_v13  ;;  %v486_v15 = vpop.f32.mrb[18].mxu1 }
 0x100   :  { %v398_v16 = vadd.f32 %v397_v14, %v1467_v31  ;;  %v399_v17 = vpop.f32.mrb[19].mxu0  ;;  %v487_v18 = vadd.f32 %v486_v15, %v1406_v59  ;;  %v488_v19 = vpop.f32.mrb[19].mxu1 }
 0x101   :  { %v400_v20 = vadd.f32 %v399_v17, %v1467_v31  ;;  %v489_v21 = vadd.f32 %v488_v19, %v1406_v59 }
 0x102   :  { %971 = vst [vmem:[%s1781_s3 + $0x200] sm:$0xff] %v398_v16  ;;  %943 = vst [vmem:[%s1781_s3 + $0x120] sm:$0xff] %v487_v18 }
 0x103   :  { %972 = vst [vmem:[%s1781_s3 + $0x208] sm:$0xff] %v400_v20  ;;  %v403_v22 = vpop.f32.mrb[20].mxu0  ;;  %944 = vst [vmem:[%s1781_s3 + $0x128] sm:$0xff] %v489_v21  ;;  %v492_v23 = vpop.f32.mrb[20].mxu1 }
 0x104   :  { %v404_v24 = vadd.f32 %v403_v22, %v1412_v62  ;;  %v405_v25 = vpop.f32.mrb[21].mxu0  ;;  %v493_v26 = vadd.f32 %v492_v23, %v1408_v60  ;;  %v494_v27 = vpop.f32.mrb[21].mxu1 }
 0x105   :  { %v406_v28 = vadd.f32 %v405_v25, %v1412_v62  ;;  %v495_v29 = vadd.f32 %v494_v27, %v1408_v60 }
 0x106   :  { %986 = vst [vmem:[%s1781_s3 + $0x278] sm:$0xff] %v404_v24  ;;  %958 = vst [vmem:[%s1781_s3 + $0x198] sm:$0xff] %v493_v26 }
 0x107   :  { %987 = vst [vmem:[%s1781_s3 + $0x280] sm:$0xff] %v406_v28  ;;  %v575_v30 = vpop.f32.mrb[22].mxu0  ;;  %959 = vst [vmem:[%s1781_s3 + $0x1a0] sm:$0xff] %v495_v29  ;;  %v498_v32 = vpop.f32.mrb[22].mxu1 }
 0x108   :  { %v576_v33 = vadd.f32 %v575_v30, %v1410_v61  ;;  %v577_v34 = vpop.f32.mrb[23].mxu0  ;;  %v499_v35 = vadd.f32 %v498_v32, %v1467_v31  ;;  %v500_v36 = vpop.f32.mrb[23].mxu1 }
 0x109   :  { %v578_v37 = vadd.f32 %v577_v34, %v1410_v61  ;;  %v501_v38 = vadd.f32 %v500_v36, %v1467_v31 }
 0x10a   :  { %915 = vst [vmem:[%s1781_s3 + $0x40] sm:$0xff] %v576_v33  ;;  %973 = vst [vmem:[%s1781_s3 + $0x210] sm:$0xff] %v499_v35 }
 0x10b   :  { %916 = vst [vmem:[%s1781_s3 + $0x48] sm:$0xff] %v578_v37  ;;  %v581_v39 = vpop.f32.mrb[24].mxu0  ;;  %974 = vst [vmem:[%s1781_s3 + $0x218] sm:$0xff] %v501_v38  ;;  %v504_v40 = vpop.f32.mrb[24].mxu1 }
 0x10c   :  { %v582_v41 = vadd.f32 %v581_v39, %v1417_v6  ;;  %v583_v42 = vpop.f32.mrb[25].mxu0  ;;  %v505_v43 = vadd.f32 %v504_v40, %v1412_v62  ;;  %v506_v44 = vpop.f32.mrb[25].mxu1 }
 0x10d   :  { %v584_v45 = vadd.f32 %v583_v42, %v1417_v6  ;;  %v507_v46 = vadd.f32 %v506_v44, %v1412_v62 }
 0x10e   :  { %930 = vst [vmem:[%s1781_s3 + $0xb8] sm:$0xff] %v582_v41  ;;  %988 = vst [vmem:[%s1781_s3 + $0x288] sm:$0xff] %v505_v43 }
 0x10f   :  { %931 = vst [vmem:[%s1781_s3 + $0xc0] sm:$0xff] %v584_v45  ;;  %v587_v47 = vpop.f32.mrb[26].mxu0  ;;  %989 = vst [vmem:[%s1781_s3 + $0x290] sm:$0xff] %v507_v46  ;;  %v676_v48 = vpop.f32.mrb[26].mxu1 }
 0x110   :  { %v588_v49 = vadd.f32 %v587_v47, %v1406_v59  ;;  %v589_v50 = vpop.f32.mrb[27].mxu0  ;;  %v677_v51 = vadd.f32 %v676_v48, %v1410_v61  ;;  %v678_v52 = vpop.f32.mrb[27].mxu1 }
 0x111   :  { %v590_v53 = vadd.f32 %v589_v50, %v1406_v59  ;;  %v679_v54 = vadd.f32 %v678_v52, %v1410_v61 }
 0x112   :  { %945 = vst [vmem:[%s1781_s3 + $0x130] sm:$0xff] %v588_v49  ;;  %917 = vst [vmem:[%s1781_s3 + $0x50] sm:$0xff] %v677_v51 }
 0x113   :  { %946 = vst [vmem:[%s1781_s3 + $0x138] sm:$0xff] %v590_v53  ;;  %v593_v55 = vpop.f32.mrb[28].mxu0  ;;  %918 = vst [vmem:[%s1781_s3 + $0x58] sm:$0xff] %v679_v54  ;;  %v682_v56 = vpop.f32.mrb[28].mxu1 }
 0x114   :  { %v594_v57 = vadd.f32 %v593_v55, %v1408_v60  ;;  %v595_v58 = vpop.f32.mrb[29].mxu0  ;;  %v683_v63 = vadd.f32 %v682_v56, %v1417_v6  ;;  %v684_v0 = vpop.f32.mrb[29].mxu1 }
 0x115   :  { %v596_v1 = vadd.f32 %v595_v58, %v1408_v60  ;;  %v685_v2 = vadd.f32 %v684_v0, %v1417_v6 }
 0x116   :  { %960 = vst [vmem:[%s1781_s3 + $0x1a8] sm:$0xff] %v594_v57  ;;  %932 = vst [vmem:[%s1781_s3 + $0xc8] sm:$0xff] %v683_v63 }
 0x117   :  { %961 = vst [vmem:[%s1781_s3 + $0x1b0] sm:$0xff] %v596_v1  ;;  %v599_v4 = vpop.f32.mrb[30].mxu0  ;;  %933 = vst [vmem:[%s1781_s3 + $0xd0] sm:$0xff] %v685_v2  ;;  %v688_v5 = vpop.f32.mrb[30].mxu1 }
 0x118   :  { %v600_v3 = vadd.f32 %v599_v4, %v1467_v31  ;;  %v601_v7 = vpop.f32.mrb[31].mxu0  ;;  %v689_v8 = vadd.f32 %v688_v5, %v1406_v59  ;;  %v690_v9 = vpop.f32.mrb[31].mxu1 }
 0x119   :  { %v602_v10 = vadd.f32 %v601_v7, %v1467_v31  ;;  %v691_v11 = vadd.f32 %v690_v9, %v1406_v59 }
 0x11a   :  { %975 = vst [vmem:[%s1781_s3 + $0x220] sm:$0xff] %v600_v3  ;;  %947 = vst [vmem:[%s1781_s3 + $0x140] sm:$0xff] %v689_v8 }
 0x11b   :  { %976 = vst [vmem:[%s1781_s3 + $0x228] sm:$0xff] %v602_v10  ;;  %v605_v12 = vpop.f32.mrb[32].mxu0  ;;  %948 = vst [vmem:[%s1781_s3 + $0x148] sm:$0xff] %v691_v11  ;;  %v694_v13 = vpop.f32.mrb[32].mxu1 }
 0x11c   :  { %v606_v14 = vadd.f32 %v605_v12, %v1412_v62  ;;  %v607_v15 = vpop.f32.mrb[33].mxu0  ;;  %v695_v16 = vadd.f32 %v694_v13, %v1408_v60  ;;  %v696_v17 = vpop.f32.mrb[33].mxu1 }
 0x11d   :  { %v608_v18 = vadd.f32 %v607_v15, %v1412_v62  ;;  %v697_v19 = vadd.f32 %v696_v17, %v1408_v60 }
 0x11e   :  { %990 = vst [vmem:[%s1781_s3 + $0x298] sm:$0xff] %v606_v14  ;;  %962 = vst [vmem:[%s1781_s3 + $0x1b8] sm:$0xff] %v695_v16 }
 0x11f   :  { %991 = vst [vmem:[%s1781_s3 + $0x2a0] sm:$0xff] %v608_v18  ;;  %v777_v20 = vpop.f32.mrb[34].mxu0  ;;  %963 = vst [vmem:[%s1781_s3 + $0x1c0] sm:$0xff] %v697_v19  ;;  %v700_v21 = vpop.f32.mrb[34].mxu1 }
 0x120   :  { %v778_v22 = vadd.f32 %v777_v20, %v1410_v61  ;;  %v779_v23 = vpop.f32.mrb[35].mxu0  ;;  %v701_v24 = vadd.f32 %v700_v21, %v1467_v31  ;;  %v702_v25 = vpop.f32.mrb[35].mxu1 }
 0x121   :  { %v780_v26 = vadd.f32 %v779_v23, %v1410_v61  ;;  %v703_v27 = vadd.f32 %v702_v25, %v1467_v31 }
 0x122   :  { %919 = vst [vmem:[%s1781_s3 + $0x60] sm:$0xff] %v778_v22  ;;  %977 = vst [vmem:[%s1781_s3 + $0x230] sm:$0xff] %v701_v24 }
 0x123   :  { %920 = vst [vmem:[%s1781_s3 + $0x68] sm:$0xff] %v780_v26  ;;  %v783_v28 = vpop.f32.mrb[36].mxu0  ;;  %978 = vst [vmem:[%s1781_s3 + $0x238] sm:$0xff] %v703_v27  ;;  %v706_v29 = vpop.f32.mrb[36].mxu1 }
 0x124   :  { %v784_v30 = vadd.f32 %v783_v28, %v1417_v6  ;;  %v785_v32 = vpop.f32.mrb[37].mxu0  ;;  %v707_v33 = vadd.f32 %v706_v29, %v1412_v62  ;;  %v708_v34 = vpop.f32.mrb[37].mxu1 }
 0x125   :  { %v786_v35 = vadd.f32 %v785_v32, %v1417_v6  ;;  %v709_v36 = vadd.f32 %v708_v34, %v1412_v62 }
 0x126   :  { %934 = vst [vmem:[%s1781_s3 + $0xd8] sm:$0xff] %v784_v30  ;;  %992 = vst [vmem:[%s1781_s3 + $0x2a8] sm:$0xff] %v707_v33 }
 0x127   :  { %935 = vst [vmem:[%s1781_s3 + $0xe0] sm:$0xff] %v786_v35  ;;  %v789_v37 = vpop.f32.mrb[38].mxu0  ;;  %993 = vst [vmem:[%s1781_s3 + $0x2b0] sm:$0xff] %v709_v36  ;;  %v1063_v38 = vpop.f32.mrb[38].mxu1 }
 0x128   :  { %v790_v39 = vadd.f32 %v789_v37, %v1406_v59  ;;  %v791_v40 = vpop.f32.mrb[39].mxu0  ;;  %v884_v41 = vadd.f32 %v1063_v38, %v1417_v6  ;;  %v878_v42 = vpop.f32.mrb[39].mxu1 }
 0x129   :  { %v792_v43 = vadd.f32 %v791_v40, %v1406_v59  ;;  %v879_v44 = vadd.f32 %v878_v42, %v1410_v61 }
 0x12a   :  { %949 = vst [vmem:[%s1781_s3 + $0x150] sm:$0xff] %v790_v39  ;;  %936 = vst [vmem:[%s1781_s3 + $0xe8] sm:$0xff] %v884_v41 }
 0x12b   :  { %950 = vst [vmem:[%s1781_s3 + $0x158] sm:$0xff] %v792_v43  ;;  %v795_v45 = vpop.f32.mrb[40].mxu0  ;;  %921 = vst [vmem:[%s1781_s3 + $0x70] sm:$0xff] %v879_v44  ;;  %v1066_v6 = vpop.f32.mrb[40].mxu1 }
 0x12c   :  { %v796_v61 = vadd.f32 %v795_v45, %v1408_v60  ;;  %v797_v46 = vpop.f32.mrb[41].mxu0  ;;  %v894_v47 = vadd.f32 %v1066_v6, %v1408_v60  ;;  %v888_v48 = vpop.f32.mrb[41].mxu1 }
 0x12d   :  { %v798_v49 = vadd.f32 %v797_v46, %v1408_v60  ;;  %v889_v50 = vadd.f32 %v888_v48, %v1406_v59 }
 0x12e   :  { %964 = vst [vmem:[%s1781_s3 + $0x1c8] sm:$0xff] %v796_v61  ;;  %966 = vst [vmem:[%s1781_s3 + $0x1d8] sm:$0xff] %v894_v47 }
 0x12f   :  { %965 = vst [vmem:[%s1781_s3 + $0x1d0] sm:$0xff] %v798_v49  ;;  %951 = vst [vmem:[%s1781_s3 + $0x160] sm:$0xff] %v889_v50  ;;  %v801_v51 = vpop.f32.mrb[42].mxu0  ;;  %v1069_v60 = vpop.f32.mrb[42].mxu1 }
 0x130   :  { %v802_v59 = vadd.f32 %v801_v51, %v1467_v31  ;;  %v904_v52 = vadd.f32 %v1069_v60, %v1412_v62  ;;  %v803_v53 = vpop.f32.mrb[43].mxu0  ;;  %v898_v54 = vpop.f32.mrb[43].mxu1 }
 0x131   :  { %v804_v55 = vadd.f32 %v803_v53, %v1467_v31  ;;  %v899_v56 = vadd.f32 %v898_v54, %v1467_v31 }
 0x132   :  { %979 = vst [vmem:[%s1781_s3 + $0x240] sm:$0xff] %v802_v59  ;;  %996 = vst [vmem:[%s1781_s3 + $0x2c8] sm:$0xff] %v904_v52 }
 0x133   :  { %980 = vst [vmem:[%s1781_s3 + $0x248] sm:$0xff] %v804_v55  ;;  %981 = vst [vmem:[%s1781_s3 + $0x250] sm:$0xff] %v899_v56  ;;  %v807_v57 = vpop.f32.mrb[44].mxu0 }
 0x134   :  { %v808_v58 = vadd.f32 %v807_v57, %v1412_v62  ;;  %v809_v31 = vpop.f32.mrb[45].mxu0 }
 0x135   :  { %v810_v63 = vadd.f32 %v809_v31, %v1412_v62 }
 0x136   :  { %994 = vst [vmem:[%s1781_s3 + $0x2b8] sm:$0xff] %v808_v58 }
 0x137   :  { %995 = vst [vmem:[%s1781_s3 + $0x2c0] sm:$0xff] %v810_v63 }

// kernel: _lambda_.14
= control target key start
LH: loop header
LB: loop body
LE: loop exit
PB: predicated region body
PF: predicated region fallthrough
CT: control target
= control target key end

     0   :  { %v1836_v3 = vmov 0   ;;  %vm316_vm0 = vcmask 130048   ;;  %s3079_s0 = inlined_call_operand.vmem [shape: f32[144,1920], index: 0, kind: input, shape index: {}]   ;;  %s3080_s1 = inlined_call_operand.vmem [shape: f32[32,144], index: 1, kind: input, shape index: {}]   ;;  %s3081_s2 = inlined_call_operand.vmem [shape: f32[32,1], index: 2, kind: input, shape index: {}]   ;;  %s3082_s3 = inlined_call_operand.vmem [shape: f32[16,1920], index: 3, kind: output, shape index: {}]  }
   0x1   :  { %v23_v0 = vld [vmem:[%s3079_s0 + $0x8] sm:$0xff]  ;;  %v38_v1 = vld [vmem:[%s3079_s0 + $0x80] sm:$0xff]  ;;  %v25_v2 = vld [vmem:[%s3079_s0 + $0x18] sm:$0xff]  ;;  %1715 = vset.pattern.permute.xlu1 %v1836_v3  ;;  %1714 = vset.pattern.permute.xlu0 %v1836_v3 }
   0x2   :  { %v1433_v4 = vpack.c.bf16 %v38_v1, %v23_v0  ;;  %v40_v5 = vld [vmem:[%s3079_s0 + $0x90] sm:$0xff]  ;;  %v22_v6 = vld [vmem:[%s3079_s0] sm:$0xff]  ;;  %v37_v7 = vld [vmem:[%s3079_s0 + $0x78] sm:$0xff] }
   0x3   :  { %v1469_v8 = vpack.c.bf16 %v40_v5, %v25_v2  ;;  %v1435_v9 = vpack.c.bf16 %v37_v7, %v22_v6  ;;  %v24_v10 = vld [vmem:[%s3079_s0 + $0x10] sm:$0xff]  ;;  %v39_v11 = vld [vmem:[%s3079_s0 + $0x88] sm:$0xff]  ;;  %v53_v12 = vld [vmem:[%s3079_s0 + $0xf8] sm:$0xff] }
   0x4   :  { %1434 = vmatprep.subr.bf16.mxu0 %v1433_v4  ;;  %v1471_v13 = vpack.c.bf16 %v39_v11, %v24_v10  ;;  %v68_v14 = vld [vmem:[%s3079_s0 + $0x170] sm:$0xff]  ;;  %v55_v15 = vld [vmem:[%s3079_s0 + $0x108] sm:$0xff]  ;;  %v70_v16 = vld [vmem:[%s3079_s0 + $0x180] sm:$0xff] }
   0x5   :  { %1470 = vmatprep.subr.bf16.mxu1 %v1469_v8  ;;  %1436 = vmatpush1.bf16.msra.mxu0 %v1435_v9  ;;  %v1437_v17 = vpack.c.bf16 %v68_v14, %v53_v12  ;;  %v1473_v18 = vpack.c.bf16 %v70_v16, %v55_v15  ;;  %v52_v19 = vld [vmem:[%s3079_s0 + $0xf0] sm:$0xff]  ;;  %v67_v20 = vld [vmem:[%s3079_s0 + $0x168] sm:$0xff]  ;;  %v54_v21 = vld [vmem:[%s3079_s0 + $0x100] sm:$0xff] }
   0x6   :  { %1472 = vmatpush1.bf16.msra.mxu1 %v1471_v13  ;;  %v1439_v22 = vpack.c.bf16 %v67_v20, %v52_v19  ;;  %v69_v23 = vld [vmem:[%s3079_s0 + $0x178] sm:$0xff]  ;;  %v83_v24 = vld [vmem:[%s3079_s0 + $0x1e8] sm:$0xff]  ;;  %v98_v25 = vld [vmem:[%s3079_s0 + $0x260] sm:$0xff] }
   0x7   :  { %1438 = vmatprep.subr.bf16.mxu0 %v1437_v17  ;;  %1474 = vmatprep.subr.bf16.mxu1 %v1473_v18  ;;  %v1475_v26 = vpack.c.bf16 %v69_v23, %v54_v21  ;;  %v1441_v27 = vpack.c.bf16 %v98_v25, %v83_v24  ;;  %v85_v28 = vld [vmem:[%s3079_s0 + $0x1f8] sm:$0xff]  ;;  %v100_v29 = vld [vmem:[%s3079_s0 + $0x270] sm:$0xff]  ;;  %v82_v30 = vld [vmem:[%s3079_s0 + $0x1e0] sm:$0xff] }
   0x8   :  { %v1477_v31 = vpack.c.bf16 %v100_v29, %v85_v28  ;;  %v97_v32 = vld [vmem:[%s3079_s0 + $0x258] sm:$0xff]  ;;  %v84_v33 = vld [vmem:[%s3079_s0 + $0x1f0] sm:$0xff]  ;;  %v99_v34 = vld [vmem:[%s3079_s0 + $0x268] sm:$0xff] }
   0x9   :  { %1440 = vmatpush1.bf16.msra.mxu0 %v1439_v22  ;;  %v1443_v35 = vpack.c.bf16 %v97_v32, %v82_v30  ;;  %v113_v36 = vld [vmem:[%s3079_s0 + $0x2d8] sm:$0xff]  ;;  %v128_v37 = vld [vmem:[%s3079_s0 + $0x350] sm:$0xff]  ;;  %v115_v38 = vld [vmem:[%s3079_s0 + $0x2e8] sm:$0xff]  ;;  %v1479_v39 = vpack.c.bf16 %v99_v34, %v84_v33 }
   0xa   :  { %1476 = vmatpush1.bf16.msra.mxu1 %v1475_v26  ;;  %1442 = vmatprep.subr.bf16.mxu0 %v1441_v27  ;;  %v1445_v40 = vpack.c.bf16 %v128_v37, %v113_v36  ;;  %v130_v41 = vld [vmem:[%s3079_s0 + $0x360] sm:$0xff]  ;;  %v112_v42 = vld [vmem:[%s3079_s0 + $0x2d0] sm:$0xff]  ;;  %v127_v43 = vld [vmem:[%s3079_s0 + $0x348] sm:$0xff] }
   0xb   :  { %1478 = vmatprep.subr.bf16.mxu1 %v1477_v31  ;;  %v1481_v44 = vpack.c.bf16 %v130_v41, %v115_v38  ;;  %v114_v45 = vld [vmem:[%s3079_s0 + $0x2e0] sm:$0xff]  ;;  %v129_v46 = vld [vmem:[%s3079_s0 + $0x358] sm:$0xff]  ;;  %v143_v47 = vld [vmem:[%s3079_s0 + $0x3c8] sm:$0xff]  ;;  %v1447_v51 = vpack.c.bf16 %v127_v43, %v112_v42 }
   0xc   :  { %v158_v48 = vld [vmem:[%s3079_s0 + $0x440] sm:$0xff]  ;;  %v145_v49 = vld [vmem:[%s3079_s0 + $0x3d8] sm:$0xff]  ;;  %v160_v50 = vld [vmem:[%s3079_s0 + $0x450] sm:$0xff]  ;;  %v1483_v52 = vpack.c.bf16 %v129_v46, %v114_v45 }
   0xd   :  { %1444 = vmatpush1.bf16.msra.mxu0 %v1443_v35  ;;  %v1449_v53 = vpack.c.bf16 %v158_v48, %v143_v47  ;;  %v142_v54 = vld [vmem:[%s3079_s0 + $0x3c0] sm:$0xff]  ;;  %v157_v55 = vld [vmem:[%s3079_s0 + $0x438] sm:$0xff]  ;;  %v144_v56 = vld [vmem:[%s3079_s0 + $0x3d0] sm:$0xff]  ;;  %v1485_v57 = vpack.c.bf16 %v160_v50, %v145_v49 }
   0xe   :  { %1480 = vmatpush1.bf16.msra.mxu1 %v1479_v39  ;;  %1446 = vmatprep.subr.bf16.mxu0 %v1445_v40  ;;  %v159_v58 = vld [vmem:[%s3079_s0 + $0x448] sm:$0xff]  ;;  %v173_v59 = vld [vmem:[%s3079_s0 + $0x4b8] sm:$0xff]  ;;  %v188_v60 = vld [vmem:[%s3079_s0 + $0x530] sm:$0xff]  ;;  %v1451_v63 = vpack.c.bf16 %v157_v55, %v142_v54 }
   0xf   :  { %1482 = vmatprep.subr.bf16.mxu1 %v1481_v44  ;;  %v175_v61 = vld [vmem:[%s3079_s0 + $0x4c8] sm:$0xff]  ;;  %v190_v62 = vld [vmem:[%s3079_s0 + $0x540] sm:$0xff]  ;;  %v1487_v0 = vpack.c.bf16 %v159_v58, %v144_v56  ;;  %v1453_v1 = vpack.c.bf16 %v188_v60, %v173_v59  ;;  %v172_v2 = vld [vmem:[%s3079_s0 + $0x4b0] sm:$0xff] }
  0x10   :  { %v187_v3 = vld [vmem:[%s3079_s0 + $0x528] sm:$0xff]  ;;  %v174_v4 = vld [vmem:[%s3079_s0 + $0x4c0] sm:$0xff]  ;;  %v1489_v5 = vpack.c.bf16 %v190_v62, %v175_v61  ;;  %v189_v6 = vld [vmem:[%s3079_s0 + $0x538] sm:$0xff] }
  0x11   :  { %1448 = vmatpush1.bf16.msra.mxu0 %v1447_v51  ;;  %v203_v7 = vld [vmem:[%s3079_s0 + $0x5a8] sm:$0xff]  ;;  %v218_v8 = vld [vmem:[%s3079_s0 + $0x620] sm:$0xff]  ;;  %v205_v9 = vld [vmem:[%s3079_s0 + $0x5b8] sm:$0xff]  ;;  %v1455_v11 = vpack.c.bf16 %v187_v3, %v172_v2  ;;  %v1491_v12 = vpack.c.bf16 %v189_v6, %v174_v4 }
  0x12   :  { %1484 = vmatpush1.bf16.msra.mxu1 %v1483_v52  ;;  %1450 = vmatprep.subr.bf16.mxu0 %v1449_v53  ;;  %v220_v10 = vld [vmem:[%s3079_s0 + $0x630] sm:$0xff]  ;;  %v1457_v13 = vpack.c.bf16 %v218_v8, %v203_v7  ;;  %v202_v14 = vld [vmem:[%s3079_s0 + $0x5a0] sm:$0xff]  ;;  %v217_v15 = vld [vmem:[%s3079_s0 + $0x618] sm:$0xff] }
  0x13   :  { %1486 = vmatprep.subr.bf16.mxu1 %v1485_v57  ;;  %v204_v16 = vld [vmem:[%s3079_s0 + $0x5b0] sm:$0xff]  ;;  %v1493_v17 = vpack.c.bf16 %v220_v10, %v205_v9  ;;  %v219_v18 = vld [vmem:[%s3079_s0 + $0x628] sm:$0xff]  ;;  %v233_v19 = vld [vmem:[%s3079_s0 + $0x698] sm:$0xff]  ;;  %v1459_v23 = vpack.c.bf16 %v217_v15, %v202_v14 }
  0x14   :  { %v248_v20 = vld [vmem:[%s3079_s0 + $0x710] sm:$0xff]  ;;  %v235_v21 = vld [vmem:[%s3079_s0 + $0x6a8] sm:$0xff]  ;;  %v250_v22 = vld [vmem:[%s3079_s0 + $0x720] sm:$0xff]  ;;  %v1495_v25 = vpack.c.bf16 %v219_v18, %v204_v16 }
  0x15   :  { %1452 = vmatpush1.bf16.msra.mxu0 %v1451_v63  ;;  %v2041_v24 = vld [vmem:[%s3080_s1 + $0x8] sm:$0xff]  ;;  %v1461_v26 = vpack.c.bf16 %v248_v20, %v233_v19  ;;  %v232_v27 = vld [vmem:[%s3079_s0 + $0x690] sm:$0xff]  ;;  %v234_v29 = vld [vmem:[%s3079_s0 + $0x6a0] sm:$0xff]  ;;  %v1497_v30 = vpack.c.bf16 %v250_v22, %v235_v21 }
  0x16   :  { %1488 = vmatpush1.bf16.msra.mxu1 %v1487_v0  ;;  %1454 = vmatprep.subr.bf16.mxu0 %v1453_v1  ;;  %v247_v28 = vld [vmem:[%s3079_s0 + $0x708] sm:$0xff]  ;;  %v249_v31 = vld [vmem:[%s3079_s0 + $0x718] sm:$0xff]  ;;  %v278_v33 = vld [vmem:[%s3079_s0 + $0x800] sm:$0xff] }
  0x17   :  { %1490 = vmatprep.subr.bf16.mxu1 %v1489_v5  ;;  %v263_v32 = vld [vmem:[%s3079_s0 + $0x788] sm:$0xff]  ;;  %1371 = vmatprep.mubr.msk.f32.mxu0 %vm316_vm0, %v2041_v24  ;;  %v265_v34 = vld [vmem:[%s3079_s0 + $0x798] sm:$0xff]  ;;  %v280_v35 = vld [vmem:[%s3079_s0 + $0x810] sm:$0xff]  ;;  %v1463_v36 = vpack.c.bf16 %v247_v28, %v232_v27  ;;  %v1499_v37 = vpack.c.bf16 %v249_v31, %v234_v29 }
  0x18   :  { %1375 = vmatprep.mubr.msk.f32.mxu1 %vm316_vm0, %v2041_v24  ;;  %v1465_v38 = vpack.c.bf16 %v278_v33, %v263_v32  ;;  %v262_v39 = vld [vmem:[%s3079_s0 + $0x780] sm:$0xff]  ;;  %v277_v40 = vld [vmem:[%s3079_s0 + $0x7f8] sm:$0xff]  ;;  %v264_v41 = vld [vmem:[%s3079_s0 + $0x790] sm:$0xff]  ;;  %v1501_v42 = vpack.c.bf16 %v280_v35, %v265_v34 }
  0x19   :  { %1456 = vmatpush1.bf16.msra.mxu0 %v1455_v11  ;;  %v279_v43 = vld [vmem:[%s3079_s0 + $0x808] sm:$0xff]  ;;  %v42_v45 = vld [vmem:[%s3079_s0 + $0xa0] sm:$0xff]  ;;  %v29_v46 = vld [vmem:[%s3079_s0 + $0x38] sm:$0xff]  ;;  %v1467_v48 = vpack.c.bf16 %v277_v40, %v262_v39 }
  0x1a   :  { %1492 = vmatpush1.bf16.msra.mxu1 %v1491_v12  ;;  %1458 = vmatprep.subr.bf16.mxu0 %v1457_v13  ;;  %v27_v44 = vld [vmem:[%s3079_s0 + $0x28] sm:$0xff]  ;;  %v44_v47 = vld [vmem:[%s3079_s0 + $0xb0] sm:$0xff]  ;;  %v1503_v49 = vpack.c.bf16 %v279_v43, %v264_v41  ;;  %v26_v51 = vld [vmem:[%s3079_s0 + $0x20] sm:$0xff] }
  0x1b   :  { %1494 = vmatprep.subr.bf16.mxu1 %v1493_v17  ;;  %v1505_v50 = vpack.c.bf16 %v42_v45, %v27_v44  ;;  %v41_v52 = vld [vmem:[%s3079_s0 + $0x98] sm:$0xff]  ;;  %v1541_v53 = vpack.c.bf16 %v44_v47, %v29_v46  ;;  %v28_v54 = vld [vmem:[%s3079_s0 + $0x30] sm:$0xff]  ;;  %v43_v55 = vld [vmem:[%s3079_s0 + $0xa8] sm:$0xff] }
  0x1c   :  { %v57_v56 = vld [vmem:[%s3079_s0 + $0x118] sm:$0xff]  ;;  %v72_v57 = vld [vmem:[%s3079_s0 + $0x190] sm:$0xff]  ;;  %v2116_v58 = vld [vmem:[%s3080_s1] sm:$0xff]  ;;  %v1507_v59 = vpack.c.bf16 %v41_v52, %v26_v51  ;;  %v1543_v62 = vpack.c.bf16 %v43_v55, %v28_v54 }
  0x1d   :  { %1460 = vmatpush1.bf16.msra.mxu0 %v1459_v23  ;;  %v59_v60 = vld [vmem:[%s3079_s0 + $0x128] sm:$0xff]  ;;  %v74_v61 = vld [vmem:[%s3079_s0 + $0x1a0] sm:$0xff]  ;;  %v56_v63 = vld [vmem:[%s3079_s0 + $0x110] sm:$0xff]  ;;  %v1509_v2 = vpack.c.bf16 %v72_v57, %v57_v56 }
  0x1e   :  { %1496 = vmatpush1.bf16.msra.mxu1 %v1495_v25  ;;  %1462 = vmatprep.subr.bf16.mxu0 %v1461_v26  ;;  %v71_v0 = vld [vmem:[%s3079_s0 + $0x188] sm:$0xff]  ;;  %v2133_v1 = vld [vmem:[%s3080_s1 + $0x18] sm:$0xff]  ;;  %v58_v3 = vld [vmem:[%s3079_s0 + $0x120] sm:$0xff]  ;;  %v1545_v5 = vpack.c.bf16 %v74_v61, %v59_v60 }
  0x1f   :  { %1498 = vmatprep.subr.bf16.mxu1 %v1497_v30  ;;  %v73_v4 = vld [vmem:[%s3079_s0 + $0x198] sm:$0xff]  ;;  %v87_v6 = vld [vmem:[%s3079_s0 + $0x208] sm:$0xff]  ;;  %v102_v7 = vld [vmem:[%s3079_s0 + $0x280] sm:$0xff]  ;;  %v1511_v9 = vpack.c.bf16 %v71_v0, %v56_v63 }
  0x20   :  { %v2152_v8 = vld [vmem:[%s3080_s1 + $0x10] sm:$0xff]  ;;  %v89_v10 = vld [vmem:[%s3079_s0 + $0x218] sm:$0xff]  ;;  %v1547_v12 = vpack.c.bf16 %v73_v4, %v58_v3  ;;  %v86_v13 = vld [vmem:[%s3079_s0 + $0x200] sm:$0xff]  ;;  %v1513_v16 = vpack.c.bf16 %v102_v7, %v87_v6 }
  0x21   :  { %1464 = vmatpush1.bf16.msra.mxu0 %v1463_v36  ;;  %v104_v11 = vld [vmem:[%s3079_s0 + $0x290] sm:$0xff]  ;;  %v101_v14 = vld [vmem:[%s3079_s0 + $0x278] sm:$0xff]  ;;  %v2173_v15 = vld [vmem:[%s3080_s1 + $0x28] sm:$0xff] }
  0x22   :  { %1500 = vmatpush1.bf16.msra.mxu1 %v1499_v37  ;;  %1466 = vmatprep.subr.bf16.mxu0 %v1465_v38  ;;  %v88_v17 = vld [vmem:[%s3079_s0 + $0x210] sm:$0xff]  ;;  %v103_v18 = vld [vmem:[%s3079_s0 + $0x288] sm:$0xff]  ;;  %v2185_v19 = vld [vmem:[%s3080_s1 + $0x20] sm:$0xff]  ;;  %v1549_v20 = vpack.c.bf16 %v104_v11, %v89_v10  ;;  %v1515_v23 = vpack.c.bf16 %v101_v14, %v86_v13 }
  0x23   :  { %1502 = vmatprep.subr.bf16.mxu1 %v1501_v42  ;;  %v117_v21 = vld [vmem:[%s3079_s0 + $0x2f8] sm:$0xff]  ;;  %v132_v22 = vld [vmem:[%s3079_s0 + $0x370] sm:$0xff]  ;;  %v119_v26 = vld [vmem:[%s3079_s0 + $0x308] sm:$0xff]  ;;  %v1551_v28 = vpack.c.bf16 %v103_v18, %v88_v17 }
  0x24   :  { %v2197_v25 = vld [vmem:[%s3080_s1 + $0x38] sm:$0xff]  ;;  %v134_v27 = vld [vmem:[%s3079_s0 + $0x380] sm:$0xff]  ;;  %v116_v29 = vld [vmem:[%s3079_s0 + $0x2f0] sm:$0xff]  ;;  %v1517_v32 = vpack.c.bf16 %v132_v22, %v117_v21 }
  0x25   :  { %1468 = vmatpush1.bf16.msra.mxu0 %v1467_v48  ;;  %v131_v30 = vld [vmem:[%s3079_s0 + $0x368] sm:$0xff]  ;;  %v118_v31 = vld [vmem:[%s3079_s0 + $0x300] sm:$0xff]  ;;  %v133_v33 = vld [vmem:[%s3079_s0 + $0x378] sm:$0xff]  ;;  %v1553_v36 = vpack.c.bf16 %v134_v27, %v119_v26 }
  0x26   :  { %1504 = vmatpush1.bf16.msra.mxu1 %v1503_v49  ;;  %1506 = vmatprep.subr.bf16.mxu0 %v1505_v50  ;;  %v147_v34 = vld [vmem:[%s3079_s0 + $0x3e8] sm:$0xff]  ;;  %v162_v35 = vld [vmem:[%s3079_s0 + $0x460] sm:$0xff]  ;;  %v149_v37 = vld [vmem:[%s3079_s0 + $0x3f8] sm:$0xff]  ;;  %v1519_v40 = vpack.c.bf16 %v131_v30, %v116_v29  ;;  %v1555_v41 = vpack.c.bf16 %v133_v33, %v118_v31 }
  0x27   :  { %1542 = vmatprep.subr.bf16.mxu1 %v1541_v53  ;;  %v164_v38 = vld [vmem:[%s3079_s0 + $0x470] sm:$0xff]  ;;  %v1521_v42 = vpack.c.bf16 %v162_v35, %v147_v34  ;;  %v146_v43 = vld [vmem:[%s3079_s0 + $0x3e0] sm:$0xff]  ;;  %v161_v44 = vld [vmem:[%s3079_s0 + $0x458] sm:$0xff] }
  0x28   :  { %394 = vmatmul.mubr.f32.vlgmr.msra.gmra.mrb[0].mxu0 %v2116_v58  ;;  %v2238_v39 = vld [vmem:[%s3080_s1 + $0x30] sm:$0xff]  ;;  %v1557_v46 = vpack.c.bf16 %v164_v38, %v149_v37  ;;  %v163_v47 = vld [vmem:[%s3079_s0 + $0x468] sm:$0xff]  ;;  %v177_v48 = vld [vmem:[%s3079_s0 + $0x4d8] sm:$0xff]  ;;  %v1523_v52 = vpack.c.bf16 %v161_v44, %v146_v43 }
  0x29   :  { %483 = vmatmul.mubr.f32.vlgmr.msra.gmra.mrb[0].mxu1 %v2116_v58  ;;  %1508 = vmatpush1.bf16.msra.mxu0 %v1507_v59  ;;  %v148_v45 = vld [vmem:[%s3079_s0 + $0x3f0] sm:$0xff]  ;;  %v179_v50 = vld [vmem:[%s3079_s0 + $0x4e8] sm:$0xff]  ;;  %v194_v51 = vld [vmem:[%s3079_s0 + $0x560] sm:$0xff] }
  0x2a   :  { %1544 = vmatpush1.bf16.msra.mxu1 %v1543_v62  ;;  %1372 = vmatprep.mubr.msk.f32.mxu0 %vm316_vm0, %v2133_v1  ;;  %v192_v49 = vld [vmem:[%s3079_s0 + $0x550] sm:$0xff]  ;;  %v1559_v53 = vpack.c.bf16 %v163_v47, %v148_v45  ;;  %v191_v56 = vld [vmem:[%s3079_s0 + $0x548] sm:$0xff]  ;;  %v178_v57 = vld [vmem:[%s3079_s0 + $0x4e0] sm:$0xff]  ;;  %v1561_v59 = vpack.c.bf16 %v194_v51, %v179_v50 }
  0x2b   :  { %1376 = vmatprep.mubr.msk.f32.mxu1 %vm316_vm0, %v2133_v1  ;;  %1510 = vmatprep.subr.bf16.mxu0 %v1509_v2  ;;  %v1525_v54 = vpack.c.bf16 %v192_v49, %v177_v48  ;;  %v176_v55 = vld [vmem:[%s3079_s0 + $0x4d0] sm:$0xff]  ;;  %v193_v60 = vld [vmem:[%s3079_s0 + $0x558] sm:$0xff]  ;;  %v207_v61 = vld [vmem:[%s3079_s0 + $0x5c8] sm:$0xff] }
  0x2c   :  { %400 = vmatmul.mubr.f32.gmra.mrb[2].mxu0 %v2152_v8  ;;  %1546 = vmatprep.subr.bf16.mxu1 %v1545_v5  ;;  %v222_v62 = vld [vmem:[%s3079_s0 + $0x640] sm:$0xff]  ;;  %v209_v63 = vld [vmem:[%s3079_s0 + $0x5d8] sm:$0xff]  ;;  %v224_v0 = vld [vmem:[%s3079_s0 + $0x650] sm:$0xff]  ;;  %v1527_v2 = vpack.c.bf16 %v191_v56, %v176_v55  ;;  %v1563_v3 = vpack.c.bf16 %v193_v60, %v178_v57 }
  0x2d   :  { %489 = vmatmul.mubr.f32.gmra.mrb[2].mxu1 %v2152_v8  ;;  %1512 = vmatpush1.bf16.msra.mxu0 %v1511_v9  ;;  %v1529_v4 = vpack.c.bf16 %v222_v62, %v207_v61  ;;  %v206_v5 = vld [vmem:[%s3079_s0 + $0x5c0] sm:$0xff]  ;;  %v221_v6 = vld [vmem:[%s3079_s0 + $0x638] sm:$0xff]  ;;  %v208_v7 = vld [vmem:[%s3079_s0 + $0x5d0] sm:$0xff]  ;;  %v1565_v9 = vpack.c.bf16 %v224_v0, %v209_v63 }
  0x2e   :  { %1548 = vmatpush1.bf16.msra.mxu1 %v1547_v12  ;;  %1373 = vmatprep.mubr.msk.f32.mxu0 %vm316_vm0, %v2173_v15  ;;  %v223_v10 = vld [vmem:[%s3079_s0 + $0x648] sm:$0xff]  ;;  %v237_v11 = vld [vmem:[%s3079_s0 + $0x6b8] sm:$0xff]  ;;  %v252_v12 = vld [vmem:[%s3079_s0 + $0x730] sm:$0xff] }
  0x2f   :  { %1377 = vmatprep.mubr.msk.f32.mxu1 %vm316_vm0, %v2173_v15  ;;  %1514 = vmatprep.subr.bf16.mxu0 %v1513_v16  ;;  %v239_v13 = vld [vmem:[%s3079_s0 + $0x6c8] sm:$0xff]  ;;  %v254_v14 = vld [vmem:[%s3079_s0 + $0x740] sm:$0xff]  ;;  %v1531_v16 = vpack.c.bf16 %v221_v6, %v206_v5  ;;  %v1567_v17 = vpack.c.bf16 %v223_v10, %v208_v7  ;;  %v1533_v18 = vpack.c.bf16 %v252_v12, %v237_v11  ;;  %v253_v26 = vld [vmem:[%s3079_s0 + $0x738] sm:$0xff] }
  0x30   :  { %406 = vmatmul.mubr.f32.gmra.mrb[4].mxu0 %v2185_v19  ;;  %1550 = vmatprep.subr.bf16.mxu1 %v1549_v20  ;;  %v236_v20 = vld [vmem:[%s3079_s0 + $0x6b0] sm:$0xff]  ;;  %v251_v21 = vld [vmem:[%s3079_s0 + $0x728] sm:$0xff]  ;;  %v238_v22 = vld [vmem:[%s3079_s0 + $0x6c0] sm:$0xff] }
  0x31   :  { %495 = vmatmul.mubr.f32.gmra.mrb[4].mxu1 %v2185_v19  ;;  %1516 = vmatpush1.bf16.msra.mxu0 %v1515_v23  ;;  %v1569_v23 = vpack.c.bf16 %v254_v14, %v239_v13  ;;  %v267_v27 = vld [vmem:[%s3079_s0 + $0x7a8] sm:$0xff]  ;;  %v269_v29 = vld [vmem:[%s3079_s0 + $0x7b8] sm:$0xff]  ;;  %v284_v30 = vld [vmem:[%s3079_s0 + $0x830] sm:$0xff]  ;;  %v1535_v31 = vpack.c.bf16 %v251_v21, %v236_v20 }
  0x32   :  { %1552 = vmatpush1.bf16.msra.mxu1 %v1551_v28  ;;  %1374 = vmatprep.mubr.msk.f32.mxu0 %vm316_vm0, %v2197_v25  ;;  %v282_v28 = vld [vmem:[%s3079_s0 + $0x820] sm:$0xff]  ;;  %v281_v35 = vld [vmem:[%s3079_s0 + $0x818] sm:$0xff]  ;;  %v1573_v37 = vpack.c.bf16 %v284_v30, %v269_v29  ;;  %v283_v38 = vld [vmem:[%s3079_s0 + $0x828] sm:$0xff] }
  0x33   :  { %1378 = vmatprep.mubr.msk.f32.mxu1 %vm316_vm0, %v2197_v25  ;;  %1518 = vmatprep.subr.bf16.mxu0 %v1517_v32  ;;  %v1571_v32 = vpack.c.bf16 %v253_v26, %v238_v22  ;;  %v1537_v33 = vpack.c.bf16 %v282_v28, %v267_v27  ;;  %v266_v34 = vld [vmem:[%s3079_s0 + $0x7a0] sm:$0xff]  ;;  %v48_v43 = vld [vmem:[%s3079_s0 + $0xd0] sm:$0xff]  ;;  %v45_v48 = vld [vmem:[%s3079_s0 + $0xb8] sm:$0xff] }
  0x34   :  { %412 = vmatmul.mubr.f32.gmra.mrb[6].mxu0 %v2238_v39  ;;  %1554 = vmatprep.subr.bf16.mxu1 %v1553_v36  ;;  %v268_v36 = vld [vmem:[%s3079_s0 + $0x7b0] sm:$0xff]  ;;  %v1539_v44 = vpack.c.bf16 %v281_v35, %v266_v34  ;;  %v30_v47 = vld [vmem:[%s3079_s0 + $0x40] sm:$0xff]  ;;  %v47_v51 = vld [vmem:[%s3079_s0 + $0xc8] sm:$0xff] }
  0x35   :  { %501 = vmatmul.mubr.f32.gmra.mrb[6].mxu1 %v2238_v39  ;;  %1520 = vmatpush1.bf16.msra.mxu0 %v1519_v40  ;;  %v31_v40 = vld [vmem:[%s3079_s0 + $0x48] sm:$0xff]  ;;  %v1575_v45 = vpack.c.bf16 %v283_v38, %v268_v36  ;;  %v32_v50 = vld [vmem:[%s3079_s0 + $0x50] sm:$0xff]  ;;  %v78_v56 = vld [vmem:[%s3079_s0 + $0x1c0] sm:$0xff] }
  0x36   :  { %1556 = vmatpush1.bf16.msra.mxu1 %v1555_v41  ;;  %1522 = vmatprep.subr.bf16.mxu0 %v1521_v42  ;;  %v46_v41 = vld [vmem:[%s3079_s0 + $0xc0] sm:$0xff]  ;;  %v33_v42 = vld [vmem:[%s3079_s0 + $0x58] sm:$0xff]  ;;  %v63_v55 = vld [vmem:[%s3079_s0 + $0x148] sm:$0xff]  ;;  %v1615_v57 = vpack.c.bf16 %v47_v51, %v32_v50 }
  0x37   :  { %1558 = vmatprep.subr.bf16.mxu1 %v1557_v46  ;;  %1379 = vmatprep.mubr.msk.f32.mxu0 %vm316_vm0, %v2041_v24  ;;  %v1577_v46 = vpack.c.bf16 %v46_v41, %v31_v40  ;;  %v1613_v49 = vpack.c.bf16 %v48_v43, %v33_v42  ;;  %v75_v60 = vld [vmem:[%s3079_s0 + $0x1a8] sm:$0xff]  ;;  %v62_v62 = vld [vmem:[%s3079_s0 + $0x140] sm:$0xff]  ;;  %v77_v63 = vld [vmem:[%s3079_s0 + $0x1b8] sm:$0xff]  ;;  %v1617_v0 = vpack.c.bf16 %v78_v56, %v63_v55 }
  0x38   :  { %1383 = vmatprep.mubr.msk.f32.mxu1 %vm316_vm0, %v2041_v24  ;;  %v93_v5 = vld [vmem:[%s3079_s0 + $0x238] sm:$0xff]  ;;  %v108_v6 = vld [vmem:[%s3079_s0 + $0x2b0] sm:$0xff]  ;;  %v1619_v7 = vpack.c.bf16 %v77_v63, %v62_v62  ;;  %v107_v13 = vld [vmem:[%s3079_s0 + $0x2a8] sm:$0xff] }
  0x39   :  { %1524 = vmatpush1.bf16.msra.mxu0 %v1523_v52  ;;  %v61_v52 = vld [vmem:[%s3079_s0 + $0x138] sm:$0xff]  ;;  %v92_v12 = vld [vmem:[%s3079_s0 + $0x230] sm:$0xff]  ;;  %v1621_v14 = vpack.c.bf16 %v108_v6, %v93_v5  ;;  %v123_v20 = vld [vmem:[%s3079_s0 + $0x328] sm:$0xff] }
  0x3a   :  { %1560 = vmatpush1.bf16.msra.mxu1 %v1559_v53  ;;  %1526 = vmatprep.subr.bf16.mxu0 %v1525_v54  ;;  %v76_v53 = vld [vmem:[%s3079_s0 + $0x1b0] sm:$0xff]  ;;  %v1579_v54 = vpack.c.bf16 %v45_v48, %v30_v47  ;;  %v105_v10 = vld [vmem:[%s3079_s0 + $0x298] sm:$0xff]  ;;  %v138_v21 = vld [vmem:[%s3079_s0 + $0x3a0] sm:$0xff]  ;;  %v1623_v22 = vpack.c.bf16 %v107_v13, %v92_v12 }
  0x3b   :  { %1562 = vmatprep.subr.bf16.mxu1 %v1561_v59  ;;  %v60_v59 = vld [vmem:[%s3079_s0 + $0x130] sm:$0xff]  ;;  %v1581_v61 = vpack.c.bf16 %v76_v53, %v61_v52  ;;  %v135_v26 = vld [vmem:[%s3079_s0 + $0x388] sm:$0xff]  ;;  %v122_v27 = vld [vmem:[%s3079_s0 + $0x320] sm:$0xff] }
  0x3c   :  { %v137_v29 = vld [vmem:[%s3079_s0 + $0x398] sm:$0xff]  ;;  %v151_v30 = vld [vmem:[%s3079_s0 + $0x408] sm:$0xff]  ;;  %v168_v34 = vld [vmem:[%s3079_s0 + $0x490] sm:$0xff] }
  0x3d   :  { %1528 = vmatpush1.bf16.msra.mxu0 %v1527_v2  ;;  %v91_v2 = vld [vmem:[%s3079_s0 + $0x228] sm:$0xff]  ;;  %v1627_v36 = vpack.c.bf16 %v137_v29, %v122_v27  ;;  %v150_v38 = vld [vmem:[%s3079_s0 + $0x400] sm:$0xff]  ;;  %v165_v40 = vld [vmem:[%s3079_s0 + $0x478] sm:$0xff] }
  0x3e   :  { %1564 = vmatpush1.bf16.msra.mxu1 %v1563_v3  ;;  %1530 = vmatprep.subr.bf16.mxu0 %v1529_v4  ;;  %v106_v3 = vld [vmem:[%s3079_s0 + $0x2a0] sm:$0xff]  ;;  %v1583_v4 = vpack.c.bf16 %v75_v60, %v60_v59  ;;  %v152_v41 = vld [vmem:[%s3079_s0 + $0x410] sm:$0xff]  ;;  %v167_v43 = vld [vmem:[%s3079_s0 + $0x488] sm:$0xff]  ;;  %v1595_v48 = vpack.c.bf16 %v165_v40, %v150_v38 }
  0x3f   :  { %1566 = vmatprep.subr.bf16.mxu1 %v1565_v9  ;;  %v90_v9 = vld [vmem:[%s3079_s0 + $0x220] sm:$0xff]  ;;  %v1585_v11 = vpack.c.bf16 %v106_v3, %v91_v2  ;;  %v1631_v51 = vpack.c.bf16 %v167_v43, %v152_v41  ;;  %v195_v53 = vld [vmem:[%s3079_s0 + $0x568] sm:$0xff]  ;;  %v294_v55 = vld [vmem:[%s3081_s2 + $0x10] sm:$0xff] }
  0x40   :  { %v198_v47 = vld [vmem:[%s3079_s0 + $0x580] sm:$0xff]  ;;  %v211_v59 = vld [vmem:[%s3079_s0 + $0x5e8] sm:$0xff]  ;;  %v228_v62 = vld [vmem:[%s3079_s0 + $0x670] sm:$0xff]  ;;  %308 = vperm.xlu0 %1714, %v294_v55   ;;  %v1837_v55 = vmov 0.0|0.0  }
  0x41   :  { %1532 = vmatpush1.bf16.msra.mxu0 %v1531_v16  ;;  %v121_v16 = vld [vmem:[%s3079_s0 + $0x318] sm:$0xff]  ;;  %v292_v50 = vld [vmem:[%s3081_s2] sm:$0xff]  ;;  %v212_v5 = vld [vmem:[%s3079_s0 + $0x5f0] sm:$0xff] }
  0x42   :  { %1568 = vmatpush1.bf16.msra.mxu1 %v1567_v17  ;;  %1534 = vmatprep.subr.bf16.mxu0 %v1533_v18  ;;  %v136_v17 = vld [vmem:[%s3079_s0 + $0x390] sm:$0xff]  ;;  %v1587_v18 = vpack.c.bf16 %v105_v10, %v90_v9  ;;  %v226_v60 = vld [vmem:[%s3079_s0 + $0x660] sm:$0xff]  ;;  %v225_v2 = vld [vmem:[%s3079_s0 + $0x658] sm:$0xff] }
  0x43   :  { %1570 = vmatprep.subr.bf16.mxu1 %v1569_v23  ;;  %v120_v23 = vld [vmem:[%s3079_s0 + $0x310] sm:$0xff]  ;;  %v1589_v28 = vpack.c.bf16 %v136_v17, %v121_v16  ;;  %298 = vperm.xlu1 %1715, %v292_v50   ;;  %v295_v6 = vld [vmem:[%s3081_s2 + $0x18] sm:$0xff]  ;;  %v227_v10 = vld [vmem:[%s3079_s0 + $0x668] sm:$0xff] }
  0x44   :  { %v1591_v35 = vpack.c.bf16 %v135_v26, %v120_v23  ;;  %v256_v12 = vld [vmem:[%s3079_s0 + $0x750] sm:$0xff]  ;;  %v243_v13 = vld [vmem:[%s3079_s0 + $0x6e8] sm:$0xff]  ;;  %313 = vperm.xlu0 %1714, %v295_v6   ;;  %v1639_v17 = vpack.c.bf16 %v227_v10, %v212_v5  ;;  %v257_v26 = vld [vmem:[%s3079_s0 + $0x758] sm:$0xff] }
  0x45   :  { %1536 = vmatpush1.bf16.msra.mxu0 %v1535_v31  ;;  %v166_v31 = vld [vmem:[%s3079_s0 + $0x480] sm:$0xff]  ;;  %v271_v27 = vld [vmem:[%s3079_s0 + $0x7c8] sm:$0xff]  ;;  %v273_v29 = vld [vmem:[%s3079_s0 + $0x7d8] sm:$0xff] }
  0x46   :  { %1572 = vmatpush1.bf16.msra.mxu1 %v1571_v32  ;;  %1538 = vmatprep.subr.bf16.mxu0 %v1537_v33  ;;  %v1625_v32 = vpack.c.bf16 %v138_v21, %v123_v20  ;;  %v153_v33 = vld [vmem:[%s3079_s0 + $0x418] sm:$0xff]  ;;  %v240_v20 = vld [vmem:[%s3079_s0 + $0x6d0] sm:$0xff]  ;;  %v255_v21 = vld [vmem:[%s3079_s0 + $0x748] sm:$0xff] }
  0x47   :  { %1574 = vmatprep.subr.bf16.mxu1 %v1573_v37  ;;  %v1593_v37 = vpack.c.bf16 %v166_v31, %v151_v30  ;;  %v1629_v42 = vpack.c.bf16 %v168_v34, %v153_v33  ;;  %v288_v30 = vld [vmem:[%s3079_s0 + $0x850] sm:$0xff]  ;;  %v1607_v31 = vpack.c.bf16 %v255_v21, %v240_v20  ;;  %v270_v34 = vld [vmem:[%s3079_s0 + $0x7c0] sm:$0xff]  ;;  %v287_v38 = vld [vmem:[%s3079_s0 + $0x848] sm:$0xff] }
  0x48   :  { %v35_v40 = vld [vmem:[%s3079_s0 + $0x68] sm:$0xff]  ;;  %v50_v41 = vld [vmem:[%s3079_s0 + $0xe0] sm:$0xff]  ;;  %v80_v50 = vld [vmem:[%s3079_s0 + $0x1d0] sm:$0xff] }
  0x49   :  { %1540 = vmatpush1.bf16.msra.mxu0 %v1539_v44  ;;  %v181_v44 = vld [vmem:[%s3079_s0 + $0x4f8] sm:$0xff]  ;;  %v111_v5 = vld [vmem:[%s3079_s0 + $0x2c8] sm:$0xff] }
  0x4a   :  { %1576 = vmatpush1.bf16.msra.mxu1 %v1575_v45  ;;  %1578 = vmatprep.subr.bf16.mxu0 %v1577_v46  ;;  %v196_v45 = vld [vmem:[%s3079_s0 + $0x570] sm:$0xff]  ;;  %v183_v46 = vld [vmem:[%s3079_s0 + $0x508] sm:$0xff]  ;;  %v125_v6 = vld [vmem:[%s3079_s0 + $0x338] sm:$0xff] }
  0x4b   :  { %1614 = vmatprep.subr.bf16.mxu1 %v1613_v49  ;;  %v180_v49 = vld [vmem:[%s3079_s0 + $0x4f0] sm:$0xff]  ;;  %v1597_v52 = vpack.c.bf16 %v196_v45, %v181_v44  ;;  %v1633_v56 = vpack.c.bf16 %v198_v47, %v183_v46  ;;  %v1649_v44 = vpack.c.bf16 %v50_v41, %v35_v40  ;;  %v34_v45 = vld [vmem:[%s3079_s0 + $0x60] sm:$0xff]  ;;  %v49_v46 = vld [vmem:[%s3079_s0 + $0xd8] sm:$0xff] }
  0x4c   :  { %572 = vmatmul.mubr.f32.vlgmr.msra.gmra.mrb[8].mxu0 %v2116_v58  ;;  %v1599_v63 = vpack.c.bf16 %v195_v53, %v180_v49  ;;  %v36_v47 = vld [vmem:[%s3079_s0 + $0x70] sm:$0xff]  ;;  %v65_v49 = vld [vmem:[%s3079_s0 + $0x158] sm:$0xff]  ;;  %v230_v40 = vld [vmem:[%s3079_s0 + $0x680] sm:$0xff] }
  0x4d   :  { %661 = vmatmul.mubr.f32.vlgmr.msra.gmra.mrb[8].mxu1 %v2116_v58  ;;  %1580 = vmatpush1.bf16.msra.mxu0 %v1579_v54  ;;  %v182_v54 = vld [vmem:[%s3079_s0 + $0x500] sm:$0xff]  ;;  %v64_v53 = vld [vmem:[%s3079_s0 + $0x150] sm:$0xff] }
  0x4e   :  { %1616 = vmatpush1.bf16.msra.mxu1 %v1615_v57  ;;  %1380 = vmatprep.mubr.msk.f32.mxu0 %vm316_vm0, %v2133_v1  ;;  %v197_v57 = vld [vmem:[%s3079_s0 + $0x578] sm:$0xff] }
  0x4f   :  { %1384 = vmatprep.mubr.msk.f32.mxu1 %vm316_vm0, %v2133_v1  ;;  %1582 = vmatprep.subr.bf16.mxu0 %v1581_v61  ;;  %v213_v61 = vld [vmem:[%s3079_s0 + $0x5f8] sm:$0xff]  ;;  %v1635_v3 = vpack.c.bf16 %v197_v57, %v182_v54  ;;  %v79_v54 = vld [vmem:[%s3079_s0 + $0x1c8] sm:$0xff]  ;;  %v66_v57 = vld [vmem:[%s3079_s0 + $0x160] sm:$0xff] }
  0x50   :  { %578 = vmatmul.mubr.f32.gmra.mrb[10].mxu0 %v2152_v8  ;;  %1618 = vmatprep.subr.bf16.mxu1 %v1617_v0  ;;  %v210_v0 = vld [vmem:[%s3079_s0 + $0x5e0] sm:$0xff]  ;;  %v1637_v9 = vpack.c.bf16 %v228_v62, %v213_v61  ;;  %v1655_v62 = vpack.c.bf16 %v79_v54, %v64_v53  ;;  %v259_v53 = vld [vmem:[%s3079_s0 + $0x768] sm:$0xff] }
  0x51   :  { %667 = vmatmul.mubr.f32.gmra.mrb[10].mxu1 %v2152_v8  ;;  %1584 = vmatpush1.bf16.msra.mxu0 %v1583_v4  ;;  %v1601_v4 = vpack.c.bf16 %v226_v60, %v211_v59  ;;  %v1603_v16 = vpack.c.bf16 %v225_v2, %v210_v0  ;;  %v81_v59 = vld [vmem:[%s3079_s0 + $0x1d8] sm:$0xff]  ;;  %v95_v60 = vld [vmem:[%s3079_s0 + $0x248] sm:$0xff]  ;;  %v110_v61 = vld [vmem:[%s3079_s0 + $0x2c0] sm:$0xff] }
  0x52   :  { %1620 = vmatpush1.bf16.msra.mxu1 %v1619_v7  ;;  %1381 = vmatprep.mubr.msk.f32.mxu0 %vm316_vm0, %v2173_v15  ;;  %v293_v7 = vld [vmem:[%s3081_s2 + $0x8] sm:$0xff]  ;;  %v94_v0 = vld [vmem:[%s3079_s0 + $0x240] sm:$0xff]  ;;  %v109_v2 = vld [vmem:[%s3079_s0 + $0x2b8] sm:$0xff] }
  0x53   :  { %1385 = vmatprep.mubr.msk.f32.mxu1 %vm316_vm0, %v2173_v15  ;;  %1586 = vmatprep.subr.bf16.mxu0 %v1585_v11  ;;  %v241_v11 = vld [vmem:[%s3079_s0 + $0x6d8] sm:$0xff]  ;;  %v246_v54 = vld [vmem:[%s3079_s0 + $0x700] sm:$0xff] }
  0x54   :  { %584 = vmatmul.mubr.f32.gmra.mrb[12].mxu0 %v2185_v19  ;;  %1622 = vmatprep.subr.bf16.mxu1 %v1621_v14  ;;  %v258_v14 = vld [vmem:[%s3079_s0 + $0x760] sm:$0xff] }
  0x55   :  { %673 = vmatmul.mubr.f32.gmra.mrb[12].mxu1 %v2185_v19  ;;  %1588 = vmatpush1.bf16.msra.mxu0 %v1587_v18  ;;  %v1605_v18 = vpack.c.bf16 %v256_v12, %v241_v11  ;;  %v1641_v23 = vpack.c.bf16 %v258_v14, %v243_v13  ;;  %v124_v11 = vld [vmem:[%s3079_s0 + $0x330] sm:$0xff]  ;;  %v139_v12 = vld [vmem:[%s3079_s0 + $0x3a8] sm:$0xff]  ;;  %v126_v13 = vld [vmem:[%s3079_s0 + $0x340] sm:$0xff] }
  0x56   :  { %1624 = vmatpush1.bf16.msra.mxu1 %v1623_v22  ;;  %1382 = vmatprep.mubr.msk.f32.mxu0 %vm316_vm0, %v2197_v25  ;;  %v242_v22 = vld [vmem:[%s3079_s0 + $0x6e0] sm:$0xff]  ;;  %v1663_v20 = vpack.c.bf16 %v139_v12, %v124_v11 }
  0x57   :  { %1386 = vmatprep.mubr.msk.f32.mxu1 %vm316_vm0, %v2197_v25  ;;  %1590 = vmatprep.subr.bf16.mxu0 %v1589_v28  ;;  %v286_v28 = vld [vmem:[%s3079_s0 + $0x840] sm:$0xff] }
  0x58   :  { %590 = vmatmul.mubr.f32.gmra.mrb[14].mxu0 %v2238_v39  ;;  %1626 = vmatprep.subr.bf16.mxu1 %v1625_v32  ;;  %v1643_v32 = vpack.c.bf16 %v257_v26, %v242_v22  ;;  %v1609_v33 = vpack.c.bf16 %v286_v28, %v271_v27  ;;  %v169_v26 = vld [vmem:[%s3079_s0 + $0x498] sm:$0xff]  ;;  %v156_v27 = vld [vmem:[%s3079_s0 + $0x430] sm:$0xff]  ;;  %v171_v28 = vld [vmem:[%s3079_s0 + $0x4a8] sm:$0xff] }
  0x59   :  { %679 = vmatmul.mubr.f32.gmra.mrb[14].mxu1 %v2238_v39  ;;  %1592 = vmatpush1.bf16.msra.mxu0 %v1591_v35  ;;  %v285_v35 = vld [vmem:[%s3079_s0 + $0x838] sm:$0xff] }
  0x5a   :  { %1628 = vmatpush1.bf16.msra.mxu1 %v1627_v36  ;;  %1594 = vmatprep.subr.bf16.mxu0 %v1593_v37  ;;  %v272_v36 = vld [vmem:[%s3079_s0 + $0x7d0] sm:$0xff]  ;;  %v1645_v37 = vpack.c.bf16 %v288_v30, %v273_v29  ;;  %v185_v29 = vld [vmem:[%s3079_s0 + $0x518] sm:$0xff] }
  0x5b   :  { %1630 = vmatprep.subr.bf16.mxu1 %v1629_v42  ;;  %1387 = vmatprep.mubr.msk.f32.mxu0 %vm316_vm0, %v2041_v24  ;;  %v1611_v42 = vpack.c.bf16 %v285_v35, %v270_v34  ;;  %v1647_v43 = vpack.c.bf16 %v287_v38, %v272_v36  ;;  %v200_v30 = vld [vmem:[%s3079_s0 + $0x590] sm:$0xff]  ;;  %v199_v35 = vld [vmem:[%s3079_s0 + $0x588] sm:$0xff]  ;;  %v186_v36 = vld [vmem:[%s3079_s0 + $0x520] sm:$0xff] }
  0x5c   :  { %1391 = vmatprep.mubr.msk.f32.mxu1 %vm316_vm0, %v2041_v24  ;;  %303 = vperm.xlu1 %1715, %v293_v7   ;;  %v140_v7 = vld [vmem:[%s3079_s0 + $0x3b0] sm:$0xff]  ;;  %v215_v38 = vld [vmem:[%s3079_s0 + $0x608] sm:$0xff] }
  0x5d   :  { %1596 = vmatpush1.bf16.msra.mxu0 %v1595_v48  ;;  %v51_v48 = vld [vmem:[%s3079_s0 + $0xe8] sm:$0xff]  ;;  %v1661_v14 = vpack.c.bf16 %v140_v7, %v125_v6  ;;  %v184_v34 = vld [vmem:[%s3079_s0 + $0x510] sm:$0xff] }
  0x5e   :  { %1632 = vmatpush1.bf16.msra.mxu1 %v1631_v51  ;;  %1598 = vmatprep.subr.bf16.mxu0 %v1597_v52  ;;  %v1651_v51 = vpack.c.bf16 %v49_v46, %v34_v45  ;;  %v1686_v52 = vpack.c.bf16 %v51_v48, %v36_v47  ;;  %v1671_v41 = vpack.c.bf16 %v199_v35, %v184_v34  ;;  %v229_v45 = vld [vmem:[%s3079_s0 + $0x678] sm:$0xff]  ;;  %v216_v46 = vld [vmem:[%s3079_s0 + $0x610] sm:$0xff] }
  0x5f   :  { %1634 = vmatprep.subr.bf16.mxu1 %v1633_v56  ;;  %v1653_v56 = vpack.c.bf16 %v80_v50, %v65_v49  ;;  %v245_v47 = vld [vmem:[%s3079_s0 + $0x6f8] sm:$0xff]  ;;  %v260_v48 = vld [vmem:[%s3079_s0 + $0x770] sm:$0xff] }
  0x61   :  { %1600 = vmatpush1.bf16.msra.mxu0 %v1599_v63  ;;  %v1689_v63 = vpack.c.bf16 %v81_v59, %v66_v57  ;;  %v275_v57 = vld [vmem:[%s3079_s0 + $0x7e8] sm:$0xff]  ;;  %v290_v59 = vld [vmem:[%s3079_s0 + $0x860] sm:$0xff] }
  0x62   :  { %1636 = vmatpush1.bf16.msra.mxu1 %v1635_v3  ;;  %1602 = vmatprep.subr.bf16.mxu0 %v1601_v4  ;;  %v1657_v3 = vpack.c.bf16 %v110_v61, %v95_v60  ;;  %v96_v4 = vld [vmem:[%s3079_s0 + $0x250] sm:$0xff] }
  0x63   :  { %1638 = vmatprep.subr.bf16.mxu1 %v1637_v9  ;;  %v1659_v9 = vpack.c.bf16 %v109_v2, %v94_v0  ;;  %v1692_v10 = vpack.c.bf16 %v111_v5, %v96_v4  ;;  %v289_v0 = vld [vmem:[%s3079_s0 + $0x858] sm:$0xff]  ;;  %v276_v2 = vld [vmem:[%s3079_s0 + $0x7f0] sm:$0xff] }
  0x65   :  { %1604 = vmatpush1.bf16.msra.mxu0 %v1603_v16  ;;  %v141_v16 = vld [vmem:[%s3079_s0 + $0x3b8] sm:$0xff] }
  0x66   :  { %1640 = vmatpush1.bf16.msra.mxu1 %v1639_v17  ;;  %1606 = vmatprep.subr.bf16.mxu0 %v1605_v18  ;;  %v155_v17 = vld [vmem:[%s3079_s0 + $0x428] sm:$0xff]  ;;  %v170_v18 = vld [vmem:[%s3079_s0 + $0x4a0] sm:$0xff]  ;;  %v1695_v21 = vpack.c.bf16 %v141_v16, %v126_v13 }
  0x67   :  { %1642 = vmatprep.subr.bf16.mxu1 %v1641_v23  ;;  %v1665_v22 = vpack.c.bf16 %v170_v18, %v155_v17  ;;  %v154_v23 = vld [vmem:[%s3079_s0 + $0x420] sm:$0xff] }
  0x69   :  { %1608 = vmatpush1.bf16.msra.mxu0 %v1607_v31  ;;  %v1667_v31 = vpack.c.bf16 %v169_v26, %v154_v23 }
  0x6a   :  { %1644 = vmatpush1.bf16.msra.mxu1 %v1643_v32  ;;  %1610 = vmatprep.subr.bf16.mxu0 %v1609_v33  ;;  %v1698_v32 = vpack.c.bf16 %v171_v28, %v156_v27  ;;  %v1669_v33 = vpack.c.bf16 %v200_v30, %v185_v29 }
  0x6b   :  { %1646 = vmatprep.subr.bf16.mxu1 %v1645_v37  ;;  %v201_v37 = vld [vmem:[%s3079_s0 + $0x598] sm:$0xff] }
  0x6d   :  { %1612 = vmatpush1.bf16.msra.mxu0 %v1611_v42  ;;  %v1701_v42 = vpack.c.bf16 %v201_v37, %v186_v36 }
  0x6e   :  { %1648 = vmatpush1.bf16.msra.mxu1 %v1647_v43  ;;  %1650 = vmatprep.subr.bf16.mxu0 %v1649_v44  ;;  %v1673_v43 = vpack.c.bf16 %v230_v40, %v215_v38  ;;  %v214_v44 = vld [vmem:[%s3079_s0 + $0x600] sm:$0xff] }
  0x6f   :  { %1685 = vmatprep.subr.bf16.mxu1 %v1837_v55  ;;  %v1675_v49 = vpack.c.bf16 %v229_v45, %v214_v44 }
  0x70   :  { %750 = vmatmul.mubr.f32.vlgmr.msra.gmra.mrb[16].mxu0 %v2116_v58 }
  0x71   :  { %839 = vmatmul.mubr.f32.vlgmr.msra.gmra.mrb[16].mxu1 %v2116_v58  ;;  %1652 = vmatpush1.bf16.msra.mxu0 %v1651_v51  ;;  %v1677_v51 = vpack.c.bf16 %v260_v48, %v245_v47 }
  0x72   :  { %1687 = vmatpush1.bf16.msra.mxu1 %v1686_v52  ;;  %1388 = vmatprep.mubr.msk.f32.mxu0 %vm316_vm0, %v2133_v1  ;;  %v244_v52 = vld [vmem:[%s3079_s0 + $0x6f0] sm:$0xff] }
  0x73   :  { %1392 = vmatprep.mubr.msk.f32.mxu1 %vm316_vm0, %v2133_v1  ;;  %1654 = vmatprep.subr.bf16.mxu0 %v1653_v56  ;;  %v261_v56 = vld [vmem:[%s3079_s0 + $0x778] sm:$0xff]  ;;  %v1679_v60 = vpack.c.bf16 %v259_v53, %v244_v52 }
  0x74   :  { %756 = vmatmul.mubr.f32.gmra.mrb[18].mxu0 %v2152_v8  ;;  %1688 = vmatprep.subr.bf16.mxu1 %v1837_v55  ;;  %v1707_v61 = vpack.c.bf16 %v261_v56, %v246_v54 }
  0x75   :  { %845 = vmatmul.mubr.f32.gmra.mrb[18].mxu1 %v2152_v8  ;;  %1656 = vmatpush1.bf16.msra.mxu0 %v1655_v62  ;;  %v1681_v62 = vpack.c.bf16 %v290_v59, %v275_v57 }
  0x76   :  { %1690 = vmatpush1.bf16.msra.mxu1 %v1689_v63  ;;  %1389 = vmatprep.mubr.msk.f32.mxu0 %vm316_vm0, %v2173_v15  ;;  %v274_v63 = vld [vmem:[%s3079_s0 + $0x7e0] sm:$0xff] }
  0x77   :  { %1393 = vmatprep.mubr.msk.f32.mxu1 %vm316_vm0, %v2173_v15  ;;  %1658 = vmatprep.subr.bf16.mxu0 %v1657_v3  ;;  %v291_v3 = vld [vmem:[%s3079_s0 + $0x868] sm:$0xff]  ;;  %v1683_v4 = vpack.c.bf16 %v289_v0, %v274_v63 }
  0x78   :  { %762 = vmatmul.mubr.f32.gmra.mrb[20].mxu0 %v2185_v19  ;;  %1691 = vmatprep.subr.bf16.mxu1 %v1837_v55  ;;  %v1710_v5 = vpack.c.bf16 %v291_v3, %v276_v2 }
  0x79   :  { %851 = vmatmul.mubr.f32.gmra.mrb[20].mxu1 %v2185_v19  ;;  %1660 = vmatpush1.bf16.msra.mxu0 %v1659_v9 }
  0x7a   :  { %1693 = vmatpush1.bf16.msra.mxu1 %v1692_v10  ;;  %1390 = vmatprep.mubr.msk.f32.mxu0 %vm316_vm0, %v2197_v25 }
  0x7b   :  { %1394 = vmatprep.mubr.msk.f32.mxu1 %vm316_vm0, %v2197_v25  ;;  %1662 = vmatprep.subr.bf16.mxu0 %v1661_v14 }
  0x7c   :  { %768 = vmatmul.mubr.f32.gmra.mrb[22].mxu0 %v2238_v39  ;;  %1694 = vmatprep.subr.bf16.mxu1 %v1837_v55 }
  0x7d   :  { %857 = vmatmul.mubr.f32.gmra.mrb[22].mxu1 %v2238_v39  ;;  %1664 = vmatpush1.bf16.msra.mxu0 %v1663_v20 }
  0x7e   :  { %1696 = vmatpush1.bf16.msra.mxu1 %v1695_v21  ;;  %1666 = vmatprep.subr.bf16.mxu0 %v1665_v22 }
  0x7f   :  { %1697 = vmatprep.subr.bf16.mxu1 %v1837_v55  ;;  %1395 = vmatprep.mubr.msk.f32.mxu0 %vm316_vm0, %v2041_v24 }
  0x80   :  { %1399 = vmatprep.mubr.msk.f32.mxu1 %vm316_vm0, %v2041_v24  ;;  %v231_v24 = vld [vmem:[%s3079_s0 + $0x688] sm:$0xff] }
  0x81   :  { %1668 = vmatpush1.bf16.msra.mxu0 %v1667_v31  ;;  %v1704_v50 = vpack.c.bf16 %v231_v24, %v216_v46 }
  0x82   :  { %1699 = vmatpush1.bf16.msra.mxu1 %v1698_v32  ;;  %1670 = vmatprep.subr.bf16.mxu0 %v1669_v33 }
  0x83   :  { %1700 = vmatprep.subr.bf16.mxu1 %v1837_v55 }
  0x85   :  { %1672 = vmatpush1.bf16.msra.mxu0 %v1671_v41 }
  0x86   :  { %1702 = vmatpush1.bf16.msra.mxu1 %v1701_v42  ;;  %1674 = vmatprep.subr.bf16.mxu0 %v1673_v43 }
  0x87   :  { %1703 = vmatprep.subr.bf16.mxu1 %v1837_v55 }
  0x89   :  { %1676 = vmatpush1.bf16.msra.mxu0 %v1675_v49 }
  0x8a   :  { %1705 = vmatpush1.bf16.msra.mxu1 %v1704_v50  ;;  %1678 = vmatprep.subr.bf16.mxu0 %v1677_v51 }
  0x8b   :  { %1706 = vmatprep.subr.bf16.mxu1 %v1837_v55 }
  0x8d   :  { %1680 = vmatpush1.bf16.msra.mxu0 %v1679_v60 }
  0x8e   :  { %1708 = vmatpush1.bf16.msra.mxu1 %v1707_v61  ;;  %1682 = vmatprep.subr.bf16.mxu0 %v1681_v62 }
  0x8f   :  { %1709 = vmatprep.subr.bf16.mxu1 %v1837_v55 }
  0x91   :  { %1684 = vmatpush1.bf16.msra.mxu0 %v1683_v4 }
  0x92   :  { %1711 = vmatpush1.bf16.msra.mxu1 %v1710_v5 }
  0x94   :  { %928 = vmatmul.mubr.f32.vlgmr.msra.gmra.mrb[24].mxu0 %v2116_v58 }
  0x95   :  { %1017 = vmatmul.mubr.f32.vlgmr.msra.gmra.mrb[24].mxu1 %v2116_v58  ;;  %1396 = vmatprep.mubr.msk.f32.mxu0 %vm316_vm0, %v2133_v1 }
  0x96   :  { %1400 = vmatprep.mubr.msk.f32.mxu1 %vm316_vm0, %v2133_v1 }
  0x98   :  { %934 = vmatmul.mubr.f32.gmra.mrb[26].mxu0 %v2152_v8 }
  0x99   :  { %1022 = vmatmul.mubr.f32.gmra.mrb[26].mxu1 %v2152_v8  ;;  %1397 = vmatprep.mubr.msk.f32.mxu0 %vm316_vm0, %v2173_v15 }
  0x9a   :  { %1401 = vmatprep.mubr.msk.f32.mxu1 %vm316_vm0, %v2173_v15 }
  0x9c   :  { %940 = vmatmul.mubr.f32.gmra.mrb[28].mxu0 %v2185_v19 }
  0x9d   :  { %1027 = vmatmul.mubr.f32.gmra.mrb[28].mxu1 %v2185_v19  ;;  %1398 = vmatprep.mubr.msk.f32.mxu0 %vm316_vm0, %v2197_v25 }
  0x9e   :  { %1402 = vmatprep.mubr.msk.f32.mxu1 %vm316_vm0, %v2197_v25 }
  0xa0   :  { %946 = vmatmul.mubr.f32.gmra.mrb[30].mxu0 %v2238_v39 }
  0xa1   :  { %1032 = vmatmul.mubr.f32.gmra.mrb[30].mxu1 %v2238_v39 }
  0xbf   :  { %v2827_v15 = vpop.permute.xlu0 %308 }
  0xc2   :  { %v2847_v42 = vpop.permute.xlu1 %298 }
  0xc3   :  { %v2840_v16 = vpop.permute.xlu0 %313 }
  0xdb   :  { %v2851_v53 = vpop.permute.xlu1 %303 }
  0xfb   :  { %v395_v58 = vpop.f32.mrb[0].mxu0 }
  0xfc   :  { %v484_v1 = vpop.f32.mrb[0].mxu1  ;;  %v397_v8 = vpop.f32.mrb[1].mxu0  ;;  %v396_v48 = vadd.f32 %v395_v58, %v2847_v42 }
  0xfd   :  { %v2825_v55 = vpop.f32.mrb[1].mxu1  ;;  %v485_v51 = vadd.f32 %v484_v1, %v2847_v42  ;;  %v398_v56 = vadd.f32 %v397_v8, %v2847_v42 }
  0xfe   :  { %v487_v59 = vadd.f32 %v2825_v55, %v2847_v42  ;;  %v1247_v61 = vmul.f32 0.01, %v396_v48  ;;  %vm1217_vm1 = vcmp.gt.f32.partialorder %v396_v48, 0.0 }
  0xff   :  { %v2829_v6 = vpop.f32.mrb[2].mxu0  ;;  %v1249_v63 = vmul.f32 0.01, %v485_v51  ;;  %vm1219_vm2 = vcmp.gt.f32.partialorder %v485_v51, 0.0  ;;  %v1248_v2 = vmul.f32 0.01, %v398_v56 }
 0x100   :  { %v2831_v19 = vpop.f32.mrb[2].mxu1  ;;  %v2833_v7 = vpop.f32.mrb[3].mxu0  ;;  %v402_v62 = vadd.f32 %v2829_v6, %v2851_v53  ;;  %vm1218_vm3 = vcmp.gt.f32.partialorder %v398_v56, 0.0  ;;  %v1250_v4 = vmul.f32 0.01, %v487_v59  ;;  %v1277_v1 = vsel %vm1217_vm1, %v396_v48, %v1247_v61 }
 0x101   :  { %v2835_v9 = vpop.f32.mrb[3].mxu1  ;;  %v491_v0 = vadd.f32 %v2831_v19, %v2851_v53  ;;  %v404_v3 = vadd.f32 %v2833_v7, %v2851_v53  ;;  %vm1220_vm4 = vcmp.gt.f32.partialorder %v487_v59, 0.0 }
 0x102   :  { %v493_v5 = vadd.f32 %v2835_v9, %v2851_v53  ;;  %v1262_v8 = vmul.f32 0.01, %v402_v62  ;;  %vm1232_vm5 = vcmp.gt.f32.partialorder %v402_v62, 0.0 }
 0x103   :  { %v407_v25 = vpop.f32.mrb[4].mxu0  ;;  %v1264_v19 = vmul.f32 0.01, %v491_v0  ;;  %vm1234_vm6 = vcmp.gt.f32.partialorder %v491_v0, 0.0  ;;  %v1263_v9 = vmul.f32 0.01, %v404_v3 }
 0x104   :  { %v408_v10 = vadd.f32 %v407_v25, %v2827_v15  ;;  %v496_v11 = vpop.f32.mrb[4].mxu1  ;;  %v409_v39 = vpop.f32.mrb[5].mxu0  ;;  %v1279_v25 = vsel %vm1219_vm2, %v485_v51, %v1249_v63  ;;  %vm1233_vm7 = vcmp.gt.f32.partialorder %v404_v3, 0.0  ;;  %vm1235_vm8 = vcmp.gt.f32.partialorder %v493_v5, 0.0 }
 0x105   :  { %v497_v12 = vadd.f32 %v496_v11, %v2827_v15  ;;  %v410_v13 = vadd.f32 %v409_v39, %v2827_v15  ;;  %v498_v14 = vpop.f32.mrb[5].mxu1 }
 0x106   :  { %v1403_v17 = vmul.f32 -1.442695, %v408_v10  ;;  %v499_v18 = vadd.f32 %v498_v14, %v2827_v15 }
 0x107   :  { %v1405_v20 = vmul.f32 -1.442695, %v497_v12  ;;  %v1404_v21 = vmul.f32 -1.442695, %v410_v13  ;;  %v413_v22 = vpop.f32.mrb[6].mxu0  ;;  %v1278_v12 = vsel %vm1218_vm3, %v398_v56, %v1248_v2 }
 0x108   :  { %1716 = vpow2.f32 %v1403_v17  ;;  %v1406_v23 = vmul.f32 -1.442695, %v499_v18  ;;  %v414_v26 = vadd.f32 %v413_v22, %v2840_v16  ;;  %v502_v27 = vpop.f32.mrb[6].mxu1  ;;  %v415_v28 = vpop.f32.mrb[7].mxu0  ;;  %v1280_v18 = vsel %vm1220_vm4, %v487_v59, %v1250_v4 }
 0x109   :  { %1718 = vpow2.f32 %v1405_v20  ;;  %v503_v29 = vadd.f32 %v502_v27, %v2840_v16  ;;  %v416_v30 = vadd.f32 %v415_v28, %v2840_v16  ;;  %v504_v31 = vpop.f32.mrb[7].mxu1 }
 0x10a   :  { %1720 = vpow2.f32 %v1404_v21  ;;  %v1418_v32 = vmul.f32 -1.442695, %v414_v26  ;;  %v505_v33 = vadd.f32 %v504_v31, %v2840_v16  ;;  %v1265_v21 = vmul.f32 0.01, %v493_v5 }
 0x10b   :  { %1722 = vpow2.f32 %v1406_v23  ;;  %v1420_v34 = vmul.f32 -1.442695, %v503_v29  ;;  %v1419_v35 = vmul.f32 -1.442695, %v416_v30  ;;  %v1292_v26 = vsel %vm1232_vm5, %v402_v62, %v1262_v8 }
 0x10c   :  { %1724 = vpow2.f32 %v1418_v32  ;;  %v1421_v36 = vmul.f32 -1.442695, %v505_v33  ;;  %v1294_v29 = vsel %vm1234_vm6, %v491_v0, %v1264_v19 }
 0x10d   :  { %1726 = vpow2.f32 %v1420_v34  ;;  %v1293_v34 = vsel %vm1233_vm7, %v404_v3, %v1263_v9 }
 0x10e   :  { %1728 = vpow2.f32 %v1419_v35 }
 0x10f   :  { %1730 = vpow2.f32 %v1421_v36 }
 0x112   :  { %v1717_v37 = vpop.eup %1716 }
 0x113   :  { %v1719_v38 = vpop.eup %1718  ;;  %v1127_v40 = vadd.f32 1.0, %v1717_v37 }
 0x114   :  { %v1721_v41 = vpop.eup %1720  ;;  %v1129_v43 = vadd.f32 1.0, %v1719_v38  ;;  %v1295_v38 = vsel %vm1235_vm8, %v493_v5, %v1265_v21 }
 0x115   :  { %v1723_v44 = vpop.eup %1722  ;;  %1732 = vrcp.f32 %v1127_v40  ;;  %v1128_v45 = vadd.f32 1.0, %v1721_v41 }
 0x116   :  { %v1725_v46 = vpop.eup %1724  ;;  %1734 = vrcp.f32 %v1129_v43  ;;  %v1130_v24 = vadd.f32 1.0, %v1723_v44 }
 0x117   :  { %v1727_v47 = vpop.eup %1726  ;;  %1736 = vrcp.f32 %v1128_v45  ;;  %v1142_v49 = vadd.f32 1.0, %v1725_v46 }
 0x118   :  { %v1729_v50 = vpop.eup %1728  ;;  %1738 = vrcp.f32 %v1130_v24  ;;  %v1144_v52 = vadd.f32 1.0, %v1727_v47 }
 0x119   :  { %v1731_v54 = vpop.eup %1730  ;;  %1740 = vrcp.f32 %v1142_v49  ;;  %v1143_v57 = vadd.f32 1.0, %v1729_v50 }
 0x11a   :  { %1742 = vrcp.f32 %v1144_v52  ;;  %v1145_v60 = vadd.f32 1.0, %v1731_v54 }
 0x11b   :  { %1744 = vrcp.f32 %v1143_v57 }
 0x11c   :  { %1746 = vrcp.f32 %v1145_v60 }
 0x11f   :  { %v1733_v58 = vpop.eup %1732  ;;  %v2864_v55 = vpop.f32.mrb[8].mxu0 }
 0x120   :  { %v1735_v6 = vpop.eup %1734  ;;  %v1307_v10 = vmul.f32 %v1733_v58, %v1277_v1  ;;  %v2866_v11 = vpop.f32.mrb[8].mxu1  ;;  %v574_v9 = vadd.f32 %v2864_v55, %v2847_v42 }
 0x121   :  { %v2868_v39 = vpop.f32.mrb[9].mxu0  ;;  %v1737_v7 = vpop.eup %1736  ;;  %v1309_v13 = vmul.f32 %v1735_v6, %v1279_v25 }
 0x122   :  { %v2871_v14 = vpop.f32.mrb[9].mxu1  ;;  %v1739_v17 = vpop.eup %1738  ;;  %1337 = vst [vmem:[%s3082_s3] sm:$0xff] %v1307_v10  ;;  %v1308_v20 = vmul.f32 %v1737_v7, %v1278_v12  ;;  %v1251_v55 = vmul.f32 0.01, %v574_v9  ;;  %vm1221_vm9 = vcmp.gt.f32.partialorder %v574_v9, 0.0 }
 0x123   :  { %v1741_v22 = vpop.eup %1740  ;;  %1339 = vst [vmem:[%s3082_s3 + $0x10] sm:$0xff] %v1309_v13  ;;  %v1310_v23 = vmul.f32 %v1739_v17, %v1280_v18  ;;  %v2881_v27 = vpop.f32.mrb[10].mxu0 }
 0x124   :  { %v1743_v28 = vpop.eup %1742  ;;  %1338 = vst [vmem:[%s3082_s3 + $0x8] sm:$0xff] %v1308_v20  ;;  %v1322_v30 = vmul.f32 %v1741_v22, %v1292_v26  ;;  %v2887_v31 = vpop.f32.mrb[10].mxu1  ;;  %v663_v20 = vadd.f32 %v2866_v11, %v2847_v42 }
 0x125   :  { %v2889_v32 = vpop.f32.mrb[11].mxu0  ;;  %v1745_v33 = vpop.eup %1744  ;;  %1340 = vst [vmem:[%s3082_s3 + $0x18] sm:$0xff] %v1310_v23  ;;  %v1324_v35 = vmul.f32 %v1743_v28, %v1294_v29  ;;  %v576_v23 = vadd.f32 %v2868_v39, %v2847_v42  ;;  %v665_v28 = vadd.f32 %v2871_v14, %v2847_v42 }
 0x126   :  { %v2895_v36 = vpop.f32.mrb[11].mxu1  ;;  %v1747_v37 = vpop.eup %1746  ;;  %v1323_v40 = vmul.f32 %v1745_v33, %v1293_v34  ;;  %1352 = vst [vmem:[%s3082_s3 + $0x78] sm:$0xff] %v1322_v30  ;;  %v580_v30 = vadd.f32 %v2881_v27, %v2851_v53  ;;  %v1253_v11 = vmul.f32 0.01, %v663_v20  ;;  %v669_v33 = vadd.f32 %v2887_v31, %v2851_v53 }
 0x127   :  { %v1325_v41 = vmul.f32 %v1747_v37, %v1295_v38  ;;  %1354 = vst [vmem:[%s3082_s3 + $0x88] sm:$0xff] %v1324_v35  ;;  %v585_v43 = vpop.f32.mrb[12].mxu0  ;;  %vm1223_vm10 = vcmp.gt.f32.partialorder %v663_v20, 0.0  ;;  %v1252_v39 = vmul.f32 0.01, %v576_v23  ;;  %v582_v34 = vadd.f32 %v2889_v32, %v2851_v53 }
 0x128   :  { %1353 = vst [vmem:[%s3082_s3 + $0x80] sm:$0xff] %v1323_v40  ;;  %v586_v44 = vadd.f32 %v585_v43, %v2827_v15  ;;  %v674_v45 = vpop.f32.mrb[12].mxu1  ;;  %v587_v46 = vpop.f32.mrb[13].mxu0  ;;  %vm1222_vm11 = vcmp.gt.f32.partialorder %v576_v23, 0.0  ;;  %v1254_v14 = vmul.f32 0.01, %v665_v28  ;;  %v671_v35 = vadd.f32 %v2895_v36, %v2851_v53 }
 0x129   :  { %1355 = vst [vmem:[%s3082_s3 + $0x90] sm:$0xff] %v1325_v41  ;;  %v675_v24 = vadd.f32 %v674_v45, %v2827_v15  ;;  %v588_v47 = vadd.f32 %v587_v46, %v2827_v15  ;;  %v676_v48 = vpop.f32.mrb[13].mxu1  ;;  %v1281_v38 = vsel %vm1221_vm9, %v574_v9, %v1251_v55  ;;  %vm1224_vm12 = vcmp.gt.f32.partialorder %v665_v28, 0.0 }
 0x12a   :  { %v1407_v49 = vmul.f32 -1.442695, %v586_v44  ;;  %v677_v50 = vadd.f32 %v676_v48, %v2827_v15  ;;  %v1266_v40 = vmul.f32 0.01, %v580_v30  ;;  %v1283_v44 = vsel %vm1223_vm10, %v663_v20, %v1253_v11 }
 0x12b   :  { %v591_v51 = vpop.f32.mrb[14].mxu0  ;;  %v1409_v52 = vmul.f32 -1.442695, %v675_v24  ;;  %v1408_v54 = vmul.f32 -1.442695, %v588_v47  ;;  %vm1236_vm13 = vcmp.gt.f32.partialorder %v580_v30, 0.0  ;;  %v1282_v36 = vsel %vm1222_vm11, %v576_v23, %v1252_v39 }
 0x12c   :  { %v592_v56 = vadd.f32 %v591_v51, %v2840_v16  ;;  %v680_v57 = vpop.f32.mrb[14].mxu1  ;;  %v593_v59 = vpop.f32.mrb[15].mxu0  ;;  %1748 = vpow2.f32 %v1407_v49  ;;  %v1410_v60 = vmul.f32 -1.442695, %v677_v50  ;;  %v1268_v45 = vmul.f32 0.01, %v669_v33 }
 0x12d   :  { %v681_v61 = vadd.f32 %v680_v57, %v2840_v16  ;;  %v682_v62 = vpop.f32.mrb[15].mxu1  ;;  %1750 = vpow2.f32 %v1409_v52  ;;  %v594_v0 = vadd.f32 %v593_v59, %v2840_v16  ;;  %vm1238_vm14 = vcmp.gt.f32.partialorder %v669_v33, 0.0 }
 0x12e   :  { %v1422_v63 = vmul.f32 -1.442695, %v592_v56  ;;  %v683_v2 = vadd.f32 %v682_v62, %v2840_v16  ;;  %1752 = vpow2.f32 %v1408_v54  ;;  %v1267_v47 = vmul.f32 0.01, %v582_v34 }
 0x12f   :  { %v1424_v3 = vmul.f32 -1.442695, %v681_v61  ;;  %1754 = vpow2.f32 %v1410_v60  ;;  %v1423_v4 = vmul.f32 -1.442695, %v594_v0  ;;  %v1284_v50 = vsel %vm1224_vm12, %v665_v28, %v1254_v14 }
 0x130   :  { %v1425_v5 = vmul.f32 -1.442695, %v683_v2  ;;  %1756 = vpow2.f32 %v1422_v63  ;;  %vm1237_vm15 = vcmp.gt.f32.partialorder %v582_v34, 0.0  ;;  %v1269_v51 = vmul.f32 0.01, %v671_v35 }
 0x131   :  { %1758 = vpow2.f32 %v1424_v3  ;;  %v1296_v57 = vsel %vm1236_vm13, %v580_v30, %v1266_v40  ;;  %vm1239_vm0 = vcmp.gt.f32.partialorder %v671_v35, 0.0  ;;  %v1298_v63 = vsel %vm1238_vm14, %v669_v33, %v1268_v45 }
 0x132   :  { %1760 = vpow2.f32 %v1423_v4  ;;  %v1297_v4 = vsel %vm1237_vm15, %v582_v34, %v1267_v47 }
 0x133   :  { %1762 = vpow2.f32 %v1425_v5 }
 0x136   :  { %v1749_v58 = vpop.eup %1748 }
 0x137   :  { %v1751_v1 = vpop.eup %1750  ;;  %v1131_v8 = vadd.f32 1.0, %v1749_v58 }
 0x138   :  { %v1753_v6 = vpop.eup %1752  ;;  %v1133_v25 = vadd.f32 1.0, %v1751_v1  ;;  %v1299_v1 = vsel %vm1239_vm0, %v671_v35, %v1269_v51 }
 0x139   :  { %v1755_v10 = vpop.eup %1754  ;;  %1764 = vrcp.f32 %v1131_v8  ;;  %v1132_v19 = vadd.f32 1.0, %v1753_v6 }
 0x13a   :  { %v1757_v7 = vpop.eup %1756  ;;  %1766 = vrcp.f32 %v1133_v25  ;;  %v1134_v12 = vadd.f32 1.0, %v1755_v10 }
 0x13b   :  { %v1759_v13 = vpop.eup %1758  ;;  %1768 = vrcp.f32 %v1132_v19  ;;  %v1146_v17 = vadd.f32 1.0, %v1757_v7 }
 0x13c   :  { %v1761_v18 = vpop.eup %1760  ;;  %1770 = vrcp.f32 %v1134_v12  ;;  %v1148_v21 = vadd.f32 1.0, %v1759_v13 }
 0x13d   :  { %v1763_v22 = vpop.eup %1762  ;;  %1772 = vrcp.f32 %v1146_v17  ;;  %v1147_v26 = vadd.f32 1.0, %v1761_v18 }
 0x13e   :  { %1774 = vrcp.f32 %v1148_v21  ;;  %v1149_v29 = vadd.f32 1.0, %v1763_v22 }
 0x13f   :  { %1776 = vrcp.f32 %v1147_v26 }
 0x140   :  { %1778 = vrcp.f32 %v1149_v29 }
 0x143   :  { %v2933_v37 = vpop.f32.mrb[16].mxu0  ;;  %v1765_v27 = vpop.eup %1764 }
 0x144   :  { %v2935_v41 = vpop.f32.mrb[16].mxu1  ;;  %v2937_v31 = vpop.f32.mrb[17].mxu0  ;;  %v1311_v32 = vmul.f32 %v1765_v27, %v1281_v38 }
 0x145   :  { %v1767_v43 = vpop.eup %1766  ;;  %v2939_v46 = vpop.f32.mrb[17].mxu1  ;;  %v841_v51 = vadd.f32 %v2935_v41, %v2847_v42 }
 0x146   :  { %v1769_v24 = vpop.eup %1768  ;;  %v1313_v48 = vmul.f32 %v1767_v43, %v1283_v44  ;;  %1341 = vst [vmem:[%s3082_s3 + $0x20] sm:$0xff] %v1311_v32 }
 0x147   :  { %v1771_v49 = vpop.eup %1770  ;;  %v1312_v52 = vmul.f32 %v1769_v24, %v1282_v36  ;;  %v2946_v54 = vpop.f32.mrb[18].mxu0  ;;  %v1257_v41 = vmul.f32 0.01, %v841_v51  ;;  %vm1227_vm2 = vcmp.gt.f32.partialorder %v841_v51, 0.0 }
 0x148   :  { %v1773_v56 = vpop.eup %1772  ;;  %1343 = vst [vmem:[%s3082_s3 + $0x30] sm:$0xff] %v1313_v48  ;;  %v1314_v59 = vmul.f32 %v1771_v49, %v1284_v50  ;;  %v2952_v60 = vpop.f32.mrb[18].mxu1  ;;  %v752_v48 = vadd.f32 %v2933_v37, %v2847_v42 }
 0x149   :  { %v2954_v61 = vpop.f32.mrb[19].mxu0  ;;  %v1775_v62 = vpop.eup %1774  ;;  %1342 = vst [vmem:[%s3082_s3 + $0x28] sm:$0xff] %v1312_v52  ;;  %v1326_v0 = vmul.f32 %v1773_v56, %v1296_v57  ;;  %v754_v57 = vadd.f32 %v2937_v31, %v2847_v42 }
 0x14a   :  { %v2960_v2 = vpop.f32.mrb[19].mxu1  ;;  %v1777_v3 = vpop.eup %1776  ;;  %1344 = vst [vmem:[%s3082_s3 + $0x38] sm:$0xff] %v1314_v59  ;;  %v1328_v5 = vmul.f32 %v1775_v62, %v1298_v63  ;;  %v843_v62 = vadd.f32 %v2939_v46, %v2847_v42  ;;  %v1255_v37 = vmul.f32 0.01, %v752_v48  ;;  %vm1225_vm1 = vcmp.gt.f32.partialorder %v752_v48, 0.0 }
 0x14b   :  { %v1779_v58 = vpop.eup %1778  ;;  %1356 = vst [vmem:[%s3082_s3 + $0x98] sm:$0xff] %v1326_v0  ;;  %v1327_v8 = vmul.f32 %v1777_v3, %v1297_v4  ;;  %v763_v6 = vpop.f32.mrb[20].mxu0  ;;  %v758_v0 = vadd.f32 %v2946_v54, %v2851_v53  ;;  %v847_v3 = vadd.f32 %v2952_v60, %v2851_v53  ;;  %v1256_v31 = vmul.f32 0.01, %v754_v57 }
 0x14c   :  { %1358 = vst [vmem:[%s3082_s3 + $0xa8] sm:$0xff] %v1328_v5  ;;  %v1329_v25 = vmul.f32 %v1779_v58, %v1299_v1  ;;  %v852_v10 = vpop.f32.mrb[20].mxu1  ;;  %v765_v19 = vpop.f32.mrb[21].mxu0  ;;  %v764_v7 = vadd.f32 %v763_v6, %v2827_v15  ;;  %v760_v4 = vadd.f32 %v2954_v61, %v2851_v53  ;;  %vm1226_vm3 = vcmp.gt.f32.partialorder %v754_v57, 0.0 }
 0x14d   :  { %1357 = vst [vmem:[%s3082_s3 + $0xa0] sm:$0xff] %v1327_v8  ;;  %v854_v12 = vpop.f32.mrb[21].mxu1  ;;  %v853_v13 = vadd.f32 %v852_v10, %v2827_v15  ;;  %v766_v9 = vadd.f32 %v765_v19, %v2827_v15  ;;  %v1258_v46 = vmul.f32 0.01, %v843_v62  ;;  %v849_v5 = vadd.f32 %v2960_v2, %v2851_v53 }
 0x14e   :  { %1359 = vst [vmem:[%s3082_s3 + $0xb0] sm:$0xff] %v1329_v25  ;;  %v855_v17 = vadd.f32 %v854_v12, %v2827_v15  ;;  %v1411_v18 = vmul.f32 -1.442695, %v764_v7  ;;  %v1285_v1 = vsel %vm1225_vm1, %v752_v48, %v1255_v37  ;;  %vm1228_vm4 = vcmp.gt.f32.partialorder %v843_v62, 0.0 }
 0x14f   :  { %v769_v20 = vpop.f32.mrb[22].mxu0  ;;  %v1413_v21 = vmul.f32 -1.442695, %v853_v13  ;;  %v1412_v22 = vmul.f32 -1.442695, %v766_v9  ;;  %v1287_v10 = vsel %vm1227_vm2, %v841_v51, %v1257_v41  ;;  %vm1240_vm5 = vcmp.gt.f32.partialorder %v758_v0, 0.0 }
 0x150   :  { %v1414_v23 = vmul.f32 -1.442695, %v855_v17  ;;  %v770_v26 = vadd.f32 %v769_v20, %v2840_v16  ;;  %1780 = vpow2.f32 %v1411_v18  ;;  %v858_v28 = vpop.f32.mrb[22].mxu1  ;;  %v771_v29 = vpop.f32.mrb[23].mxu0  ;;  %v1270_v8 = vmul.f32 0.01, %v758_v0 }
 0x151   :  { %1782 = vpow2.f32 %v1413_v21  ;;  %v859_v30 = vadd.f32 %v858_v28, %v2840_v16  ;;  %v772_v11 = vadd.f32 %v771_v29, %v2840_v16  ;;  %v860_v33 = vpop.f32.mrb[23].mxu1  ;;  %v1272_v19 = vmul.f32 0.01, %v847_v3 }
 0x152   :  { %v1426_v55 = vmul.f32 -1.442695, %v770_v26  ;;  %1784 = vpow2.f32 %v1412_v22  ;;  %v861_v39 = vadd.f32 %v860_v33, %v2840_v16  ;;  %v1286_v13 = vsel %vm1226_vm3, %v754_v57, %v1256_v31 }
 0x153   :  { %1786 = vpow2.f32 %v1414_v23  ;;  %v1428_v34 = vmul.f32 -1.442695, %v859_v30  ;;  %v1427_v14 = vmul.f32 -1.442695, %v772_v11  ;;  %vm1242_vm6 = vcmp.gt.f32.partialorder %v847_v3, 0.0 }
 0x154   :  { %1788 = vpow2.f32 %v1426_v55  ;;  %v1429_v35 = vmul.f32 -1.442695, %v861_v39  ;;  %v1271_v2 = vmul.f32 0.01, %v760_v4  ;;  %v1288_v18 = vsel %vm1228_vm4, %v843_v62, %v1258_v46 }
 0x155   :  { %1790 = vpow2.f32 %v1428_v34  ;;  %vm1241_vm7 = vcmp.gt.f32.partialorder %v760_v4, 0.0  ;;  %v1273_v20 = vmul.f32 0.01, %v849_v5  ;;  %v1300_v26 = vsel %vm1240_vm5, %v758_v0, %v1270_v8 }
 0x156   :  { %1792 = vpow2.f32 %v1427_v14  ;;  %vm1243_vm8 = vcmp.gt.f32.partialorder %v849_v5, 0.0  ;;  %v1302_v11 = vsel %vm1242_vm6, %v847_v3, %v1272_v19  ;;  %v1301_v14 = vsel %vm1241_vm7, %v760_v4, %v1271_v2 }
 0x157   :  { %1794 = vpow2.f32 %v1429_v35 }
 0x15a   :  { %v1781_v27 = vpop.eup %1780 }
 0x15b   :  { %v1783_v38 = vpop.eup %1782  ;;  %v1135_v40 = vadd.f32 1.0, %v1781_v27 }
 0x15c   :  { %v1785_v43 = vpop.eup %1784  ;;  %v1137_v44 = vadd.f32 1.0, %v1783_v38  ;;  %v1303_v38 = vsel %vm1243_vm8, %v849_v5, %v1273_v20 }
 0x15d   :  { %v1787_v45 = vpop.eup %1786  ;;  %1796 = vrcp.f32 %v1135_v40  ;;  %v1136_v32 = vadd.f32 1.0, %v1785_v43 }
 0x15e   :  { %v1789_v24 = vpop.eup %1788  ;;  %1798 = vrcp.f32 %v1137_v44  ;;  %v1138_v36 = vadd.f32 1.0, %v1787_v45 }
 0x15f   :  { %v1791_v47 = vpop.eup %1790  ;;  %1800 = vrcp.f32 %v1136_v32  ;;  %v1150_v49 = vadd.f32 1.0, %v1789_v24 }
 0x160   :  { %v1793_v50 = vpop.eup %1792  ;;  %1802 = vrcp.f32 %v1138_v36  ;;  %v1152_v52 = vadd.f32 1.0, %v1791_v47 }
 0x161   :  { %v1795_v56 = vpop.eup %1794  ;;  %1804 = vrcp.f32 %v1150_v49  ;;  %v1151_v59 = vadd.f32 1.0, %v1793_v50 }
 0x162   :  { %1806 = vrcp.f32 %v1152_v52  ;;  %v1153_v63 = vadd.f32 1.0, %v1795_v56 }
 0x163   :  { %1808 = vrcp.f32 %v1151_v59 }
 0x164   :  { %1810 = vrcp.f32 %v1153_v63 }
 0x167   :  { %v3002_v58 = vpop.f32.mrb[24].mxu0  ;;  %v1797_v54 = vpop.eup %1796 }
 0x168   :  { %v3004_v6 = vpop.f32.mrb[24].mxu1  ;;  %v3006_v60 = vpop.f32.mrb[25].mxu0  ;;  %v1315_v61 = vmul.f32 %v1797_v54, %v1285_v1 }
 0x169   :  { %v1799_v25 = vpop.eup %1798  ;;  %v1020_v7 = vpop.f32.mrb[25].mxu1  ;;  %v1019_v19 = vadd.f32 %v3004_v6, %v2847_v42 }
 0x16a   :  { %v1801_v12 = vpop.eup %1800  ;;  %v1317_v9 = vmul.f32 %v1799_v25, %v1287_v10  ;;  %1345 = vst [vmem:[%s3082_s3 + $0x40] sm:$0xff] %v1315_v61  ;;  %v932_v7 = vadd.f32 %v3006_v60, %v2847_v42 }
 0x16b   :  { %v1803_v17 = vpop.eup %1802  ;;  %v1316_v21 = vmul.f32 %v1801_v12, %v1286_v13  ;;  %v3013_v22 = vpop.f32.mrb[26].mxu0  ;;  %vm1231_vm10 = vcmp.gt.f32.partialorder %v1019_v19, 0.0 }
 0x16c   :  { %v1805_v23 = vpop.eup %1804  ;;  %1347 = vst [vmem:[%s3082_s3 + $0x50] sm:$0xff] %v1317_v9  ;;  %v1318_v28 = vmul.f32 %v1803_v17, %v1288_v18  ;;  %v3019_v29 = vpop.f32.mrb[26].mxu1  ;;  %v936_v2 = vadd.f32 %v3013_v22, %v2851_v53  ;;  %v1260_v17 = vmul.f32 0.01, %v932_v7  ;;  %vm1230_vm11 = vcmp.gt.f32.partialorder %v932_v7, 0.0 }
 0x16d   :  { %v3021_v55 = vpop.f32.mrb[27].mxu0  ;;  %v1807_v30 = vpop.eup %1806  ;;  %1346 = vst [vmem:[%s3082_s3 + $0x48] sm:$0xff] %v1316_v21  ;;  %v1330_v33 = vmul.f32 %v1805_v23, %v1300_v26  ;;  %v1024_v9 = vadd.f32 %v3019_v29, %v2851_v53 }
 0x16e   :  { %v1025_v39 = vpop.f32.mrb[27].mxu1  ;;  %v1809_v34 = vpop.eup %1808  ;;  %1348 = vst [vmem:[%s3082_s3 + $0x58] sm:$0xff] %v1318_v28  ;;  %v1332_v35 = vmul.f32 %v1807_v30, %v1302_v11  ;;  %v938_v6 = vadd.f32 %v3021_v55, %v2851_v53  ;;  %v1274_v18 = vmul.f32 0.01, %v936_v2  ;;  %vm1244_vm12 = vcmp.gt.f32.partialorder %v936_v2, 0.0 }
 0x16f   :  { %v1811_v27 = vpop.eup %1810  ;;  %1360 = vst [vmem:[%s3082_s3 + $0xb8] sm:$0xff] %v1330_v33  ;;  %v1331_v40 = vmul.f32 %v1809_v34, %v1301_v14  ;;  %v941_v43 = vpop.f32.mrb[28].mxu0  ;;  %v1276_v23 = vmul.f32 0.01, %v1024_v9  ;;  %v1290_v28 = vsel %vm1230_vm11, %v932_v7, %v1260_v17  ;;  %vm1246_vm13 = vcmp.gt.f32.partialorder %v1024_v9, 0.0 }
 0x170   :  { %1362 = vst [vmem:[%s3082_s3 + $0xc8] sm:$0xff] %v1332_v35  ;;  %v1333_v44 = vmul.f32 %v1811_v27, %v1303_v38  ;;  %v942_v45 = vadd.f32 %v941_v43, %v2827_v15  ;;  %v1028_v32 = vpop.f32.mrb[28].mxu1  ;;  %v943_v24 = vpop.f32.mrb[29].mxu0  ;;  %v1275_v30 = vmul.f32 0.01, %v938_v6  ;;  %vm1245_vm14 = vcmp.gt.f32.partialorder %v938_v6, 0.0 }
 0x171   :  { %1361 = vst [vmem:[%s3082_s3 + $0xc0] sm:$0xff] %v1331_v40  ;;  %v1029_v36 = vadd.f32 %v1028_v32, %v2827_v15  ;;  %v944_v47 = vadd.f32 %v943_v24, %v2827_v15  ;;  %v1030_v48 = vpop.f32.mrb[29].mxu1  ;;  %v1304_v55 = vsel %vm1244_vm12, %v936_v2, %v1274_v18  ;;  %v1306_v39 = vsel %vm1246_vm13, %v1024_v9, %v1276_v23 }
 0x172   :  { %1363 = vst [vmem:[%s3082_s3 + $0xd0] sm:$0xff] %v1333_v44  ;;  %v1415_v49 = vmul.f32 -1.442695, %v942_v45  ;;  %v1305_v35 = vsel %vm1245_vm14, %v938_v6, %v1275_v30 }
 0x173   :  { %v1417_v50 = vmul.f32 -1.442695, %v1029_v36  ;;  %v1416_v51 = vmul.f32 -1.442695, %v944_v47  ;;  %v947_v52 = vpop.f32.mrb[30].mxu0 }
 0x174   :  { %1812 = vpow2.f32 %v1415_v49  ;;  %v948_v56 = vadd.f32 %v947_v52, %v2840_v16  ;;  %v1033_v57 = vpop.f32.mrb[30].mxu1  ;;  %v949_v59 = vpop.f32.mrb[31].mxu0 }
 0x175   :  { %1814 = vpow2.f32 %v1417_v50  ;;  %v1034_v62 = vadd.f32 %v1033_v57, %v2840_v16  ;;  %v950_v63 = vadd.f32 %v949_v59, %v2840_v16  ;;  %v1035_v15 = vpop.f32.mrb[31].mxu1  ;;  %v930_v16 = vadd.f32 %v3002_v58, %v2847_v42 }
 0x176   :  { %1816 = vpow2.f32 %v1416_v51  ;;  %v1430_v37 = vmul.f32 -1.442695, %v948_v56  ;;  %v1261_v58 = vmul.f32 0.01, %v1019_v19 }
 0x177   :  { %v1432_v0 = vmul.f32 -1.442695, %v1034_v62  ;;  %v1431_v41 = vmul.f32 -1.442695, %v950_v63  ;;  %v1259_v13 = vmul.f32 0.01, %v930_v16 }
 0x178   :  { %1818 = vpow2.f32 %v1430_v37  ;;  %vm1229_vm9 = vcmp.gt.f32.partialorder %v930_v16, 0.0  ;;  %v1291_v21 = vsel %vm1231_vm10, %v1019_v19, %v1261_v58 }
 0x179   :  { %1820 = vpow2.f32 %v1432_v0  ;;  %v1289_v60 = vsel %vm1229_vm9, %v930_v16, %v1259_v13 }
 0x17a   :  { %1822 = vpow2.f32 %v1431_v41 }
 0x17e   :  { %v1813_v3 = vpop.eup %1812 }
 0x17f   :  { %v1815_v31 = vpop.eup %1814  ;;  %v1139_v4 = vadd.f32 1.0, %v1813_v3 }
 0x180   :  { %v1817_v46 = vpop.eup %1816  ;;  %v1141_v5 = vadd.f32 1.0, %v1815_v31 }
 0x181   :  { %1824 = vrcp.f32 %v1139_v4  ;;  %v1140_v54 = vadd.f32 1.0, %v1817_v46 }
 0x182   :  { %v1819_v1 = vpop.eup %1818  ;;  %1826 = vrcp.f32 %v1141_v5 }
 0x183   :  { %v1821_v8 = vpop.eup %1820  ;;  %1828 = vrcp.f32 %v1140_v54  ;;  %v1154_v25 = vadd.f32 1.0, %v1819_v1 }
 0x184   :  { %v1823_v10 = vpop.eup %1822  ;;  %v1156_v61 = vadd.f32 1.0, %v1821_v8 }
 0x185   :  { %1830 = vrcp.f32 %v1154_v25  ;;  %v1155_v12 = vadd.f32 1.0, %v1823_v10 }
 0x186   :  { %1832 = vrcp.f32 %v1156_v61 }
 0x187   :  { %1834 = vrcp.f32 %v1155_v12 }
 0x18b   :  { %v1825_v42 = vpop.eup %1824 }
 0x18c   :  { %v1827_v20 = vpop.eup %1826  ;;  %v1319_v22 = vmul.f32 %v1825_v42, %v1289_v60 }
 0x18d   :  { %v1829_v26 = vpop.eup %1828  ;;  %v1321_v11 = vmul.f32 %v1827_v20, %v1291_v21 }
 0x18e   :  { %1349 = vst [vmem:[%s3082_s3 + $0x60] sm:$0xff] %v1319_v22  ;;  %v1320_v53 = vmul.f32 %v1829_v26, %v1290_v28 }
 0x18f   :  { %v1831_v29 = vpop.eup %1830  ;;  %1351 = vst [vmem:[%s3082_s3 + $0x70] sm:$0xff] %v1321_v11 }
 0x190   :  { %v1833_v33 = vpop.eup %1832  ;;  %1350 = vst [vmem:[%s3082_s3 + $0x68] sm:$0xff] %v1320_v53  ;;  %v1334_v34 = vmul.f32 %v1831_v29, %v1304_v55 }
 0x191   :  { %v1835_v14 = vpop.eup %1834  ;;  %v1336_v27 = vmul.f32 %v1833_v33, %v1306_v39 }
 0x192   :  { %1364 = vst [vmem:[%s3082_s3 + $0xd8] sm:$0xff] %v1334_v34  ;;  %v1335_v38 = vmul.f32 %v1835_v14, %v1305_v35 }
 0x193   :  { %1366 = vst [vmem:[%s3082_s3 + $0xe8] sm:$0xff] %v1336_v27 }
 0x194   :  { %1365 = vst [vmem:[%s3082_s3 + $0xe0] sm:$0xff] %v1335_v38 }

// kernel: _lambda_.11
= control target key start
LH: loop header
LB: loop body
LE: loop exit
PB: predicated region body
PF: predicated region fallthrough
CT: control target
= control target key end

     0   :  { %v40_v0 = vlaneseq  ;;  %v836_v2 = vmov 1983009808   ;;  %v837_v4 = vmov 0.0   ;;  %v838_v7 = vmov 0   ;;  %s1053_s0 = inlined_call_operand.vmem [shape: f32[2,1920], index: 0, kind: input, shape index: {}]   ;;  %s1054_s2 = inlined_call_operand.vmem [shape: f32[16,1], index: 2, kind: input, shape index: {}]   ;;  %s1055_s1 = inlined_call_operand.vmem [shape: f32[16,2], index: 1, kind: input, shape index: {}]   ;;  %s1056_s3 = inlined_call_operand.vmem [shape: f32[16,1920], index: 3, kind: output, shape index: {}]  }
   0x1   :  { %v16_v1 = vld [vmem:[%s1053_s0] sm:$0xff]  ;;  %v38_v3 = vunpack.c.l.s4 %v836_v2  ;;  %205 = vmatprep.mubr.f32.mxu0 %v837_v4  ;;  %282 = vmatprep.mubr.f32.mxu1 %v837_v4  ;;  %v17_v5 = vld [vmem:[%s1053_s0 + $0x8] sm:$0xff]  ;;  %v18_v12 = vld [vmem:[%s1053_s0 + $0x10] sm:$0xff]  ;;  %vm110_vm0 = vcmask 1041408   ;;  %vm103_vm1 = vcmask 15360  }
   0x2   :  { %v41_v6 = vshrl.u32 %v40_v0, 7  ;;  %831 = vset.pattern.permute.xlu0 %v838_v7  ;;  %v36_v9 = vcombine.high %v16_v1, %v16_v1  ;;  %v20_v10 = vld [vmem:[%s1054_s2] sm:$0xff]  ;;  %v53_v11 = vcombine.high %v17_v5, %v17_v5  ;;  %v21_v14 = vld [vmem:[%s1054_s2 + $0x8] sm:$0xff]  ;;  %v70_v18 = vcombine.high %v18_v12, %v18_v12  ;;  %v19_v28 = vld [vmem:[%s1053_s0 + $0x18] sm:$0x3f] }
   0x3   :  { %v39_v8 = vunpack.c.0.s8 %v38_v3  ;;  %24 = vperm.xlu0 %831, %v20_v10   ;;  %v14_v24 = vld [vmem:[%s1055_s1] sm:$0xff]  ;;  %v15_v29 = vld [vmem:[%s1055_s1 + $0x8] sm:$0xff]  ;;  %v87_v32 = vcombine.high %v19_v28, %v19_v28 }
   0x5   :  { %v42_v13 = vsub.s32 %v39_v8, %v41_v6 }
   0x7   :  { %v43_v15 = vrot.slane %v16_v1, %v42_v13  ;;  %v50_v16 = vrot.slane %v36_v9, %v42_v13  ;;  %v60_v17 = vrot.slane %v17_v5, %v42_v13  ;;  %v67_v19 = vrot.slane %v53_v11, %v42_v13  ;;  %29 = vperm.xlu0 %831, %v21_v14  }
   0x8   :  { %v77_v20 = vrot.slane %v18_v12, %v42_v13  ;;  %v84_v25 = vrot.slane %v70_v18, %v42_v13  ;;  %v94_v31 = vrot.slane %v19_v28, %v42_v13  ;;  %v101_v34 = vrot.slane %v87_v32, %v42_v13 }
   0x9   :  { %v51_v21 = vcombine.high %v43_v15, %v43_v15  ;;  %v52_v22 = vcombine.high %v50_v16, %v50_v16  ;;  %v68_v23 = vcombine.high %v60_v17, %v60_v17  ;;  %v69_v26 = vcombine.high %v67_v19, %v67_v19 }
   0xa   :  { %v85_v27 = vcombine.high %v77_v20, %v77_v20  ;;  %v86_v30 = vcombine.high %v84_v25, %v84_v25  ;;  %v102_v33 = vcombine.high %v94_v31, %v94_v31 }
   0xb   :  { %789 = vmatprep.subr.msk.mxu0 %vm110_vm0, %v51_v21  ;;  %793 = vmatprep.subr.msk.mxu1 %vm110_vm0, %v52_v22 }
   0xc   :  { %790 = vmatpush1.msk.msra.mxu0 %vm110_vm0, %v43_v15  ;;  %794 = vmatpush1.msk.msra.mxu1 %vm110_vm0, %v50_v16 }
   0xd   :  { %791 = vmatmul.mubr.msk.f32.vlgmr.msra.gmra.mrb[0].mxu0 %vm103_vm1, %v14_v24  ;;  %797 = vmatprep.subr.msk.mxu0 %vm110_vm0, %v68_v23 }
   0xe   :  { %795 = vmatmul.mubr.msk.f32.vlgmr.msra.gmra.mrb[0].mxu1 %vm103_vm1, %v14_v24  ;;  %798 = vmatpush1.msk.msra.mxu0 %vm110_vm0, %v60_v17 }
   0xf   :  { %211 = vmatprep.mubr.f32.mxu0 %v837_v4  ;;  %288 = vmatprep.mubr.f32.mxu1 %v837_v4 }
  0x10   :  { %801 = vmatprep.subr.msk.mxu1 %vm110_vm0, %v69_v26  ;;  %805 = vmatprep.subr.msk.mxu0 %vm110_vm0, %v85_v27 }
  0x11   :  { %792 = vmatmul.mubr.msk.f32.gmra.mrb[2].mxu0 %vm103_vm1, %v15_v29  ;;  %802 = vmatpush1.msk.msra.mxu1 %vm110_vm0, %v67_v19 }
  0x12   :  { %796 = vmatmul.mubr.msk.f32.gmra.mrb[2].mxu1 %vm103_vm1, %v15_v29  ;;  %359 = vmatprep.mubr.f32.mxu0 %v837_v4 }
  0x13   :  { %436 = vmatprep.mubr.f32.mxu1 %v837_v4  ;;  %809 = vmatprep.subr.msk.mxu1 %vm110_vm0, %v86_v30 }
  0x15   :  { %799 = vmatmul.mubr.msk.f32.vlgmr.msra.gmra.mrb[4].mxu0 %vm103_vm1, %v14_v24 }
  0x16   :  { %803 = vmatmul.mubr.msk.f32.vlgmr.msra.gmra.mrb[4].mxu1 %vm103_vm1, %v14_v24  ;;  %806 = vmatpush1.msk.msra.mxu0 %vm110_vm0, %v77_v20 }
  0x17   :  { %365 = vmatprep.mubr.f32.mxu0 %v837_v4  ;;  %442 = vmatprep.mubr.f32.mxu1 %v837_v4 }
  0x18   :  { %810 = vmatpush1.msk.msra.mxu1 %vm110_vm0, %v84_v25  ;;  %813 = vmatprep.subr.msk.mxu0 %vm110_vm0, %v102_v33 }
  0x19   :  { %800 = vmatmul.mubr.msk.f32.gmra.mrb[6].mxu0 %vm103_vm1, %v15_v29  ;;  %823 = vmatprep.subr.msk.mxu1 %vm110_vm0, %v101_v34 }
  0x1a   :  { %804 = vmatmul.mubr.msk.f32.gmra.mrb[6].mxu1 %vm103_vm1, %v15_v29  ;;  %513 = vmatprep.mubr.f32.mxu0 %v837_v4 }
  0x1b   :  { %590 = vmatprep.mubr.f32.mxu1 %v837_v4 }
  0x1d   :  { %807 = vmatmul.mubr.msk.f32.vlgmr.msra.gmra.mrb[8].mxu0 %vm103_vm1, %v14_v24 }
  0x1e   :  { %811 = vmatmul.mubr.msk.f32.vlgmr.msra.gmra.mrb[8].mxu1 %vm103_vm1, %v14_v24  ;;  %814 = vmatpush1.msk.msra.mxu0 %vm110_vm0, %v94_v31 }
  0x1f   :  { %519 = vmatprep.mubr.f32.mxu0 %v837_v4  ;;  %596 = vmatprep.mubr.f32.mxu1 %v837_v4 }
  0x20   :  { %824 = vmatpush3.msk.msra.mxu1 %vm110_vm0, %v101_v34 }
  0x21   :  { %808 = vmatmul.mubr.msk.f32.gmra.mrb[10].mxu0 %vm103_vm1, %v15_v29 }
  0x22   :  { %812 = vmatmul.mubr.msk.f32.gmra.mrb[10].mxu1 %vm103_vm1, %v15_v29  ;;  %667 = vmatprep.mubr.f32.mxu0 %v837_v4 }
  0x23   :  { %825 = vmatprep.mubr.msk.f32.mxu1 %vm103_vm1, %v14_v24 }
  0x25   :  { %815 = vmatmul.mubr.msk.f32.vlgmr.msra.gmra.mrb[12].mxu0 %vm103_vm1, %v14_v24 }
  0x26   :  { %826 = vmatmul.mubr.msk.f32.vlgmr.msra.gmra.mrb[12].mxu1 %vm103_vm1, %v15_v29  ;;  %673 = vmatprep.mubr.f32.mxu0 %v837_v4 }
  0x29   :  { %816 = vmatmul.mubr.msk.f32.gmra.mrb[14].mxu0 %vm103_vm1, %v15_v29 }
  0x82   :  { %v929_v35 = vpop.permute.xlu0 %24 }
  0x86   :  { %v934_v42 = vpop.permute.xlu0 %29 }
  0xe0   :  { %v207_v36 = vpop.f32.mrb[0].mxu0 }
  0xe1   :  { %v208_v37 = vadd.f32 %v207_v36, %v929_v35  ;;  %v209_v38 = vpop.f32.mrb[1].mxu0  ;;  %v284_v39 = vpop.f32.mrb[0].mxu1 }
  0xe2   :  { %v210_v40 = vadd.f32 %v209_v38, %v929_v35  ;;  %v285_v41 = vadd.f32 %v284_v39, %v929_v35  ;;  %v286_v43 = vpop.f32.mrb[1].mxu1 }
  0xe3   :  { %755 = vst [vmem:[%s1056_s3] sm:$0xff] %v208_v37  ;;  %v287_v44 = vadd.f32 %v286_v43, %v929_v35 }
  0xe4   :  { %756 = vst [vmem:[%s1056_s3 + $0x8] sm:$0xff] %v210_v40  ;;  %v213_v45 = vpop.f32.mrb[2].mxu0  ;;  %757 = vst [vmem:[%s1056_s3 + $0x10] sm:$0xff] %v285_v41 }
  0xe5   :  { %v214_v46 = vadd.f32 %v213_v45, %v934_v42  ;;  %v215_v47 = vpop.f32.mrb[3].mxu0  ;;  %758 = vst [vmem:[%s1056_s3 + $0x18] sm:$0xff] %v287_v44  ;;  %v290_v48 = vpop.f32.mrb[2].mxu1 }
  0xe6   :  { %v216_v49 = vadd.f32 %v215_v47, %v934_v42  ;;  %v291_v50 = vadd.f32 %v290_v48, %v934_v42  ;;  %v292_v51 = vpop.f32.mrb[3].mxu1 }
  0xe7   :  { %770 = vst [vmem:[%s1056_s3 + $0x78] sm:$0xff] %v214_v46  ;;  %v293_v52 = vadd.f32 %v292_v51, %v934_v42 }
  0xe8   :  { %771 = vst [vmem:[%s1056_s3 + $0x80] sm:$0xff] %v216_v49  ;;  %772 = vst [vmem:[%s1056_s3 + $0x88] sm:$0xff] %v291_v50  ;;  %v361_v53 = vpop.f32.mrb[4].mxu0 }
  0xe9   :  { %v362_v54 = vadd.f32 %v361_v53, %v929_v35  ;;  %773 = vst [vmem:[%s1056_s3 + $0x90] sm:$0xff] %v293_v52  ;;  %v363_v55 = vpop.f32.mrb[5].mxu0  ;;  %v438_v56 = vpop.f32.mrb[4].mxu1 }
  0xea   :  { %v364_v57 = vadd.f32 %v363_v55, %v929_v35  ;;  %v439_v58 = vadd.f32 %v438_v56, %v929_v35  ;;  %v440_v59 = vpop.f32.mrb[5].mxu1 }
  0xeb   :  { %759 = vst [vmem:[%s1056_s3 + $0x20] sm:$0xff] %v362_v54  ;;  %v441_v60 = vadd.f32 %v440_v59, %v929_v35 }
  0xec   :  { %760 = vst [vmem:[%s1056_s3 + $0x28] sm:$0xff] %v364_v57  ;;  %v367_v61 = vpop.f32.mrb[6].mxu0  ;;  %761 = vst [vmem:[%s1056_s3 + $0x30] sm:$0xff] %v439_v58 }
  0xed   :  { %v368_v62 = vadd.f32 %v367_v61, %v934_v42  ;;  %v369_v63 = vpop.f32.mrb[7].mxu0  ;;  %762 = vst [vmem:[%s1056_s3 + $0x38] sm:$0xff] %v441_v60  ;;  %v444_v0 = vpop.f32.mrb[6].mxu1 }
  0xee   :  { %v370_v1 = vadd.f32 %v369_v63, %v934_v42  ;;  %v445_v2 = vadd.f32 %v444_v0, %v934_v42  ;;  %v446_v3 = vpop.f32.mrb[7].mxu1 }
  0xef   :  { %774 = vst [vmem:[%s1056_s3 + $0x98] sm:$0xff] %v368_v62  ;;  %v447_v4 = vadd.f32 %v446_v3, %v934_v42 }
  0xf0   :  { %775 = vst [vmem:[%s1056_s3 + $0xa0] sm:$0xff] %v370_v1  ;;  %776 = vst [vmem:[%s1056_s3 + $0xa8] sm:$0xff] %v445_v2  ;;  %v515_v5 = vpop.f32.mrb[8].mxu0 }
  0xf1   :  { %v516_v6 = vadd.f32 %v515_v5, %v929_v35  ;;  %777 = vst [vmem:[%s1056_s3 + $0xb0] sm:$0xff] %v447_v4  ;;  %v517_v7 = vpop.f32.mrb[9].mxu0  ;;  %v592_v8 = vpop.f32.mrb[8].mxu1 }
  0xf2   :  { %v518_v9 = vadd.f32 %v517_v7, %v929_v35  ;;  %v593_v10 = vadd.f32 %v592_v8, %v929_v35  ;;  %v594_v11 = vpop.f32.mrb[9].mxu1 }
  0xf3   :  { %763 = vst [vmem:[%s1056_s3 + $0x40] sm:$0xff] %v516_v6  ;;  %v595_v12 = vadd.f32 %v594_v11, %v929_v35 }
  0xf4   :  { %764 = vst [vmem:[%s1056_s3 + $0x48] sm:$0xff] %v518_v9  ;;  %v521_v13 = vpop.f32.mrb[10].mxu0  ;;  %765 = vst [vmem:[%s1056_s3 + $0x50] sm:$0xff] %v593_v10 }
  0xf5   :  { %v522_v14 = vadd.f32 %v521_v13, %v934_v42  ;;  %v523_v15 = vpop.f32.mrb[11].mxu0  ;;  %766 = vst [vmem:[%s1056_s3 + $0x58] sm:$0xff] %v595_v12  ;;  %v598_v16 = vpop.f32.mrb[10].mxu1 }
  0xf6   :  { %v524_v17 = vadd.f32 %v523_v15, %v934_v42  ;;  %v599_v18 = vadd.f32 %v598_v16, %v934_v42  ;;  %v600_v19 = vpop.f32.mrb[11].mxu1 }
  0xf7   :  { %778 = vst [vmem:[%s1056_s3 + $0xb8] sm:$0xff] %v522_v14  ;;  %v601_v20 = vadd.f32 %v600_v19, %v934_v42 }
  0xf8   :  { %779 = vst [vmem:[%s1056_s3 + $0xc0] sm:$0xff] %v524_v17  ;;  %780 = vst [vmem:[%s1056_s3 + $0xc8] sm:$0xff] %v599_v18  ;;  %v669_v21 = vpop.f32.mrb[12].mxu0 }
  0xf9   :  { %781 = vst [vmem:[%s1056_s3 + $0xd0] sm:$0xff] %v601_v20  ;;  %v670_v22 = vadd.f32 %v669_v21, %v929_v35  ;;  %v671_v23 = vpop.f32.mrb[13].mxu0  ;;  %v827_v24 = vpop.f32.mrb[12].mxu1 }
  0xfa   :  { %v672_v25 = vadd.f32 %v671_v23, %v929_v35  ;;  %v752_v26 = vadd.f32 %v827_v24, %v934_v42  ;;  %v746_v27 = vpop.f32.mrb[13].mxu1 }
  0xfb   :  { %767 = vst [vmem:[%s1056_s3 + $0x60] sm:$0xff] %v670_v22  ;;  %v747_v28 = vadd.f32 %v746_v27, %v929_v35 }
  0xfc   :  { %768 = vst [vmem:[%s1056_s3 + $0x68] sm:$0xff] %v672_v25  ;;  %784 = vst [vmem:[%s1056_s3 + $0xe8] sm:$0xff] %v752_v26  ;;  %v675_v29 = vpop.f32.mrb[14].mxu0 }
  0xfd   :  { %769 = vst [vmem:[%s1056_s3 + $0x70] sm:$0xff] %v747_v28  ;;  %v676_v30 = vadd.f32 %v675_v29, %v934_v42  ;;  %v677_v31 = vpop.f32.mrb[15].mxu0 }
  0xfe   :  { %v678_v32 = vadd.f32 %v677_v31, %v934_v42 }
  0xff   :  { %782 = vst [vmem:[%s1056_s3 + $0xd8] sm:$0xff] %v676_v30 }
 0x100   :  { %783 = vst [vmem:[%s1056_s3 + $0xe0] sm:$0xff] %v678_v32 }

// kernel: _lambda_.15
= control target key start
LH: loop header
LB: loop body
LE: loop exit
PB: predicated region body
PF: predicated region fallthrough
CT: control target
= control target key end

     0   :  { %s3559_s13 = smov 0   ;;  %s3561_s14 = smov 0   ;;  %s5302_s0 = inlined_call_operand.vmem [shape: f32[16,2,16,60], index: 0, kind: input, shape index: {}]   ;;  %s5303_s1 = inlined_call_operand.vmem [shape: f32[16,2,16,60], index: 1, kind: input, shape index: {}]   ;;  %s5304_s2 = inlined_call_operand.vmem [shape: f32[16,1], index: 2, kind: input, shape index: {}]   ;;  %s5305_s3 = inlined_call_operand.vmem [shape: f32[1,16], index: 3, kind: input, shape index: {}]   ;;  %s5306_s4 = inlined_call_operand.vmem [shape: f32[16,16], index: 4, kind: input, shape index: {}]   ;;  %s5307_s5 = inlined_call_operand.vmem [shape: f32[60,60], index: 5, kind: input, shape index: {}]   ;;  %s5308_s6 = inlined_call_operand.vmem [shape: f32[60,60], index: 6, kind: input, shape index: {}]   ;;  %s5309_s7 = inlined_call_operand.vmem [shape: f32[4,60], index: 7, kind: input, shape index: {}]   ;;  %s5310_s8 = inlined_call_operand.vmem [shape: f32[16,16,60], index: 8, kind: input, shape index: {}]   ;;  %s5311_s9 = inlined_call_operand.vmem [shape: f32[16,16,60], index: 9, kind: input, shape index: {}]   ;;  %s5312_s10 = inlined_call_operand.vmem [shape: f32[16,2,16,60], index: 10, kind: output, shape index: {}]  }
   0x1   :  { %s3563_s15 = smov 0  }
   0x2 LB: > { %s3010_s16 = sadd.s32 4294967295, %s3499_s15   ;;  %s3576_s17 = sadd.s32 1, %s3499_s15   ;;  %s3499_s15 = sphi %s3563_s15, %s5374_s15   ;;  %s3495_s14 = sphi %s3561_s14, %s5373_s14   ;;  %s3491_s13 = sphi %s3559_s13, %s5372_s13  }
   0x3   : > { %s24_s18 = ssub.s32 %s3499_s15, %s3576_s17  ;;  %s27_s19 = sadd.s32 1, %s3495_s14 }
   0x4   : > { %p25_p0 = scmp.eq.s32.totalorder %s24_s18, 0  ;;  %p34_p1 = scmp.ne.s32.totalorder %s3495_s14, %s3491_s13 }
   0x5   : > { %p35_p2 = scmp.eq.s32.totalorder %s3499_s15, 0  ;;  %p258_p3 = scmp.eq.s32.totalorder %s3010_s16, 1 }
   0x6   : > { %s3587_s20 = scalar_select %p25_p0, %s3495_s14, %s27_s19  }
   0x7   : > { %p3589_p4 = por %p35_p2, %p34_p1  ;;  %p3593_p5 = por %p258_p3, %p34_p1 }
   0x8   : > { %p3013_p6 = scmp.ge.s32.totalorder %s3499_s15, 2 }
   0xa   : > { %304 = sbr.rel (%p3013_p6) target bundleno = 57 (0x39), region = 48 }
  0x11   : > { %307 = sbr.rel (!%p3589_p4) target bundleno = 37 (0x25), region = 52  ;;  %s309_s23 = sand.u32 (%p3589_p4), 1, %s3495_s14  }
  0x12   : > { %s3097_s24 = sshll.u32 (%p3589_p4), %s3499_s15, 4  ;;  %s3014_s25 = sshll.u32 (%p3589_p4), %s309_s23, 8 }
  0x13   : > { %s3605_s28 = scalar_lea.vmem (%p3589_p4), %s5302_s0, %s3097_s24  ;;  %s3610_s29 = scalar_lea.vmem (%p3589_p4), [#allocation2], %s3014_s25 }
  0x14   : > { %v404_v0 = vld [vmem:[%s3605_s28] sm:$0xff] (%p3589_p4)  ;;  %v406_v1 = vld [vmem:[%s3605_s28 + $0x8] sm:$0xff] (%p3589_p4) }
  0x15   : > { %v408_v2 = vld [vmem:[%s3605_s28 + $0x20] sm:$0xff] (%p3589_p4)  ;;  %405 = vst [vmem:[%s3610_s29] sm:$0xff] (%p3589_p4), %v404_v0  ;;  %407 = vst [vmem:[%s3610_s29 + $0x8] sm:$0xff] (%p3589_p4), %v406_v1  ;;  %v410_v3 = vld [vmem:[%s3605_s28 + $0x28] sm:$0xff] (%p3589_p4) }
  0x16   : > { %409 = vst [vmem:[%s3610_s29 + $0x10] sm:$0xff] (%p3589_p4), %v408_v2  ;;  %v412_v4 = vld [vmem:[%s3605_s28 + $0x40] sm:$0xff] (%p3589_p4)  ;;  %v414_v5 = vld [vmem:[%s3605_s28 + $0x48] sm:$0xff] (%p3589_p4)  ;;  %411 = vst [vmem:[%s3610_s29 + $0x18] sm:$0xff] (%p3589_p4), %v410_v3 }
  0x17   : > { %413 = vst [vmem:[%s3610_s29 + $0x20] sm:$0xff] (%p3589_p4), %v412_v4  ;;  %415 = vst [vmem:[%s3610_s29 + $0x28] sm:$0xff] (%p3589_p4), %v414_v5  ;;  %v416_v6 = vld [vmem:[%s3605_s28 + $0x60] sm:$0xff] (%p3589_p4)  ;;  %v418_v7 = vld [vmem:[%s3605_s28 + $0x68] sm:$0xff] (%p3589_p4) }
  0x18   : > { %v420_v8 = vld [vmem:[%s3605_s28 + $0x80] sm:$0xff]  ;;  %417 = vst [vmem:[%s3610_s29 + $0x30] sm:$0xff] %v416_v6  ;;  %419 = vst [vmem:[%s3610_s29 + $0x38] sm:$0xff] %v418_v7  ;;  %v422_v9 = vld [vmem:[%s3605_s28 + $0x88] sm:$0xff] }
  0x19   : > { %421 = vst [vmem:[%s3610_s29 + $0x40] sm:$0xff] %v420_v8  ;;  %v424_v10 = vld [vmem:[%s3605_s28 + $0xa0] sm:$0xff]  ;;  %v426_v11 = vld [vmem:[%s3605_s28 + $0xa8] sm:$0xff]  ;;  %423 = vst [vmem:[%s3610_s29 + $0x48] sm:$0xff] %v422_v9 }
  0x1a   : > { %425 = vst [vmem:[%s3610_s29 + $0x50] sm:$0xff] %v424_v10  ;;  %427 = vst [vmem:[%s3610_s29 + $0x58] sm:$0xff] %v426_v11  ;;  %v428_v12 = vld [vmem:[%s3605_s28 + $0xc0] sm:$0xff]  ;;  %v430_v13 = vld [vmem:[%s3605_s28 + $0xc8] sm:$0xff] }
  0x1b   : > { %v432_v14 = vld [vmem:[%s3605_s28 + $0xe0] sm:$0xff]  ;;  %429 = vst [vmem:[%s3610_s29 + $0x60] sm:$0xff] %v428_v12  ;;  %431 = vst [vmem:[%s3610_s29 + $0x68] sm:$0xff] %v430_v13  ;;  %v434_v15 = vld [vmem:[%s3605_s28 + $0xe8] sm:$0xff] }
  0x1c   : > { %433 = vst [vmem:[%s3610_s29 + $0x70] sm:$0xff] %v432_v14  ;;  %v436_v16 = vld [vmem:[%s3605_s28 + $0x100] sm:$0xff]  ;;  %v438_v17 = vld [vmem:[%s3605_s28 + $0x108] sm:$0xff]  ;;  %435 = vst [vmem:[%s3610_s29 + $0x78] sm:$0xff] %v434_v15 }
  0x1d   : > { %437 = vst [vmem:[%s3610_s29 + $0x80] sm:$0xff] %v436_v16  ;;  %439 = vst [vmem:[%s3610_s29 + $0x88] sm:$0xff] %v438_v17  ;;  %v440_v18 = vld [vmem:[%s3605_s28 + $0x120] sm:$0xff]  ;;  %v442_v19 = vld [vmem:[%s3605_s28 + $0x128] sm:$0xff] }
  0x1e   : > { %v444_v20 = vld [vmem:[%s3605_s28 + $0x140] sm:$0xff]  ;;  %441 = vst [vmem:[%s3610_s29 + $0x90] sm:$0xff] %v440_v18  ;;  %443 = vst [vmem:[%s3610_s29 + $0x98] sm:$0xff] %v442_v19  ;;  %v446_v21 = vld [vmem:[%s3605_s28 + $0x148] sm:$0xff] }
  0x1f   : > { %445 = vst [vmem:[%s3610_s29 + $0xa0] sm:$0xff] %v444_v20  ;;  %v448_v22 = vld [vmem:[%s3605_s28 + $0x160] sm:$0xff]  ;;  %v450_v23 = vld [vmem:[%s3605_s28 + $0x168] sm:$0xff]  ;;  %447 = vst [vmem:[%s3610_s29 + $0xa8] sm:$0xff] %v446_v21 }
  0x20   : > { %449 = vst [vmem:[%s3610_s29 + $0xb0] sm:$0xff] %v448_v22  ;;  %451 = vst [vmem:[%s3610_s29 + $0xb8] sm:$0xff] %v450_v23  ;;  %v452_v24 = vld [vmem:[%s3605_s28 + $0x180] sm:$0xff]  ;;  %v454_v25 = vld [vmem:[%s3605_s28 + $0x188] sm:$0xff] }
  0x21   : > { %v456_v26 = vld [vmem:[%s3605_s28 + $0x1a0] sm:$0xff]  ;;  %453 = vst [vmem:[%s3610_s29 + $0xc0] sm:$0xff] %v452_v24  ;;  %455 = vst [vmem:[%s3610_s29 + $0xc8] sm:$0xff] %v454_v25  ;;  %v458_v27 = vld [vmem:[%s3605_s28 + $0x1a8] sm:$0xff] }
  0x22   : > { %457 = vst [vmem:[%s3610_s29 + $0xd0] sm:$0xff] %v456_v26  ;;  %v460_v28 = vld [vmem:[%s3605_s28 + $0x1c0] sm:$0xff]  ;;  %v462_v29 = vld [vmem:[%s3605_s28 + $0x1c8] sm:$0xff]  ;;  %459 = vst [vmem:[%s3610_s29 + $0xd8] sm:$0xff] %v458_v27 }
  0x23   : > { %461 = vst [vmem:[%s3610_s29 + $0xe0] sm:$0xff] %v460_v28  ;;  %463 = vst [vmem:[%s3610_s29 + $0xe8] sm:$0xff] %v462_v29  ;;  %v464_v30 = vld [vmem:[%s3605_s28 + $0x1e0] sm:$0xff]  ;;  %v466_v31 = vld [vmem:[%s3605_s28 + $0x1e8] sm:$0xff] }
  0x24   : > { %465 = vst [vmem:[%s3610_s29 + $0xf0] sm:$0xff] %v464_v30  ;;  %467 = vst [vmem:[%s3610_s29 + $0xf8] sm:$0xff] %v466_v31 }
  0x25 PF: > { %473 = sbr.rel (!%p3589_p4) target bundleno = 57 (0x39), region = 90  ;;  %s475_s30 = sand.u32 (%p3589_p4), 1, %s3495_s14  }
  0x26   : > { %s3098_s11 = sshll.u32 (%p3589_p4), %s3499_s15, 4  ;;  %s3017_s12 = sshll.u32 (%p3589_p4), %s475_s30, 8 }
  0x27   : > { %s3680_s23 = scalar_lea.vmem (%p3589_p4), %s5303_s1, %s3098_s11  ;;  %s3685_s21 = scalar_lea.vmem (%p3589_p4), [#allocation3], %s3017_s12 }
  0x28   : > { %v570_v32 = vld [vmem:[%s3680_s23] sm:$0xff] (%p3589_p4)  ;;  %v572_v33 = vld [vmem:[%s3680_s23 + $0x8] sm:$0xff] (%p3589_p4) }
  0x29   : > { %v574_v34 = vld [vmem:[%s3680_s23 + $0x20] sm:$0xff] (%p3589_p4)  ;;  %571 = vst [vmem:[%s3685_s21] sm:$0xff] (%p3589_p4), %v570_v32  ;;  %573 = vst [vmem:[%s3685_s21 + $0x8] sm:$0xff] (%p3589_p4), %v572_v33  ;;  %v576_v35 = vld [vmem:[%s3680_s23 + $0x28] sm:$0xff] (%p3589_p4) }
  0x2a   : > { %575 = vst [vmem:[%s3685_s21 + $0x10] sm:$0xff] (%p3589_p4), %v574_v34  ;;  %v578_v36 = vld [vmem:[%s3680_s23 + $0x40] sm:$0xff] (%p3589_p4)  ;;  %v580_v37 = vld [vmem:[%s3680_s23 + $0x48] sm:$0xff] (%p3589_p4)  ;;  %577 = vst [vmem:[%s3685_s21 + $0x18] sm:$0xff] (%p3589_p4), %v576_v35 }
  0x2b   : > { %579 = vst [vmem:[%s3685_s21 + $0x20] sm:$0xff] (%p3589_p4), %v578_v36  ;;  %581 = vst [vmem:[%s3685_s21 + $0x28] sm:$0xff] (%p3589_p4), %v580_v37  ;;  %v582_v38 = vld [vmem:[%s3680_s23 + $0x60] sm:$0xff] (%p3589_p4)  ;;  %v584_v39 = vld [vmem:[%s3680_s23 + $0x68] sm:$0xff] (%p3589_p4) }
  0x2c   : > { %v586_v40 = vld [vmem:[%s3680_s23 + $0x80] sm:$0xff]  ;;  %583 = vst [vmem:[%s3685_s21 + $0x30] sm:$0xff] %v582_v38  ;;  %585 = vst [vmem:[%s3685_s21 + $0x38] sm:$0xff] %v584_v39  ;;  %v588_v41 = vld [vmem:[%s3680_s23 + $0x88] sm:$0xff] }
  0x2d   : > { %587 = vst [vmem:[%s3685_s21 + $0x40] sm:$0xff] %v586_v40  ;;  %v590_v42 = vld [vmem:[%s3680_s23 + $0xa0] sm:$0xff]  ;;  %v592_v43 = vld [vmem:[%s3680_s23 + $0xa8] sm:$0xff]  ;;  %589 = vst [vmem:[%s3685_s21 + $0x48] sm:$0xff] %v588_v41 }
  0x2e   : > { %591 = vst [vmem:[%s3685_s21 + $0x50] sm:$0xff] %v590_v42  ;;  %593 = vst [vmem:[%s3685_s21 + $0x58] sm:$0xff] %v592_v43  ;;  %v594_v44 = vld [vmem:[%s3680_s23 + $0xc0] sm:$0xff]  ;;  %v596_v45 = vld [vmem:[%s3680_s23 + $0xc8] sm:$0xff] }
  0x2f   : > { %v598_v46 = vld [vmem:[%s3680_s23 + $0xe0] sm:$0xff]  ;;  %595 = vst [vmem:[%s3685_s21 + $0x60] sm:$0xff] %v594_v44  ;;  %597 = vst [vmem:[%s3685_s21 + $0x68] sm:$0xff] %v596_v45  ;;  %v600_v47 = vld [vmem:[%s3680_s23 + $0xe8] sm:$0xff] }
  0x30   : > { %599 = vst [vmem:[%s3685_s21 + $0x70] sm:$0xff] %v598_v46  ;;  %v602_v48 = vld [vmem:[%s3680_s23 + $0x100] sm:$0xff]  ;;  %v604_v49 = vld [vmem:[%s3680_s23 + $0x108] sm:$0xff]  ;;  %601 = vst [vmem:[%s3685_s21 + $0x78] sm:$0xff] %v600_v47 }
  0x31   : > { %603 = vst [vmem:[%s3685_s21 + $0x80] sm:$0xff] %v602_v48  ;;  %605 = vst [vmem:[%s3685_s21 + $0x88] sm:$0xff] %v604_v49  ;;  %v606_v50 = vld [vmem:[%s3680_s23 + $0x120] sm:$0xff]  ;;  %v608_v51 = vld [vmem:[%s3680_s23 + $0x128] sm:$0xff] }
  0x32   : > { %v610_v52 = vld [vmem:[%s3680_s23 + $0x140] sm:$0xff]  ;;  %607 = vst [vmem:[%s3685_s21 + $0x90] sm:$0xff] %v606_v50  ;;  %609 = vst [vmem:[%s3685_s21 + $0x98] sm:$0xff] %v608_v51  ;;  %v612_v53 = vld [vmem:[%s3680_s23 + $0x148] sm:$0xff] }
  0x33   : > { %611 = vst [vmem:[%s3685_s21 + $0xa0] sm:$0xff] %v610_v52  ;;  %v614_v54 = vld [vmem:[%s3680_s23 + $0x160] sm:$0xff]  ;;  %v616_v55 = vld [vmem:[%s3680_s23 + $0x168] sm:$0xff]  ;;  %613 = vst [vmem:[%s3685_s21 + $0xa8] sm:$0xff] %v612_v53 }
  0x34   : > { %615 = vst [vmem:[%s3685_s21 + $0xb0] sm:$0xff] %v614_v54  ;;  %617 = vst [vmem:[%s3685_s21 + $0xb8] sm:$0xff] %v616_v55  ;;  %v618_v56 = vld [vmem:[%s3680_s23 + $0x180] sm:$0xff]  ;;  %v620_v57 = vld [vmem:[%s3680_s23 + $0x188] sm:$0xff] }
  0x35   : > { %v622_v58 = vld [vmem:[%s3680_s23 + $0x1a0] sm:$0xff]  ;;  %619 = vst [vmem:[%s3685_s21 + $0xc0] sm:$0xff] %v618_v56  ;;  %621 = vst [vmem:[%s3685_s21 + $0xc8] sm:$0xff] %v620_v57  ;;  %v624_v59 = vld [vmem:[%s3680_s23 + $0x1a8] sm:$0xff] }
  0x36   : > { %623 = vst [vmem:[%s3685_s21 + $0xd0] sm:$0xff] %v622_v58  ;;  %v626_v60 = vld [vmem:[%s3680_s23 + $0x1c0] sm:$0xff]  ;;  %v628_v61 = vld [vmem:[%s3680_s23 + $0x1c8] sm:$0xff]  ;;  %625 = vst [vmem:[%s3685_s21 + $0xd8] sm:$0xff] %v624_v59 }
  0x37   : > { %627 = vst [vmem:[%s3685_s21 + $0xe0] sm:$0xff] %v626_v60  ;;  %629 = vst [vmem:[%s3685_s21 + $0xe8] sm:$0xff] %v628_v61  ;;  %v630_v62 = vld [vmem:[%s3680_s23 + $0x1e0] sm:$0xff]  ;;  %v632_v63 = vld [vmem:[%s3680_s23 + $0x1e8] sm:$0xff] }
  0x38   : > { %631 = vst [vmem:[%s3685_s21 + $0xf0] sm:$0xff] %v630_v62  ;;  %633 = vst [vmem:[%s3685_s21 + $0xf8] sm:$0xff] %v632_v63 }
  0x39 PF: > { %p3020_p7 = scmp.ge.s32.totalorder %s3499_s15, 1  ;;  %p638_p8 = scmp.lt.s32.totalorder %s3499_s15, 3 }
  0x3b   : > { %p639_p9 = pnand %p3020_p7, %p638_p8 }
  0x3d   : > { %642 = sbr.rel (%p639_p9) target bundleno = 2127 (0x84f), region = 128 }
  0x44   : > { %v3024_v0 = vld [vmem:[%s5305_s3] ss:$0 sm:$0xff]  ;;  %v764_v1 = vlaneseq  ;;  %v3501_v2 = vmov 0   ;;  %v3502_v3 = vmov 1966171168   ;;  %v757_v13 = vld [vmem:[%s5304_s2 + $0x8] sm:$0xff] }
  0x45   : > { %1087 = vbcast.lane.b32.xlu0 %v3024_v0, 256  ;;  %3375 = vset.pattern.permute.xlu1 %v3501_v2  ;;  %v762_v4 = vunpack.c.l.s4 %v3502_v3  ;;  %v756_v5 = vld [vmem:[%s5304_s2] sm:$0xff]  ;;  %v809_v28 = vcombine.high %v757_v13, %v757_v13  ;;  %vm1310_vm0 = vcmask 130048   ;;  %s645_s12 = sand.u32 1, %s3491_s13   ;;  %vm1018_vm1 = vcmask 490496  }
  0x46   : > { %v3756_v6 = vshrl.u32 %v764_v1, 7  ;;  %3376 = vset.pattern.permute.xlu0 %v3501_v2  ;;  %v760_v8 = vcombine.high %v756_v5, %v756_v5  ;;  %v1269_v53 = vld [vmem:[%s5306_s4] sm:$0xff]  ;;  %s3786_s18 = sshll.u32 %s645_s12, 8  ;;  %vm1287_vm2 = vcmask 1041409   ;;  %vm1289_vm3 = vcmask 1042434   ;;  %vm4221_vm13 = vmpackc.low %vm1018_vm1, %vm1018_vm1 }
  0x47   : > { %v763_v7 = vunpack.c.0.s8 %v762_v4  ;;  %3174 = vmatprep.mubr.msk.f32.mxu0 %vm1310_vm0, %v1269_v53  ;;  %s3789_s19 = scalar_lea.vmem [#allocation2], %s3786_s18  ;;  %vm1291_vm4 = vcmask 1043459   ;;  %vm1293_vm5 = vcmask 1044484   ;;  %vm1295_vm6 = vcmask 1045509   ;;  %s4320_s13 = scalar_lea.vmem [#allocation3], %s3786_s18 }
  0x48   : > { %5334 = vst [vmem:[#allocation5_spill] sm:$0xff] %v3756_v6  ;;  %v3760_v11 = vsub.s32 0, %v3756_v6  ;;  %v3792_v54 = vld [vmem:[%s3789_s19] sm:$0xff]  ;;  %v3795_v55 = vld [vmem:[%s3789_s19 + $0x10] sm:$0xff]  ;;  %v3822_v1 = vld [vmem:[%s3789_s19 + $0x8] sm:$0xff]  ;;  %vm1297_vm7 = vcmask 1046534  }
  0x49   : > { %1091 = vbcast.lane.b32.xlu0 %v3024_v0, 264  ;;  %v766_v9 = vsub.s32 %v763_v7, %v3756_v6  ;;  %v3798_v56 = vld [vmem:[%s3789_s19 + $0x20] sm:$0xff]  ;;  %v3801_v57 = vld [vmem:[%s3789_s19 + $0x30] sm:$0xff]  ;;  %v3825_v2 = vld [vmem:[%s3789_s19 + $0x18] sm:$0xff]  ;;  %vm1299_vm8 = vcmask 1047559   ;;  %vm1641_vm9 = vcmask 1043456  }
  0x4a   : > { %5335 = vst [vmem:[#allocation6_spill] sm:$0xff] %v3760_v11  ;;  %v3804_v58 = vld [vmem:[%s3789_s19 + $0x40] sm:$0xff]  ;;  %v3807_v59 = vld [vmem:[%s3789_s19 + $0x50] sm:$0xff]  ;;  %v3828_v3 = vld [vmem:[%s3789_s19 + $0x28] sm:$0xff]  ;;  %vm3503_vm10 = vmmov 1   ;;  %vm1822_vm12 = vcmask 486400  }
  0x4b   : > { %v767_v10 = vrot.slane %v756_v5, %v766_v9  ;;  %v774_v12 = vrot.slane %v760_v8, %v766_v9  ;;  %v816_v20 = vrot.slane %v757_v13, %v766_v9  ;;  %v823_v33 = vrot.slane %v809_v28, %v766_v9  ;;  %v3810_v60 = vld [vmem:[%s3789_s19 + $0x60] sm:$0xff]  ;;  %v3813_v61 = vld [vmem:[%s3789_s19 + $0x70] sm:$0xff]  ;;  %v3831_v4 = vld [vmem:[%s3789_s19 + $0x38] sm:$0xff] }
  0x4c   : > { %v3816_v62 = vld [vmem:[%s3789_s19 + $0x80] sm:$0xff]  ;;  %v3819_v63 = vld [vmem:[%s3789_s19 + $0x90] sm:$0xff]  ;;  %vm3306_vm11 = vmpackc.low %vm1641_vm9, %vm3503_vm10 }
  0x4d   : > { %v783_v14 = vrot.slane %v767_v10, %v766_v9  ;;  %v775_v15 = vcombine.high %v767_v10, %v767_v10  ;;  %v776_v16 = vcombine.high %v774_v12, %v774_v12  ;;  %v824_v27 = vcombine.high %v816_v20, %v816_v20  ;;  %5336 = vst [vmem:[#allocation7_spill] sm:$0xff] %v3816_v62  ;;  %v3834_v5 = vld [vmem:[%s3789_s19 + $0xa0] sm:$0xff]  ;;  %v3837_v7 = vld [vmem:[%s3789_s19 + $0xb0] sm:$0xff] }
  0x4e   : > { %v790_v30 = vrot.slane %v774_v12, %v766_v9  ;;  %v825_v38 = vcombine.high %v823_v33, %v823_v33  ;;  %v832_v40 = vrot.slane %v816_v20, %v766_v9  ;;  %v839_v48 = vrot.slane %v823_v33, %v766_v9  ;;  %5337 = vst [vmem:[#allocation8_spill] sm:$0xff] %v3819_v63  ;;  %v3840_v8 = vld [vmem:[%s3789_s19 + $0xc0] sm:$0xff]  ;;  %v3849_v12 = vld [vmem:[%s3789_s19 + $0xf0] sm:$0xff]  ;;  %v3895_v33 = vld [vmem:[%s3789_s19 + $0xb8] sm:$0xff] }
  0x4f   : > { %v861_v17 = vrot.slane %v783_v14, %v3760_v11  ;;  %v805_v18 = vcombine.high %v783_v14, %v783_v14  ;;  %v797_v19 = vrot.slane %v775_v15, %v766_v9  ;;  %v804_v21 = vrot.slane %v776_v16, %v766_v9  ;;  %5338 = vst [vmem:[#allocation9_spill] sm:$0xff] %v3834_v5  ;;  %v3846_v10 = vld [vmem:[%s3789_s19 + $0xe0] sm:$0xff] }
  0x50   : > { %v846_v32 = vrot.slane %v824_v27, %v766_v9  ;;  %v877_v34 = vrot.slane %v790_v30, %v3760_v11  ;;  %v806_v35 = vcombine.high %v790_v30, %v790_v30  ;;  %v853_v42 = vrot.slane %v825_v38, %v766_v9  ;;  %5339 = vst [vmem:[#allocation10_spill] sm:$0xff] %v3837_v7  ;;  %v3843_v9 = vld [vmem:[%s3789_s19 + $0xd0] sm:$0xff] }
  0x51   : > { %923 = vperm.xlu1 %3375, %v861_v17   ;;  %v865_v22 = vrot.slane %v797_v19, %v3760_v11  ;;  %v869_v23 = vrot.slane %v805_v18, %v3760_v11  ;;  %v807_v24 = vcombine.high %v797_v19, %v797_v19  ;;  %v881_v25 = vrot.slane %v804_v21, %v3760_v11  ;;  %v3856_v17 = vld [vmem:[%s3789_s19 + $0x48] sm:$0xff]  ;;  %v3859_v18 = vld [vmem:[%s3789_s19 + $0x58] sm:$0xff] }
  0x52   : > { %v808_v26 = vcombine.high %v804_v21, %v804_v21  ;;  %v897_v36 = vrot.slane %v846_v32, %v3760_v11  ;;  %v856_v37 = vcombine.high %v846_v32, %v846_v32  ;;  %v885_v39 = vrot.slane %v806_v35, %v3760_v11  ;;  %5340 = vst [vmem:[#allocation11_spill] sm:$0xff] %v3840_v8  ;;  %v3862_v19 = vld [vmem:[%s3789_s19 + $0x68] sm:$0xff] }
  0x53   : > { %931 = vperm.xlu0 %3376, %v869_v23   ;;  %v873_v29 = vrot.slane %v807_v24, %v3760_v11  ;;  %v893_v43 = vrot.slane %v832_v40, %v3760_v11  ;;  %v854_v44 = vcombine.high %v832_v40, %v832_v40  ;;  %v913_v45 = vrot.slane %v853_v42, %v3760_v11  ;;  %v3871_v24 = vld [vmem:[%s3789_s19 + $0x78] sm:$0xff]  ;;  %v3892_v32 = vld [vmem:[%s3789_s19 + $0xa8] sm:$0xff] }
  0x54   : > { %v889_v31 = vrot.slane %v808_v26, %v3760_v11  ;;  %v905_v41 = vrot.slane %v856_v37, %v3760_v11  ;;  %v857_v46 = vcombine.high %v853_v42, %v853_v42  ;;  %v909_v50 = vrot.slane %v839_v48, %v3760_v11  ;;  %5341 = vst [vmem:[#allocation12_spill] sm:$0xff] %v3843_v9  ;;  %v3877_v26 = vld [vmem:[%s3789_s19 + $0x98] sm:$0xff]  ;;  %v3916_v40 = vld [vmem:[%s3789_s19 + $0xe8] sm:$0xff] }
  0x55   : > { %927 = vperm.xlu1 %3375, %v865_v22   ;;  %v901_v47 = vrot.slane %v854_v44, %v3760_v11  ;;  %v855_v51 = vcombine.high %v839_v48, %v839_v48  ;;  %5342 = vst [vmem:[#allocation13_spill] sm:$0xff] %v3846_v10  ;;  %5343 = vst [vmem:[#allocation14_spill] sm:$0xff] %v3849_v12 }
  0x56   : > { %v921_v49 = vrot.slane %v857_v46, %v3760_v11  ;;  %5345 = vst [vmem:[#allocation16_spill] sm:$0xff] %v3877_v26  ;;  %5346 = vst [vmem:[#allocation17_spill] sm:$0xff] %v3892_v32 }
  0x57   : > { %943 = vperm.xlu0 %3376, %v881_v25   ;;  %v917_v52 = vrot.slane %v855_v51, %v3760_v11  ;;  %v3874_v25 = vld [vmem:[%s3789_s19 + $0x88] sm:$0xff]  ;;  %5347 = vst [vmem:[#allocation18_spill] sm:$0xff] %v3895_v33  ;;  %5350 = vst [vmem:[#allocation21_spill] sm:$0xff] %v3916_v40 }
  0x58   : > { %5344 = vst [vmem:[#allocation15_spill] sm:$0xff] %v3874_v25 }
  0x59   : > { %935 = vperm.xlu1 %3375, %v873_v29  }
  0x5b   : > { %951 = vperm.xlu0 %3376, %v889_v31  }
  0x5d   : > { %939 = vperm.xlu1 %3375, %v877_v34   ;;  %v3898_v34 = vld [vmem:[%s3789_s19 + $0xc8] sm:$0xff] }
  0x5e   : > { %5348 = vst [vmem:[#allocation19_spill] sm:$0xff] %v3898_v34 }
  0x5f   : > { %959 = vperm.xlu0 %3376, %v897_v36  }
  0x61   : > { %947 = vperm.xlu1 %3375, %v885_v39   ;;  %v3913_v39 = vld [vmem:[%s3789_s19 + $0xd8] sm:$0xff] }
  0x62   : > { %5349 = vst [vmem:[#allocation20_spill] sm:$0xff] %v3913_v39 }
  0x63   : > { %967 = vperm.xlu0 %3376, %v905_v41   ;;  %v3919_v41 = vld [vmem:[%s3789_s19 + $0xf8] sm:$0xff] }
  0x64   : > { %5351 = vst [vmem:[#allocation22_spill] sm:$0xff] %v3919_v41 }
  0x65   : > { %955 = vperm.xlu1 %3375, %v893_v43  }
  0x67   : > { %975 = vperm.xlu0 %3376, %v913_v45  }
  0x69   : > { %963 = vperm.xlu1 %3375, %v901_v47  }
  0x6b   : > { %983 = vperm.xlu0 %3376, %v921_v49  }
  0x6d   : > { %971 = vperm.xlu1 %3375, %v909_v50  }
  0x71   : > { %979 = vperm.xlu1 %3375, %v917_v52  }
  0xb7   : > { %v1088_v0 = vpop.permute.xlu0 %1087 }
  0xb8   : > { %v1093_v13 = vmul.f32 %v1088_v0, %v3792_v54  ;;  %v1095_v14 = vmul.f32 %v1088_v0, %v3795_v55  ;;  %v1097_v15 = vmul.f32 %v1088_v0, %v3798_v56  ;;  %v1099_v16 = vmul.f32 %v1088_v0, %v3801_v57 }
  0xb9   : > { %v1101_v20 = vmul.f32 %v1088_v0, %v3804_v58  ;;  %v1103_v21 = vmul.f32 %v1088_v0, %v3807_v59  ;;  %v1105_v22 = vmul.f32 %v1088_v0, %v3810_v60  ;;  %v3868_v23 = vmul.f32 %v1088_v0, %v3813_v61 }
  0xba   : > { %v3880_v27 = vmul.f32 %v1088_v0, %v3816_v62  ;;  %v3883_v28 = vmul.f32 %v1088_v0, %v3819_v63  ;;  %v3886_v29 = vmul.f32 %v1088_v0, %v3834_v5  ;;  %v3889_v30 = vmul.f32 %v1088_v0, %v3837_v7 }
  0xbb   : > { %v1092_v31 = vpop.permute.xlu0 %1091  ;;  %v3901_v35 = vmul.f32 %v1088_v0, %v3840_v8  ;;  %v3904_v36 = vmul.f32 %v1088_v0, %v3843_v9  ;;  %v3907_v37 = vmul.f32 %v1088_v0, %v3846_v10  ;;  %v3910_v38 = vmul.f32 %v1088_v0, %v3849_v12 }
  0xbc   : > { %v1094_v42 = vmul.f32 %v1092_v31, %v3822_v1  ;;  %v1096_v43 = vmul.f32 %v1092_v31, %v3825_v2  ;;  %v1098_v44 = vmul.f32 %v1092_v31, %v3828_v3  ;;  %v1100_v45 = vmul.f32 %v1092_v31, %v3831_v4 }
  0xbd   : > { %v1102_v46 = vmul.f32 %v1092_v31, %v3856_v17  ;;  %v1104_v47 = vmul.f32 %v1092_v31, %v3859_v18  ;;  %v1106_v48 = vmul.f32 %v1092_v31, %v3862_v19  ;;  %v1108_v49 = vmul.f32 %v1092_v31, %v3871_v24 }
  0xbe   : > { %v3930_v50 = vmul.f32 %v1092_v31, %v3874_v25  ;;  %v3933_v51 = vmul.f32 %v1092_v31, %v3877_v26  ;;  %v3936_v52 = vmul.f32 %v1092_v31, %v3892_v32  ;;  %v3939_v53 = vmul.f32 %v1092_v31, %v3895_v33 }
  0xbf   : > { %v3942_v0 = vmul.f32 %v1092_v31, %v3898_v34  ;;  %v3945_v11 = vmul.f32 %v1092_v31, %v3913_v39  ;;  %v3948_v6 = vmul.f32 %v1092_v31, %v3916_v40  ;;  %v3951_v12 = vmul.f32 %v1092_v31, %v3919_v41 }
  0xc0   : > { %v1125_v10 = vsel %vm1018_vm1, %v1093_v13, 0.0  ;;  %v1126_v9 = vsel %vm1018_vm1, %v1094_v42, 0.0  ;;  %v1134_v8 = vsel %vm1018_vm1, %v1095_v14, 0.0  ;;  %v1135_v33 = vsel %vm1018_vm1, %v1096_v43, 0.0 }
  0xc1   : > { %v1127_v7 = vadd.f32 %v1126_v9, %v1125_v10  ;;  %v1136_v34 = vadd.f32 %v1135_v33, %v1134_v8  ;;  %v1143_v32 = vsel %vm1018_vm1, %v1097_v15, 0.0  ;;  %v1144_v39 = vsel %vm1018_vm1, %v1098_v44, 0.0 }
  0xc2   : > { %v1145_v5 = vadd.f32 %v1144_v39, %v1143_v32  ;;  %v1152_v40 = vsel %vm1018_vm1, %v1099_v16, 0.0  ;;  %v1153_v31 = vsel %vm1018_vm1, %v1100_v45, 0.0  ;;  %v1161_v41 = vsel %vm1018_vm1, %v1101_v20, 0.0 }
  0xc3   : > { %v1128_v13 = vrot.slane %v1127_v7, 4  ;;  %v1137_v26 = vrot.slane %v1136_v34, 4  ;;  %v1154_v42 = vadd.f32 %v1153_v31, %v1152_v40  ;;  %v1162_v14 = vsel %vm1018_vm1, %v1102_v46, 0.0 }
  0xc4   : > { %v1146_v63 = vrot.slane %v1145_v5, 4  ;;  %v1163_v43 = vadd.f32 %v1162_v14, %v1161_v41  ;;  %v1170_v8 = vsel %vm1018_vm1, %v1103_v21, 0.0  ;;  %v1171_v9 = vsel %vm1018_vm1, %v1104_v47, 0.0 }
  0xc5   : > { %v1129_v10 = vadd.f32 %v1128_v13, %v1127_v7  ;;  %v1138_v15 = vadd.f32 %v1137_v26, %v1136_v34  ;;  %v1155_v32 = vrot.slane %v1154_v42, 4  ;;  %v1172_v33 = vadd.f32 %v1171_v9, %v1170_v8 }
  0xc6   : > { %v1147_v16 = vadd.f32 %v1146_v63, %v1145_v5  ;;  %v1164_v39 = vrot.slane %v1163_v43, 4  ;;  %v1179_v44 = vsel %vm1018_vm1, %v1105_v22, 0.0  ;;  %v1180_v20 = vsel %vm1018_vm1, %v1106_v48, 0.0 }
  0xc7   : > { %v1130_v45 = vrot.slane %v1129_v10, 2  ;;  %v1139_v40 = vrot.slane %v1138_v15, 2  ;;  %v1156_v31 = vadd.f32 %v1155_v32, %v1154_v42  ;;  %v1173_v46 = vrot.slane %v1172_v33, 4 }
  0xc8   : > { %v1148_v25 = vrot.slane %v1147_v16, 2  ;;  %v1165_v41 = vadd.f32 %v1164_v39, %v1163_v43  ;;  %v1181_v14 = vadd.f32 %v1180_v20, %v1179_v44  ;;  %v1188_v21 = vsel %vm1018_vm1, %v3868_v23, 0.0 }
  0xc9   : > { %v1131_v7 = vadd.f32 %v1130_v45, %v1129_v10  ;;  %v1140_v26 = vadd.f32 %v1139_v40, %v1138_v15  ;;  %v1157_v34 = vrot.slane %v1156_v31, 2  ;;  %v1174_v47 = vadd.f32 %v1173_v46, %v1172_v33 }
  0xca   : > { %v1149_v63 = vadd.f32 %v1148_v25, %v1147_v16  ;;  %v1166_v5 = vrot.slane %v1165_v41, 2  ;;  %v1182_v13 = vrot.slane %v1181_v14, 4  ;;  %v1189_v22 = vsel %vm1018_vm1, %v1108_v49, 0.0 }
  0xcb   : > { %v1132_v48 = vrot.slane %v1131_v7, 1  ;;  %v1141_v8 = vrot.slane %v1140_v26, 1  ;;  %v1158_v9 = vadd.f32 %v1157_v34, %v1156_v31  ;;  %v1175_v42 = vrot.slane %v1174_v47, 2 }
  0xcc   : > { %v1150_v32 = vrot.slane %v1149_v63, 1  ;;  %v1167_v62 = vadd.f32 %v1166_v5, %v1165_v41  ;;  %v1183_v43 = vadd.f32 %v1182_v13, %v1181_v14  ;;  %v1190_v39 = vadd.f32 %v1189_v22, %v1188_v21 }
  0xcd   : > { %v3970_v44 = vadd.f32 %v1132_v48, %v1131_v7  ;;  %v3972_v23 = vadd.f32 %v1141_v8, %v1140_v26  ;;  %v1159_v10 = vrot.slane %v1158_v9, 1  ;;  %v1176_v15 = vadd.f32 %v1175_v42, %v1174_v47 }
  0xce   : > { %v3974_v33 = vadd.f32 %v1150_v32, %v1149_v63  ;;  %v1168_v25 = vrot.slane %v1167_v62, 1  ;;  %v1184_v16 = vrot.slane %v1183_v43, 2  ;;  %v1191_v20 = vrot.slane %v1190_v39, 4 }
  0xcf   : > { %v3976_v49 = vadd.f32 %v1159_v10, %v1158_v9  ;;  %v1177_v45 = vrot.slane %v1176_v15, 1  ;;  %v1197_v40 = vsel %vm1018_vm1, %v3880_v27, 0.0  ;;  %v1198_v31 = vsel %vm1018_vm1, %v3930_v50, 0.0 }
  0xd0   : > { %v3982_v46 = vadd.f32 %v1168_v25, %v1167_v62  ;;  %v1185_v41 = vadd.f32 %v1184_v16, %v1183_v43  ;;  %v1192_v14 = vadd.f32 %v1191_v20, %v1190_v39  ;;  %v1199_v21 = vadd.f32 %v1198_v31, %v1197_v40  ;;  %v3984_v7 = vpop.permute.xlu1 %923 }
  0xd1   : > { %v3986_v26 = vadd.f32 %v1177_v45, %v1176_v15  ;;  %v1206_v34 = vsel %vm1018_vm1, %v3883_v28, 0.0  ;;  %v1207_v47 = vsel %vm1018_vm1, %v3933_v51, 0.0  ;;  %v1215_v27 = vsel %vm1018_vm1, %v3886_v29, 0.0 }
  0xd2   : > { %v1186_v63 = vrot.slane %v1185_v41, 1  ;;  %v1193_v50 = vrot.slane %v1192_v14, 2  ;;  %v1200_v62 = vrot.slane %v1199_v21, 4  ;;  %v1208_v5 = vadd.f32 %v1207_v47, %v1206_v34 }
  0xd3   : > { %v1216_v13 = vsel %vm1018_vm1, %v3936_v52, 0.0  ;;  %v1224_v22 = vsel %vm1018_vm1, %v3889_v30, 0.0  ;;  %v1225_v48 = vsel %vm1018_vm1, %v3939_v53, 0.0  ;;  %v1233_v28 = vsel %vm1018_vm1, %v3901_v35, 0.0 }
  0xd4   : > { %v4002_v51 = vadd.f32 %v1186_v63, %v1185_v41  ;;  %v1194_v8 = vadd.f32 %v1193_v50, %v1192_v14  ;;  %v1201_v29 = vadd.f32 %v1200_v62, %v1199_v21  ;;  %v1209_v9 = vrot.slane %v1208_v5, 4  ;;  %v4004_v42 = vpop.permute.xlu1 %927  ;;  %v932_v63 = vpop.permute.xlu0 %931 }
  0xd5   : > { %v1217_v32 = vadd.f32 %v1216_v13, %v1215_v27  ;;  %v1226_v43 = vadd.f32 %v1225_v48, %v1224_v22  ;;  %v1234_v52 = vsel %vm1018_vm1, %v3942_v0, 0.0  ;;  %v1242_v30 = vsel %vm1018_vm1, %v3904_v36, 0.0 }
  0xd6   : > { %v1195_v53 = vrot.slane %v1194_v8, 1  ;;  %v1202_v39 = vrot.slane %v1201_v29, 2  ;;  %v1210_v35 = vadd.f32 %v1209_v9, %v1208_v5  ;;  %v1235_v10 = vadd.f32 %v1234_v52, %v1233_v28 }
  0xd7   : > { %v1218_v15 = vrot.slane %v1217_v32, 4  ;;  %v1227_v25 = vrot.slane %v1226_v43, 4  ;;  %v1243_v16 = vsel %vm1018_vm1, %v3945_v11, 0.0  ;;  %v1251_v20 = vsel %vm1018_vm1, %v3907_v37, 0.0 }
  0xd8   : > { %v4014_v45 = vadd.f32 %v1195_v53, %v1194_v8  ;;  %v1203_v0 = vadd.f32 %v1202_v39, %v1201_v29  ;;  %v1211_v40 = vrot.slane %v1210_v35, 2  ;;  %v1236_v36 = vrot.slane %v1235_v10, 4  ;;  %v4016_v31 = vpop.permute.xlu1 %935 }
  0xd9   : > { %v1219_v41 = vadd.f32 %v1218_v15, %v1217_v32  ;;  %v1228_v14 = vadd.f32 %v1227_v25, %v1226_v43  ;;  %v1244_v21 = vadd.f32 %v1243_v16, %v1242_v30  ;;  %v1252_v34 = vsel %vm1018_vm1, %v3948_v6, 0.0 }
  0xda   : > { %v1204_v11 = vrot.slane %v1203_v0, 1  ;;  %v1212_v47 = vadd.f32 %v1211_v40, %v1210_v35  ;;  %v1237_v27 = vadd.f32 %v1236_v36, %v1235_v10  ;;  %v1253_v37 = vadd.f32 %v1252_v34, %v1251_v20  ;;  %v4026_v35 = vpop.permute.xlu0 %943 }
  0xdb   : > { %v1220_v50 = vrot.slane %v1219_v41, 2  ;;  %v1229_v62 = vrot.slane %v1228_v14, 2  ;;  %v1245_v5 = vrot.slane %v1244_v21, 4  ;;  %v1260_v13 = vsel %vm1018_vm1, %v3910_v38, 0.0 }
  0xdc   : > { %v1205_v22 = vadd.f32 %v1204_v11, %v1203_v0  ;;  %v1213_v48 = vrot.slane %v1212_v47, 1  ;;  %v1238_v28 = vrot.slane %v1237_v27, 2  ;;  %v1254_v8 = vrot.slane %v1253_v37, 4  ;;  %v4022_v29 = vpop.permute.xlu1 %939 }
  0xdd   : > { %v1221_v6 = vadd.f32 %v1220_v50, %v1219_v41  ;;  %v1230_v9 = vadd.f32 %v1229_v62, %v1228_v14  ;;  %v1246_v32 = vadd.f32 %v1245_v5, %v1244_v21  ;;  %v1261_v43 = vsel %vm1018_vm1, %v3951_v12, 0.0 }
  0xde   : > { %v1214_v52 = vadd.f32 %v1213_v48, %v1212_v47  ;;  %v1239_v30 = vadd.f32 %v1238_v28, %v1237_v27  ;;  %v1255_v53 = vadd.f32 %v1254_v8, %v1253_v37  ;;  %v1262_v39 = vadd.f32 %v1261_v43, %v1260_v13  ;;  %v952_v13 = vpop.permute.xlu0 %951 }
  0xdf   : > { %v1222_v10 = vrot.slane %v1221_v6, 1  ;;  %v1231_v38 = vrot.slane %v1230_v9, 1  ;;  %v1247_v15 = vrot.slane %v1246_v32, 2  ;;  %v1288_v25 = vsel %vm1287_vm2, %v3972_v23, %v3970_v44 }
  0xe0   : > { %v1240_v16 = vrot.slane %v1239_v30, 1  ;;  %v1256_v20 = vrot.slane %v1255_v53, 2  ;;  %v1263_v0 = vrot.slane %v1262_v39, 4  ;;  %v1290_v40 = vsel %vm1289_vm3, %v3974_v33, %v1288_v25  ;;  %v948_v27 = vpop.permute.xlu1 %947 }
  0xe1   : > { %v1223_v12 = vadd.f32 %v1222_v10, %v1221_v6  ;;  %v1232_v36 = vadd.f32 %v1231_v38, %v1230_v9  ;;  %v1248_v41 = vadd.f32 %v1247_v15, %v1246_v32  ;;  %v1292_v14 = vsel %vm1291_vm4, %v3976_v49, %v1290_v40 }
  0xe2   : > { %v1241_v21 = vadd.f32 %v1240_v16, %v1239_v30  ;;  %v1257_v34 = vadd.f32 %v1256_v20, %v1255_v53  ;;  %v1264_v11 = vadd.f32 %v1263_v0, %v1262_v39  ;;  %v1294_v47 = vsel %vm1293_vm5, %v3982_v46, %v1292_v14  ;;  %v960_v16 = vpop.permute.xlu0 %959 }
  0xe3   : > { %v1249_v44 = vrot.slane %v1248_v41, 1  ;;  %v1296_v23 = vsel %vm1295_vm6, %v3986_v26, %v1294_v47  ;;  %v1301_v37 = vsel %vm1287_vm2, %v1214_v52, %v1205_v22  ;;  %v986_v33 = vmul.f32 %v3984_v7, %v3792_v54 }
  0xe4   : > { %v1258_v50 = vrot.slane %v1257_v34, 1  ;;  %v1265_v62 = vrot.slane %v1264_v11, 2  ;;  %v1298_v49 = vsel %vm1297_vm7, %v4002_v51, %v1296_v23  ;;  %v1302_v5 = vsel %vm1289_vm3, %v1223_v12, %v1301_v37  ;;  %v956_v53 = vpop.permute.xlu1 %955 }
  0xe5   : > { %v1250_v48 = vadd.f32 %v1249_v44, %v1248_v41  ;;  %v1300_v46 = vsel %vm1299_vm8, %v4014_v45, %v1298_v49  ;;  %v1303_v28 = vsel %vm1291_vm4, %v1232_v36, %v1302_v5  ;;  %v987_v26 = vmul.f32 %v3984_v7, %v3822_v1  ;;  %v5353_v5 = vld [vmem:[#allocation15_spill] sm:$0xff] }
  0xe6   : > { %v1259_v22 = vadd.f32 %v1258_v50, %v1257_v34  ;;  %v1266_v8 = vadd.f32 %v1265_v62, %v1264_v11  ;;  %v1304_v6 = vsel %vm1293_vm5, %v1241_v21, %v1303_v28  ;;  %v1019_v9 = vsel %vm1018_vm1, %v986_v33, 0.0  ;;  %v968_v37 = vpop.permute.xlu0 %967  ;;  %v5352_v62 = vld [vmem:[#allocation7_spill] sm:$0xff]  ;;  %v5354_v28 = vld [vmem:[#allocation8_spill] sm:$0xff] }
  0xe7   : > { %v1305_v51 = vsel %vm1295_vm6, %v1250_v48, %v1304_v6  ;;  %v1050_v32 = vsel %vm1018_vm1, %v987_v26, 0.0  ;;  %v988_v43 = vmul.f32 %v4004_v42, %v3795_v55  ;;  %v989_v45 = vmul.f32 %v4004_v42, %v3825_v2 }
  0xe8   : > { %v1267_v52 = vrot.slane %v1266_v8, 1  ;;  %v1306_v30 = vsel %vm1297_vm7, %v1259_v22, %v1305_v51  ;;  %v990_v1 = vmul.f32 %v932_v63, %v3798_v56  ;;  %v991_v7 = vmul.f32 %v932_v63, %v3828_v3  ;;  %v964_v11 = vpop.permute.xlu1 %963 }
  0xe9   : > { %v1020_v39 = vsel %vm1018_vm1, %v988_v43, 0.0  ;;  %v1051_v10 = vsel %vm1018_vm1, %v989_v45, 0.0  ;;  %v992_v38 = vmul.f32 %v4016_v31, %v3801_v57  ;;  %v993_v55 = vmul.f32 %v4016_v31, %v3831_v4  ;;  %v5357_v45 = vld [vmem:[#allocation17_spill] sm:$0xff] }
  0xea   : > { %v1268_v15 = vadd.f32 %v1267_v52, %v1266_v8  ;;  %v1021_v2 = vadd.f32 %v1020_v39, %v1019_v9  ;;  %v1052_v42 = vadd.f32 %v1051_v10, %v1050_v32  ;;  %v1022_v25 = vsel %vm1018_vm1, %v990_v1, 0.0  ;;  %v5356_v32 = vld [vmem:[#allocation9_spill] sm:$0xff]  ;;  %v5358_v10 = vld [vmem:[#allocation10_spill] sm:$0xff] }
  0xeb   : > { %v1053_v56 = vsel %vm1018_vm1, %v991_v7, 0.0  ;;  %v1024_v3 = vsel %vm1018_vm1, %v992_v38, 0.0  ;;  %v1055_v63 = vsel %vm1018_vm1, %v993_v55, 0.0  ;;  %v994_v20 = vmul.f32 %v4022_v29, %v3804_v58  ;;  %v976_v7 = vpop.permute.xlu0 %975  ;;  %v5359_v55 = vld [vmem:[#allocation18_spill] sm:$0xff] }
  0xec   : > { %v1307_v57 = vsel %vm1299_vm8, %v1268_v15, %v1306_v30  ;;  %v1023_v0 = vadd.f32 %v1022_v25, %v1021_v2  ;;  %v1054_v40 = vadd.f32 %v1053_v56, %v1052_v42  ;;  %v995_v4 = vmul.f32 %v4022_v29, %v3856_v17  ;;  %v972_v6 = vpop.permute.xlu1 %971  ;;  %v5360_v56 = vld [vmem:[#allocation11_spill] sm:$0xff] }
  0xed   : > { %v3285_v31 = vpack.c.bf16 %v1307_v57, %v1300_v46  ;;  %v1026_v12 = vsel %vm1018_vm1, %v994_v20, 0.0  ;;  %v996_v36 = vmul.f32 %v4026_v35, %v3807_v59  ;;  %v997_v41 = vmul.f32 %v4026_v35, %v3859_v18  ;;  %v1270_v59 = vld [vmem:[%s5306_s4 + $0x8] sm:$0xff] }
  0xee   : > { %v1025_v14 = vadd.f32 %v1024_v3, %v1023_v0  ;;  %v1056_v21 = vadd.f32 %v1055_v63, %v1054_v40  ;;  %v1057_v58 = vsel %vm1018_vm1, %v995_v4, 0.0  ;;  %v998_v34 = vmul.f32 %v948_v27, %v3810_v60  ;;  %v5361_v63 = vld [vmem:[#allocation19_spill] sm:$0xff] }
  0xef   : > { %3286 = vmatprep.subr.bf16.mxu0 %v3285_v31  ;;  %v1028_v47 = vsel %vm1018_vm1, %v996_v36, 0.0  ;;  %v1059_v17 = vsel %vm1018_vm1, %v997_v41, 0.0  ;;  %v999_v29 = vmul.f32 %v948_v27, %v3862_v19  ;;  %v1000_v44 = vmul.f32 %v952_v13, %v3813_v61  ;;  %v5363_v41 = vld [vmem:[#allocation20_spill] sm:$0xff] }
  0xf0   : > { %3288 = vmatpush3.bf16.msra.mxu0 %v3285_v31  ;;  %v1027_v18 = vadd.f32 %v1026_v12, %v1025_v14  ;;  %v1058_v35 = vadd.f32 %v1057_v58, %v1056_v21  ;;  %v1001_v23 = vmul.f32 %v952_v13, %v3871_v24  ;;  %v1030_v33 = vsel %vm1018_vm1, %v998_v34, 0.0  ;;  %v5355_v24 = vld [vmem:[#allocation16_spill] sm:$0xff]  ;;  %v980_v40 = vpop.permute.xlu1 %979  ;;  %v984_v34 = vpop.permute.xlu0 %983 }
  0xf1   : > { %v1061_v50 = vsel %vm1018_vm1, %v999_v29, 0.0  ;;  %v1002_v49 = vmul.f32 %v956_v53, %v5352_v62  ;;  %v1003_v19 = vmul.f32 %v956_v53, %v5353_v5  ;;  %v1032_v48 = vsel %vm1018_vm1, %v1000_v44, 0.0  ;;  %v5362_v12 = vld [vmem:[#allocation12_spill] sm:$0xff]  ;;  %v5365_v44 = vld [vmem:[#allocation21_spill] sm:$0xff] }
  0xf2   : > { %v1029_v27 = vadd.f32 %v1028_v47, %v1027_v18  ;;  %v1060_v61 = vadd.f32 %v1059_v17, %v1058_v35  ;;  %v1063_v46 = vsel %vm1018_vm1, %v1001_v23, 0.0  ;;  %v1004_v26 = vmul.f32 %v960_v16, %v5354_v28  ;;  %v5364_v17 = vld [vmem:[#allocation13_spill] sm:$0xff] }
  0xf3   : > { %3175 = vmatmul.mubr.msk.f32.vlgmr.msra.gmra.mrb[0].mxu0 %vm1310_vm0, %v1270_v59  ;;  %v1005_v13 = vmul.f32 %v960_v16, %v5355_v24  ;;  %v1034_v9 = vsel %vm1018_vm1, %v1002_v49, 0.0  ;;  %v1065_v51 = vsel %vm1018_vm1, %v1003_v19, 0.0  ;;  %v1006_v43 = vmul.f32 %v964_v11, %v5356_v32 }
  0xf4   : > { %v1031_v22 = vadd.f32 %v1030_v33, %v1029_v27  ;;  %v1062_v8 = vadd.f32 %v1061_v50, %v1060_v61  ;;  %v1007_v52 = vmul.f32 %v964_v11, %v5357_v45  ;;  %v1036_v53 = vsel %vm1018_vm1, %v1004_v26, 0.0  ;;  %v5366_v33 = vld [vmem:[#allocation14_spill] sm:$0xff] }
  0xf5   : > { %v1067_v39 = vsel %vm1018_vm1, %v1005_v13, 0.0  ;;  %v1008_v38 = vmul.f32 %v968_v37, %v5358_v10  ;;  %v1009_v15 = vmul.f32 %v968_v37, %v5359_v55  ;;  %v1038_v25 = vsel %vm1018_vm1, %v1006_v43, 0.0  ;;  %v5367_v27 = vld [vmem:[#allocation22_spill] sm:$0xff] }
  0xf6   : > { %v1033_v30 = vadd.f32 %v1032_v48, %v1031_v22  ;;  %v1064_v1 = vadd.f32 %v1063_v46, %v1062_v8  ;;  %v1069_v16 = vsel %vm1018_vm1, %v1007_v52, 0.0  ;;  %v1010_v3 = vmul.f32 %v972_v6, %v5360_v56  ;;  %v1393_v10 = vld [vmem:[%s5307_s5 + $0x8] sm:$0xff] }
  0xf7   : > { %v1011_v20 = vmul.f32 %v972_v6, %v5361_v63  ;;  %v1040_v4 = vsel %vm1018_vm1, %v1008_v38, 0.0  ;;  %v1071_v31 = vsel %vm1018_vm1, %v1009_v15, 0.0  ;;  %v1012_v36 = vmul.f32 %v976_v7, %v5362_v12  ;;  %v1392_v38 = vld [vmem:[%s5307_s5] sm:$0xff] }
  0xf8   : > { %v1035_v2 = vadd.f32 %v1034_v9, %v1033_v30  ;;  %v1066_v42 = vadd.f32 %v1065_v51, %v1064_v1  ;;  %v1013_v14 = vmul.f32 %v976_v7, %v5363_v41  ;;  %v1042_v11 = vsel %vm1018_vm1, %v1010_v3, 0.0 }
  0xf9   : > { %v1073_v47 = vsel %vm1018_vm1, %v1011_v20, 0.0  ;;  %v1014_v29 = vmul.f32 %v980_v40, %v5364_v17  ;;  %v1015_v59 = vmul.f32 %v980_v40, %v5365_v44  ;;  %v1044_v23 = vsel %vm1018_vm1, %v1012_v36, 0.0 }
  0xfa   : > { %v1037_v57 = vadd.f32 %v1036_v53, %v1035_v2  ;;  %v1068_v0 = vadd.f32 %v1067_v39, %v1066_v42  ;;  %v1075_v37 = vsel %vm1018_vm1, %v1013_v14, 0.0  ;;  %v1016_v50 = vmul.f32 %v984_v34, %v5366_v33  ;;  %v1609_v39 = vld [vmem:[%s5308_s6] sm:$0xff] }
  0xfb   : > { %v1046_v5 = vsel %vm1018_vm1, %v1014_v29, 0.0  ;;  %v1077_v19 = vsel %vm1018_vm1, %v1015_v59, 0.0  ;;  %v1017_v61 = vmul.f32 %v984_v34, %v5367_v27  ;;  %3209 = vmatprep.mubr.msk.f32.mxu0 %vm1018_vm1, %v1609_v39  ;;  %v1398_v34 = vld [vmem:[%s5307_s5 + $0x30] sm:$0xff]  ;;  %v1612_v39 = vld [vmem:[%s5308_s6 + $0x18] sm:$0xff] }
  0xfc   : > { %v1039_v21 = vadd.f32 %v1038_v25, %v1037_v57  ;;  %v1070_v58 = vadd.f32 %v1069_v16, %v1068_v0  ;;  %v1048_v28 = vsel %vm1018_vm1, %v1016_v50, 0.0  ;;  %v1394_v16 = vld [vmem:[%s5307_s5 + $0x10] sm:$0xff]  ;;  %v1397_v0 = vld [vmem:[%s5307_s5 + $0x28] sm:$0xff] }
  0xfd   : > { %v1079_v13 = vsel %vm1018_vm1, %v1017_v61, 0.0 }
  0xfe   : > { %v1041_v18 = vadd.f32 %v1040_v4, %v1039_v21  ;;  %v1072_v35 = vadd.f32 %v1071_v31, %v1070_v58  ;;  %v1396_v4 = vld [vmem:[%s5307_s5 + $0x20] sm:$0xff]  ;;  %v1399_v21 = vld [vmem:[%s5307_s5 + $0x38] sm:$0xf] }
 0x100   : > { %v1043_v62 = vadd.f32 %v1042_v11, %v1041_v18  ;;  %v1074_v49 = vadd.f32 %v1073_v47, %v1072_v35 }
 0x102   : > { %v1045_v48 = vadd.f32 %v1044_v23, %v1043_v62  ;;  %v1076_v46 = vadd.f32 %v1075_v37, %v1074_v49 }
 0x104   : > { %v1047_v26 = vadd.f32 %v1046_v5, %v1045_v48  ;;  %v1078_v24 = vadd.f32 %v1077_v19, %v1076_v46 }
 0x106   : > { %v1049_v22 = vadd.f32 %v1048_v28, %v1047_v26  ;;  %v1080_v8 = vadd.f32 %v1079_v13, %v1078_v24 }
 0x108   : > { %1400 = vxpose.xlu1.b32.start [1/2] (short) (narrow) %v1049_v22, 64 }
 0x10c   : > { %1401 = vxpose.xlu1.b32.end [2/2] (short) (narrow) %v1080_v8, 64 }
 0x188   : > { %v1416_v6 = vpop.trf.xlu1 }
 0x189   : > { %3181 = vmatprep.mubr.msk.f32.mxu1 %vm1310_vm0, %v1416_v6 }
 0x18c   : > { %v1417_v9 = vpop.trf.xlu1 }
 0x190   : > { %v1418_v51 = vpop.trf.xlu1 }
 0x194   : > { %v1419_v32 = vpop.trf.xlu1 }
 0x198   : > { %v1420_v43 = vpop.trf.xlu1 }
 0x19c   : > { %v1421_v1 = vpop.trf.xlu1 }
 0x1a0   : > { %v1422_v7 = vpop.trf.xlu1 }
 0x1a4   : > { %v1423_v53 = vpop.trf.xlu1 }
 0x1c6   : > { %v3176_v45 = vpop.f32.mrb[0].mxu0 }
 0x1c7   : > { %v1383_v52 = vpop.f32.mrb[1].mxu0 }
 0x1c8   : > { %v3289_v30 = vpack.c.bf16 %v3176_v45, %v1383_v52 }
 0x1ca   : > { %3290 = vmatprep.subr.bf16.mxu1 %v3289_v30 }
 0x1cb   : > { %3292 = vmatpush3.bf16.msra.mxu1 %v3289_v30 }
 0x1ce   : > { %3182 = vmatmul.mubr.msk.f32.vlgmr.msra.gmra.mrb[0].mxu1 %vm1310_vm0, %v1417_v9 }
 0x1cf   : > { %3184 = vmatprep.mubr.msk.f32.mxu1 %vm1310_vm0, %v1418_v51 }
 0x1d2   : > { %3185 = vmatmul.mubr.msk.f32.gmra.mrb[2].mxu1 %vm1310_vm0, %v1419_v32 }
 0x1d3   : > { %3187 = vmatprep.mubr.msk.f32.mxu1 %vm1310_vm0, %v1420_v43 }
 0x1d6   : > { %3188 = vmatmul.mubr.msk.f32.gmra.mrb[4].mxu1 %vm1310_vm0, %v1421_v1 }
 0x1d7   : > { %3190 = vmatprep.mubr.msk.f32.mxu1 %vm1310_vm0, %v1422_v7  ;;  %v1610_v7 = vld [vmem:[%s5308_s6 + $0x8] sm:$0xff] }
 0x1da   : > { %3191 = vmatmul.mubr.msk.f32.gmra.mrb[6].mxu1 %vm1310_vm0, %v1423_v53  ;;  %v1611_v53 = vld [vmem:[%s5308_s6 + $0x10] sm:$0xff] }
 0x1db   : > { %3255 = vmatprep.mubr.msk.f32.mxu1 %vm1018_vm1, %v3810_v60  ;;  %v1395_v60 = vld [vmem:[%s5307_s5 + $0x18] sm:$0xff] }
 0x2a1   : > { %v3183_v55 = vpop.f32.mrb[0].mxu1 }
 0x2a2   : > { %v1528_v15 = vadd.f32 %v3183_v55, %v1393_v10  ;;  %v1522_v2 = vpop.f32.mrb[1].mxu1  ;;  %v1613_v10 = vld [vmem:[%s5308_s6 + $0x20] sm:$0xff]  ;;  %v1615_v55 = vld [vmem:[%s5308_s6 + $0x30] sm:$0xff] }
 0x2a3   : > { %v1523_v42 = vadd.f32 %v1522_v2, %v1392_v38  ;;  %v1614_v38 = vld [vmem:[%s5308_s6 + $0x28] sm:$0xff]  ;;  %v1750_v2 = vld [vmem:[%s5309_s7] sm:$0xf] }
 0x2a4   : > { %v3036_v25 = vmul.f32 -1.442695, %v1528_v15  ;;  %v1616_v15 = vld [vmem:[%s5308_s6 + $0x38] sm:$0xf] }
 0x2a5   : > { %v3035_v56 = vmul.f32 -1.442695, %v1523_v42  ;;  %v3186_v3 = vpop.f32.mrb[2].mxu1  ;;  %v1763_v42 = vadd.f32 1e-05, %v1750_v2 }
 0x2a6   : > { %3379 = vpow2.f32 %v3036_v25  ;;  %v1538_v63 = vadd.f32 %v3186_v3, %v1395_v60  ;;  %v1532_v20 = vpop.f32.mrb[3].mxu1  ;;  %v5368_v60 = vld [vmem:[#allocation5_spill] sm:$0xff] }
 0x2a7   : > { %3381 = vpow2.f32 %v3035_v56  ;;  %v1533_v57 = vadd.f32 %v1532_v20, %v1394_v16  ;;  %v1767_v25 = vsub.s32 1, %v5368_v60  ;;  %v5369_v56 = vld [vmem:[#allocation6_spill] sm:$0xff] }
 0x2a8   : > { %v3038_v40 = vmul.f32 -1.442695, %v1538_v63  ;;  %v1754_v3 = vrot.slane %v1750_v2, %v5369_v56  ;;  %v1779_v63 = vsub.s32 2, %v5368_v60 }
 0x2a9   : > { %v3037_v31 = vmul.f32 -1.442695, %v1533_v57  ;;  %v3189_v12 = vpop.f32.mrb[4].mxu1  ;;  %v1791_v57 = vsub.s32 3, %v5368_v60 }
 0x2aa   : > { %3383 = vpow2.f32 %v3038_v40  ;;  %v1548_v36 = vadd.f32 %v3189_v12, %v1397_v0  ;;  %v1542_v41 = vpop.f32.mrb[5].mxu1 }
 0x2ab   : > { %3385 = vpow2.f32 %v3037_v31  ;;  %v1543_v14 = vadd.f32 %v1542_v41, %v1396_v4 }
 0x2ac   : > { %v3040_v58 = vmul.f32 -1.442695, %v1548_v36  ;;  %v1792_v36 = vrot.slane %v1750_v2, %v1791_v57 }
 0x2ad   : > { %v3039_v11 = vmul.f32 -1.442695, %v1543_v14  ;;  %v3192_v47 = vpop.f32.mrb[6].mxu1 }
 0x2ae   : > { %3387 = vpow2.f32 %v3040_v58  ;;  %v1558_v17 = vadd.f32 %v3192_v47, %v1399_v21  ;;  %v1552_v29 = vpop.f32.mrb[7].mxu1 }
 0x2af   : > { %3389 = vpow2.f32 %v3039_v11  ;;  %v1553_v44 = vadd.f32 %v1552_v29, %v1398_v34 }
 0x2b0   : > { %v3380_v59 = vpop.eup %3379  ;;  %v3042_v18 = vmul.f32 -1.442695, %v1558_v17 }
 0x2b1   : > { %v3382_v35 = vpop.eup %3381  ;;  %v1586_v23 = vadd.f32 1.0, %v3380_v59  ;;  %v3041_v37 = vmul.f32 -1.442695, %v1553_v44 }
 0x2b2   : > { %v1585_v33 = vadd.f32 1.0, %v3382_v35  ;;  %3391 = vpow2.f32 %v3042_v18 }
 0x2b3   : > { %3393 = vrcp.f32 %v1586_v23 }
 0x2b4   : > { %v3384_v50 = vpop.eup %3383  ;;  %3395 = vrcp.f32 %v1585_v33 }
 0x2b5   : > { %v3386_v62 = vpop.eup %3385  ;;  %v1588_v49 = vadd.f32 1.0, %v3384_v50  ;;  %3397 = vpow2.f32 %v3041_v37 }
 0x2b6   : > { %v1587_v5 = vadd.f32 1.0, %v3386_v62 }
 0x2b7   : > { %3399 = vrcp.f32 %v1588_v49 }
 0x2b8   : > { %v3388_v19 = vpop.eup %3387  ;;  %3401 = vrcp.f32 %v1587_v5 }
 0x2b9   : > { %v3390_v27 = vpop.eup %3389  ;;  %v1590_v61 = vadd.f32 1.0, %v3388_v19 }
 0x2ba   : > { %v1589_v48 = vadd.f32 1.0, %v3390_v27 }
 0x2bb   : > { %3403 = vrcp.f32 %v1590_v61 }
 0x2bc   : > { %v3392_v46 = vpop.eup %3391  ;;  %3405 = vrcp.f32 %v1589_v48 }
 0x2bd   : > { %v3394_v28 = vpop.eup %3393  ;;  %v1592_v26 = vadd.f32 1.0, %v3392_v46 }
 0x2be   : > { %v3396_v24 = vpop.eup %3395 }
 0x2bf   : > { %v3398_v13 = vpop.eup %3397  ;;  %v3293_v22 = vpack.c.bf16 %v3394_v28, %v3396_v24  ;;  %3407 = vrcp.f32 %v1592_v26 }
 0x2c0   : > { %v1591_v8 = vadd.f32 1.0, %v3398_v13 }
 0x2c1   : > { %v3400_v6 = vpop.eup %3399  ;;  %3294 = vmatprep.subr.bf16.mxu0 %v3293_v22 }
 0x2c2   : > { %v3402_v9 = vpop.eup %3401  ;;  %3409 = vrcp.f32 %v1591_v8  ;;  %3296 = vmatpush3.bf16.msra.mxu0 %v3293_v22 }
 0x2c3   : > { %v3297_v51 = vpack.c.bf16 %v3400_v6, %v3402_v9  ;;  %3411 = vrsqrt.f32 %v1763_v42 }
 0x2c5   : > { %v3404_v32 = vpop.eup %3403  ;;  %3298 = vmatprep.subr.bf16.mxu0 %v3297_v51 }
 0x2c6   : > { %v3406_v43 = vpop.eup %3405  ;;  %3300 = vmatpush3.bf16.msra.mxu0 %v3297_v51 }
 0x2c7   : > { %v3301_v45 = vpack.c.bf16 %v3404_v32, %v3406_v43 }
 0x2c9   : > { %3302 = vmatprep.subr.bf16.mxu0 %v3301_v45  ;;  %v3408_v52 = vpop.eup %3407 }
 0x2ca   : > { %3304 = vmatpush3.bf16.msra.mxu0 %v3301_v45 }
 0x2cc   : > { %v3410_v30 = vpop.eup %3409 }
 0x2cd   : > { %v3305_v1 = vpack.c.bf16 %v3408_v52, %v3410_v30  ;;  %v3412_v16 = vpop.eup %3411 }
 0x2ce   : > { %v1768_v20 = vrot.slane %v3412_v16, %v1767_v25 }
 0x2cf   : > { %3307 = vmatprep.subr.msk.bf16.mxu0 %vm3306_vm11, %v3305_v1 }
 0x2d0   : > { %3310 = vmatpush3.bf16.msk.msra.mxu0 %vm3306_vm11, %v3305_v1 }
 0x2d3   : > { %3210 = vmatmul.mubr.msk.f32.vlgmr.msra.gmra.mrb[2].mxu0 %vm1018_vm1, %v1610_v7 }
 0x2d4   : > { %3212 = vmatprep.mubr.msk.f32.mxu0 %vm1018_vm1, %v1611_v53 }
 0x2d7   : > { %3213 = vmatmul.mubr.msk.f32.gmra.mrb[4].mxu0 %vm1018_vm1, %v1612_v39 }
 0x2d8   : > { %3215 = vmatprep.mubr.msk.f32.mxu0 %vm1018_vm1, %v1613_v10 }
 0x2db   : > { %3216 = vmatmul.mubr.msk.f32.gmra.mrb[6].mxu0 %vm1018_vm1, %v1614_v38 }
 0x2dc   : > { %3218 = vmatprep.mubr.msk.f32.mxu0 %vm1018_vm1, %v1615_v55 }
 0x2df   : > { %3219 = vmatmul.mubr.msk.f32.gmra.mrb[8].mxu0 %vm1018_vm1, %v1616_v15 }
 0x2e0   : > { %3237 = vmatprep.mubr.msk.f32.mxu0 %vm1018_vm1, %v3792_v54  ;;  %v1780_v54 = vrot.slane %v1750_v2, %v1779_v63 }
 0x3a6   : > { %v3211_v0 = vpop.f32.mrb[2].mxu0 }
 0x3a7   : > { %v1756_v40 = vsub.f32 %v3211_v0, %v1754_v3  ;;  %v1711_v4 = vpop.f32.mrb[3].mxu0 }
 0x3a8   : > { %v1755_v31 = vsub.f32 %v1711_v4, %v1754_v3 }
 0x3a9   : > { %v1770_v12 = vmul.f32 %v1768_v20, %v1756_v40 }
 0x3aa   : > { %v1769_v41 = vmul.f32 %v1768_v20, %v1755_v31  ;;  %v3214_v14 = vpop.f32.mrb[4].mxu0 }
 0x3ab   : > { %v1758_v21 = vsub.f32 %v3214_v14, %v1754_v3  ;;  %v1721_v58 = vpop.f32.mrb[5].mxu0  ;;  %v1782_v34 = vmul.f32 %v1780_v54, %v1770_v12 }
 0x3ac   : > { %v1757_v11 = vsub.f32 %v1721_v58, %v1754_v3  ;;  %v1781_v47 = vmul.f32 %v1780_v54, %v1769_v41 }
 0x3ad   : > { %v1794_v17 = vadd.f32 %v1792_v36, %v1782_v34  ;;  %v1772_v59 = vmul.f32 %v1768_v20, %v1758_v21 }
 0x3ae   : > { %v1771_v29 = vmul.f32 %v1768_v20, %v1757_v11  ;;  %v3217_v44 = vpop.f32.mrb[6].mxu0  ;;  %v1793_v37 = vadd.f32 %v1792_v36, %v1781_v47 }
 0x3af   : > { %v1760_v18 = vsub.f32 %v3217_v44, %v1754_v3  ;;  %v1731_v35 = vpop.f32.mrb[7].mxu0  ;;  %v1804_v23 = vsel %vm1018_vm1, %v1794_v17, -inf  ;;  %v1784_v48 = vmul.f32 %v1780_v54, %v1772_v59 }
 0x3b0   : > { %v1759_v33 = vsub.f32 %v1731_v35, %v1754_v3  ;;  %1805 = vmax.xlane.f32.xlu0 %v1804_v23  ;;  %v1783_v50 = vmul.f32 %v1780_v54, %v1771_v29  ;;  %v1801_v27 = vsel %vm1018_vm1, %v1793_v37, -inf }
 0x3b1   : > { %v1774_v62 = vmul.f32 %v1768_v20, %v1760_v18  ;;  %v1796_v6 = vadd.f32 %v1792_v36, %v1784_v48 }
 0x3b2   : > { %v1773_v49 = vmul.f32 %v1768_v20, %v1759_v33  ;;  %v1795_v5 = vadd.f32 %v1792_v36, %v1783_v50  ;;  %v3220_v19 = vpop.f32.mrb[8].mxu0 }
 0x3b3   : > { %v1741_v61 = vpop.f32.mrb[9].mxu0  ;;  %v1762_v24 = vsub.f32 %v3220_v19, %v1754_v3  ;;  %v1786_v13 = vmul.f32 %v1780_v54, %v1774_v62  ;;  %v1810_v45 = vsel %vm1018_vm1, %v1796_v6, -inf }
 0x3b4   : > { %1802 = vmax.xlane.f32.xlu0 %v1801_v27  ;;  %v1785_v46 = vmul.f32 %v1780_v54, %v1773_v49  ;;  %v1761_v28 = vsub.f32 %v1741_v61, %v1754_v3  ;;  %v1807_v26 = vsel %vm1018_vm1, %v1795_v5, -inf }
 0x3b5   : > { %v1776_v51 = vmul.f32 %v1768_v20, %v1762_v24  ;;  %v1798_v32 = vadd.f32 %v1792_v36, %v1786_v13 }
 0x3b6   : > { %v1797_v22 = vadd.f32 %v1792_v36, %v1785_v46  ;;  %v1775_v8 = vmul.f32 %v1768_v20, %v1761_v28 }
 0x3b7   : > { %v1816_v52 = vsel %vm1018_vm1, %v1798_v32, -inf  ;;  %v1788_v1 = vmul.f32 %v1780_v54, %v1776_v51 }
 0x3b8   : > { %1808 = vmax.xlane.f32.xlu0 %v1807_v26  ;;  %v1813_v9 = vsel %vm1018_vm1, %v1797_v22, -inf  ;;  %v1787_v43 = vmul.f32 %v1780_v54, %v1775_v8 }
 0x3b9   : > { %1814 = vmax.xlane.f32.xlu1 %v1813_v9  ;;  %v1800_v53 = vadd.f32 %v1792_v36, %v1788_v1 }
 0x3ba   : > { %v1799_v30 = vadd.f32 %v1792_v36, %v1787_v43 }
 0x3bb   : > { %v1823_v39 = vsel %vm1822_vm12, %v1800_v53, -inf }
 0x3bc   : > { %1811 = vmax.xlane.f32.xlu0 %v1810_v45  ;;  %v1819_v7 = vsel %vm1018_vm1, %v1799_v30, -inf }
 0x3c0   : > { %1817 = vmax.xlane.f32.xlu0 %v1816_v52 }
 0x3c4   : > { %1820 = vmax.xlane.f32.xlu0 %v1819_v7 }
 0x3c8   : > { %1824 = vmax.xlane.f32.xlu0 %v1823_v39 }
 0x43d   : > { %v1806_v10 = vpop.xlane.xlu0 %1805 }
 0x43e   : > { %v1827_v38 = vsub.f32 %v1794_v17, %v1806_v10 }
 0x440   : > { %v1836_v55 = vmul.f32 1.442695, %v1827_v38 }
 0x441   : > { %v1803_v15 = vpop.xlane.xlu0 %1802 }
 0x442   : > { %3413 = vpow2.f32 %v1836_v55  ;;  %v1826_v2 = vsub.f32 %v1793_v37, %v1803_v15 }
 0x444   : > { %v1834_v42 = vmul.f32 1.442695, %v1826_v2 }
 0x445   : > { %v1809_v60 = vpop.xlane.xlu0 %1808 }
 0x446   : > { %3415 = vpow2.f32 %v1834_v42  ;;  %v1828_v25 = vsub.f32 %v1795_v5, %v1809_v60  ;;  %v1815_v57 = vpop.xlane.xlu1 %1814  ;;  %v3447_v42 = vld [vmem:[%s3789_s19 + $0x8] sm:$0xff] }
 0x447   : > { %v1830_v31 = vsub.f32 %v1797_v22, %v1815_v57  ;;  %v3448_v60 = vld [vmem:[%s3789_s19 + $0x68] sm:$0xff] }
 0x448   : > { %v1838_v63 = vmul.f32 1.442695, %v1828_v25  ;;  %v3449_v25 = vld [vmem:[%s3789_s19 + $0x10] sm:$0xff]  ;;  %v3455_v57 = vld [vmem:[%s3789_s19 + $0x28] sm:$0xff] }
 0x449   : > { %v1812_v16 = vpop.xlane.xlu0 %1811  ;;  %v1842_v14 = vmul.f32 1.442695, %v1830_v31  ;;  %v3460_v31 = vld [vmem:[%s3789_s19 + $0x98] sm:$0xff] }
 0x44a   : > { %v1829_v56 = vsub.f32 %v1796_v6, %v1812_v16  ;;  %v3450_v16 = vld [vmem:[%s3789_s19 + $0x70] sm:$0xff] }
 0x44c   : > { %v3414_v3 = vpop.eup %3413  ;;  %v1840_v20 = vmul.f32 1.442695, %v1829_v56  ;;  %v3451_v56 = vld [vmem:[%s3789_s19 + $0x18] sm:$0xff] }
 0x44d   : > { %v1818_v0 = vpop.xlane.xlu0 %1817  ;;  %v1853_v40 = vsel %vm1018_vm1, %v3414_v3, 0.0 }
 0x44e   : > { %3417 = vpow2.f32 %v1840_v20  ;;  %v1831_v4 = vsub.f32 %v1798_v32, %v1818_v0  ;;  %1854 = vadd.xlane.f32.xlu0 %v1853_v40  ;;  %v3454_v20 = vld [vmem:[%s3789_s19 + $0x80] sm:$0xff]  ;;  %v3456_v0 = vld [vmem:[%s3789_s19 + $0x88] sm:$0xff]  ;;  %v3457_v40 = vld [vmem:[%s3789_s19 + $0x30] sm:$0xff] }
 0x44f   : > { %3419 = vpow2.f32 %v1838_v63  ;;  %v3453_v63 = vld [vmem:[%s3789_s19 + $0x20] sm:$0xff] }
 0x450   : > { %v3416_v54 = vpop.eup %3415  ;;  %v1844_v12 = vmul.f32 1.442695, %v1831_v4  ;;  %v3458_v4 = vld [vmem:[%s3789_s19 + $0x90] sm:$0xff] }
 0x451   : > { %v1821_v36 = vpop.xlane.xlu0 %1820  ;;  %v1850_v41 = vsel %vm1018_vm1, %v3416_v54, 0.0 }
 0x452   : > { %1851 = vadd.xlane.f32.xlu0 %v1850_v41  ;;  %3421 = vpow2.f32 %v1844_v12  ;;  %v1832_v21 = vsub.f32 %v1799_v30, %v1821_v36  ;;  %v3461_v12 = vld [vmem:[%s3789_s19 + $0x40] sm:$0xff]  ;;  %v3463_v41 = vld [vmem:[%s3789_s19 + $0x48] sm:$0xff] }
 0x453   : > { %3423 = vpow2.f32 %v1842_v14  ;;  %v3462_v36 = vld [vmem:[%s3789_s19 + $0xa0] sm:$0xff]  ;;  %v3464_v14 = vld [vmem:[%s3789_s19 + $0xa8] sm:$0xff] }
 0x454   : > { %v1846_v11 = vmul.f32 1.442695, %v1832_v21  ;;  %v3465_v21 = vld [vmem:[%s3789_s19 + $0x50] sm:$0xff] }
 0x455   : > { %v1825_v58 = vpop.xlane.xlu0 %1824 }
 0x456   : > { %v1833_v47 = vsub.f32 %v1800_v53, %v1825_v58  ;;  %3425 = vpow2.f32 %v1846_v11  ;;  %v3466_v58 = vld [vmem:[%s3789_s19 + $0xb0] sm:$0xff]  ;;  %v3468_v11 = vld [vmem:[%s3789_s19 + $0xb8] sm:$0xff] }
 0x458   : > { %v3418_v34 = vpop.eup %3417  ;;  %v1848_v44 = vmul.f32 1.442695, %v1833_v47  ;;  %v3469_v47 = vld [vmem:[%s3789_s19 + $0xc0] sm:$0xff] }
 0x459   : > { %v1859_v17 = vsel %vm1018_vm1, %v3418_v34, 0.0  ;;  %v3420_v29 = vpop.eup %3419 }
 0x45a   : > { %1860 = vadd.xlane.f32.xlu0 %v1859_v17  ;;  %v1856_v59 = vsel %vm1018_vm1, %v3420_v29, 0.0  ;;  %3427 = vpow2.f32 %v1848_v44  ;;  %v3470_v17 = vld [vmem:[%s3789_s19 + $0xc8] sm:$0xff]  ;;  %v3472_v44 = vld [vmem:[%s3789_s19 + $0xd8] sm:$0xff] }
 0x45c   : > { %v3422_v18 = vpop.eup %3421 }
 0x45d   : > { %v1865_v35 = vsel %vm1018_vm1, %v3422_v18, 0.0  ;;  %v3424_v23 = vpop.eup %3423 }
 0x45e   : > { %1857 = vadd.xlane.f32.xlu0 %v1856_v59  ;;  %v1862_v37 = vsel %vm1018_vm1, %v3424_v23, 0.0  ;;  %v3473_v59 = vld [vmem:[%s3789_s19 + $0xe0] sm:$0xff] }
 0x460   : > { %v3426_v33 = vpop.eup %3425 }
 0x461   : > { %v1868_v50 = vsel %vm1018_vm1, %v3426_v33, 0.0 }
 0x462   : > { %1866 = vadd.xlane.f32.xlu0 %v1865_v35  ;;  %v3475_v35 = vld [vmem:[%s3789_s19 + $0xf0] sm:$0xff] }
 0x464   : > { %v3428_v62 = vpop.eup %3427 }
 0x465   : > { %v1871_v49 = vsel %vm1822_vm12, %v3428_v62, 0.0 }
 0x466   : > { %1863 = vadd.xlane.f32.xlu0 %v1862_v37 }
 0x46a   : > { %1869 = vadd.xlane.f32.xlu0 %v1868_v50  ;;  %v725_v50 = vld [vmem:[%s4320_s13 + $0x8] sm:$0xff] }
 0x46e   : > { %1872 = vadd.xlane.f32.xlu0 %v1871_v49 }
 0x4db   : > { %v1855_v5 = vpop.xlane.xlu0 %1854 }
 0x4dc   : > { %3429 = vrcp.f32 %v1855_v5 }
 0x4df   : > { %v1852_v19 = vpop.xlane.xlu0 %1851 }
 0x4e0   : > { %3431 = vrcp.f32 %v1852_v19  ;;  %v724_v19 = vld [vmem:[%s4320_s13] sm:$0xff] }
 0x4e6   : > { %v3430_v61 = vpop.eup %3429 }
 0x4e7   : > { %v1861_v27 = vpop.xlane.xlu0 %1860  ;;  %v1877_v26 = vmul.f32 %v3430_v61, %v3414_v3  ;;  %v3452_v3 = vld [vmem:[%s3789_s19 + $0x78] sm:$0xff] }
 0x4e8   : > { %3433 = vrcp.f32 %v1861_v27 }
 0x4ea   : > { %v3432_v48 = vpop.eup %3431 }
 0x4eb   : > { %v1858_v46 = vpop.xlane.xlu0 %1857  ;;  %v1875_v28 = vmul.f32 %v3432_v48, %v3416_v54  ;;  %v3459_v54 = vld [vmem:[%s3789_s19 + $0x38] sm:$0xff] }
 0x4ec   : > { %3435 = vrcp.f32 %v1858_v46 }
 0x4ed   : > { %v3311_v13 = vpack.c.bf16 %v1877_v26, %v1875_v28 }
 0x4ef   : > { %3313 = vmatprep.subr.msk.bf16.mxu0 %vm4221_vm13, %v3311_v13  ;;  %3335 = vmatprep.subr.msk.bf16.mxu1 %vm4221_vm13, %v3311_v13  ;;  %v1867_v22 = vpop.xlane.xlu0 %1866 }
 0x4f0   : > { %3316 = vmatpush3.bf16.xpose.msk.msra.mxu0 %vm4221_vm13, %v3311_v13  ;;  %3339 = vmatpush3.bf16.xpose.msk.msra.mxu1 %vm4221_vm13, %v3311_v13  ;;  %3437 = vrcp.f32 %v1867_v22  ;;  %v727_v13 = vld [vmem:[%s4320_s13 + $0x18] sm:$0xff] }
 0x4f2   : > { %v3434_v6 = vpop.eup %3433 }
 0x4f3   : > { %v1864_v8 = vpop.xlane.xlu0 %1863  ;;  %v1881_v43 = vmul.f32 %v3434_v6, %v3418_v34  ;;  %v3467_v34 = vld [vmem:[%s3789_s19 + $0x58] sm:$0xff] }
 0x4f4   : > { %3439 = vrcp.f32 %v1864_v8 }
 0x4f6   : > { %v3436_v9 = vpop.eup %3435 }
 0x4f7   : > { %v1870_v51 = vpop.xlane.xlu0 %1869  ;;  %v1879_v32 = vmul.f32 %v3436_v9, %v3420_v29  ;;  %v3471_v29 = vld [vmem:[%s3789_s19 + $0xd0] sm:$0xff] }
 0x4f8   : > { %3441 = vrcp.f32 %v1870_v51  ;;  %v726_v9 = vld [vmem:[%s4320_s13 + $0x10] sm:$0xff] }
 0x4f9   : > { %v3317_v45 = vpack.c.bf16 %v1881_v43, %v1879_v32 }
 0x4fa   : > { %v3438_v30 = vpop.eup %3437 }
 0x4fb   : > { %3319 = vmatprep.subr.msk.bf16.mxu0 %vm4221_vm13, %v3317_v45  ;;  %3336 = vmatprep.subr.msk.bf16.mxu1 %vm4221_vm13, %v3317_v45  ;;  %v1873_v52 = vpop.xlane.xlu0 %1872  ;;  %v1885_v53 = vmul.f32 %v3438_v30, %v3422_v18  ;;  %v3474_v18 = vld [vmem:[%s3789_s19 + $0xe8] sm:$0xff] }
 0x4fc   : > { %3443 = vrcp.f32 %v1873_v52  ;;  %3322 = vmatpush3.bf16.xpose.msk.msra.mxu0 %vm4221_vm13, %v3317_v45  ;;  %3340 = vmatpush3.bf16.xpose.msk.msra.mxu1 %vm4221_vm13, %v3317_v45 }
 0x4fe   : > { %v3440_v1 = vpop.eup %3439 }
 0x4ff   : > { %v1883_v7 = vmul.f32 %v3440_v1, %v3424_v23  ;;  %v3476_v23 = vld [vmem:[%s3789_s19 + $0xf8] sm:$0xff] }
 0x501   : > { %v3323_v39 = vpack.c.bf16 %v1885_v53, %v1883_v7 }
 0x502   : > { %v3442_v10 = vpop.eup %3441 }
 0x503   : > { %3325 = vmatprep.subr.msk.bf16.mxu0 %vm4221_vm13, %v3323_v39  ;;  %3337 = vmatprep.subr.msk.bf16.mxu1 %vm4221_vm13, %v3323_v39  ;;  %v1887_v55 = vmul.f32 %v3442_v10, %v3426_v33 }
 0x504   : > { %3328 = vmatpush3.bf16.xpose.msk.msra.mxu0 %vm4221_vm13, %v3323_v39  ;;  %3341 = vmatpush3.bf16.xpose.msk.msra.mxu1 %vm4221_vm13, %v3323_v39 }
 0x506   : > { %v3444_v38 = vpop.eup %3443 }
 0x507   : > { %v1889_v15 = vmul.f32 %v3444_v38, %v3428_v62 }
 0x509   : > { %v3329_v2 = vpack.c.bf16 %v1889_v15, %v1887_v55  ;;  %v729_v15 = vld [vmem:[%s4320_s13 + $0x28] sm:$0xff] }
 0x50b   : > { %3331 = vmatprep.subr.msk.bf16.mxu0 %vm4221_vm13, %v3329_v2  ;;  %3338 = vmatprep.subr.msk.bf16.mxu1 %vm4221_vm13, %v3329_v2 }
 0x50c   : > { %3334 = vmatpush3.bf16.xpose.msk.msra.mxu0 %vm4221_vm13, %v3329_v2  ;;  %3342 = vmatpush3.bf16.xpose.msk.msra.mxu1 %vm4221_vm13, %v3329_v2  ;;  %v728_v2 = vld [vmem:[%s4320_s13 + $0x20] sm:$0xff] }
 0x513   : > { %3238 = vmatmul.mubr.msk.f32.vlgmr.msra.gmra.mrb[10].mxu0 %vm1018_vm1, %v3447_v42  ;;  %3256 = vmatmul.mubr.msk.f32.vlgmr.msra.gmra.mrb[8].mxu1 %vm1018_vm1, %v3448_v60 }
 0x514   : > { %3240 = vmatprep.mubr.msk.f32.mxu0 %vm1018_vm1, %v3449_v25  ;;  %3258 = vmatprep.mubr.msk.f32.mxu1 %vm1018_vm1, %v3450_v16 }
 0x517   : > { %3241 = vmatmul.mubr.msk.f32.gmra.mrb[12].mxu0 %vm1018_vm1, %v3451_v56  ;;  %3259 = vmatmul.mubr.msk.f32.gmra.mrb[10].mxu1 %vm1018_vm1, %v3452_v3 }
 0x518   : > { %3243 = vmatprep.mubr.msk.f32.mxu0 %vm1018_vm1, %v3453_v63  ;;  %3261 = vmatprep.mubr.msk.f32.mxu1 %vm1018_vm1, %v3454_v20 }
 0x51b   : > { %3244 = vmatmul.mubr.msk.f32.gmra.mrb[14].mxu0 %vm1018_vm1, %v3455_v57  ;;  %3262 = vmatmul.mubr.msk.f32.gmra.mrb[12].mxu1 %vm1018_vm1, %v3456_v0 }
 0x51c   : > { %3246 = vmatprep.mubr.msk.f32.mxu0 %vm1018_vm1, %v3457_v40  ;;  %3264 = vmatprep.mubr.msk.f32.mxu1 %vm1018_vm1, %v3458_v4  ;;  %v731_v40 = vld [vmem:[%s4320_s13 + $0x38] sm:$0xff] }
 0x51f   : > { %3247 = vmatmul.mubr.msk.f32.gmra.mrb[16].mxu0 %vm1018_vm1, %v3459_v54  ;;  %3265 = vmatmul.mubr.msk.f32.gmra.mrb[14].mxu1 %vm1018_vm1, %v3460_v31 }
 0x520   : > { %3249 = vmatprep.mubr.msk.f32.mxu0 %vm1018_vm1, %v3461_v12  ;;  %3267 = vmatprep.mubr.msk.f32.mxu1 %vm1018_vm1, %v3462_v36  ;;  %v730_v36 = vld [vmem:[%s4320_s13 + $0x30] sm:$0xff] }
 0x523   : > { %3250 = vmatmul.mubr.msk.f32.gmra.mrb[18].mxu0 %vm1018_vm1, %v3463_v41  ;;  %3268 = vmatmul.mubr.msk.f32.gmra.mrb[16].mxu1 %vm1018_vm1, %v3464_v14 }
 0x524   : > { %3252 = vmatprep.mubr.msk.f32.mxu0 %vm1018_vm1, %v3465_v21  ;;  %3270 = vmatprep.mubr.msk.f32.mxu1 %vm1018_vm1, %v3466_v58 }
 0x527   : > { %3253 = vmatmul.mubr.msk.f32.gmra.mrb[20].mxu0 %vm1018_vm1, %v3467_v34  ;;  %3271 = vmatmul.mubr.msk.f32.gmra.mrb[18].mxu1 %vm1018_vm1, %v3468_v11 }
 0x528   : > { %3273 = vmatprep.mubr.msk.f32.mxu1 %vm1018_vm1, %v3469_v47 }
 0x52b   : > { %3274 = vmatmul.mubr.msk.f32.gmra.mrb[20].mxu1 %vm1018_vm1, %v3470_v17 }
 0x52c   : > { %3276 = vmatprep.mubr.msk.f32.mxu1 %vm1018_vm1, %v3471_v29 }
 0x52f   : > { %3277 = vmatmul.mubr.msk.f32.gmra.mrb[22].mxu1 %vm1018_vm1, %v3472_v44 }
 0x530   : > { %3279 = vmatprep.mubr.msk.f32.mxu1 %vm1018_vm1, %v3473_v59 }
 0x533   : > { %3280 = vmatmul.mubr.msk.f32.gmra.mrb[24].mxu1 %vm1018_vm1, %v3474_v18 }
 0x534   : > { %3282 = vmatprep.mubr.msk.f32.mxu1 %vm1018_vm1, %v3475_v35 }
 0x537   : > { %3283 = vmatmul.mubr.msk.f32.gmra.mrb[26].mxu1 %vm1018_vm1, %v3476_v23 }
 0x5e6   : > { %v3239_v37 = vpop.f32.mrb[10].mxu0  ;;  %v4317_v33 = vpop.f32.mrb[8].mxu1 }
 0x5e7   : > { %vm2236_vm14 = vcmp.gt.f32.partialorder %v3239_v37, 0.0  ;;  %v2268_v62 = vmul.f32 0.01, %v3239_v37  ;;  %v2076_v49 = vpop.f32.mrb[11].mxu0  ;;  %v4323_v5 = vpop.f32.mrb[9].mxu1  ;;  %vm2248_vm12 = vcmp.gt.f32.partialorder %v4317_v33, 0.0 }
 0x5e8   : > { %vm2235_vm15 = vcmp.gt.f32.partialorder %v2076_v49, 0.0  ;;  %v2267_v27 = vmul.f32 0.01, %v2076_v49  ;;  %vm2247_vm9 = vcmp.gt.f32.partialorder %v4323_v5, 0.0 }
 0x5e9   : > { %v2300_v61 = vsel %vm2236_vm14, %v3239_v37, %v2268_v62  ;;  %v733_v37 = vld [vmem:[%s4320_s13 + $0x48] sm:$0xff] }
 0x5ea   : > { %v4326_v48 = vadd.f32 %v2300_v61, %v725_v50  ;;  %v2299_v46 = vsel %vm2235_vm15, %v2076_v49, %v2267_v27  ;;  %v3242_v28 = vpop.f32.mrb[12].mxu0  ;;  %v4328_v26 = vpop.f32.mrb[10].mxu1  ;;  %v732_v50 = vld [vmem:[%s4320_s13 + $0x40] sm:$0xff] }
 0x5eb   : > { %v4330_v24 = vadd.f32 %v2299_v46, %v724_v19  ;;  %vm2238_vm0 = vcmp.gt.f32.partialorder %v3242_v28, 0.0  ;;  %v2270_v22 = vmul.f32 0.01, %v3242_v28  ;;  %v2086_v8 = vpop.f32.mrb[13].mxu0  ;;  %v4333_v6 = vpop.f32.mrb[11].mxu1  ;;  %vm2250_vm14 = vcmp.gt.f32.partialorder %v4328_v26, 0.0 }
 0x5ec   : > { %vm2237_vm2 = vcmp.gt.f32.partialorder %v2086_v8, 0.0  ;;  %v2269_v51 = vmul.f32 0.01, %v2086_v8  ;;  %v2364_v32 = vsel %vm1018_vm1, %v4326_v48, 0.0  ;;  %vm2249_vm13 = vcmp.gt.f32.partialorder %v4333_v6, 0.0 }
 0x5ed   : > { %v2363_v43 = vsel %vm1018_vm1, %v4330_v24, 0.0  ;;  %v2302_v45 = vsel %vm2238_vm0, %v3242_v28, %v2270_v22 }
 0x5ee   : > { %v4340_v52 = vadd.f32 %v2302_v45, %v727_v13  ;;  %v2301_v30 = vsel %vm2237_vm2, %v2086_v8, %v2269_v51  ;;  %v3245_v1 = vpop.f32.mrb[14].mxu0  ;;  %v4342_v7 = vpop.f32.mrb[12].mxu1  ;;  %v2365_v55 = vadd.f32 %v2364_v32, %v2363_v43  ;;  %v2279_v13 = vmul.f32 0.01, %v4323_v5  ;;  %v735_v51 = vld [vmem:[%s4320_s13 + $0x58] sm:$0xff] }
 0x5ef   : > { %v4344_v53 = vadd.f32 %v2301_v30, %v726_v9  ;;  %vm2240_vm3 = vcmp.gt.f32.partialorder %v3245_v1, 0.0  ;;  %v2272_v39 = vmul.f32 0.01, %v3245_v1  ;;  %v2096_v10 = vpop.f32.mrb[15].mxu0  ;;  %v4346_v38 = vpop.f32.mrb[13].mxu1  ;;  %vm2252_vm0 = vcmp.gt.f32.partialorder %v4342_v7, 0.0 }
 0x5f0   : > { %vm2239_vm4 = vcmp.gt.f32.partialorder %v2096_v10, 0.0  ;;  %v2271_v42 = vmul.f32 0.01, %v2096_v10  ;;  %v2368_v16 = vsel %vm1018_vm1, %v4340_v52, 0.0  ;;  %vm2251_vm15 = vcmp.gt.f32.partialorder %v4346_v38, 0.0 }
 0x5f1   : > { %v2366_v60 = vsel %vm1018_vm1, %v4344_v53, 0.0  ;;  %v2304_v25 = vsel %vm2240_vm3, %v3245_v1, %v2272_v39  ;;  %v734_v1 = vld [vmem:[%s4320_s13 + $0x50] sm:$0xff] }
 0x5f2   : > { %v2367_v56 = vadd.f32 %v2366_v60, %v2365_v55  ;;  %v2303_v3 = vsel %vm2239_vm4, %v2096_v10, %v2271_v42  ;;  %v3248_v63 = vpop.f32.mrb[16].mxu0  ;;  %v4354_v20 = vpop.f32.mrb[14].mxu1  ;;  %v4356_v57 = vadd.f32 %v2304_v25, %v729_v15  ;;  %v2280_v10 = vmul.f32 0.01, %v4317_v33  ;;  %v736_v60 = vld [vmem:[%s4320_s13 + $0x60] sm:$0xff] }
 0x5f3   : > { %v4358_v0 = vadd.f32 %v2303_v3, %v728_v2  ;;  %vm2242_vm5 = vcmp.gt.f32.partialorder %v3248_v63, 0.0  ;;  %v2274_v4 = vmul.f32 0.01, %v3248_v63  ;;  %v2106_v54 = vpop.f32.mrb[17].mxu0  ;;  %v4361_v31 = vpop.f32.mrb[15].mxu1  ;;  %v2311_v25 = vsel %vm2247_vm9, %v4323_v5, %v2279_v13 }
 0x5f4   : > { %v2369_v12 = vadd.f32 %v2368_v16, %v2367_v56  ;;  %vm2241_vm6 = vcmp.gt.f32.partialorder %v2106_v54, 0.0  ;;  %v2273_v41 = vmul.f32 0.01, %v2106_v54  ;;  %v2372_v29 = vsel %vm1018_vm1, %v4356_v57, 0.0 }
 0x5f5   : > { %v2370_v14 = vsel %vm1018_vm1, %v4358_v0, 0.0  ;;  %v2306_v21 = vsel %vm2242_vm5, %v3248_v63, %v2274_v4  ;;  %v2281_v16 = vmul.f32 0.01, %v4333_v6  ;;  %v2312_v5 = vsel %vm2248_vm12, %v4317_v33, %v2280_v10 }
 0x5f6   : > { %v2371_v58 = vadd.f32 %v2370_v14, %v2369_v12  ;;  %v4366_v34 = vadd.f32 %v2306_v21, %v731_v40  ;;  %v2305_v11 = vsel %vm2241_vm6, %v2106_v54, %v2273_v41  ;;  %v3251_v47 = vpop.f32.mrb[18].mxu0  ;;  %v4368_v17 = vpop.f32.mrb[16].mxu1  ;;  %v737_v12 = vld [vmem:[%s4320_s13 + $0x68] sm:$0xff]  ;;  %v4419_v14 = vadd.f32 %v2311_v25, %v736_v60 }
 0x5f7   : > { %v4372_v44 = vadd.f32 %v2305_v11, %v730_v36  ;;  %vm2244_vm7 = vcmp.gt.f32.partialorder %v3251_v47, 0.0  ;;  %v2276_v59 = vmul.f32 0.01, %v3251_v47  ;;  %v2116_v18 = vpop.f32.mrb[19].mxu0  ;;  %v4374_v35 = vpop.f32.mrb[17].mxu1  ;;  %v2313_v11 = vsel %vm2249_vm13, %v4333_v6, %v2281_v16 }
 0x5f8   : > { %v2373_v23 = vadd.f32 %v2372_v29, %v2371_v58  ;;  %vm2243_vm8 = vcmp.gt.f32.partialorder %v2116_v18, 0.0  ;;  %v2275_v62 = vmul.f32 0.01, %v2116_v18  ;;  %v2376_v27 = vsel %vm1018_vm1, %v4366_v34, 0.0  ;;  %v738_v58 = vld [vmem:[%s4320_s13 + $0x70] sm:$0xff] }
 0x5f9   : > { %v2374_v49 = vsel %vm1018_vm1, %v4372_v44, 0.0  ;;  %v2308_v19 = vsel %vm2244_vm7, %v3251_v47, %v2276_v59  ;;  %v2282_v36 = vmul.f32 0.01, %v4328_v26  ;;  %v2283_v47 = vmul.f32 0.01, %v4346_v38 }
 0x5fa   : > { %v2375_v61 = vadd.f32 %v2374_v49, %v2373_v23  ;;  %v2307_v46 = vsel %vm2243_vm8, %v2116_v18, %v2275_v62  ;;  %v3254_v28 = vpop.f32.mrb[20].mxu0  ;;  %v4384_v22 = vpop.f32.mrb[18].mxu1  ;;  %v4386_v8 = vadd.f32 %v2308_v19, %v733_v37  ;;  %v4429_v59 = vadd.f32 %v2312_v5, %v737_v12  ;;  %v739_v37 = vld [vmem:[%s4320_s13 + $0x78] sm:$0xff] }
 0x5fb   : > { %v4388_v9 = vadd.f32 %v2307_v46, %v732_v50  ;;  %vm2246_vm10 = vcmp.gt.f32.partialorder %v3254_v28, 0.0  ;;  %v2278_v32 = vmul.f32 0.01, %v3254_v28  ;;  %v2126_v43 = vpop.f32.mrb[21].mxu0  ;;  %v4391_v45 = vpop.f32.mrb[19].mxu1  ;;  %v2314_v50 = vsel %vm2250_vm14, %v4328_v26, %v2282_v36 }
 0x5fc   : > { %v2377_v30 = vadd.f32 %v2376_v27, %v2375_v61  ;;  %vm2245_vm11 = vcmp.gt.f32.partialorder %v2126_v43, 0.0  ;;  %v2277_v39 = vmul.f32 0.01, %v2126_v43  ;;  %v2380_v3 = vsel %vm1018_vm1, %v4386_v8, 0.0  ;;  %v740_v27 = vld [vmem:[%s4320_s13 + $0x80] sm:$0xff] }
 0x5fd   : > { %v2378_v55 = vsel %vm1018_vm1, %v4388_v9, 0.0  ;;  %v2310_v15 = vsel %vm2246_vm10, %v3254_v28, %v2278_v32  ;;  %v2284_v6 = vmul.f32 0.01, %v4342_v7  ;;  %v2386_v62 = vsel %vm1018_vm1, %v4419_v14, 0.0 }
 0x5fe   : > { %v2379_v2 = vadd.f32 %v2378_v55, %v2377_v30  ;;  %v2309_v42 = vsel %vm2245_vm11, %v2126_v43, %v2277_v39  ;;  %v4403_v56 = vpop.f32.mrb[20].mxu1  ;;  %v4407_v63 = vadd.f32 %v2310_v15, %v735_v51  ;;  %v4439_v49 = vadd.f32 %v2313_v11, %v738_v58  ;;  %v741_v43 = vld [vmem:[%s4320_s13 + $0x88] sm:$0xff]  ;;  %v742_v55 = vld [vmem:[%s4320_s13 + $0x90] sm:$0xff] }
 0x5ff   : > { %v4409_v40 = vadd.f32 %v2309_v42, %v734_v1  ;;  %v4412_v4 = vpop.f32.mrb[21].mxu1  ;;  %v2315_v61 = vsel %vm2251_vm15, %v4346_v38, %v2283_v47  ;;  %v2285_v46 = vmul.f32 0.01, %v4361_v31  ;;  %v2388_v26 = vsel %vm1018_vm1, %v4429_v59, 0.0 }
 0x600   : > { %v2381_v54 = vadd.f32 %v2380_v3, %v2379_v2  ;;  %v2384_v33 = vsel %vm1018_vm1, %v4407_v63, 0.0  ;;  %v4449_v13 = vadd.f32 %v2314_v50, %v739_v37  ;;  %vm2253_vm2 = vcmp.gt.f32.partialorder %v4361_v31, 0.0  ;;  %v743_v3 = vld [vmem:[%s4320_s13 + $0x98] sm:$0xff] }
 0x601   : > { %v2382_v41 = vsel %vm1018_vm1, %v4409_v40, 0.0  ;;  %v2316_v30 = vsel %vm2252_vm0, %v4342_v7, %v2284_v6  ;;  %v2286_v38 = vmul.f32 0.01, %v4354_v20  ;;  %v2390_v1 = vsel %vm1018_vm1, %v4439_v49, 0.0 }
 0x602   : > { %v2383_v21 = vadd.f32 %v2382_v41, %v2381_v54  ;;  %v4425_v29 = vpop.f32.mrb[22].mxu1  ;;  %v4459_v39 = vadd.f32 %v2315_v61, %v740_v27  ;;  %vm2254_vm3 = vcmp.gt.f32.partialorder %v4354_v20, 0.0  ;;  %v2317_v15 = vsel %vm2253_vm2, %v4361_v31, %v2285_v46  ;;  %v744_v41 = vld [vmem:[%s4320_s13 + $0xa0] sm:$0xff] }
 0x603   : > { %v4432_v18 = vpop.f32.mrb[23].mxu1  ;;  %v2287_v2 = vmul.f32 0.01, %v4374_v35  ;;  %v2392_v7 = vsel %vm1018_vm1, %v4449_v13, 0.0  ;;  %v4469_v60 = vadd.f32 %v2316_v30, %v741_v43  ;;  %vm2255_vm4 = vcmp.gt.f32.partialorder %v4374_v35, 0.0 }
 0x604   : > { %v2385_v23 = vadd.f32 %v2384_v33, %v2383_v21  ;;  %v2318_v54 = vsel %vm2254_vm3, %v4354_v20, %v2286_v38  ;;  %v2288_v31 = vmul.f32 0.01, %v4368_v17  ;;  %v2394_v12 = vsel %vm1018_vm1, %v4459_v39, 0.0  ;;  %v745_v33 = vld [vmem:[%s4320_s13 + $0xa8] sm:$0xff] }
 0x605   : > { %v4479_v5 = vadd.f32 %v2317_v15, %v742_v55  ;;  %vm2256_vm5 = vcmp.gt.f32.partialorder %v4368_v17, 0.0  ;;  %v2319_v21 = vsel %vm2255_vm4, %v4374_v35, %v2287_v2  ;;  %v2289_v58 = vmul.f32 0.01, %v4391_v45 }
 0x606   : > { %v2387_v19 = vadd.f32 %v2386_v62, %v2385_v23  ;;  %v4445_v28 = vpop.f32.mrb[24].mxu1  ;;  %v2396_v11 = vsel %vm1018_vm1, %v4469_v60, 0.0  ;;  %v4487_v20 = vadd.f32 %v2318_v54, %v743_v3  ;;  %vm2257_vm6 = vcmp.gt.f32.partialorder %v4391_v45, 0.0  ;;  %v746_v62 = vld [vmem:[%s4320_s13 + $0xb0] sm:$0xff] }
 0x607   : > { %v4452_v51 = vpop.f32.mrb[25].mxu1  ;;  %v2320_v23 = vsel %vm2256_vm5, %v4368_v17, %v2288_v31  ;;  %v2290_v37 = vmul.f32 0.01, %v4384_v22  ;;  %v2398_v50 = vsel %vm1018_vm1, %v4479_v5, 0.0  ;;  %v4495_v35 = vadd.f32 %v2319_v21, %v744_v41 }
 0x608   : > { %v2389_v32 = vadd.f32 %v2388_v26, %v2387_v19  ;;  %vm2258_vm7 = vcmp.gt.f32.partialorder %v4384_v22, 0.0  ;;  %v2321_v19 = vsel %vm2257_vm6, %v4391_v45, %v2289_v58  ;;  %v2291_v27 = vmul.f32 0.01, %v4412_v4  ;;  %v747_v26 = vld [vmem:[%s4320_s13 + $0xb8] sm:$0xff] }
 0x609   : > { %v2400_v61 = vsel %vm1018_vm1, %v4487_v20, 0.0  ;;  %v4503_v17 = vadd.f32 %v2320_v23, %v745_v33  ;;  %vm2259_vm8 = vcmp.gt.f32.partialorder %v4412_v4, 0.0  ;;  %v2292_v43 = vmul.f32 0.01, %v4403_v56 }
 0x60a   : > { %v2391_v10 = vadd.f32 %v2390_v1, %v2389_v32  ;;  %v4465_v42 = vpop.f32.mrb[26].mxu1  ;;  %v2322_v32 = vsel %vm2258_vm7, %v4384_v22, %v2290_v37  ;;  %v2402_v30 = vsel %vm1018_vm1, %v4495_v35, 0.0  ;;  %v4511_v45 = vadd.f32 %v2321_v19, %v746_v62  ;;  %v748_v1 = vld [vmem:[%s4320_s13 + $0xc0] sm:$0xff] }
 0x60b   : > { %v4472_v25 = vpop.f32.mrb[27].mxu1  ;;  %vm2260_vm9 = vcmp.gt.f32.partialorder %v4403_v56, 0.0  ;;  %v2293_v55 = vmul.f32 0.01, %v4432_v18  ;;  %v2404_v15 = vsel %vm1018_vm1, %v4503_v17, 0.0  ;;  %v4519_v22 = vadd.f32 %v2322_v32, %v747_v26 }
 0x60c   : > { %v2393_v16 = vadd.f32 %v2392_v7, %v2391_v10  ;;  %v2323_v10 = vsel %vm2259_vm8, %v4412_v4, %v2291_v27  ;;  %vm2261_vm10 = vcmp.gt.f32.partialorder %v4432_v18, 0.0  ;;  %v749_v7 = vld [vmem:[%s4320_s13 + $0xc8] sm:$0xff]  ;;  %v2294_v3 = vmul.f32 0.01, %v4425_v29 }
 0x60d   : > { %v2406_v54 = vsel %vm1018_vm1, %v4511_v45, 0.0  ;;  %v4527_v4 = vadd.f32 %v2323_v10, %v748_v1  ;;  %vm2262_vm11 = vcmp.gt.f32.partialorder %v4425_v29, 0.0  ;;  %v2295_v41 = vmul.f32 0.01, %v4452_v51 }
 0x60e   : > { %v2395_v36 = vadd.f32 %v2394_v12, %v2393_v16  ;;  %v2324_v16 = vsel %vm2260_vm9, %v4403_v56, %v2292_v43  ;;  %v750_v12 = vld [vmem:[%s4320_s13 + $0xd0] sm:$0xff]  ;;  %v2408_v21 = vsel %vm1018_vm1, %v4519_v22, 0.0  ;;  %vm2263_vm12 = vcmp.gt.f32.partialorder %v4452_v51, 0.0 }
 0x60f   : > { %v4535_v56 = vadd.f32 %v2324_v16, %v749_v7  ;;  %v2296_v33 = vmul.f32 0.01, %v4445_v28  ;;  %v2410_v23 = vsel %vm1018_vm1, %v4527_v4, 0.0  ;;  %vm2264_vm13 = vcmp.gt.f32.partialorder %v4445_v28, 0.0 }
 0x610   : > { %v2397_v47 = vadd.f32 %v2396_v11, %v2395_v36  ;;  %v2325_v36 = vsel %vm2261_vm10, %v4432_v18, %v2293_v55  ;;  %v751_v11 = vld [vmem:[%s4320_s13 + $0xd8] sm:$0xff]  ;;  %v2297_v62 = vmul.f32 0.01, %v4472_v25  ;;  %vm2265_vm14 = vcmp.gt.f32.partialorder %v4472_v25, 0.0 }
 0x611   : > { %v4543_v18 = vadd.f32 %v2325_v36, %v750_v12  ;;  %v2412_v19 = vsel %vm1018_vm1, %v4535_v56, 0.0  ;;  %v2298_v26 = vmul.f32 0.01, %v4465_v42  ;;  %vm2266_vm15 = vcmp.gt.f32.partialorder %v4465_v42, 0.0  ;;  %v755_v55 = vld [vmem:[%s4320_s13 + $0xf8] sm:$0xff] }
 0x612   : > { %v2399_v6 = vadd.f32 %v2398_v50, %v2397_v47  ;;  %v2326_v47 = vsel %vm2262_vm11, %v4425_v29, %v2294_v3  ;;  %v752_v50 = vld [vmem:[%s4320_s13 + $0xe0] sm:$0xff] }
 0x613   : > { %v4551_v29 = vadd.f32 %v2326_v47, %v751_v11  ;;  %v2414_v32 = vsel %vm1018_vm1, %v4543_v18, 0.0 }
 0x614   : > { %v2401_v46 = vadd.f32 %v2400_v61, %v2399_v6  ;;  %v2327_v6 = vsel %vm2263_vm12, %v4452_v51, %v2295_v41  ;;  %v753_v61 = vld [vmem:[%s4320_s13 + $0xe8] sm:$0xff] }
 0x615   : > { %v4559_v51 = vadd.f32 %v2327_v6, %v752_v50  ;;  %v2416_v1 = vsel %vm1018_vm1, %v4551_v29, 0.0 }
 0x616   : > { %v2403_v38 = vadd.f32 %v2402_v30, %v2401_v46  ;;  %v2328_v46 = vsel %vm2264_vm13, %v4445_v28, %v2296_v33  ;;  %v754_v30 = vld [vmem:[%s4320_s13 + $0xf0] sm:$0xff]  ;;  %v2330_v28 = vsel %vm2266_vm15, %v4465_v42, %v2298_v26 }
 0x617   : > { %v4566_v10 = vadd.f32 %v2328_v46, %v753_v61  ;;  %v4574_v3 = vadd.f32 %v2330_v28, %v755_v55 }
 0x618   : > { %v2405_v2 = vadd.f32 %v2404_v15, %v2403_v38  ;;  %v2329_v38 = vsel %vm2265_vm14, %v4472_v25, %v2297_v62 }
 0x619   : > { %v4572_v7 = vadd.f32 %v2329_v38, %v754_v30  ;;  %v2420_v25 = vsel %vm1018_vm1, %v4566_v10, 0.0  ;;  %v2424_v42 = vsel %vm1018_vm1, %v4574_v3, 0.0 }
 0x61a   : > { %v2407_v31 = vadd.f32 %v2406_v54, %v2405_v2  ;;  %v2418_v2 = vsel %vm1018_vm1, %v4559_v51, 0.0 }
 0x61c   : > { %v2409_v58 = vadd.f32 %v2408_v21, %v2407_v31  ;;  %v2422_v31 = vsel %vm1018_vm1, %v4572_v7, 0.0 }
 0x61e   : > { %v2411_v37 = vadd.f32 %v2410_v23, %v2409_v58 }
 0x620   : > { %v2413_v27 = vadd.f32 %v2412_v19, %v2411_v37 }
 0x622   : > { %v2415_v43 = vadd.f32 %v2414_v32, %v2413_v27 }
 0x624   : > { %v2417_v15 = vadd.f32 %v2416_v1, %v2415_v43 }
 0x626   : > { %v2419_v16 = vadd.f32 %v2418_v2, %v2417_v15 }
 0x628   : > { %v2421_v54 = vadd.f32 %v2420_v25, %v2419_v16 }
 0x62a   : > { %v2423_v12 = vadd.f32 %v2422_v31, %v2421_v54 }
 0x62c   : > { %v2425_v36 = vadd.f32 %v2424_v42, %v2423_v12 }
 0x62e   : > { %2426 = vadd.xlane.f32.xlu0 %v2425_v36 }
 0x6bb   : > { %v2427_v41 = vpop.xlane.xlu0 %2426 }
 0x6bc   : > { %v2428_v21 = vrot.slane %v2427_v41, 4 }
 0x6be   : > { %v2429_v58 = vadd.f32 %v2428_v21, %v2427_v41 }
 0x6c0   : > { %v2430_v11 = vrot.slane %v2429_v58, 2 }
 0x6c2   : > { %v2431_v47 = vadd.f32 %v2430_v11, %v2429_v58 }
 0x6c4   : > { %v2432_v33 = vrot.slane %v2431_v47, 1 }
 0x6c6   : > { %v2433_v23 = vadd.f32 %v2432_v33, %v2431_v47 }
 0x6c8   : > { %3343 = vpush %v2433_v23 }
 0x6f9   : > { %s3344_s19 = spop %3343 }
 0x6fa   : > { %v2435_v37 = vstv %s3344_s19  ;;  %s3099_s19 = sshll.u32 (%p3593_p5), %s3010_s16, 4 }
 0x6fb   : > { %v4582_v50 = vmul.f32 6.510417e-05, %v2435_v37  ;;  %s5229_s22 = scalar_lea.vmem (%p3593_p5), %s5312_s10, %s3099_s19 }
 0x6fd   : > { %v4586_v6 = vsub.f32 %v4330_v24, %v4582_v50  ;;  %v4590_v62 = vsub.f32 %v4326_v48, %v4582_v50  ;;  %v4594_v19 = vsub.f32 %v4344_v53, %v4582_v50  ;;  %v4598_v27 = vsub.f32 %v4340_v52, %v4582_v50 }
 0x6fe   : > { %v4606_v24 = vsub.f32 %v4358_v0, %v4582_v50  ;;  %v4612_v53 = vsub.f32 %v4356_v57, %v4582_v50  ;;  %v4620_v30 = vsub.f32 %v4372_v44, %v4582_v50  ;;  %v4627_v57 = vsub.f32 %v4366_v34, %v4582_v50 }
 0x6ff   : > { %v2470_v61 = vmul.f32 %v4586_v6, %v4586_v6  ;;  %v2471_v46 = vmul.f32 %v4590_v62, %v4590_v62  ;;  %v2472_v48 = vmul.f32 %v4594_v19, %v4594_v19  ;;  %v2473_v52 = vmul.f32 %v4598_v27, %v4598_v27 }
 0x700   : > { %v2474_v0 = vmul.f32 %v4606_v24, %v4606_v24  ;;  %v2475_v28 = vmul.f32 %v4612_v53, %v4612_v53  ;;  %v4634_v44 = vsub.f32 %v4388_v9, %v4582_v50  ;;  %v2476_v2 = vmul.f32 %v4620_v30, %v4620_v30 }
 0x701   : > { %v2502_v26 = vsel %vm1018_vm1, %v2470_v61, 0.0  ;;  %v2503_v32 = vsel %vm1018_vm1, %v2471_v46, 0.0  ;;  %v2505_v38 = vsel %vm1018_vm1, %v2472_v48, 0.0  ;;  %v2507_v55 = vsel %vm1018_vm1, %v2473_v52, 0.0 }
 0x702   : > { %v2504_v43 = vadd.f32 %v2503_v32, %v2502_v26  ;;  %v2509_v16 = vsel %vm1018_vm1, %v2474_v0, 0.0  ;;  %v4641_v34 = vsub.f32 %v4386_v8, %v4582_v50  ;;  %v2477_v54 = vmul.f32 %v4627_v57, %v4627_v57 }
 0x703   : > { %v2511_v31 = vsel %vm1018_vm1, %v2475_v28, 0.0  ;;  %v4648_v9 = vsub.f32 %v4409_v40, %v4582_v50  ;;  %v2478_v42 = vmul.f32 %v4634_v44, %v4634_v44  ;;  %v2513_v36 = vsel %vm1018_vm1, %v2476_v2, 0.0 }
 0x704   : > { %v2506_v1 = vadd.f32 %v2505_v38, %v2504_v43  ;;  %v4655_v8 = vsub.f32 %v4407_v63, %v4582_v50  ;;  %v2479_v21 = vmul.f32 %v4641_v34, %v4641_v34  ;;  %v2515_v58 = vsel %vm1018_vm1, %v2477_v54, 0.0 }
 0x705   : > { %v4662_v40 = vsub.f32 %v4419_v14, %v4582_v50  ;;  %v2480_v47 = vmul.f32 %v4648_v9, %v4648_v9  ;;  %v2517_v33 = vsel %vm1018_vm1, %v2478_v42, 0.0  ;;  %v4669_v63 = vsub.f32 %v4429_v59, %v4582_v50 }
 0x706   : > { %v2508_v15 = vadd.f32 %v2507_v55, %v2506_v1  ;;  %v2481_v37 = vmul.f32 %v4655_v8, %v4655_v8  ;;  %v2519_v61 = vsel %vm1018_vm1, %v2479_v21, 0.0  ;;  %v4676_v14 = vsub.f32 %v4439_v49, %v4582_v50 }
 0x707   : > { %v2482_v48 = vmul.f32 %v4662_v40, %v4662_v40  ;;  %v2521_v52 = vsel %vm1018_vm1, %v2480_v47, 0.0  ;;  %v4683_v59 = vsub.f32 %v4449_v13, %v4582_v50  ;;  %v2483_v32 = vmul.f32 %v4669_v63, %v4669_v63 }
 0x708   : > { %v2510_v25 = vadd.f32 %v2509_v16, %v2508_v15  ;;  %v2523_v43 = vsel %vm1018_vm1, %v2481_v37, 0.0  ;;  %v4690_v49 = vsub.f32 %v4459_v39, %v4582_v50  ;;  %v2484_v38 = vmul.f32 %v4676_v14, %v4676_v14 }
 0x709   : > { %v2525_v1 = vsel %vm1018_vm1, %v2482_v48, 0.0  ;;  %v4697_v13 = vsub.f32 %v4469_v60, %v4582_v50  ;;  %v2485_v55 = vmul.f32 %v4683_v59, %v4683_v59  ;;  %v2527_v15 = vsel %vm1018_vm1, %v2483_v32, 0.0 }
 0x70a   : > { %v2512_v12 = vadd.f32 %v2511_v31, %v2510_v25  ;;  %v4704_v39 = vsub.f32 %v4479_v5, %v4582_v50  ;;  %v2486_v16 = vmul.f32 %v4690_v49, %v4690_v49  ;;  %v2529_v25 = vsel %vm1018_vm1, %v2484_v38, 0.0 }
 0x70b   : > { %v4711_v60 = vsub.f32 %v4487_v20, %v4582_v50  ;;  %v2487_v31 = vmul.f32 %v4697_v13, %v4697_v13  ;;  %v4718_v5 = vsub.f32 %v4495_v35, %v4582_v50  ;;  %v4725_v20 = vsub.f32 %v4503_v17, %v4582_v50 }
 0x70c   : > { %v2514_v41 = vadd.f32 %v2513_v36, %v2512_v12  ;;  %v2531_v12 = vsel %vm1018_vm1, %v2485_v55, 0.0  ;;  %v2488_v36 = vmul.f32 %v4704_v39, %v4704_v39  ;;  %v4732_v35 = vsub.f32 %v4511_v45, %v4582_v50 }
 0x70d   : > { %v4739_v17 = vsub.f32 %v4519_v22, %v4582_v50  ;;  %v4746_v45 = vsub.f32 %v4527_v4, %v4582_v50  ;;  %v4753_v22 = vsub.f32 %v4535_v56, %v4582_v50  ;;  %v4760_v4 = vsub.f32 %v4543_v18, %v4582_v50 }
 0x70e   : > { %v2516_v11 = vadd.f32 %v2515_v58, %v2514_v41  ;;  %v2533_v41 = vsel %vm1018_vm1, %v2486_v16, 0.0  ;;  %v2489_v58 = vmul.f32 %v4711_v60, %v4711_v60  ;;  %v4767_v56 = vsub.f32 %v4551_v29, %v4582_v50 }
 0x70f   : > { %v4774_v18 = vsub.f32 %v4559_v51, %v4582_v50  ;;  %v4781_v29 = vsub.f32 %v4566_v10, %v4582_v50  ;;  %v4788_v51 = vsub.f32 %v4572_v7, %v4582_v50  ;;  %v4795_v10 = vsub.f32 %v4574_v3, %v4582_v50 }
 0x710   : > { %v2518_v23 = vadd.f32 %v2517_v33, %v2516_v11  ;;  %v2535_v11 = vsel %vm1018_vm1, %v2487_v31, 0.0  ;;  %v2490_v33 = vmul.f32 %v4718_v5, %v4718_v5 }
 0x711   : > { %v2500_v7 = vmul.f32 %v4788_v51, %v4788_v51 }
 0x712   : > { %v2520_v46 = vadd.f32 %v2519_v61, %v2518_v23  ;;  %v2537_v23 = vsel %vm1018_vm1, %v2488_v36, 0.0  ;;  %v2491_v61 = vmul.f32 %v4725_v20, %v4725_v20 }
 0x713   : > { %v2561_v3 = vsel %vm1018_vm1, %v2500_v7, 0.0 }
 0x714   : > { %v2522_v26 = vadd.f32 %v2521_v52, %v2520_v46  ;;  %v2539_v46 = vsel %vm1018_vm1, %v2489_v58, 0.0  ;;  %v2492_v52 = vmul.f32 %v4732_v35, %v4732_v35 }
 0x716   : > { %v2524_v0 = vadd.f32 %v2523_v43, %v2522_v26  ;;  %v2541_v26 = vsel %vm1018_vm1, %v2490_v33, 0.0  ;;  %v2493_v43 = vmul.f32 %v4739_v17, %v4739_v17 }
 0x718   : > { %v2526_v28 = vadd.f32 %v2525_v1, %v2524_v0  ;;  %v2543_v0 = vsel %vm1018_vm1, %v2491_v61, 0.0  ;;  %v2494_v1 = vmul.f32 %v4746_v45, %v4746_v45  ;;  %v2501_v61 = vmul.f32 %v4795_v10, %v4795_v10 }
 0x71a   : > { %v2528_v2 = vadd.f32 %v2527_v15, %v2526_v28  ;;  %v2545_v28 = vsel %vm1018_vm1, %v2492_v52, 0.0  ;;  %v2495_v15 = vmul.f32 %v4753_v22, %v4753_v22  ;;  %v2563_v52 = vsel %vm1018_vm1, %v2501_v61, 0.0 }
 0x71c   : > { %v2530_v54 = vadd.f32 %v2529_v25, %v2528_v2  ;;  %v2547_v2 = vsel %vm1018_vm1, %v2493_v43, 0.0  ;;  %v2496_v25 = vmul.f32 %v4760_v4, %v4760_v4 }
 0x71e   : > { %v2532_v42 = vadd.f32 %v2531_v12, %v2530_v54  ;;  %v2549_v54 = vsel %vm1018_vm1, %v2494_v1, 0.0  ;;  %v2497_v12 = vmul.f32 %v4767_v56, %v4767_v56 }
 0x720   : > { %v2534_v21 = vadd.f32 %v2533_v41, %v2532_v42  ;;  %v2551_v42 = vsel %vm1018_vm1, %v2495_v15, 0.0  ;;  %v2498_v41 = vmul.f32 %v4774_v18, %v4774_v18 }
 0x722   : > { %v2536_v47 = vadd.f32 %v2535_v11, %v2534_v21  ;;  %v2553_v21 = vsel %vm1018_vm1, %v2496_v25, 0.0  ;;  %v2499_v11 = vmul.f32 %v4781_v29, %v4781_v29 }
 0x724   : > { %v2538_v37 = vadd.f32 %v2537_v23, %v2536_v47  ;;  %v2555_v47 = vsel %vm1018_vm1, %v2497_v12, 0.0  ;;  %v2557_v23 = vsel %vm1018_vm1, %v2498_v41, 0.0 }
 0x726   : > { %v2540_v48 = vadd.f32 %v2539_v46, %v2538_v37  ;;  %v2559_v46 = vsel %vm1018_vm1, %v2499_v11, 0.0 }
 0x728   : > { %v2542_v32 = vadd.f32 %v2541_v26, %v2540_v48 }
 0x72a   : > { %v2544_v38 = vadd.f32 %v2543_v0, %v2542_v32 }
 0x72c   : > { %v2546_v55 = vadd.f32 %v2545_v28, %v2544_v38 }
 0x72e   : > { %v2548_v16 = vadd.f32 %v2547_v2, %v2546_v55 }
 0x730   : > { %v2550_v31 = vadd.f32 %v2549_v54, %v2548_v16 }
 0x732   : > { %v2552_v36 = vadd.f32 %v2551_v42, %v2550_v31 }
 0x734   : > { %v2554_v58 = vadd.f32 %v2553_v21, %v2552_v36 }
 0x736   : > { %v2556_v33 = vadd.f32 %v2555_v47, %v2554_v58 }
 0x738   : > { %v2558_v37 = vadd.f32 %v2557_v23, %v2556_v33  ;;  %v2618_v23 = vld [vmem:[%s5310_s8 + $0x40] sm:$0xff] }
 0x73a   : > { %v2560_v48 = vadd.f32 %v2559_v46, %v2558_v37  ;;  %v2619_v37 = vld [vmem:[%s5310_s8 + $0x48] sm:$0xff] }
 0x73c   : > { %v2562_v50 = vadd.f32 %v2561_v3, %v2560_v48  ;;  %v2622_v48 = vld [vmem:[%s5310_s8 + $0x60] sm:$0xff]  ;;  %v2623_v3 = vld [vmem:[%s5310_s8 + $0x68] sm:$0xff] }
 0x73e   : > { %v2564_v26 = vadd.f32 %v2563_v52, %v2562_v50 }
 0x740   : > { %2565 = vadd.xlane.f32.xlu0 %v2564_v26  ;;  %v2626_v26 = vld [vmem:[%s5310_s8 + $0x80] sm:$0xff] }
 0x7cd   : > { %v2566_v32 = vpop.xlane.xlu0 %2565 }
 0x7ce   : > { %v2567_v43 = vrot.slane %v2566_v32, 4 }
 0x7d0   : > { %v2568_v0 = vadd.f32 %v2567_v43, %v2566_v32  ;;  %v2627_v32 = vld [vmem:[%s5310_s8 + $0x88] sm:$0xff]  ;;  %v2628_v43 = vld [vmem:[%s5310_s8 + $0x90] sm:$0xff] }
 0x7d2   : > { %v2569_v38 = vrot.slane %v2568_v0, 2 }
 0x7d4   : > { %v2570_v1 = vadd.f32 %v2569_v38, %v2568_v0  ;;  %v2633_v0 = vld [vmem:[%s5310_s8 + $0xb8] sm:$0xff] }
 0x7d6   : > { %v2571_v28 = vrot.slane %v2570_v1, 1 }
 0x7d8   : > { %v2572_v55 = vadd.f32 %v2571_v28, %v2570_v1 }
 0x7da   : > { %3345 = vpush %v2572_v55 }
 0x80b   : > { %s3346_s23 = spop %3345 }
 0x80c   : > { %v2574_v15 = vstv %s3346_s23  ;;  %s5115_s23 = scalar_lea.vmem [#allocation4], %s3786_s18 }
 0x80d   : > { %v2575_v2 = vmul.f32 6.510417e-05, %v2574_v15  ;;  %v2634_v15 = vld [vmem:[%s5310_s8 + $0xc0] sm:$0xff] }
 0x80f   : > { %v2576_v16 = vadd.f32 1e-05, %v2575_v2  ;;  %v2635_v2 = vld [vmem:[%s5310_s8 + $0xc8] sm:$0xff] }
 0x811   : > { %3445 = vrsqrt.f32 %v2576_v16  ;;  %v2636_v16 = vld [vmem:[%s5310_s8 + $0xd0] sm:$0xff] }
 0x81b   : > { %v3446_v25 = vpop.eup %3445 }
 0x81c   : > { %v2578_v54 = vmul.f32 %v3446_v25, %v4586_v6  ;;  %v2579_v31 = vmul.f32 %v3446_v25, %v4590_v62  ;;  %v2580_v12 = vmul.f32 %v3446_v25, %v4594_v19  ;;  %v2581_v42 = vmul.f32 %v3446_v25, %v4598_v27 }
 0x81d   : > { %v2582_v36 = vmul.f32 %v3446_v25, %v4606_v24  ;;  %v2583_v41 = vmul.f32 %v3446_v25, %v4612_v53  ;;  %v2584_v21 = vmul.f32 %v3446_v25, %v4620_v30  ;;  %v2585_v58 = vmul.f32 %v3446_v25, %v4627_v57  ;;  %v2610_v30 = vld [vmem:[%s5310_s8] sm:$0xff]  ;;  %v2611_v57 = vld [vmem:[%s5310_s8 + $0x8] sm:$0xff] }
 0x81e   : > { %v4817_v11 = vmul.f32 %v3446_v25, %v4634_v44  ;;  %v4820_v47 = vmul.f32 %v3446_v25, %v4641_v34  ;;  %v4823_v6 = vmul.f32 %v3446_v25, %v4648_v9  ;;  %v4826_v62 = vmul.f32 %v3446_v25, %v4655_v8  ;;  %v2612_v44 = vld [vmem:[%s5310_s8 + $0x10] sm:$0xff]  ;;  %v2613_v34 = vld [vmem:[%s5310_s8 + $0x18] sm:$0xff] }
 0x81f   : > { %v4829_v19 = vmul.f32 %v3446_v25, %v4662_v40  ;;  %v4832_v27 = vmul.f32 %v3446_v25, %v4669_v63  ;;  %v4835_v24 = vmul.f32 %v3446_v25, %v4676_v14  ;;  %v4838_v53 = vmul.f32 %v3446_v25, %v4683_v59  ;;  %v2614_v14 = vld [vmem:[%s5310_s8 + $0x20] sm:$0xff]  ;;  %v2615_v59 = vld [vmem:[%s5310_s8 + $0x28] sm:$0xff] }
 0x820   : > { %v4853_v9 = vmul.f32 %v3446_v25, %v4690_v49  ;;  %v4856_v8 = vmul.f32 %v3446_v25, %v4697_v13  ;;  %v4859_v40 = vmul.f32 %v3446_v25, %v4704_v39  ;;  %v4862_v63 = vmul.f32 %v3446_v25, %v4711_v60  ;;  %v2616_v49 = vld [vmem:[%s5310_s8 + $0x30] sm:$0xff]  ;;  %v2617_v13 = vld [vmem:[%s5310_s8 + $0x38] sm:$0xff] }
 0x821   : > { %v4877_v39 = vmul.f32 %v3446_v25, %v4718_v5  ;;  %v4880_v60 = vmul.f32 %v3446_v25, %v4725_v20  ;;  %v4883_v33 = vmul.f32 %v3446_v25, %v4732_v35  ;;  %v4886_v7 = vmul.f32 %v3446_v25, %v4739_v17  ;;  %v2620_v5 = vld [vmem:[%s5310_s8 + $0x50] sm:$0xff]  ;;  %v2621_v20 = vld [vmem:[%s5310_s8 + $0x58] sm:$0xff] }
 0x822   : > { %v4901_v35 = vmul.f32 %v3446_v25, %v4746_v45  ;;  %v4904_v17 = vmul.f32 %v3446_v25, %v4753_v22  ;;  %v4907_v61 = vmul.f32 %v3446_v25, %v4760_v4  ;;  %v4910_v46 = vmul.f32 %v3446_v25, %v4767_v56  ;;  %v2624_v45 = vld [vmem:[%s5310_s8 + $0x70] sm:$0xff]  ;;  %v2625_v22 = vld [vmem:[%s5310_s8 + $0x78] sm:$0xff] }
 0x823   : > { %v2606_v4 = vmul.f32 %v3446_v25, %v4774_v18  ;;  %v2607_v56 = vmul.f32 %v3446_v25, %v4781_v29  ;;  %v2608_v50 = vmul.f32 %v3446_v25, %v4788_v51  ;;  %v2609_v52 = vmul.f32 %v3446_v25, %v4795_v10  ;;  %v2629_v18 = vld [vmem:[%s5310_s8 + $0x98] sm:$0xff]  ;;  %v2630_v29 = vld [vmem:[%s5310_s8 + $0xa0] sm:$0xff]  ;;  %v2631_v51 = vld [vmem:[%s5310_s8 + $0xa8] sm:$0xff] }
 0x824   : > { %v2632_v10 = vld [vmem:[%s5310_s8 + $0xb0] sm:$0xff]  ;;  %v2642_v38 = vmul.f32 %v2610_v30, %v2578_v54  ;;  %v2643_v1 = vmul.f32 %v2611_v57, %v2579_v31  ;;  %v2644_v28 = vmul.f32 %v2612_v44, %v2580_v12  ;;  %v2645_v55 = vmul.f32 %v2613_v34, %v2581_v42  ;;  %v2637_v25 = vld [vmem:[%s5310_s8 + $0xd8] sm:$0xff]  ;;  %v2638_v30 = vld [vmem:[%s5310_s8 + $0xe0] sm:$0xff] }
 0x825   : > { %v2646_v54 = vmul.f32 %v2614_v14, %v2582_v36  ;;  %v2647_v31 = vmul.f32 %v2615_v59, %v2583_v41  ;;  %v2648_v12 = vmul.f32 %v2616_v49, %v2584_v21  ;;  %v2649_v42 = vmul.f32 %v2617_v13, %v2585_v58  ;;  %v2639_v57 = vld [vmem:[%s5310_s8 + $0xe8] sm:$0xff]  ;;  %v2640_v44 = vld [vmem:[%s5310_s8 + $0xf0] sm:$0xff]  ;;  %v2641_v34 = vld [vmem:[%s5310_s8 + $0xf8] sm:$0xff] }
 0x826   : > { %v2650_v36 = vmul.f32 %v2618_v23, %v4817_v11  ;;  %v2651_v41 = vmul.f32 %v2619_v37, %v4820_v47  ;;  %v2652_v21 = vmul.f32 %v2620_v5, %v4823_v6  ;;  %v2653_v58 = vmul.f32 %v2621_v20, %v4826_v62  ;;  %v2674_v11 = vld [vmem:[%s5311_s9] sm:$0xff]  ;;  %v2675_v47 = vld [vmem:[%s5311_s9 + $0x8] sm:$0xff]  ;;  %v2676_v6 = vld [vmem:[%s5311_s9 + $0x10] sm:$0xff] }
 0x827   : > { %v4981_v14 = vmul.f32 %v2622_v48, %v4829_v19  ;;  %v4984_v59 = vmul.f32 %v2623_v3, %v4832_v27  ;;  %v4987_v49 = vmul.f32 %v2624_v45, %v4835_v24  ;;  %v4990_v13 = vmul.f32 %v2625_v22, %v4838_v53  ;;  %v2677_v62 = vld [vmem:[%s5311_s9 + $0x18] sm:$0xff]  ;;  %v2678_v23 = vld [vmem:[%s5311_s9 + $0x20] sm:$0xff]  ;;  %v2679_v37 = vld [vmem:[%s5311_s9 + $0x28] sm:$0xff] }
 0x828   : > { %v5005_v19 = vmul.f32 %v2626_v26, %v4853_v9  ;;  %v5008_v27 = vmul.f32 %v2627_v32, %v4856_v8  ;;  %v5011_v24 = vmul.f32 %v2628_v43, %v4859_v40  ;;  %v5014_v53 = vmul.f32 %v2629_v18, %v4862_v63  ;;  %v2680_v9 = vld [vmem:[%s5311_s9 + $0x30] sm:$0xff]  ;;  %v2681_v8 = vld [vmem:[%s5311_s9 + $0x38] sm:$0xff]  ;;  %v2682_v48 = vld [vmem:[%s5311_s9 + $0x40] sm:$0xff] }
 0x829   : > { %v5029_v40 = vmul.f32 %v2630_v29, %v4877_v39  ;;  %v5032_v63 = vmul.f32 %v2631_v51, %v4880_v60  ;;  %v5035_v5 = vmul.f32 %v2632_v10, %v4883_v33  ;;  %v5038_v20 = vmul.f32 %v2633_v0, %v4886_v7  ;;  %v2683_v3 = vld [vmem:[%s5311_s9 + $0x48] sm:$0xff]  ;;  %v2684_v39 = vld [vmem:[%s5311_s9 + $0x50] sm:$0xff]  ;;  %v2685_v22 = vld [vmem:[%s5311_s9 + $0x58] sm:$0xff] }
 0x82a   : > { %v5050_v60 = vmul.f32 %v2634_v15, %v4901_v35  ;;  %v5053_v33 = vmul.f32 %v2635_v2, %v4904_v17  ;;  %v5056_v7 = vmul.f32 %v2636_v16, %v4907_v61  ;;  %v5059_v45 = vmul.f32 %v2637_v25, %v4910_v46  ;;  %v2686_v26 = vld [vmem:[%s5311_s9 + $0x60] sm:$0xff]  ;;  %v2687_v35 = vld [vmem:[%s5311_s9 + $0x68] sm:$0xff]  ;;  %v2688_v43 = vld [vmem:[%s5311_s9 + $0x70] sm:$0xff] }
 0x82b   : > { %v5070_v17 = vmul.f32 %v2638_v30, %v2606_v4  ;;  %v5072_v32 = vmul.f32 %v2639_v57, %v2607_v56  ;;  %v5074_v61 = vmul.f32 %v2640_v44, %v2608_v50  ;;  %v5076_v46 = vmul.f32 %v2641_v34, %v2609_v52  ;;  %v2689_v18 = vld [vmem:[%s5311_s9 + $0x78] sm:$0xff]  ;;  %v2690_v29 = vld [vmem:[%s5311_s9 + $0x80] sm:$0xff]  ;;  %v2691_v4 = vld [vmem:[%s5311_s9 + $0x88] sm:$0xff] }
 0x82c   : > { %v2692_v56 = vld [vmem:[%s5311_s9 + $0x90] sm:$0xff]  ;;  %v2693_v50 = vld [vmem:[%s5311_s9 + $0x98] sm:$0xff]  ;;  %v2706_v52 = vadd.f32 %v2674_v11, %v2642_v38  ;;  %v2707_v51 = vadd.f32 %v2675_v47, %v2643_v1  ;;  %v2708_v10 = vadd.f32 %v2676_v6, %v2644_v28  ;;  %v2709_v0 = vadd.f32 %v2677_v62, %v2645_v55  ;;  %v2694_v15 = vld [vmem:[%s5311_s9 + $0xa0] sm:$0xff] }
 0x82d   : > { %v2695_v2 = vld [vmem:[%s5311_s9 + $0xa8] sm:$0xff]  ;;  %v2696_v16 = vld [vmem:[%s5311_s9 + $0xb0] sm:$0xff]  ;;  %v2710_v25 = vadd.f32 %v2678_v23, %v2646_v54  ;;  %v2711_v30 = vadd.f32 %v2679_v37, %v2647_v31  ;;  %v2712_v57 = vadd.f32 %v2680_v9, %v2648_v12  ;;  %v2713_v38 = vadd.f32 %v2681_v8, %v2649_v42  ;;  %v2697_v1 = vld [vmem:[%s5311_s9 + $0xb8] sm:$0xff] }
 0x82e   : > { %v2698_v28 = vld [vmem:[%s5311_s9 + $0xc0] sm:$0xff]  ;;  %v2699_v55 = vld [vmem:[%s5311_s9 + $0xc8] sm:$0xff]  ;;  %v2714_v44 = vadd.f32 %v2682_v48, %v2650_v36  ;;  %v2715_v34 = vadd.f32 %v2683_v3, %v2651_v41  ;;  %v2716_v11 = vadd.f32 %v2684_v39, %v2652_v21  ;;  %v2717_v47 = vadd.f32 %v2685_v22, %v2653_v58  ;;  %2738 = vst.msk [vmem:[%s5115_s23] sm:$0xff] %vm1018_vm1, %v2706_v52  ;;  %v2700_v54 = vld [vmem:[%s5311_s9 + $0xd0] sm:$0xff] }
 0x82f   : > { %2739 = vst.msk [vmem:[%s5115_s23 + $0x8] sm:$0xff] %vm1018_vm1, %v2707_v51  ;;  %2740 = vst.msk [vmem:[%s5115_s23 + $0x10] sm:$0xff] %vm1018_vm1, %v2708_v10  ;;  %v2701_v31 = vld [vmem:[%s5311_s9 + $0xd8] sm:$0xff]  ;;  %v2702_v12 = vld [vmem:[%s5311_s9 + $0xe0] sm:$0xff]  ;;  %v2718_v42 = vadd.f32 %v2686_v26, %v4981_v14  ;;  %v2719_v36 = vadd.f32 %v2687_v35, %v4984_v59  ;;  %v2720_v41 = vadd.f32 %v2688_v43, %v4987_v49 }
 0x830   : > { %2741 = vst.msk [vmem:[%s5115_s23 + $0x18] sm:$0xff] %vm1018_vm1, %v2709_v0  ;;  %v2721_v21 = vadd.f32 %v2689_v18, %v4990_v13  ;;  %2742 = vst.msk [vmem:[%s5115_s23 + $0x20] sm:$0xff] %vm1018_vm1, %v2710_v25  ;;  %v2703_v58 = vld [vmem:[%s5311_s9 + $0xe8] sm:$0xff]  ;;  %v2704_v14 = vld [vmem:[%s5311_s9 + $0xf0] sm:$0xff]  ;;  %v2722_v49 = vadd.f32 %v2690_v29, %v5005_v19  ;;  %v2723_v13 = vadd.f32 %v2691_v4, %v5008_v27 }
 0x831   : > { %2743 = vst.msk [vmem:[%s5115_s23 + $0x28] sm:$0xff] %vm1018_vm1, %v2711_v30  ;;  %2744 = vst.msk [vmem:[%s5115_s23 + $0x30] sm:$0xff] %vm1018_vm1, %v2712_v57  ;;  %v2705_v59 = vld [vmem:[%s5311_s9 + $0xf8] sm:$0xff]  ;;  %v2724_v6 = vadd.f32 %v2692_v56, %v5011_v24  ;;  %v2725_v62 = vadd.f32 %v2693_v50, %v5014_v53  ;;  %v2726_v19 = vadd.f32 %v2694_v15, %v5029_v40 }
 0x832   : > { %2745 = vst.msk [vmem:[%s5115_s23 + $0x38] sm:$0xff] %vm1018_vm1, %v2713_v38  ;;  %2746 = vst.msk [vmem:[%s5115_s23 + $0x40] sm:$0xff] %vm1018_vm1, %v2714_v44  ;;  %v2727_v27 = vadd.f32 %v2695_v2, %v5032_v63  ;;  %v2728_v24 = vadd.f32 %v2696_v16, %v5035_v5  ;;  %v2729_v53 = vadd.f32 %v2697_v1, %v5038_v20 }
 0x833   : > { %2747 = vst.msk [vmem:[%s5115_s23 + $0x48] sm:$0xff] %vm1018_vm1, %v2715_v34  ;;  %2748 = vst.msk [vmem:[%s5115_s23 + $0x50] sm:$0xff] %vm1018_vm1, %v2716_v11  ;;  %v2730_v23 = vadd.f32 %v2698_v28, %v5050_v60  ;;  %v2731_v37 = vadd.f32 %v2699_v55, %v5053_v33  ;;  %v2732_v9 = vadd.f32 %v2700_v54, %v5056_v7 }
 0x834   : > { %2749 = vst.msk [vmem:[%s5115_s23 + $0x58] sm:$0xff] %vm1018_vm1, %v2717_v47  ;;  %2750 = vst.msk [vmem:[%s5115_s23 + $0x60] sm:$0xff] %vm1018_vm1, %v2718_v42  ;;  %v2733_v8 = vadd.f32 %v2701_v31, %v5059_v45  ;;  %v2734_v40 = vadd.f32 %v2702_v12, %v5070_v17  ;;  %v2735_v63 = vadd.f32 %v2703_v58, %v5072_v32 }
 0x835   : > { %2751 = vst.msk [vmem:[%s5115_s23 + $0x68] sm:$0xff] %vm1018_vm1, %v2719_v36  ;;  %2752 = vst.msk [vmem:[%s5115_s23 + $0x70] sm:$0xff] %vm1018_vm1, %v2720_v41  ;;  %v2736_v5 = vadd.f32 %v2704_v14, %v5074_v61  ;;  %v2737_v20 = vadd.f32 %v2705_v59, %v5076_v46  ;;  %v2869_v48 = vld [vmem:[%s5115_s23] sm:$0xff] (%p3593_p5) }
 0x836   : > { %2753 = vst.msk [vmem:[%s5115_s23 + $0x78] sm:$0xff] %vm1018_vm1, %v2721_v21  ;;  %2754 = vst.msk [vmem:[%s5115_s23 + $0x80] sm:$0xff] %vm1018_vm1, %v2722_v49  ;;  %v2871_v3 = vld [vmem:[%s5115_s23 + $0x8] sm:$0xff] (%p3593_p5)  ;;  %v2873_v39 = vld [vmem:[%s5115_s23 + $0x10] sm:$0xff] (%p3593_p5) }
 0x837   : > { %2755 = vst.msk [vmem:[%s5115_s23 + $0x88] sm:$0xff] %vm1018_vm1, %v2723_v13  ;;  %2756 = vst.msk [vmem:[%s5115_s23 + $0x90] sm:$0xff] %vm1018_vm1, %v2724_v6  ;;  %v2875_v60 = vld [vmem:[%s5115_s23 + $0x18] sm:$0xff] (%p3593_p5)  ;;  %v2877_v33 = vld [vmem:[%s5115_s23 + $0x20] sm:$0xff] (%p3593_p5) }
 0x838   : > { %2757 = vst.msk [vmem:[%s5115_s23 + $0x98] sm:$0xff] %vm1018_vm1, %v2725_v62  ;;  %2758 = vst.msk [vmem:[%s5115_s23 + $0xa0] sm:$0xff] %vm1018_vm1, %v2726_v19  ;;  %2776 = sbr.rel (!%p3593_p5) target bundleno = 2127 (0x84f), region = 140  ;;  %v2879_v7 = vld [vmem:[%s5115_s23 + $0x28] sm:$0xff] (%p3593_p5)  ;;  %v2881_v45 = vld [vmem:[%s5115_s23 + $0x30] sm:$0xff] (%p3593_p5) }
 0x839   : > { %2759 = vst.msk [vmem:[%s5115_s23 + $0xa8] sm:$0xff] %vm1018_vm1, %v2727_v27  ;;  %2760 = vst.msk [vmem:[%s5115_s23 + $0xb0] sm:$0xff] %vm1018_vm1, %v2728_v24  ;;  %v2883_v22 = vld [vmem:[%s5115_s23 + $0x38] sm:$0xff] (%p3593_p5)  ;;  %v2885_v26 = vld [vmem:[%s5115_s23 + $0x40] sm:$0xff] (%p3593_p5) }
 0x83a   : > { %2761 = vst.msk [vmem:[%s5115_s23 + $0xb8] sm:$0xff] %vm1018_vm1, %v2729_v53  ;;  %2762 = vst.msk [vmem:[%s5115_s23 + $0xc0] sm:$0xff] %vm1018_vm1, %v2730_v23  ;;  %v2887_v35 = vld [vmem:[%s5115_s23 + $0x48] sm:$0xff] (%p3593_p5)  ;;  %v2889_v17 = vld [vmem:[%s5115_s23 + $0x50] sm:$0xff] (%p3593_p5) }
 0x83b   : > { %2763 = vst.msk [vmem:[%s5115_s23 + $0xc8] sm:$0xff] %vm1018_vm1, %v2731_v37  ;;  %2764 = vst.msk [vmem:[%s5115_s23 + $0xd0] sm:$0xff] %vm1018_vm1, %v2732_v9  ;;  %v2891_v32 = vld [vmem:[%s5115_s23 + $0x58] sm:$0xff] (%p3593_p5)  ;;  %v2893_v61 = vld [vmem:[%s5115_s23 + $0x60] sm:$0xff] (%p3593_p5) }
 0x83c   : > { %2765 = vst.msk [vmem:[%s5115_s23 + $0xd8] sm:$0xff] %vm1018_vm1, %v2733_v8  ;;  %2766 = vst.msk [vmem:[%s5115_s23 + $0xe0] sm:$0xff] %vm1018_vm1, %v2734_v40  ;;  %v2895_v46 = vld [vmem:[%s5115_s23 + $0x68] sm:$0xff] (%p3593_p5)  ;;  %v2897_v43 = vld [vmem:[%s5115_s23 + $0x70] sm:$0xff] (%p3593_p5) }
 0x83d   : > { %2767 = vst.msk [vmem:[%s5115_s23 + $0xe8] sm:$0xff] %vm1018_vm1, %v2735_v63  ;;  %2768 = vst.msk [vmem:[%s5115_s23 + $0xf0] sm:$0xff] %vm1018_vm1, %v2736_v5  ;;  %v2899_v18 = vld [vmem:[%s5115_s23 + $0x78] sm:$0xff] (%p3593_p5)  ;;  %v2901_v29 = vld [vmem:[%s5115_s23 + $0x80] sm:$0xff] (%p3593_p5) }
 0x83e   : > { %2769 = vst.msk [vmem:[%s5115_s23 + $0xf8] sm:$0xff] %vm1018_vm1, %v2737_v20  ;;  %2870 = vst [vmem:[%s5229_s22] sm:$0xff] (%p3593_p5), %v2869_v48  ;;  %v2903_v4 = vld [vmem:[%s5115_s23 + $0x88] sm:$0xff] (%p3593_p5)  ;;  %v2905_v56 = vld [vmem:[%s5115_s23 + $0x90] sm:$0xff] (%p3593_p5) }
 0x83f   : > { %2872 = vst [vmem:[%s5229_s22 + $0x8] sm:$0xff] %v2871_v3  ;;  %2874 = vst [vmem:[%s5229_s22 + $0x20] sm:$0xff] %v2873_v39  ;;  %v2907_v50 = vld [vmem:[%s5115_s23 + $0x98] sm:$0xff]  ;;  %v2909_v52 = vld [vmem:[%s5115_s23 + $0xa0] sm:$0xff] }
 0x840   : > { %2876 = vst [vmem:[%s5229_s22 + $0x28] sm:$0xff] %v2875_v60  ;;  %2878 = vst [vmem:[%s5229_s22 + $0x40] sm:$0xff] %v2877_v33  ;;  %v2911_v51 = vld [vmem:[%s5115_s23 + $0xa8] sm:$0xff]  ;;  %v2913_v10 = vld [vmem:[%s5115_s23 + $0xb0] sm:$0xff] }
 0x841   : > { %2880 = vst [vmem:[%s5229_s22 + $0x48] sm:$0xff] %v2879_v7  ;;  %2882 = vst [vmem:[%s5229_s22 + $0x60] sm:$0xff] %v2881_v45  ;;  %v2915_v0 = vld [vmem:[%s5115_s23 + $0xb8] sm:$0xff]  ;;  %v2917_v15 = vld [vmem:[%s5115_s23 + $0xc0] sm:$0xff] }
 0x842   : > { %2884 = vst [vmem:[%s5229_s22 + $0x68] sm:$0xff] %v2883_v22  ;;  %2886 = vst [vmem:[%s5229_s22 + $0x80] sm:$0xff] %v2885_v26  ;;  %v2919_v2 = vld [vmem:[%s5115_s23 + $0xc8] sm:$0xff]  ;;  %v2921_v16 = vld [vmem:[%s5115_s23 + $0xd0] sm:$0xff] }
 0x843   : > { %2888 = vst [vmem:[%s5229_s22 + $0x88] sm:$0xff] %v2887_v35  ;;  %2890 = vst [vmem:[%s5229_s22 + $0xa0] sm:$0xff] %v2889_v17  ;;  %v2923_v25 = vld [vmem:[%s5115_s23 + $0xd8] sm:$0xff]  ;;  %v2925_v30 = vld [vmem:[%s5115_s23 + $0xe0] sm:$0xff] }
 0x844   : > { %2892 = vst [vmem:[%s5229_s22 + $0xa8] sm:$0xff] %v2891_v32  ;;  %2894 = vst [vmem:[%s5229_s22 + $0xc0] sm:$0xff] %v2893_v61  ;;  %v2927_v57 = vld [vmem:[%s5115_s23 + $0xe8] sm:$0xff]  ;;  %v2929_v38 = vld [vmem:[%s5115_s23 + $0xf0] sm:$0xff] }
 0x845   : > { %2896 = vst [vmem:[%s5229_s22 + $0xc8] sm:$0xff] %v2895_v46  ;;  %2898 = vst [vmem:[%s5229_s22 + $0xe0] sm:$0xff] %v2897_v43  ;;  %v2931_v1 = vld [vmem:[%s5115_s23 + $0xf8] sm:$0xff] }
 0x846   : > { %2900 = vst [vmem:[%s5229_s22 + $0xe8] sm:$0xff] %v2899_v18  ;;  %2902 = vst [vmem:[%s5229_s22 + $0x100] sm:$0xff] %v2901_v29 }
 0x847   : > { %2904 = vst [vmem:[%s5229_s22 + $0x108] sm:$0xff] %v2903_v4  ;;  %2906 = vst [vmem:[%s5229_s22 + $0x120] sm:$0xff] %v2905_v56 }
 0x848   : > { %2908 = vst [vmem:[%s5229_s22 + $0x128] sm:$0xff] %v2907_v50  ;;  %2910 = vst [vmem:[%s5229_s22 + $0x140] sm:$0xff] %v2909_v52 }
 0x849   : > { %2912 = vst [vmem:[%s5229_s22 + $0x148] sm:$0xff] %v2911_v51  ;;  %2914 = vst [vmem:[%s5229_s22 + $0x160] sm:$0xff] %v2913_v10 }
 0x84a   : > { %2916 = vst [vmem:[%s5229_s22 + $0x168] sm:$0xff] %v2915_v0  ;;  %2918 = vst [vmem:[%s5229_s22 + $0x180] sm:$0xff] %v2917_v15 }
 0x84b   : > { %2920 = vst [vmem:[%s5229_s22 + $0x188] sm:$0xff] %v2919_v2  ;;  %2922 = vst [vmem:[%s5229_s22 + $0x1a0] sm:$0xff] %v2921_v16 }
 0x84c   : > { %2924 = vst [vmem:[%s5229_s22 + $0x1a8] sm:$0xff] %v2923_v25  ;;  %2926 = vst [vmem:[%s5229_s22 + $0x1c0] sm:$0xff] %v2925_v30 }
 0x84d   : > { %2928 = vst [vmem:[%s5229_s22 + $0x1c8] sm:$0xff] %v2927_v57  ;;  %2930 = vst [vmem:[%s5229_s22 + $0x1e0] sm:$0xff] %v2929_v38 }
 0x84e   : > { %2932 = vst [vmem:[%s5229_s22 + $0x1e8] sm:$0xff] %v2931_v1 }
 0x84f PF: > { %p17_p10 = scmp.ge.s32.totalorder %s3576_s17, 4   ;;  %s5372_s13 = smov %s3495_s14 }
 0x850   : > { %s5373_s14 = smov %s3587_s20  ;;  %s5374_s15 = smov %s3576_s17 }
 0x851   :  { %19 = sbr.rel (!%p17_p10) target bundleno = 2 (0x2), region = 217 }

// kernel: _lambda_.17
= control target key start
LH: loop header
LB: loop body
LE: loop exit
PB: predicated region body
PF: predicated region fallthrough
CT: control target
= control target key end

     0   :  { %v1001_v3 = vmov 0.0   ;;  %v1002_v8 = vmov 0   ;;  %vm118_vm0 = vcmask 392192   ;;  %s1479_s0 = inlined_call_operand.vmem [shape: f32[48,1920], index: 0, kind: input, shape index: {}]   ;;  %s1480_s1 = inlined_call_operand.vmem [shape: f32[16,48], index: 1, kind: input, shape index: {}]   ;;  %s1481_s2 = inlined_call_operand.vmem [shape: f32[16,1], index: 2, kind: input, shape index: {}]   ;;  %s1482_s3 = inlined_call_operand.vmem [shape: f32[16,1920], index: 3, kind: output, shape index: {}]  }
   0x1   :  { %v17_v0 = vld [vmem:[%s1479_s0 + $0x8] sm:$0xff]  ;;  %v32_v1 = vld [vmem:[%s1479_s0 + $0x80] sm:$0xff]  ;;  %v19_v2 = vld [vmem:[%s1479_s0 + $0x18] sm:$0xff]  ;;  %189 = vmatprep.mubr.f32.mxu0 %v1001_v3  ;;  %266 = vmatprep.mubr.f32.mxu1 %v1001_v3 }
   0x2   :  { %v902_v4 = vpack.c.bf16 %v32_v1, %v17_v0  ;;  %v34_v5 = vld [vmem:[%s1479_s0 + $0x90] sm:$0xff]  ;;  %v16_v6 = vld [vmem:[%s1479_s0] sm:$0xff]  ;;  %v31_v7 = vld [vmem:[%s1479_s0 + $0x78] sm:$0xff]  ;;  %1000 = vset.pattern.permute.xlu0 %v1002_v8 }
   0x3   :  { %v914_v9 = vpack.c.bf16 %v34_v5, %v19_v2  ;;  %v904_v10 = vpack.c.bf16 %v31_v7, %v16_v6  ;;  %v18_v11 = vld [vmem:[%s1479_s0 + $0x10] sm:$0xff]  ;;  %v33_v12 = vld [vmem:[%s1479_s0 + $0x88] sm:$0xff]  ;;  %v47_v13 = vld [vmem:[%s1479_s0 + $0xf8] sm:$0xff] }
   0x4   :  { %903 = vmatprep.subr.bf16.mxu0 %v902_v4  ;;  %v916_v14 = vpack.c.bf16 %v33_v12, %v18_v11  ;;  %v62_v15 = vld [vmem:[%s1479_s0 + $0x170] sm:$0xff]  ;;  %v49_v16 = vld [vmem:[%s1479_s0 + $0x108] sm:$0xff]  ;;  %v64_v17 = vld [vmem:[%s1479_s0 + $0x180] sm:$0xff] }
   0x5   :  { %915 = vmatprep.subr.bf16.mxu1 %v914_v9  ;;  %905 = vmatpush1.bf16.msra.mxu0 %v904_v10  ;;  %v906_v18 = vpack.c.bf16 %v62_v15, %v47_v13  ;;  %v918_v19 = vpack.c.bf16 %v64_v17, %v49_v16  ;;  %v46_v20 = vld [vmem:[%s1479_s0 + $0xf0] sm:$0xff]  ;;  %v61_v21 = vld [vmem:[%s1479_s0 + $0x168] sm:$0xff]  ;;  %v48_v22 = vld [vmem:[%s1479_s0 + $0x100] sm:$0xff] }
   0x6   :  { %917 = vmatpush1.bf16.msra.mxu1 %v916_v14  ;;  %v908_v23 = vpack.c.bf16 %v61_v21, %v46_v20  ;;  %v63_v24 = vld [vmem:[%s1479_s0 + $0x178] sm:$0xff]  ;;  %v77_v25 = vld [vmem:[%s1479_s0 + $0x1e8] sm:$0xff]  ;;  %v92_v26 = vld [vmem:[%s1479_s0 + $0x260] sm:$0xff] }
   0x7   :  { %907 = vmatprep.subr.bf16.mxu0 %v906_v18  ;;  %919 = vmatprep.subr.bf16.mxu1 %v918_v19  ;;  %v920_v27 = vpack.c.bf16 %v63_v24, %v48_v22  ;;  %v910_v28 = vpack.c.bf16 %v92_v26, %v77_v25  ;;  %v79_v29 = vld [vmem:[%s1479_s0 + $0x1f8] sm:$0xff]  ;;  %v94_v30 = vld [vmem:[%s1479_s0 + $0x270] sm:$0xff]  ;;  %v76_v31 = vld [vmem:[%s1479_s0 + $0x1e0] sm:$0xff] }
   0x8   :  { %v922_v32 = vpack.c.bf16 %v94_v30, %v79_v29  ;;  %v91_v33 = vld [vmem:[%s1479_s0 + $0x258] sm:$0xff]  ;;  %v78_v34 = vld [vmem:[%s1479_s0 + $0x1f0] sm:$0xff]  ;;  %v93_v35 = vld [vmem:[%s1479_s0 + $0x268] sm:$0xff] }
   0x9   :  { %909 = vmatpush1.bf16.msra.mxu0 %v908_v23  ;;  %v912_v36 = vpack.c.bf16 %v91_v33, %v76_v31  ;;  %v21_v37 = vld [vmem:[%s1479_s0 + $0x28] sm:$0xff]  ;;  %v36_v38 = vld [vmem:[%s1479_s0 + $0xa0] sm:$0xff]  ;;  %v924_v39 = vpack.c.bf16 %v93_v35, %v78_v34  ;;  %v23_v41 = vld [vmem:[%s1479_s0 + $0x38] sm:$0xff] }
   0xa   :  { %921 = vmatpush1.bf16.msra.mxu1 %v920_v27  ;;  %911 = vmatprep.subr.bf16.mxu0 %v910_v28  ;;  %v926_v40 = vpack.c.bf16 %v36_v38, %v21_v37  ;;  %v38_v42 = vld [vmem:[%s1479_s0 + $0xb0] sm:$0xff]  ;;  %v20_v43 = vld [vmem:[%s1479_s0 + $0x20] sm:$0xff]  ;;  %v35_v45 = vld [vmem:[%s1479_s0 + $0x98] sm:$0xff] }
   0xb   :  { %923 = vmatprep.subr.bf16.mxu1 %v922_v32  ;;  %v938_v44 = vpack.c.bf16 %v38_v42, %v23_v41  ;;  %v22_v46 = vld [vmem:[%s1479_s0 + $0x30] sm:$0xff]  ;;  %v37_v47 = vld [vmem:[%s1479_s0 + $0xa8] sm:$0xff]  ;;  %v51_v48 = vld [vmem:[%s1479_s0 + $0x118] sm:$0xff]  ;;  %v928_v52 = vpack.c.bf16 %v35_v45, %v20_v43 }
   0xc   :  { %v66_v49 = vld [vmem:[%s1479_s0 + $0x190] sm:$0xff]  ;;  %v53_v50 = vld [vmem:[%s1479_s0 + $0x128] sm:$0xff]  ;;  %v1133_v51 = vld [vmem:[%s1480_s1] sm:$0xff]  ;;  %v940_v54 = vpack.c.bf16 %v37_v47, %v22_v46 }
   0xd   :  { %913 = vmatpush1.bf16.msra.mxu0 %v912_v36  ;;  %v68_v53 = vld [vmem:[%s1479_s0 + $0x1a0] sm:$0xff]  ;;  %v930_v55 = vpack.c.bf16 %v66_v49, %v51_v48  ;;  %v50_v56 = vld [vmem:[%s1479_s0 + $0x110] sm:$0xff]  ;;  %v65_v57 = vld [vmem:[%s1479_s0 + $0x188] sm:$0xff] }
   0xe   :  { %925 = vmatpush1.bf16.msra.mxu1 %v924_v39  ;;  %927 = vmatprep.subr.bf16.mxu0 %v926_v40  ;;  %v52_v58 = vld [vmem:[%s1479_s0 + $0x120] sm:$0xff]  ;;  %v942_v59 = vpack.c.bf16 %v68_v53, %v53_v50  ;;  %v67_v60 = vld [vmem:[%s1479_s0 + $0x198] sm:$0xff]  ;;  %v81_v61 = vld [vmem:[%s1479_s0 + $0x208] sm:$0xff]  ;;  %v932_v1 = vpack.c.bf16 %v65_v57, %v50_v56 }
   0xf   :  { %939 = vmatprep.subr.bf16.mxu1 %v938_v44  ;;  %v96_v62 = vld [vmem:[%s1479_s0 + $0x280] sm:$0xff]  ;;  %v83_v63 = vld [vmem:[%s1479_s0 + $0x218] sm:$0xff]  ;;  %v98_v0 = vld [vmem:[%s1479_s0 + $0x290] sm:$0xff]  ;;  %v944_v4 = vpack.c.bf16 %v67_v60, %v52_v58 }
  0x10   :  { %863 = vmatmul.mubr.msk.f32.vlgmr.msra.gmra.mrb[0].mxu0 %vm118_vm0, %v1133_v51  ;;  %v1169_v2 = vld [vmem:[%s1480_s1 + $0x8] sm:$0xff]  ;;  %v934_v5 = vpack.c.bf16 %v96_v62, %v81_v61  ;;  %v80_v6 = vld [vmem:[%s1479_s0 + $0x200] sm:$0xff]  ;;  %v95_v7 = vld [vmem:[%s1479_s0 + $0x278] sm:$0xff]  ;;  %v946_v9 = vpack.c.bf16 %v98_v0, %v83_v63 }
  0x11   :  { %865 = vmatmul.mubr.msk.f32.vlgmr.msra.gmra.mrb[0].mxu1 %vm118_vm0, %v1133_v51  ;;  %929 = vmatpush1.bf16.msra.mxu0 %v928_v52  ;;  %v82_v8 = vld [vmem:[%s1479_s0 + $0x210] sm:$0xff]  ;;  %v97_v10 = vld [vmem:[%s1479_s0 + $0x288] sm:$0xff]  ;;  %v40_v12 = vld [vmem:[%s1479_s0 + $0xc0] sm:$0xff]  ;;  %v936_v15 = vpack.c.bf16 %v95_v7, %v80_v6 }
  0x12   :  { %941 = vmatpush1.bf16.msra.mxu1 %v940_v54  ;;  %931 = vmatprep.subr.bf16.mxu0 %v930_v55  ;;  %v25_v11 = vld [vmem:[%s1479_s0 + $0x48] sm:$0xff]  ;;  %v27_v13 = vld [vmem:[%s1479_s0 + $0x58] sm:$0xff]  ;;  %v42_v14 = vld [vmem:[%s1479_s0 + $0xd0] sm:$0xff]  ;;  %v948_v16 = vpack.c.bf16 %v97_v10, %v82_v8 }
  0x13   :  { %943 = vmatprep.subr.bf16.mxu1 %v942_v59  ;;  %195 = vmatprep.mubr.f32.mxu0 %v1001_v3  ;;  %v950_v17 = vpack.c.bf16 %v40_v12, %v25_v11  ;;  %v24_v18 = vld [vmem:[%s1479_s0 + $0x40] sm:$0xff]  ;;  %v39_v19 = vld [vmem:[%s1479_s0 + $0xb8] sm:$0xff]  ;;  %v26_v20 = vld [vmem:[%s1479_s0 + $0x50] sm:$0xff]  ;;  %v962_v21 = vpack.c.bf16 %v42_v14, %v27_v13 }
  0x14   :  { %864 = vmatmul.mubr.msk.f32.gmra.mrb[2].mxu0 %vm118_vm0, %v1169_v2  ;;  %272 = vmatprep.mubr.f32.mxu1 %v1001_v3  ;;  %v41_v22 = vld [vmem:[%s1479_s0 + $0xc8] sm:$0xff]  ;;  %v55_v23 = vld [vmem:[%s1479_s0 + $0x138] sm:$0xff]  ;;  %v70_v24 = vld [vmem:[%s1479_s0 + $0x1b0] sm:$0xff]  ;;  %v952_v27 = vpack.c.bf16 %v39_v19, %v24_v18 }
  0x15   :  { %933 = vmatpush1.bf16.msra.mxu0 %v932_v1  ;;  %866 = vmatmul.mubr.msk.f32.gmra.mrb[2].mxu1 %vm118_vm0, %v1169_v2  ;;  %v57_v25 = vld [vmem:[%s1479_s0 + $0x148] sm:$0xff]  ;;  %v72_v26 = vld [vmem:[%s1479_s0 + $0x1c0] sm:$0xff]  ;;  %v964_v28 = vpack.c.bf16 %v41_v22, %v26_v20  ;;  %v954_v29 = vpack.c.bf16 %v70_v24, %v55_v23  ;;  %v54_v30 = vld [vmem:[%s1479_s0 + $0x130] sm:$0xff] }
  0x16   :  { %945 = vmatpush1.bf16.msra.mxu1 %v944_v4  ;;  %935 = vmatprep.subr.bf16.mxu0 %v934_v5  ;;  %v69_v31 = vld [vmem:[%s1479_s0 + $0x1a8] sm:$0xff]  ;;  %v56_v32 = vld [vmem:[%s1479_s0 + $0x140] sm:$0xff]  ;;  %v966_v33 = vpack.c.bf16 %v72_v26, %v57_v25  ;;  %v71_v34 = vld [vmem:[%s1479_s0 + $0x1b8] sm:$0xff] }
  0x17   :  { %947 = vmatprep.subr.bf16.mxu1 %v946_v9  ;;  %343 = vmatprep.mubr.f32.mxu0 %v1001_v3  ;;  %v85_v35 = vld [vmem:[%s1479_s0 + $0x228] sm:$0xff]  ;;  %v100_v36 = vld [vmem:[%s1479_s0 + $0x2a0] sm:$0xff]  ;;  %v87_v37 = vld [vmem:[%s1479_s0 + $0x238] sm:$0xff]  ;;  %v956_v39 = vpack.c.bf16 %v69_v31, %v54_v30  ;;  %v968_v40 = vpack.c.bf16 %v71_v34, %v56_v32 }
  0x18   :  { %420 = vmatprep.mubr.f32.mxu1 %v1001_v3  ;;  %v102_v38 = vld [vmem:[%s1479_s0 + $0x2b0] sm:$0xff]  ;;  %v958_v41 = vpack.c.bf16 %v100_v36, %v85_v35  ;;  %v84_v42 = vld [vmem:[%s1479_s0 + $0x220] sm:$0xff]  ;;  %v99_v43 = vld [vmem:[%s1479_s0 + $0x298] sm:$0xff] }
  0x19   :  { %937 = vmatpush1.bf16.msra.mxu0 %v936_v15  ;;  %v86_v44 = vld [vmem:[%s1479_s0 + $0x230] sm:$0xff]  ;;  %v970_v45 = vpack.c.bf16 %v102_v38, %v87_v37  ;;  %v101_v46 = vld [vmem:[%s1479_s0 + $0x2a8] sm:$0xff]  ;;  %v44_v48 = vld [vmem:[%s1479_s0 + $0xe0] sm:$0xff]  ;;  %v960_v52 = vpack.c.bf16 %v99_v43, %v84_v42 }
  0x1a   :  { %949 = vmatpush1.bf16.msra.mxu1 %v948_v16  ;;  %951 = vmatprep.subr.bf16.mxu0 %v950_v17  ;;  %v29_v47 = vld [vmem:[%s1479_s0 + $0x68] sm:$0xff]  ;;  %v30_v49 = vld [vmem:[%s1479_s0 + $0x70] sm:$0xff]  ;;  %v106_v53 = vld [vmem:[%s1481_s2] sm:$0xff]  ;;  %v972_v54 = vpack.c.bf16 %v101_v46, %v86_v44 }
  0x1b   :  { %963 = vmatprep.subr.bf16.mxu1 %v962_v21  ;;  %v45_v50 = vld [vmem:[%s1479_s0 + $0xe8] sm:$0xff]  ;;  %v974_v55 = vpack.c.bf16 %v44_v48, %v29_v47  ;;  %v28_v56 = vld [vmem:[%s1479_s0 + $0x60] sm:$0xff]  ;;  %v43_v57 = vld [vmem:[%s1479_s0 + $0xd8] sm:$0xff]  ;;  %110 = vperm.xlu0 %1000, %v106_v53  }
  0x1c   :  { %867 = vmatmul.mubr.msk.f32.vlgmr.msra.gmra.mrb[4].mxu0 %vm118_vm0, %v1133_v51  ;;  %v986_v58 = vpack.c.bf16 %v45_v50, %v30_v49  ;;  %v59_v59 = vld [vmem:[%s1479_s0 + $0x158] sm:$0xff]  ;;  %v74_v60 = vld [vmem:[%s1479_s0 + $0x1d0] sm:$0xff]  ;;  %v60_v61 = vld [vmem:[%s1479_s0 + $0x160] sm:$0xff]  ;;  %v976_v63 = vpack.c.bf16 %v43_v57, %v28_v56 }
  0x1d   :  { %869 = vmatmul.mubr.msk.f32.vlgmr.msra.gmra.mrb[4].mxu1 %vm118_vm0, %v1133_v51  ;;  %953 = vmatpush1.bf16.msra.mxu0 %v952_v27  ;;  %v75_v62 = vld [vmem:[%s1479_s0 + $0x1d8] sm:$0xff]  ;;  %v107_v0 = vld [vmem:[%s1481_s2 + $0x8] sm:$0xff]  ;;  %v58_v1 = vld [vmem:[%s1479_s0 + $0x150] sm:$0xff]  ;;  %v978_v5 = vpack.c.bf16 %v74_v60, %v59_v59 }
  0x1e   :  { %965 = vmatpush1.bf16.msra.mxu1 %v964_v28  ;;  %955 = vmatprep.subr.bf16.mxu0 %v954_v29  ;;  %v73_v4 = vld [vmem:[%s1479_s0 + $0x1c8] sm:$0xff]  ;;  %v990_v6 = vpack.c.bf16 %v75_v62, %v60_v61  ;;  %v104_v8 = vld [vmem:[%s1479_s0 + $0x2c0] sm:$0xff]  ;;  %v90_v9 = vld [vmem:[%s1479_s0 + $0x250] sm:$0xff] }
  0x1f   :  { %967 = vmatprep.subr.bf16.mxu1 %v966_v33  ;;  %349 = vmatprep.mubr.f32.mxu0 %v1001_v3  ;;  %v89_v7 = vld [vmem:[%s1479_s0 + $0x248] sm:$0xff]  ;;  %v980_v11 = vpack.c.bf16 %v73_v4, %v58_v1  ;;  %v88_v13 = vld [vmem:[%s1479_s0 + $0x240] sm:$0xff]  ;;  %v103_v14 = vld [vmem:[%s1479_s0 + $0x2b8] sm:$0xff] }
  0x20   :  { %868 = vmatmul.mubr.msk.f32.gmra.mrb[6].mxu0 %vm118_vm0, %v1169_v2  ;;  %426 = vmatprep.mubr.f32.mxu1 %v1001_v3  ;;  %v105_v10 = vld [vmem:[%s1479_s0 + $0x2c8] sm:$0xff]  ;;  %v982_v12 = vpack.c.bf16 %v104_v8, %v89_v7  ;;  %v984_v16 = vpack.c.bf16 %v103_v14, %v88_v13 }
  0x21   :  { %957 = vmatpush1.bf16.msra.mxu0 %v956_v39  ;;  %870 = vmatmul.mubr.msk.f32.gmra.mrb[6].mxu1 %vm118_vm0, %v1169_v2  ;;  %v994_v15 = vpack.c.bf16 %v105_v10, %v90_v9 }
  0x22   :  { %969 = vmatpush1.bf16.msra.mxu1 %v968_v40  ;;  %959 = vmatprep.subr.bf16.mxu0 %v958_v41 }
  0x23   :  { %971 = vmatprep.subr.bf16.mxu1 %v970_v45  ;;  %497 = vmatprep.mubr.f32.mxu0 %v1001_v3 }
  0x24   :  { %574 = vmatprep.mubr.f32.mxu1 %v1001_v3  ;;  %115 = vperm.xlu0 %1000, %v107_v0  }
  0x25   :  { %961 = vmatpush1.bf16.msra.mxu0 %v960_v52 }
  0x26   :  { %973 = vmatpush1.bf16.msra.mxu1 %v972_v54  ;;  %975 = vmatprep.subr.bf16.mxu0 %v974_v55 }
  0x27   :  { %987 = vmatprep.subr.bf16.mxu1 %v986_v58 }
  0x28   :  { %871 = vmatmul.mubr.msk.f32.vlgmr.msra.gmra.mrb[8].mxu0 %vm118_vm0, %v1133_v51 }
  0x29   :  { %873 = vmatmul.mubr.msk.f32.vlgmr.msra.gmra.mrb[8].mxu1 %vm118_vm0, %v1133_v51  ;;  %977 = vmatpush1.bf16.msra.mxu0 %v976_v63 }
  0x2a   :  { %989 = vmatpush3.bf16.msra.mxu1 %v986_v58  ;;  %503 = vmatprep.mubr.f32.mxu0 %v1001_v3 }
  0x2b   :  { %979 = vmatprep.subr.bf16.mxu0 %v978_v5  ;;  %991 = vmatprep.subr.bf16.mxu1 %v990_v6 }
  0x2c   :  { %872 = vmatmul.mubr.msk.f32.gmra.mrb[10].mxu0 %vm118_vm0, %v1169_v2  ;;  %580 = vmatprep.mubr.f32.mxu1 %v1001_v3 }
  0x2d   :  { %981 = vmatpush1.bf16.msra.mxu0 %v980_v11  ;;  %874 = vmatmul.mubr.msk.f32.gmra.mrb[10].mxu1 %vm118_vm0, %v1169_v2 }
  0x2e   :  { %993 = vmatpush3.bf16.msra.mxu1 %v990_v6  ;;  %983 = vmatprep.subr.bf16.mxu0 %v982_v12 }
  0x2f   :  { %995 = vmatprep.subr.bf16.mxu1 %v994_v15  ;;  %651 = vmatprep.mubr.f32.mxu0 %v1001_v3 }
  0x30   :  { %899 = vmatprep.mubr.msk.f32.mxu1 %vm118_vm0, %v1133_v51 }
  0x31   :  { %985 = vmatpush1.bf16.msra.mxu0 %v984_v16 }
  0x32   :  { %997 = vmatpush3.bf16.msra.mxu1 %v994_v15 }
  0x34   :  { %875 = vmatmul.mubr.msk.f32.vlgmr.msra.gmra.mrb[12].mxu0 %vm118_vm0, %v1133_v51 }
  0x35   :  { %900 = vmatmul.mubr.msk.f32.vlgmr.msra.gmra.mrb[12].mxu1 %vm118_vm0, %v1169_v2  ;;  %657 = vmatprep.mubr.f32.mxu0 %v1001_v3 }
  0x38   :  { %876 = vmatmul.mubr.msk.f32.gmra.mrb[14].mxu0 %vm118_vm0, %v1169_v2 }
  0x9a   :  { %v1355_v17 = vpop.permute.xlu0 %110 }
  0xa3   :  { %v1361_v3 = vpop.permute.xlu0 %115 }
  0xe3   :  { %v191_v18 = vpop.f32.mrb[0].mxu0 }
  0xe4   :  { %v192_v19 = vadd.f32 %v191_v18, %v1355_v17  ;;  %v193_v20 = vpop.f32.mrb[1].mxu0  ;;  %v268_v21 = vpop.f32.mrb[0].mxu1 }
  0xe5   :  { %v194_v22 = vadd.f32 %v193_v20, %v1355_v17  ;;  %v269_v23 = vadd.f32 %v268_v21, %v1355_v17  ;;  %v270_v51 = vpop.f32.mrb[1].mxu1 }
  0xe6   :  { %vm739_vm1 = vcmp.gt.f32.partialorder %v192_v19, 0.0  ;;  %v769_v24 = vmul.f32 0.01, %v192_v19  ;;  %v271_v25 = vadd.f32 %v270_v51, %v1355_v17 }
  0xe7   :  { %vm740_vm2 = vcmp.gt.f32.partialorder %v194_v22, 0.0  ;;  %v770_v2 = vmul.f32 0.01, %v194_v22  ;;  %vm741_vm3 = vcmp.gt.f32.partialorder %v269_v23, 0.0  ;;  %v771_v26 = vmul.f32 0.01, %v269_v23 }
  0xe8   :  { %v799_v27 = vsel %vm739_vm1, %v192_v19, %v769_v24  ;;  %vm742_vm4 = vcmp.gt.f32.partialorder %v271_v25, 0.0  ;;  %v772_v28 = vmul.f32 0.01, %v271_v25  ;;  %v197_v29 = vpop.f32.mrb[2].mxu0  ;;  %v274_v30 = vpop.f32.mrb[2].mxu1 }
  0xe9   :  { %829 = vst [vmem:[%s1482_s3] sm:$0xff] %v799_v27  ;;  %v800_v31 = vsel %vm740_vm2, %v194_v22, %v770_v2  ;;  %v801_v32 = vsel %vm741_vm3, %v269_v23, %v771_v26  ;;  %v198_v33 = vadd.f32 %v197_v29, %v1361_v3  ;;  %v199_v34 = vpop.f32.mrb[3].mxu0  ;;  %v275_v35 = vadd.f32 %v274_v30, %v1361_v3  ;;  %v276_v36 = vpop.f32.mrb[3].mxu1 }
  0xea   :  { %830 = vst [vmem:[%s1482_s3 + $0x8] sm:$0xff] %v800_v31  ;;  %831 = vst [vmem:[%s1482_s3 + $0x10] sm:$0xff] %v801_v32  ;;  %v802_v37 = vsel %vm742_vm4, %v271_v25, %v772_v28  ;;  %v200_v38 = vadd.f32 %v199_v34, %v1361_v3  ;;  %v277_v39 = vadd.f32 %v276_v36, %v1361_v3 }
  0xeb   :  { %832 = vst [vmem:[%s1482_s3 + $0x18] sm:$0xff] %v802_v37  ;;  %vm754_vm5 = vcmp.gt.f32.partialorder %v198_v33, 0.0  ;;  %v784_v40 = vmul.f32 0.01, %v198_v33  ;;  %vm756_vm6 = vcmp.gt.f32.partialorder %v275_v35, 0.0 }
  0xec   :  { %v786_v41 = vmul.f32 0.01, %v275_v35  ;;  %vm755_vm7 = vcmp.gt.f32.partialorder %v200_v38, 0.0  ;;  %v785_v42 = vmul.f32 0.01, %v200_v38  ;;  %vm757_vm8 = vcmp.gt.f32.partialorder %v277_v39, 0.0 }
  0xed   :  { %v787_v43 = vmul.f32 0.01, %v277_v39  ;;  %v814_v44 = vsel %vm754_vm5, %v198_v33, %v784_v40 }
  0xee   :  { %v816_v45 = vsel %vm756_vm6, %v275_v35, %v786_v41  ;;  %844 = vst [vmem:[%s1482_s3 + $0x78] sm:$0xff] %v814_v44  ;;  %v815_v46 = vsel %vm755_vm7, %v200_v38, %v785_v42 }
  0xef   :  { %846 = vst [vmem:[%s1482_s3 + $0x88] sm:$0xff] %v816_v45  ;;  %v817_v47 = vsel %vm757_vm8, %v277_v39, %v787_v43  ;;  %845 = vst [vmem:[%s1482_s3 + $0x80] sm:$0xff] %v815_v46  ;;  %v345_v48 = vpop.f32.mrb[4].mxu0 }
  0xf0   :  { %847 = vst [vmem:[%s1482_s3 + $0x90] sm:$0xff] %v817_v47  ;;  %v346_v49 = vadd.f32 %v345_v48, %v1355_v17  ;;  %v347_v50 = vpop.f32.mrb[5].mxu0  ;;  %v422_v52 = vpop.f32.mrb[4].mxu1 }
  0xf1   :  { %v348_v53 = vadd.f32 %v347_v50, %v1355_v17  ;;  %v423_v54 = vadd.f32 %v422_v52, %v1355_v17  ;;  %v424_v55 = vpop.f32.mrb[5].mxu1 }
  0xf2   :  { %vm743_vm9 = vcmp.gt.f32.partialorder %v346_v49, 0.0  ;;  %v773_v56 = vmul.f32 0.01, %v346_v49  ;;  %v425_v57 = vadd.f32 %v424_v55, %v1355_v17 }
  0xf3   :  { %vm744_vm10 = vcmp.gt.f32.partialorder %v348_v53, 0.0  ;;  %v774_v58 = vmul.f32 0.01, %v348_v53  ;;  %vm745_vm11 = vcmp.gt.f32.partialorder %v423_v54, 0.0  ;;  %v775_v59 = vmul.f32 0.01, %v423_v54 }
  0xf4   :  { %v803_v60 = vsel %vm743_vm9, %v346_v49, %v773_v56  ;;  %vm746_vm12 = vcmp.gt.f32.partialorder %v425_v57, 0.0  ;;  %v776_v61 = vmul.f32 0.01, %v425_v57  ;;  %v351_v62 = vpop.f32.mrb[6].mxu0  ;;  %v428_v63 = vpop.f32.mrb[6].mxu1 }
  0xf5   :  { %833 = vst [vmem:[%s1482_s3 + $0x20] sm:$0xff] %v803_v60  ;;  %v804_v0 = vsel %vm744_vm10, %v348_v53, %v774_v58  ;;  %v805_v1 = vsel %vm745_vm11, %v423_v54, %v775_v59  ;;  %v352_v4 = vadd.f32 %v351_v62, %v1361_v3  ;;  %v353_v5 = vpop.f32.mrb[7].mxu0  ;;  %v429_v6 = vadd.f32 %v428_v63, %v1361_v3  ;;  %v430_v7 = vpop.f32.mrb[7].mxu1 }
  0xf6   :  { %834 = vst [vmem:[%s1482_s3 + $0x28] sm:$0xff] %v804_v0  ;;  %835 = vst [vmem:[%s1482_s3 + $0x30] sm:$0xff] %v805_v1  ;;  %v806_v8 = vsel %vm746_vm12, %v425_v57, %v776_v61  ;;  %v354_v9 = vadd.f32 %v353_v5, %v1361_v3  ;;  %v431_v10 = vadd.f32 %v430_v7, %v1361_v3 }
  0xf7   :  { %836 = vst [vmem:[%s1482_s3 + $0x38] sm:$0xff] %v806_v8  ;;  %vm758_vm13 = vcmp.gt.f32.partialorder %v352_v4, 0.0  ;;  %v788_v11 = vmul.f32 0.01, %v352_v4  ;;  %vm760_vm14 = vcmp.gt.f32.partialorder %v429_v6, 0.0 }
  0xf8   :  { %v790_v12 = vmul.f32 0.01, %v429_v6  ;;  %vm759_vm15 = vcmp.gt.f32.partialorder %v354_v9, 0.0  ;;  %v789_v13 = vmul.f32 0.01, %v354_v9  ;;  %vm761_vm0 = vcmp.gt.f32.partialorder %v431_v10, 0.0 }
  0xf9   :  { %v791_v14 = vmul.f32 0.01, %v431_v10  ;;  %v818_v15 = vsel %vm758_vm13, %v352_v4, %v788_v11 }
  0xfa   :  { %v820_v16 = vsel %vm760_vm14, %v429_v6, %v790_v12  ;;  %848 = vst [vmem:[%s1482_s3 + $0x98] sm:$0xff] %v818_v15  ;;  %v819_v18 = vsel %vm759_vm15, %v354_v9, %v789_v13 }
  0xfb   :  { %850 = vst [vmem:[%s1482_s3 + $0xa8] sm:$0xff] %v820_v16  ;;  %v821_v19 = vsel %vm761_vm0, %v431_v10, %v791_v14  ;;  %849 = vst [vmem:[%s1482_s3 + $0xa0] sm:$0xff] %v819_v18  ;;  %v499_v20 = vpop.f32.mrb[8].mxu0 }
  0xfc   :  { %851 = vst [vmem:[%s1482_s3 + $0xb0] sm:$0xff] %v821_v19  ;;  %v500_v21 = vadd.f32 %v499_v20, %v1355_v17  ;;  %v501_v22 = vpop.f32.mrb[9].mxu0  ;;  %v576_v23 = vpop.f32.mrb[8].mxu1 }
  0xfd   :  { %v502_v51 = vadd.f32 %v501_v22, %v1355_v17  ;;  %v577_v24 = vadd.f32 %v576_v23, %v1355_v17  ;;  %v578_v25 = vpop.f32.mrb[9].mxu1 }
  0xfe   :  { %vm747_vm1 = vcmp.gt.f32.partialorder %v500_v21, 0.0  ;;  %v777_v2 = vmul.f32 0.01, %v500_v21  ;;  %v579_v26 = vadd.f32 %v578_v25, %v1355_v17 }
  0xff   :  { %vm748_vm2 = vcmp.gt.f32.partialorder %v502_v51, 0.0  ;;  %v778_v27 = vmul.f32 0.01, %v502_v51  ;;  %vm749_vm3 = vcmp.gt.f32.partialorder %v577_v24, 0.0  ;;  %v779_v28 = vmul.f32 0.01, %v577_v24 }
 0x100   :  { %v807_v29 = vsel %vm747_vm1, %v500_v21, %v777_v2  ;;  %vm750_vm4 = vcmp.gt.f32.partialorder %v579_v26, 0.0  ;;  %v780_v30 = vmul.f32 0.01, %v579_v26  ;;  %v505_v31 = vpop.f32.mrb[10].mxu0  ;;  %v582_v32 = vpop.f32.mrb[10].mxu1 }
 0x101   :  { %837 = vst [vmem:[%s1482_s3 + $0x40] sm:$0xff] %v807_v29  ;;  %v808_v33 = vsel %vm748_vm2, %v502_v51, %v778_v27  ;;  %v809_v34 = vsel %vm749_vm3, %v577_v24, %v779_v28  ;;  %v506_v35 = vadd.f32 %v505_v31, %v1361_v3  ;;  %v507_v36 = vpop.f32.mrb[11].mxu0  ;;  %v583_v37 = vadd.f32 %v582_v32, %v1361_v3  ;;  %v584_v38 = vpop.f32.mrb[11].mxu1 }
 0x102   :  { %838 = vst [vmem:[%s1482_s3 + $0x48] sm:$0xff] %v808_v33  ;;  %839 = vst [vmem:[%s1482_s3 + $0x50] sm:$0xff] %v809_v34  ;;  %v810_v39 = vsel %vm750_vm4, %v579_v26, %v780_v30  ;;  %v508_v40 = vadd.f32 %v507_v36, %v1361_v3  ;;  %v585_v41 = vadd.f32 %v584_v38, %v1361_v3 }
 0x103   :  { %840 = vst [vmem:[%s1482_s3 + $0x58] sm:$0xff] %v810_v39  ;;  %vm762_vm5 = vcmp.gt.f32.partialorder %v506_v35, 0.0  ;;  %v792_v42 = vmul.f32 0.01, %v506_v35  ;;  %vm764_vm6 = vcmp.gt.f32.partialorder %v583_v37, 0.0 }
 0x104   :  { %v794_v43 = vmul.f32 0.01, %v583_v37  ;;  %vm763_vm7 = vcmp.gt.f32.partialorder %v508_v40, 0.0  ;;  %v793_v44 = vmul.f32 0.01, %v508_v40  ;;  %vm765_vm8 = vcmp.gt.f32.partialorder %v585_v41, 0.0 }
 0x105   :  { %v795_v45 = vmul.f32 0.01, %v585_v41  ;;  %v822_v46 = vsel %vm762_vm5, %v506_v35, %v792_v42 }
 0x106   :  { %v824_v47 = vsel %vm764_vm6, %v583_v37, %v794_v43  ;;  %852 = vst [vmem:[%s1482_s3 + $0xb8] sm:$0xff] %v822_v46  ;;  %v823_v48 = vsel %vm763_vm7, %v508_v40, %v793_v44 }
 0x107   :  { %854 = vst [vmem:[%s1482_s3 + $0xc8] sm:$0xff] %v824_v47  ;;  %v825_v49 = vsel %vm765_vm8, %v585_v41, %v795_v45  ;;  %853 = vst [vmem:[%s1482_s3 + $0xc0] sm:$0xff] %v823_v48  ;;  %v653_v50 = vpop.f32.mrb[12].mxu0 }
 0x108   :  { %855 = vst [vmem:[%s1482_s3 + $0xd0] sm:$0xff] %v825_v49  ;;  %v654_v52 = vadd.f32 %v653_v50, %v1355_v17  ;;  %v901_v53 = vpop.f32.mrb[12].mxu1  ;;  %v655_v54 = vpop.f32.mrb[13].mxu0 }
 0x109   :  { %v736_v55 = vadd.f32 %v901_v53, %v1361_v3  ;;  %v656_v56 = vadd.f32 %v655_v54, %v1355_v17  ;;  %v730_v57 = vpop.f32.mrb[13].mxu1 }
 0x10a   :  { %vm751_vm9 = vcmp.gt.f32.partialorder %v654_v52, 0.0  ;;  %v781_v58 = vmul.f32 0.01, %v654_v52  ;;  %v731_v59 = vadd.f32 %v730_v57, %v1355_v17 }
 0x10b   :  { %vm768_vm10 = vcmp.gt.f32.partialorder %v736_v55, 0.0  ;;  %v798_v60 = vmul.f32 0.01, %v736_v55  ;;  %vm752_vm11 = vcmp.gt.f32.partialorder %v656_v56, 0.0  ;;  %v782_v61 = vmul.f32 0.01, %v656_v56 }
 0x10c   :  { %v811_v62 = vsel %vm751_vm9, %v654_v52, %v781_v58  ;;  %vm753_vm12 = vcmp.gt.f32.partialorder %v731_v59, 0.0  ;;  %v783_v63 = vmul.f32 0.01, %v731_v59  ;;  %v659_v0 = vpop.f32.mrb[14].mxu0 }
 0x10d   :  { %841 = vst [vmem:[%s1482_s3 + $0x60] sm:$0xff] %v811_v62  ;;  %v828_v1 = vsel %vm768_vm10, %v736_v55, %v798_v60  ;;  %v812_v4 = vsel %vm752_vm11, %v656_v56, %v782_v61  ;;  %v660_v5 = vadd.f32 %v659_v0, %v1361_v3  ;;  %v661_v6 = vpop.f32.mrb[15].mxu0 }
 0x10e   :  { %858 = vst [vmem:[%s1482_s3 + $0xe8] sm:$0xff] %v828_v1  ;;  %842 = vst [vmem:[%s1482_s3 + $0x68] sm:$0xff] %v812_v4  ;;  %v813_v17 = vsel %vm753_vm12, %v731_v59, %v783_v63  ;;  %v662_v7 = vadd.f32 %v661_v6, %v1361_v3 }
 0x10f   :  { %843 = vst [vmem:[%s1482_s3 + $0x70] sm:$0xff] %v813_v17  ;;  %vm766_vm13 = vcmp.gt.f32.partialorder %v660_v5, 0.0  ;;  %v796_v8 = vmul.f32 0.01, %v660_v5 }
 0x110   :  { %vm767_vm14 = vcmp.gt.f32.partialorder %v662_v7, 0.0  ;;  %v797_v9 = vmul.f32 0.01, %v662_v7 }
 0x111   :  { %v826_v10 = vsel %vm766_vm13, %v660_v5, %v796_v8 }
 0x112   :  { %856 = vst [vmem:[%s1482_s3 + $0xd8] sm:$0xff] %v826_v10  ;;  %v827_v11 = vsel %vm767_vm14, %v662_v7, %v797_v9 }
 0x113   :  { %857 = vst [vmem:[%s1482_s3 + $0xe0] sm:$0xff] %v827_v11 }

// kernel: _lambda_.16
= control target key start
LH: loop header
LB: loop body
LE: loop exit
PB: predicated region body
PF: predicated region fallthrough
CT: control target
= control target key end

     0   :  { %v775_v3 = vmov 0.0   ;;  %v776_v8 = vmov 0   ;;  %vm58_vm0 = vcmask 130048   ;;  %s1063_s0 = inlined_call_operand.vmem [shape: f32[16,1920], index: 0, kind: input, shape index: {}]   ;;  %s1064_s1 = inlined_call_operand.vmem [shape: f32[16,16], index: 1, kind: input, shape index: {}]   ;;  %s1065_s2 = inlined_call_operand.vmem [shape: f32[16,1], index: 2, kind: input, shape index: {}]   ;;  %s1066_s3 = inlined_call_operand.vmem [shape: f32[16,1920], index: 3, kind: output, shape index: {}]  }
   0x1   :  { %v17_v0 = vld [vmem:[%s1063_s0 + $0x8] sm:$0xff]  ;;  %v32_v1 = vld [vmem:[%s1063_s0 + $0x80] sm:$0xff]  ;;  %129 = vmatprep.mubr.f32.mxu0 %v775_v3  ;;  %206 = vmatprep.mubr.f32.mxu1 %v775_v3  ;;  %v31_v5 = vld [vmem:[%s1063_s0 + $0x78] sm:$0xff] }
   0x2   :  { %v16_v2 = vld [vmem:[%s1063_s0] sm:$0xff]  ;;  %v740_v4 = vpack.c.bf16 %v32_v1, %v17_v0  ;;  %v19_v6 = vld [vmem:[%s1063_s0 + $0x18] sm:$0xff]  ;;  %v34_v7 = vld [vmem:[%s1063_s0 + $0x90] sm:$0xff]  ;;  %774 = vset.pattern.permute.xlu0 %v776_v8 }
   0x3   :  { %v742_v9 = vpack.c.bf16 %v31_v5, %v16_v2  ;;  %v744_v10 = vpack.c.bf16 %v34_v7, %v19_v6  ;;  %v18_v11 = vld [vmem:[%s1063_s0 + $0x10] sm:$0xff]  ;;  %v33_v12 = vld [vmem:[%s1063_s0 + $0x88] sm:$0xff]  ;;  %v36_v15 = vld [vmem:[%s1063_s0 + $0xa0] sm:$0xff] }
   0x4   :  { %741 = vmatprep.subr.bf16.mxu0 %v740_v4  ;;  %v746_v13 = vpack.c.bf16 %v33_v12, %v18_v11  ;;  %v21_v14 = vld [vmem:[%s1063_s0 + $0x28] sm:$0xff]  ;;  %v20_v16 = vld [vmem:[%s1063_s0 + $0x20] sm:$0xff]  ;;  %v35_v19 = vld [vmem:[%s1063_s0 + $0x98] sm:$0xff] }
   0x5   :  { %743 = vmatpush1.bf16.msra.mxu0 %v742_v9  ;;  %745 = vmatprep.subr.bf16.mxu1 %v744_v10  ;;  %v835_v17 = vld [vmem:[%s1064_s1] sm:$0xff]  ;;  %v748_v18 = vpack.c.bf16 %v36_v15, %v21_v14  ;;  %v23_v20 = vld [vmem:[%s1063_s0 + $0x38] sm:$0xff]  ;;  %v750_v21 = vpack.c.bf16 %v35_v19, %v20_v16  ;;  %v38_v22 = vld [vmem:[%s1063_s0 + $0xb0] sm:$0xff] }
   0x6   :  { %747 = vmatpush1.bf16.msra.mxu1 %v746_v13  ;;  %v22_v23 = vld [vmem:[%s1063_s0 + $0x30] sm:$0xff]  ;;  %v37_v24 = vld [vmem:[%s1063_s0 + $0xa8] sm:$0xff]  ;;  %v752_v25 = vpack.c.bf16 %v38_v22, %v23_v20  ;;  %v40_v27 = vld [vmem:[%s1063_s0 + $0xc0] sm:$0xff] }
   0x7   :  { %749 = vmatprep.subr.bf16.mxu0 %v748_v18  ;;  %v25_v26 = vld [vmem:[%s1063_s0 + $0x48] sm:$0xff]  ;;  %v754_v28 = vpack.c.bf16 %v37_v24, %v22_v23  ;;  %v27_v30 = vld [vmem:[%s1063_s0 + $0x58] sm:$0xff]  ;;  %v42_v31 = vld [vmem:[%s1063_s0 + $0xd0] sm:$0xff] }
   0x8   :  { %713 = vmatmul.mubr.msk.f32.vlgmr.msra.gmra.mrb[0].mxu0 %vm58_vm0, %v835_v17  ;;  %v756_v29 = vpack.c.bf16 %v40_v27, %v25_v26  ;;  %v15_v32 = vld [vmem:[%s1064_s1 + $0x8] sm:$0xff]  ;;  %v24_v33 = vld [vmem:[%s1063_s0 + $0x40] sm:$0xff]  ;;  %v39_v34 = vld [vmem:[%s1063_s0 + $0xb8] sm:$0xff]  ;;  %v760_v35 = vpack.c.bf16 %v42_v31, %v27_v30  ;;  %753 = vmatprep.subr.bf16.mxu1 %v752_v25 }
   0x9   :  { %715 = vmatmul.mubr.msk.f32.vlgmr.msra.gmra.mrb[0].mxu1 %vm58_vm0, %v835_v17  ;;  %751 = vmatpush1.bf16.msra.mxu0 %v750_v21  ;;  %v26_v36 = vld [vmem:[%s1063_s0 + $0x50] sm:$0xff]  ;;  %v41_v37 = vld [vmem:[%s1063_s0 + $0xc8] sm:$0xff]  ;;  %v44_v39 = vld [vmem:[%s1063_s0 + $0xe0] sm:$0xff]  ;;  %v758_v41 = vpack.c.bf16 %v39_v34, %v24_v33 }
   0xa   :  { %135 = vmatprep.mubr.f32.mxu0 %v775_v3  ;;  %212 = vmatprep.mubr.f32.mxu1 %v775_v3  ;;  %v29_v38 = vld [vmem:[%s1063_s0 + $0x68] sm:$0xff]  ;;  %v46_v40 = vld [vmem:[%s1065_s2] sm:$0xff]  ;;  %v30_v42 = vld [vmem:[%s1063_s0 + $0x70] sm:$0xff]  ;;  %v762_v44 = vpack.c.bf16 %v41_v37, %v26_v36 }
   0xb   :  { %757 = vmatprep.subr.bf16.mxu0 %v756_v29  ;;  %755 = vmatpush1.bf16.msra.mxu1 %v754_v28  ;;  %v45_v43 = vld [vmem:[%s1063_s0 + $0xe8] sm:$0xff]  ;;  %v764_v45 = vpack.c.bf16 %v44_v39, %v29_v38  ;;  %v28_v47 = vld [vmem:[%s1063_s0 + $0x60] sm:$0xff]  ;;  %v43_v48 = vld [vmem:[%s1063_s0 + $0xd8] sm:$0xff] }
   0xc   :  { %714 = vmatmul.mubr.msk.f32.gmra.mrb[2].mxu0 %vm58_vm0, %v15_v32  ;;  %761 = vmatprep.subr.bf16.mxu1 %v760_v35  ;;  %v768_v46 = vpack.c.bf16 %v45_v43, %v30_v42  ;;  %v47_v49 = vld [vmem:[%s1065_s2 + $0x8] sm:$0xff]  ;;  %v766_v50 = vpack.c.bf16 %v43_v48, %v28_v47 }
   0xd   :  { %716 = vmatmul.mubr.msk.f32.gmra.mrb[2].mxu1 %vm58_vm0, %v15_v32  ;;  %283 = vmatprep.mubr.f32.mxu0 %v775_v3 }
   0xe   :  { %360 = vmatprep.mubr.f32.mxu1 %v775_v3  ;;  %50 = vperm.xlu0 %774, %v46_v40  }
  0x10   :  { %717 = vmatmul.mubr.msk.f32.vlgmr.msra.gmra.mrb[4].mxu0 %vm58_vm0, %v835_v17 }
  0x11   :  { %719 = vmatmul.mubr.msk.f32.vlgmr.msra.gmra.mrb[4].mxu1 %vm58_vm0, %v835_v17  ;;  %759 = vmatpush1.bf16.msra.mxu0 %v758_v41 }
  0x12   :  { %289 = vmatprep.mubr.f32.mxu0 %v775_v3  ;;  %366 = vmatprep.mubr.f32.mxu1 %v775_v3 }
  0x13   :  { %763 = vmatpush1.bf16.msra.mxu1 %v762_v44  ;;  %765 = vmatprep.subr.bf16.mxu0 %v764_v45 }
  0x14   :  { %718 = vmatmul.mubr.msk.f32.gmra.mrb[6].mxu0 %vm58_vm0, %v15_v32  ;;  %769 = vmatprep.subr.bf16.mxu1 %v768_v46 }
  0x15   :  { %720 = vmatmul.mubr.msk.f32.gmra.mrb[6].mxu1 %vm58_vm0, %v15_v32  ;;  %437 = vmatprep.mubr.f32.mxu0 %v775_v3 }
  0x16   :  { %514 = vmatprep.mubr.f32.mxu1 %v775_v3  ;;  %55 = vperm.xlu0 %774, %v47_v49  }
  0x18   :  { %721 = vmatmul.mubr.msk.f32.vlgmr.msra.gmra.mrb[8].mxu0 %vm58_vm0, %v835_v17 }
  0x19   :  { %723 = vmatmul.mubr.msk.f32.vlgmr.msra.gmra.mrb[8].mxu1 %vm58_vm0, %v835_v17  ;;  %767 = vmatpush1.bf16.msra.mxu0 %v766_v50 }
  0x1a   :  { %443 = vmatprep.mubr.f32.mxu0 %v775_v3  ;;  %520 = vmatprep.mubr.f32.mxu1 %v775_v3 }
  0x1b   :  { %771 = vmatpush3.bf16.msra.mxu1 %v768_v46 }
  0x1c   :  { %722 = vmatmul.mubr.msk.f32.gmra.mrb[10].mxu0 %vm58_vm0, %v15_v32 }
  0x1d   :  { %724 = vmatmul.mubr.msk.f32.gmra.mrb[10].mxu1 %vm58_vm0, %v15_v32  ;;  %591 = vmatprep.mubr.f32.mxu0 %v775_v3 }
  0x1e   :  { %737 = vmatprep.mubr.msk.f32.mxu1 %vm58_vm0, %v835_v17 }
  0x20   :  { %725 = vmatmul.mubr.msk.f32.vlgmr.msra.gmra.mrb[12].mxu0 %vm58_vm0, %v835_v17 }
  0x21   :  { %738 = vmatmul.mubr.msk.f32.vlgmr.msra.gmra.mrb[12].mxu1 %vm58_vm0, %v15_v32  ;;  %597 = vmatprep.mubr.f32.mxu0 %v775_v3 }
  0x24   :  { %726 = vmatmul.mubr.msk.f32.gmra.mrb[14].mxu0 %vm58_vm0, %v15_v32 }
  0x8d   :  { %v939_v51 = vpop.permute.xlu0 %50 }
  0x95   :  { %v944_v58 = vpop.permute.xlu0 %55 }
  0xdb   :  { %v131_v52 = vpop.f32.mrb[0].mxu0 }
  0xdc   :  { %v132_v53 = vadd.f32 %v131_v52, %v939_v51  ;;  %v133_v54 = vpop.f32.mrb[1].mxu0  ;;  %v208_v55 = vpop.f32.mrb[0].mxu1 }
  0xdd   :  { %v134_v56 = vadd.f32 %v133_v54, %v939_v51  ;;  %v209_v57 = vadd.f32 %v208_v55, %v939_v51  ;;  %v210_v59 = vpop.f32.mrb[1].mxu1 }
  0xde   :  { %679 = vst [vmem:[%s1066_s3] sm:$0xff] %v132_v53  ;;  %v211_v60 = vadd.f32 %v210_v59, %v939_v51 }
  0xdf   :  { %680 = vst [vmem:[%s1066_s3 + $0x8] sm:$0xff] %v134_v56  ;;  %v137_v61 = vpop.f32.mrb[2].mxu0  ;;  %681 = vst [vmem:[%s1066_s3 + $0x10] sm:$0xff] %v209_v57 }
  0xe0   :  { %v138_v62 = vadd.f32 %v137_v61, %v944_v58  ;;  %v139_v63 = vpop.f32.mrb[3].mxu0  ;;  %682 = vst [vmem:[%s1066_s3 + $0x18] sm:$0xff] %v211_v60  ;;  %v214_v0 = vpop.f32.mrb[2].mxu1 }
  0xe1   :  { %v140_v1 = vadd.f32 %v139_v63, %v944_v58  ;;  %v215_v2 = vadd.f32 %v214_v0, %v944_v58  ;;  %v216_v3 = vpop.f32.mrb[3].mxu1 }
  0xe2   :  { %694 = vst [vmem:[%s1066_s3 + $0x78] sm:$0xff] %v138_v62  ;;  %v217_v4 = vadd.f32 %v216_v3, %v944_v58 }
  0xe3   :  { %695 = vst [vmem:[%s1066_s3 + $0x80] sm:$0xff] %v140_v1  ;;  %696 = vst [vmem:[%s1066_s3 + $0x88] sm:$0xff] %v215_v2  ;;  %v285_v5 = vpop.f32.mrb[4].mxu0 }
  0xe4   :  { %v286_v6 = vadd.f32 %v285_v5, %v939_v51  ;;  %697 = vst [vmem:[%s1066_s3 + $0x90] sm:$0xff] %v217_v4  ;;  %v287_v7 = vpop.f32.mrb[5].mxu0  ;;  %v362_v8 = vpop.f32.mrb[4].mxu1 }
  0xe5   :  { %v288_v9 = vadd.f32 %v287_v7, %v939_v51  ;;  %v363_v10 = vadd.f32 %v362_v8, %v939_v51  ;;  %v364_v11 = vpop.f32.mrb[5].mxu1 }
  0xe6   :  { %683 = vst [vmem:[%s1066_s3 + $0x20] sm:$0xff] %v286_v6  ;;  %v365_v12 = vadd.f32 %v364_v11, %v939_v51 }
  0xe7   :  { %684 = vst [vmem:[%s1066_s3 + $0x28] sm:$0xff] %v288_v9  ;;  %v291_v13 = vpop.f32.mrb[6].mxu0  ;;  %685 = vst [vmem:[%s1066_s3 + $0x30] sm:$0xff] %v363_v10 }
  0xe8   :  { %v292_v14 = vadd.f32 %v291_v13, %v944_v58  ;;  %v293_v15 = vpop.f32.mrb[7].mxu0  ;;  %686 = vst [vmem:[%s1066_s3 + $0x38] sm:$0xff] %v365_v12  ;;  %v368_v16 = vpop.f32.mrb[6].mxu1 }
  0xe9   :  { %v294_v17 = vadd.f32 %v293_v15, %v944_v58  ;;  %v369_v18 = vadd.f32 %v368_v16, %v944_v58  ;;  %v370_v19 = vpop.f32.mrb[7].mxu1 }
  0xea   :  { %698 = vst [vmem:[%s1066_s3 + $0x98] sm:$0xff] %v292_v14  ;;  %v371_v20 = vadd.f32 %v370_v19, %v944_v58 }
  0xeb   :  { %699 = vst [vmem:[%s1066_s3 + $0xa0] sm:$0xff] %v294_v17  ;;  %700 = vst [vmem:[%s1066_s3 + $0xa8] sm:$0xff] %v369_v18  ;;  %v439_v21 = vpop.f32.mrb[8].mxu0 }
  0xec   :  { %v440_v22 = vadd.f32 %v439_v21, %v939_v51  ;;  %701 = vst [vmem:[%s1066_s3 + $0xb0] sm:$0xff] %v371_v20  ;;  %v441_v23 = vpop.f32.mrb[9].mxu0  ;;  %v516_v24 = vpop.f32.mrb[8].mxu1 }
  0xed   :  { %v442_v25 = vadd.f32 %v441_v23, %v939_v51  ;;  %v517_v26 = vadd.f32 %v516_v24, %v939_v51  ;;  %v518_v27 = vpop.f32.mrb[9].mxu1 }
  0xee   :  { %687 = vst [vmem:[%s1066_s3 + $0x40] sm:$0xff] %v440_v22  ;;  %v519_v28 = vadd.f32 %v518_v27, %v939_v51 }
  0xef   :  { %688 = vst [vmem:[%s1066_s3 + $0x48] sm:$0xff] %v442_v25  ;;  %v445_v29 = vpop.f32.mrb[10].mxu0  ;;  %689 = vst [vmem:[%s1066_s3 + $0x50] sm:$0xff] %v517_v26 }
  0xf0   :  { %v446_v30 = vadd.f32 %v445_v29, %v944_v58  ;;  %v447_v31 = vpop.f32.mrb[11].mxu0  ;;  %690 = vst [vmem:[%s1066_s3 + $0x58] sm:$0xff] %v519_v28  ;;  %v522_v32 = vpop.f32.mrb[10].mxu1 }
  0xf1   :  { %v448_v33 = vadd.f32 %v447_v31, %v944_v58  ;;  %v523_v34 = vadd.f32 %v522_v32, %v944_v58  ;;  %v524_v35 = vpop.f32.mrb[11].mxu1 }
  0xf2   :  { %702 = vst [vmem:[%s1066_s3 + $0xb8] sm:$0xff] %v446_v30  ;;  %v525_v36 = vadd.f32 %v524_v35, %v944_v58 }
  0xf3   :  { %703 = vst [vmem:[%s1066_s3 + $0xc0] sm:$0xff] %v448_v33  ;;  %704 = vst [vmem:[%s1066_s3 + $0xc8] sm:$0xff] %v523_v34  ;;  %v593_v37 = vpop.f32.mrb[12].mxu0 }
  0xf4   :  { %705 = vst [vmem:[%s1066_s3 + $0xd0] sm:$0xff] %v525_v36  ;;  %v594_v38 = vadd.f32 %v593_v37, %v939_v51  ;;  %v595_v39 = vpop.f32.mrb[13].mxu0  ;;  %v739_v40 = vpop.f32.mrb[12].mxu1 }
  0xf5   :  { %v596_v41 = vadd.f32 %v595_v39, %v939_v51  ;;  %v676_v42 = vadd.f32 %v739_v40, %v944_v58  ;;  %v670_v43 = vpop.f32.mrb[13].mxu1 }
  0xf6   :  { %691 = vst [vmem:[%s1066_s3 + $0x60] sm:$0xff] %v594_v38  ;;  %v671_v44 = vadd.f32 %v670_v43, %v939_v51 }
  0xf7   :  { %692 = vst [vmem:[%s1066_s3 + $0x68] sm:$0xff] %v596_v41  ;;  %708 = vst [vmem:[%s1066_s3 + $0xe8] sm:$0xff] %v676_v42  ;;  %v599_v45 = vpop.f32.mrb[14].mxu0 }
  0xf8   :  { %693 = vst [vmem:[%s1066_s3 + $0x70] sm:$0xff] %v671_v44  ;;  %v600_v46 = vadd.f32 %v599_v45, %v944_v58  ;;  %v601_v47 = vpop.f32.mrb[15].mxu0 }
  0xf9   :  { %v602_v48 = vadd.f32 %v601_v47, %v944_v58 }
  0xfa   :  { %706 = vst [vmem:[%s1066_s3 + $0xd8] sm:$0xff] %v600_v46 }
  0xfb   :  { %707 = vst [vmem:[%s1066_s3 + $0xe0] sm:$0xff] %v602_v48 }

// kernel: _lambda_.21
= control target key start
LH: loop header
LB: loop body
LE: loop exit
PB: predicated region body
PF: predicated region fallthrough
CT: control target
= control target key end

     0   :  { %v315_v3 = vmov 0.0|0.0   ;;  %v316_v4 = vmov 0.0   ;;  %vm317_vm0 = vmmov 0   ;;  %v318_v10 = vmov 0   ;;  %s444_s0 = inlined_call_operand.vmem [shape: f32[80,384], index: 0, kind: input, shape index: {}]   ;;  %s445_s2 = inlined_call_operand.<no memory space> [shape: f32[1,1], index: 2, kind: input, shape index: {}]   ;;  %s446_s1 = inlined_call_operand.vmem [shape: f32[1,80], index: 1, kind: input, shape index: {}]   ;;  %s447_s3 = inlined_call_operand.vmem [shape: f32[1,384], index: 3, kind: output, shape index: {}]  }
   0x1   :  { %v18_v0 = vld [vmem:[%s444_s0 + $0x8] sm:$0xff]  ;;  %v21_v1 = vld [vmem:[%s444_s0 + $0x20] sm:$0xff]  ;;  %294 = vmatprep.subr.bf16.mxu1 %v315_v3  ;;  %125 = vmatprep.mubr.f32.mxu0 %v316_v4  ;;  %v8_v5 = vstv %s445_s2  ;;  %v20_v7 = vld [vmem:[%s444_s0 + $0x18] sm:$0xff]  ;;  %vm57_vm1 = vcmask 654336   ;;  %v53_v51 = vlaneseq  ;;  %v319_v54 = vmov 1966171168  }
   0x2   :  { %v17_v2 = vld [vmem:[%s444_s0] sm:$0xff]  ;;  %v274_v6 = vpack.c.bf16 %v21_v1, %v18_v0  ;;  %v19_v8 = vld [vmem:[%s444_s0 + $0x10] sm:$0xff]  ;;  %v22_v9 = vld [vmem:[%s444_s0 + $0x28] sm:$0xff]  ;;  %271 = vmatprep.mubr.msk.f32.mxu1 %vm317_vm0, %v316_v4  ;;  %314 = vset.pattern.permute.xlu0 %v318_v10  ;;  %9 = vst [vmem:[#allocation2] sm:$0x1] %v8_v5  ;;  %v207_v55 = vunpack.c.l.s4 %v319_v54 }
   0x3   :  { %v276_v11 = vpack.c.bf16 %v20_v7, %v17_v2  ;;  %v295_v12 = vpack.c.bf16 %v22_v9, %v19_v8  ;;  %v24_v13 = vld [vmem:[%s444_s0 + $0x38] sm:$0xff]  ;;  %v27_v14 = vld [vmem:[%s444_s0 + $0x50] sm:$0xff]  ;;  %v26_v17 = vld [vmem:[%s444_s0 + $0x48] sm:$0xff]  ;;  %v54_v52 = vshrl.u32 %v53_v51, 7  ;;  %vm231_vm2 = vcmp.lt.s32.totalorder %v53_v51, 384 }
   0x4   :  { %v23_v15 = vld [vmem:[%s444_s0 + $0x30] sm:$0xff]  ;;  %275 = vmatprep.subr.bf16.mxu0 %v274_v6  ;;  %v278_v16 = vpack.c.bf16 %v27_v14, %v24_v13  ;;  %v25_v18 = vld [vmem:[%s444_s0 + $0x40] sm:$0xff]  ;;  %v28_v19 = vld [vmem:[%s444_s0 + $0x58] sm:$0xff]  ;;  %v208_v58 = vunpack.c.0.s8 %v207_v55 }
   0x5   :  { %277 = vmatpush1.bf16.msra.mxu0 %v276_v11  ;;  %296 = vmatpush3.bf16.msra.mxu1 %v295_v12  ;;  %v280_v20 = vpack.c.bf16 %v26_v17, %v23_v15  ;;  %v298_v21 = vpack.c.bf16 %v28_v19, %v25_v18  ;;  %v30_v22 = vld [vmem:[%s444_s0 + $0x68] sm:$0xff]  ;;  %v33_v23 = vld [vmem:[%s444_s0 + $0x80] sm:$0xff]  ;;  %v32_v26 = vld [vmem:[%s444_s0 + $0x78] sm:$0xff]  ;;  %v55_v53 = vsub.s32 0, %v54_v52 }
   0x6   :  { %v29_v24 = vld [vmem:[%s444_s0 + $0x60] sm:$0xff]  ;;  %279 = vmatprep.subr.bf16.mxu0 %v278_v16  ;;  %297 = vmatprep.subr.bf16.mxu1 %v315_v3  ;;  %v282_v25 = vpack.c.bf16 %v33_v23, %v30_v22  ;;  %v31_v27 = vld [vmem:[%s444_s0 + $0x70] sm:$0xff]  ;;  %v34_v28 = vld [vmem:[%s444_s0 + $0x88] sm:$0xff]  ;;  %v211_v0 = vsub.s32 %v208_v58, %v54_v52 }
   0x7   :  { %v36_v29 = vld [vmem:[%s444_s0 + $0x98] sm:$0xff]  ;;  %v39_v30 = vld [vmem:[%s444_s0 + $0xb0] sm:$0xff]  ;;  %v284_v31 = vpack.c.bf16 %v32_v26, %v29_v24  ;;  %v301_v32 = vpack.c.bf16 %v34_v28, %v31_v27  ;;  %v38_v35 = vld [vmem:[%s444_s0 + $0xa8] sm:$0xff] }
   0x8   :  { %v35_v33 = vld [vmem:[%s444_s0 + $0x90] sm:$0xff]  ;;  %v286_v34 = vpack.c.bf16 %v39_v30, %v36_v29  ;;  %v37_v36 = vld [vmem:[%s444_s0 + $0xa0] sm:$0xff]  ;;  %v40_v37 = vld [vmem:[%s444_s0 + $0xb8] sm:$0xff] }
   0x9   :  { %281 = vmatpush1.bf16.msra.mxu0 %v280_v20  ;;  %299 = vmatpush3.bf16.msra.mxu1 %v298_v21  ;;  %v42_v38 = vld [vmem:[%s444_s0 + $0xc8] sm:$0xff]  ;;  %v45_v39 = vld [vmem:[%s444_s0 + $0xe0] sm:$0xff]  ;;  %v288_v41 = vpack.c.bf16 %v38_v35, %v35_v33  ;;  %v304_v42 = vpack.c.bf16 %v40_v37, %v37_v36  ;;  %v44_v45 = vld [vmem:[%s444_s0 + $0xd8] sm:$0xff] }
   0xa   :  { %283 = vmatprep.subr.bf16.mxu0 %v282_v25  ;;  %300 = vmatprep.subr.bf16.mxu1 %v315_v3  ;;  %v47_v40 = vld [vmem:[#allocation2] sm:$0x1]  ;;  %v290_v44 = vpack.c.bf16 %v45_v39, %v42_v38  ;;  %v43_v46 = vld [vmem:[%s444_s0 + $0xd0] sm:$0xff]  ;;  %v46_v47 = vld [vmem:[%s444_s0 + $0xe8] sm:$0xff] }
   0xb   :  { %50 = vperm.xlu0 %314, %v47_v40   ;;  %v41_v43 = vld [vmem:[%s444_s0 + $0xc0] sm:$0xff]  ;;  %v307_v49 = vpack.c.bf16 %v46_v47, %v43_v46 }
   0xc   :  { %v292_v48 = vpack.c.bf16 %v44_v45, %v41_v43  ;;  %v16_v50 = vld [vmem:[%s446_s1] sm:$0x1] }
   0xd   :  { %285 = vmatpush1.bf16.msra.mxu0 %v284_v31  ;;  %302 = vmatpush3.bf16.msra.mxu1 %v301_v32 }
   0xe   :  { %287 = vmatprep.subr.bf16.mxu0 %v286_v34  ;;  %303 = vmatprep.subr.bf16.mxu1 %v315_v3 }
  0x11   :  { %289 = vmatpush1.bf16.msra.mxu0 %v288_v41  ;;  %305 = vmatpush3.bf16.msra.mxu1 %v304_v42 }
  0x12   :  { %291 = vmatprep.subr.bf16.mxu0 %v290_v44  ;;  %306 = vmatprep.subr.bf16.mxu1 %v315_v3 }
  0x15   :  { %293 = vmatpush1.bf16.msra.mxu0 %v292_v48  ;;  %308 = vmatpush3.bf16.msra.mxu1 %v307_v49 }
  0x18   :  { %238 = vmatmul.mubr.msk.f32.vlgmr.msra.gmra.mrb[0].mxu0 %vm57_vm1, %v16_v50  ;;  %272 = vmatmul.mubr.msk.f32.vlgmr.msra.gmra.mrb[0].mxu1 %vm57_vm1, %v16_v50 }
  0x8a   :  { %v51_v56 = vpop.permute.xlu0 %50 }
  0x8b   :  { %v56_v57 = vrot.slane %v51_v56, %v55_v53 }
  0xeb   :  { %v127_v59 = vpop.f32.mrb[0].mxu0  ;;  %v198_v60 = vpop.f32.mrb[0].mxu1 }
  0xec   :  { %v128_v61 = vadd.f32 %v127_v59, %v56_v57  ;;  %v129_v62 = vpop.f32.mrb[1].mxu0  ;;  %v273_v63 = vpop.f32.mrb[1].mxu1  ;;  %v199_v2 = vadd.f32 %v198_v60, %v56_v57 }
  0xed   :  { %v130_v1 = vadd.f32 %v129_v62, %v56_v57 }
  0xee   :  { %v219_v5 = vrot.slane %v199_v2, %v211_v0 }
  0xef   :  { %v205_v3 = vcombine.low %v128_v61, %v130_v1 }
  0xf1   :  { %v212_v4 = vrot.slane %v205_v3, %v211_v0 }
  0xf3   :  { %v220_v6 = vcombine.low %v212_v4, %v219_v5 }
  0xf5   :  { %v227_v7 = vrot.slane %v220_v6, %v211_v0 }
  0xf7   :  { %233 = vst.msk [vmem:[%s447_s3] sm:$0x7] %vm231_vm2, %v227_v7 }

</bundles_post_ra>
